<compile_context>
chip_gen: v7x
topology: tpu7x:2x2x1
jax: 0.10.0
libtpu: 0.0.40
codegen_flags: <defaults>
</compile_context>

<pallas_src>
import functools

import jax
import jax.numpy as jnp
from jax.experimental import pallas as pl
from jax.experimental.pallas import tpu as pltpu


def _fused_upsample_kernel(x_ref, w1_ref, b1_ref, w2_ref, b2_ref, o_ref,
                           px_ref, *, NB, H, W, C, Cout):
    """NB batch elements per grid step.

    x_ref : (NB, H, W, C)         input tile (NHWC)
    w1_ref: (9*C, C)              conv1 weights, im2col-flattened
    b1_ref: (1, C)
    w2_ref: (9*C, Cout)           conv2 weights, im2col-flattened
    b2_ref: (1, Cout)
    o_ref : (NB, H*W, Cout)       conv2 output (pre pixel-shuffle)
    px_ref: (NB, H+2, W+2, C) f32 scratch: zero-haloed padded images
    """
    # Zero the padded scratch once; every 1-pixel halo stays zero for all
    # subsequent grid steps because only the interiors are ever overwritten.
    @pl.when(pl.program_id(0) == 0)
    def _():
        px_ref[...] = jnp.zeros_like(px_ref)

    def im2col():
        # (NB*H*W, 9*C) patch matrix; tap order (dy, dx) row-major with channel
        # fastest matches the wrapper's (3,3,C,Cout) -> (9*C, Cout) reshape.
        cols = [px_ref[:, dy:dy + H, dx:dx + W, :].reshape(NB * H * W, C)
                for dy in range(3) for dx in range(3)]
        return jnp.concatenate(cols, axis=-1)

    # ---- conv1: one im2col matmul on the MXU, f32 accumulation ----
    px_ref[:, 1:H + 1, 1:W + 1, :] = x_ref[...].astype(jnp.float32)
    h1 = jnp.dot(im2col(), w1_ref[...], preferred_element_type=jnp.float32)
    h1 = h1 + b1_ref[...]                                    # (NB*H*W, C)

    # ---- conv2: conv1 output stays VMEM-resident (no HBM round-trip) ----
    px_ref[:, 1:H + 1, 1:W + 1, :] = h1.reshape(NB, H, W, C)
    h2 = jnp.dot(im2col(), w2_ref[...], preferred_element_type=jnp.float32)
    h2 = h2 + b2_ref[...]                                    # (NB*H*W, Cout)

    o_ref[...] = h2.reshape(NB, H * W, Cout).astype(o_ref.dtype)


def _round_up(x, m):
    return (x + m - 1) // m * m


def _pick_batch_block(N, H, W, C, Cout, budget_bytes=24 << 20):
    """Largest divisor of N whose VMEM footprint (padded to (8,128) tiles,
    inputs/outputs double-buffered) stays under a conservative budget."""
    def est(nb):
        lane = lambda c: _round_up(max(c, 1), 128)
        sub = lambda s: _round_up(max(s, 1), 8)
        scratch = nb * (H + 2) * sub(W + 2) * lane(C) * 4
        x_blk = 2 * nb * H * sub(W) * lane(C) * 4
        o_blk = 2 * nb * sub(H * W) * lane(Cout) * 4
        wgt = (9 * C) * (lane(C) + lane(Cout)) * 4
        return scratch + x_blk + o_blk + wgt

    for nb in range(min(N, 16), 0, -1):
        if N % nb == 0 and est(nb) <= budget_bytes:
            return nb
    return 1


def upsample_forward(x_nchw, params, scale):
    """Fused conv1 -> conv2 -> pixel_shuffle.  x_nchw: (N, C, H, W) -> NCHW out."""
    N, Cin, H, W = x_nchw.shape
    w1, b1 = params["w1"], params["b1"]          # (3,3,C,C), (C,)
    w2, b2 = params["w2"], params["b2"]          # (3,3,C,Cout), (Cout,)
    C = w1.shape[-1]
    Cout = w2.shape[-1]
    assert Cin == C, "conv1 is features -> features"

    x_nhwc = jnp.transpose(x_nchw, (0, 2, 3, 1))             # NCHW -> NHWC
    w1f = w1.reshape(9 * C, C)                               # im2col weights
    w2f = w2.reshape(9 * C, Cout)

    NB = _pick_batch_block(N, H, W, C, Cout)
    kernel = functools.partial(_fused_upsample_kernel,
                               NB=NB, H=H, W=W, C=C, Cout=Cout)
    y = pl.pallas_call(
        kernel,
        out_shape=jax.ShapeDtypeStruct((N, H * W, Cout), x_nchw.dtype),
        grid_spec=pltpu.PrefetchScalarGridSpec(
            num_scalar_prefetch=0,
            grid=(N // NB,),
            in_specs=[
                pl.BlockSpec((NB, H, W, C), lambda n: (n, 0, 0, 0)),
                pl.BlockSpec((9 * C, C), lambda n: (0, 0)),      # resident
                pl.BlockSpec((1, C), lambda n: (0, 0)),          # resident
                pl.BlockSpec((9 * C, Cout), lambda n: (0, 0)),   # resident
                pl.BlockSpec((1, Cout), lambda n: (0, 0)),       # resident
            ],
            out_specs=pl.BlockSpec((NB, H * W, Cout), lambda n: (n, 0, 0)),
            scratch_shapes=[pltpu.VMEM((NB, H + 2, W + 2, C), jnp.float32)],
        ),
        compiler_params=pltpu.CompilerParams(
            dimension_semantics=("parallel",)),
    )(x_nhwc, w1f, b1.reshape(1, C), w2f, b2.reshape(1, Cout))

    # pixel_shuffle (PyTorch channel ordering) on the tiny conv2 output.
    s = scale
    y = y.reshape(N, H, W, Cout // (s * s), s, s)
    y = y.transpose(0, 3, 1, 4, 2, 5)                         # (N, c, H, sy, W, sx)
    return y.reshape(N, Cout // (s * s), H * s, W * s)        # NCHW


if __name__ == "__main__":
    scale, features = 2, 4
    N, H, W = 2, 16, 16

    key = jax.random.PRNGKey(0)
    k1, k2, k3, k4, k5 = jax.random.split(key, 5)
    c2_out = 3 * scale ** 2
    # Deterministic synthetic parameters (weights stored as HWIO = (3,3,Cin,Cout)).
    params = {
        "w1": jax.random.normal(k1, (3, 3, features, features), jnp.float32) * 0.1,
        "b1": jax.random.normal(k2, (features,), jnp.float32) * 0.1,
        "w2": jax.random.normal(k3, (3, 3, features, c2_out), jnp.float32) * 0.1,
        "b2": jax.random.normal(k4, (c2_out,), jnp.float32) * 0.1,
    }
    x = jax.random.normal(k5, (N, features, H, W), jnp.float32)  # NCHW input

    out = upsample_forward(x, params, scale)
    out = jax.block_until_ready(out)

    # Pure-JAX reference (lax.conv) to validate the fused Pallas kernel.
    def ref_conv(xx, w, b):
        y = jax.lax.conv_general_dilated(
            xx, w, window_strides=(1, 1), padding="SAME",
            dimension_numbers=("NCHW", "HWIO", "NCHW"))
        return y + b[None, :, None, None]

    ref = ref_conv(x, params["w1"], params["b1"])
    ref = ref_conv(ref, params["w2"], params["b2"])
    ref = ref.reshape(N, 3, scale, scale, H, W)
    ref = ref.transpose(0, 1, 4, 2, 5, 3).reshape(N, 3, H * scale, W * scale)

    assert out.shape == (N, 3, H * scale, W * scale), out.shape
    assert jnp.allclose(out, ref, atol=1e-4, rtol=1e-4), float(
        jnp.max(jnp.abs(out - ref)))
    print("KERNEL_OK")
</pallas_src>

<mosaic_0001>
module attributes {stable_mosaic.version = 11 : i64} {
  func.func @_fused_upsample_kernel(%arg0: i32, %arg1: memref<2x16x16x4xf32, #tpu.memory_space<vmem>>, %arg2: memref<36x4xf32, #tpu.memory_space<vmem>>, %arg3: memref<1x4xf32, #tpu.memory_space<vmem>>, %arg4: memref<36x12xf32, #tpu.memory_space<vmem>>, %arg5: memref<1x12xf32, #tpu.memory_space<vmem>>, %arg6: memref<2x256x12xf32, #tpu.memory_space<vmem>>, %arg7: memref<2x18x18x4xf32, #tpu.memory_space<vmem>>) attributes {dimension_semantics = [#tpu.dimension_semantics<parallel>], iteration_bounds = array<i64: 1>, scalar_prefetch = 0 : i64, scratch_operands = 1 : i64, tpu.core_type = #tpu.core_type<tc>, window_params = [{transform_indices = @transform_0, window_bounds = array<i64: 2, 16, 16, 4>}, {pipeline_mode = #tpu.pipeline_mode<synchronous>, transform_indices = @transform_1, window_bounds = array<i64: 36, 4>}, {pipeline_mode = #tpu.pipeline_mode<synchronous>, transform_indices = @transform_2, window_bounds = array<i64: 1, 4>}, {pipeline_mode = #tpu.pipeline_mode<synchronous>, transform_indices = @transform_3, window_bounds = array<i64: 36, 12>}, {pipeline_mode = #tpu.pipeline_mode<synchronous>, transform_indices = @transform_4, window_bounds = array<i64: 1, 12>}, {transform_indices = @transform_5, window_bounds = array<i64: 2, 256, 12>}]} {
    %c0_i32 = arith.constant 0 : i32
    %0 = arith.cmpi eq, %arg0, %c0_i32 : i32
    %1 = arith.extui %0 : i1 to i32
    %c0_i32_0 = arith.constant 0 : i32
    %2 = arith.cmpi ne, %1, %c0_i32_0 : i32
    scf.if %2 {
      %cst_94 = arith.constant 0.000000e+00 : f32
      %57 = vector.broadcast %cst_94 : f32 to vector<2x18x18x4xf32>
      %c0_95 = arith.constant 0 : index
      %c0_96 = arith.constant 0 : index
      %c0_97 = arith.constant 0 : index
      %c0_98 = arith.constant 0 : index
      %58 = vector.load %arg7[%c0_95, %c0_96, %c0_97, %c0_98] : memref<2x18x18x4xf32, #tpu.memory_space<vmem>>, vector<2x18x18x4xf32>
      tpu.vector_store %arg7[%c0_95, %c0_96, %c0_97, %c0_98], %57 {strides = array<i32>} : memref<2x18x18x4xf32, #tpu.memory_space<vmem>>, vector<2x18x18x4xf32>,
    } else {
    }
    %c0 = arith.constant 0 : index
    %c0_1 = arith.constant 0 : index
    %c0_2 = arith.constant 0 : index
    %c0_3 = arith.constant 0 : index
    %3 = vector.load %arg1[%c0, %c0_1, %c0_2, %c0_3] : memref<2x16x16x4xf32, #tpu.memory_space<vmem>>, vector<2x16x16x4xf32>
    %c0_4 = arith.constant 0 : index
    %c1 = arith.constant 1 : index
    %c1_5 = arith.constant 1 : index
    %c0_6 = arith.constant 0 : index
    %4 = vector.load %arg7[%c0_4, %c1, %c1_5, %c0_6] : memref<2x18x18x4xf32, #tpu.memory_space<vmem>>, vector<2x16x16x4xf32>
    tpu.vector_store %arg7[%c0_4, %c1, %c1_5, %c0_6], %3 {strides = array<i32>} : memref<2x18x18x4xf32, #tpu.memory_space<vmem>>, vector<2x16x16x4xf32>,
    %c0_7 = arith.constant 0 : index
    %c0_8 = arith.constant 0 : index
    %c0_9 = arith.constant 0 : index
    %c0_10 = arith.constant 0 : index
    %5 = vector.load %arg7[%c0_7, %c0_8, %c0_9, %c0_10] : memref<2x18x18x4xf32, #tpu.memory_space<vmem>>, vector<2x16x16x4xf32>
    %6 = vector.shape_cast %5 : vector<2x16x16x4xf32> to vector<512x4xf32>
    %c0_11 = arith.constant 0 : index
    %c0_12 = arith.constant 0 : index
    %c1_13 = arith.constant 1 : index
    %c0_14 = arith.constant 0 : index
    %7 = vector.load %arg7[%c0_11, %c0_12, %c1_13, %c0_14] : memref<2x18x18x4xf32, #tpu.memory_space<vmem>>, vector<2x16x16x4xf32>
    %8 = vector.shape_cast %7 : vector<2x16x16x4xf32> to vector<512x4xf32>
    %c0_15 = arith.constant 0 : index
    %c0_16 = arith.constant 0 : index
    %c2 = arith.constant 2 : index
    %c0_17 = arith.constant 0 : index
    %9 = vector.load %arg7[%c0_15, %c0_16, %c2, %c0_17] : memref<2x18x18x4xf32, #tpu.memory_space<vmem>>, vector<2x16x16x4xf32>
    %10 = vector.shape_cast %9 : vector<2x16x16x4xf32> to vector<512x4xf32>
    %c0_18 = arith.constant 0 : index
    %c1_19 = arith.constant 1 : index
    %c0_20 = arith.constant 0 : index
    %c0_21 = arith.constant 0 : index
    %11 = vector.load %arg7[%c0_18, %c1_19, %c0_20, %c0_21] : memref<2x18x18x4xf32, #tpu.memory_space<vmem>>, vector<2x16x16x4xf32>
    %12 = vector.shape_cast %11 : vector<2x16x16x4xf32> to vector<512x4xf32>
    %c0_22 = arith.constant 0 : index
    %c1_23 = arith.constant 1 : index
    %c1_24 = arith.constant 1 : index
    %c0_25 = arith.constant 0 : index
    %13 = vector.load %arg7[%c0_22, %c1_23, %c1_24, %c0_25] : memref<2x18x18x4xf32, #tpu.memory_space<vmem>>, vector<2x16x16x4xf32>
    %14 = vector.shape_cast %13 : vector<2x16x16x4xf32> to vector<512x4xf32>
    %c0_26 = arith.constant 0 : index
    %c1_27 = arith.constant 1 : index
    %c2_28 = arith.constant 2 : index
    %c0_29 = arith.constant 0 : index
    %15 = vector.load %arg7[%c0_26, %c1_27, %c2_28, %c0_29] : memref<2x18x18x4xf32, #tpu.memory_space<vmem>>, vector<2x16x16x4xf32>
    %16 = vector.shape_cast %15 : vector<2x16x16x4xf32> to vector<512x4xf32>
    %c0_30 = arith.constant 0 : index
    %c2_31 = arith.constant 2 : index
    %c0_32 = arith.constant 0 : index
    %c0_33 = arith.constant 0 : index
    %17 = vector.load %arg7[%c0_30, %c2_31, %c0_32, %c0_33] : memref<2x18x18x4xf32, #tpu.memory_space<vmem>>, vector<2x16x16x4xf32>
    %18 = vector.shape_cast %17 : vector<2x16x16x4xf32> to vector<512x4xf32>
    %c0_34 = arith.constant 0 : index
    %c2_35 = arith.constant 2 : index
    %c1_36 = arith.constant 1 : index
    %c0_37 = arith.constant 0 : index
    %19 = vector.load %arg7[%c0_34, %c2_35, %c1_36, %c0_37] : memref<2x18x18x4xf32, #tpu.memory_space<vmem>>, vector<2x16x16x4xf32>
    %20 = vector.shape_cast %19 : vector<2x16x16x4xf32> to vector<512x4xf32>
    %c0_38 = arith.constant 0 : index
    %c2_39 = arith.constant 2 : index
    %c2_40 = arith.constant 2 : index
    %c0_41 = arith.constant 0 : index
    %21 = vector.load %arg7[%c0_38, %c2_39, %c2_40, %c0_41] : memref<2x18x18x4xf32, #tpu.memory_space<vmem>>, vector<2x16x16x4xf32>
    %22 = vector.shape_cast %21 : vector<2x16x16x4xf32> to vector<512x4xf32>
    %23 = tpu.concatenate %6, %8, %10, %12, %14, %16, %18, %20, %22 in 1 : vector<512x4xf32>, vector<512x4xf32>, vector<512x4xf32>, vector<512x4xf32>, vector<512x4xf32>, vector<512x4xf32>, vector<512x4xf32>, vector<512x4xf32>, vector<512x4xf32> -> vector<512x36xf32>
    %c0_42 = arith.constant 0 : index
    %c0_43 = arith.constant 0 : index
    %24 = vector.load %arg2[%c0_42, %c0_43] : memref<36x4xf32, #tpu.memory_space<vmem>>, vector<36x4xf32>
    %cst = arith.constant dense<0.000000e+00> : vector<512x4xf32>
    %25 = tpu.matmul %23, %24, %cst {dimension_numbers = #tpu.dot_dimension_numbers<[1], [0], [0], [1], [0, 0, 1, 1], [], []>} : vector<512x36xf32>, vector<36x4xf32>, vector<512x4xf32> -> vector<512x4xf32>
    %c0_44 = arith.constant 0 : index
    %c0_45 = arith.constant 0 : index
    %26 = vector.load %arg3[%c0_44, %c0_45] : memref<1x4xf32, #tpu.memory_space<vmem>>, vector<1x4xf32>
    %27 = vector.broadcast %26 : vector<1x4xf32> to vector<512x4xf32>
    %28 = arith.addf %25, %27 : vector<512x4xf32>
    %29 = vector.shape_cast %28 : vector<512x4xf32> to vector<2x16x16x4xf32>
    %c0_46 = arith.constant 0 : index
    %c1_47 = arith.constant 1 : index
    %c1_48 = arith.constant 1 : index
    %c0_49 = arith.constant 0 : index
    %30 = vector.load %arg7[%c0_46, %c1_47, %c1_48, %c0_49] : memref<2x18x18x4xf32, #tpu.memory_space<vmem>>, vector<2x16x16x4xf32>
    tpu.vector_store %arg7[%c0_46, %c1_47, %c1_48, %c0_49], %29 {strides = array<i32>} : memref<2x18x18x4xf32, #tpu.memory_space<vmem>>, vector<2x16x16x4xf32>,
    %c0_50 = arith.constant 0 : index
    %c0_51 = arith.constant 0 : index
    %c0_52 = arith.constant 0 : index
    %c0_53 = arith.constant 0 : index
    %31 = vector.load %arg7[%c0_50, %c0_51, %c0_52, %c0_53] : memref<2x18x18x4xf32, #tpu.memory_space<vmem>>, vector<2x16x16x4xf32>
    %32 = vector.shape_cast %31 : vector<2x16x16x4xf32> to vector<512x4xf32>
    %c0_54 = arith.constant 0 : index
    %c0_55 = arith.constant 0 : index
    %c1_56 = arith.constant 1 : index
    %c0_57 = arith.constant 0 : index
    %33 = vector.load %arg7[%c0_54, %c0_55, %c1_56, %c0_57] : memref<2x18x18x4xf32, #tpu.memory_space<vmem>>, vector<2x16x16x4xf32>
    %34 = vector.shape_cast %33 : vector<2x16x16x4xf32> to vector<512x4xf32>
    %c0_58 = arith.constant 0 : index
    %c0_59 = arith.constant 0 : index
    %c2_60 = arith.constant 2 : index
    %c0_61 = arith.constant 0 : index
    %35 = vector.load %arg7[%c0_58, %c0_59, %c2_60, %c0_61] : memref<2x18x18x4xf32, #tpu.memory_space<vmem>>, vector<2x16x16x4xf32>
    %36 = vector.shape_cast %35 : vector<2x16x16x4xf32> to vector<512x4xf32>
    %c0_62 = arith.constant 0 : index
    %c1_63 = arith.constant 1 : index
    %c0_64 = arith.constant 0 : index
    %c0_65 = arith.constant 0 : index
    %37 = vector.load %arg7[%c0_62, %c1_63, %c0_64, %c0_65] : memref<2x18x18x4xf32, #tpu.memory_space<vmem>>, vector<2x16x16x4xf32>
    %38 = vector.shape_cast %37 : vector<2x16x16x4xf32> to vector<512x4xf32>
    %c0_66 = arith.constant 0 : index
    %c1_67 = arith.constant 1 : index
    %c1_68 = arith.constant 1 : index
    %c0_69 = arith.constant 0 : index
    %39 = vector.load %arg7[%c0_66, %c1_67, %c1_68, %c0_69] : memref<2x18x18x4xf32, #tpu.memory_space<vmem>>, vector<2x16x16x4xf32>
    %40 = vector.shape_cast %39 : vector<2x16x16x4xf32> to vector<512x4xf32>
    %c0_70 = arith.constant 0 : index
    %c1_71 = arith.constant 1 : index
    %c2_72 = arith.constant 2 : index
    %c0_73 = arith.constant 0 : index
    %41 = vector.load %arg7[%c0_70, %c1_71, %c2_72, %c0_73] : memref<2x18x18x4xf32, #tpu.memory_space<vmem>>, vector<2x16x16x4xf32>
    %42 = vector.shape_cast %41 : vector<2x16x16x4xf32> to vector<512x4xf32>
    %c0_74 = arith.constant 0 : index
    %c2_75 = arith.constant 2 : index
    %c0_76 = arith.constant 0 : index
    %c0_77 = arith.constant 0 : index
    %43 = vector.load %arg7[%c0_74, %c2_75, %c0_76, %c0_77] : memref<2x18x18x4xf32, #tpu.memory_space<vmem>>, vector<2x16x16x4xf32>
    %44 = vector.shape_cast %43 : vector<2x16x16x4xf32> to vector<512x4xf32>
    %c0_78 = arith.constant 0 : index
    %c2_79 = arith.constant 2 : index
    %c1_80 = arith.constant 1 : index
    %c0_81 = arith.constant 0 : index
    %45 = vector.load %arg7[%c0_78, %c2_79, %c1_80, %c0_81] : memref<2x18x18x4xf32, #tpu.memory_space<vmem>>, vector<2x16x16x4xf32>
    %46 = vector.shape_cast %45 : vector<2x16x16x4xf32> to vector<512x4xf32>
    %c0_82 = arith.constant 0 : index
    %c2_83 = arith.constant 2 : index
    %c2_84 = arith.constant 2 : index
    %c0_85 = arith.constant 0 : index
    %47 = vector.load %arg7[%c0_82, %c2_83, %c2_84, %c0_85] : memref<2x18x18x4xf32, #tpu.memory_space<vmem>>, vector<2x16x16x4xf32>
    %48 = vector.shape_cast %47 : vector<2x16x16x4xf32> to vector<512x4xf32>
    %49 = tpu.concatenate %32, %34, %36, %38, %40, %42, %44, %46, %48 in 1 : vector<512x4xf32>, vector<512x4xf32>, vector<512x4xf32>, vector<512x4xf32>, vector<512x4xf32>, vector<512x4xf32>, vector<512x4xf32>, vector<512x4xf32>, vector<512x4xf32> -> vector<512x36xf32>
    %c0_86 = arith.constant 0 : index
    %c0_87 = arith.constant 0 : index
    %50 = vector.load %arg4[%c0_86, %c0_87] : memref<36x12xf32, #tpu.memory_space<vmem>>, vector<36x12xf32>
    %cst_88 = arith.constant dense<0.000000e+00> : vector<512x12xf32>
    %51 = tpu.matmul %49, %50, %cst_88 {dimension_numbers = #tpu.dot_dimension_numbers<[1], [0], [0], [1], [0, 0, 1, 1], [], []>} : vector<512x36xf32>, vector<36x12xf32>, vector<512x12xf32> -> vector<512x12xf32>
    %c0_89 = arith.constant 0 : index
    %c0_90 = arith.constant 0 : index
    %52 = vector.load %arg5[%c0_89, %c0_90] : memref<1x12xf32, #tpu.memory_space<vmem>>, vector<1x12xf32>
    %53 = vector.broadcast %52 : vector<1x12xf32> to vector<512x12xf32>
    %54 = arith.addf %51, %53 : vector<512x12xf32>
    %55 = vector.shape_cast %54 : vector<512x12xf32> to vector<2x256x12xf32>
    %c0_91 = arith.constant 0 : index
    %c0_92 = arith.constant 0 : index
    %c0_93 = arith.constant 0 : index
    %56 = vector.load %arg6[%c0_91, %c0_92, %c0_93] : memref<2x256x12xf32, #tpu.memory_space<vmem>>, vector<2x256x12xf32>
    tpu.vector_store %arg6[%c0_91, %c0_92, %c0_93], %55 {strides = array<i32>} : memref<2x256x12xf32, #tpu.memory_space<vmem>>, vector<2x256x12xf32>,
    return
  }
  func.func @transform_0(%arg0: i32) -> (i32, i32, i32, i32) {
    %c0_i32 = arith.constant 0 : i32
    %c0_i32_0 = arith.constant 0 : i32
    %c0_i32_1 = arith.constant 0 : i32
    %c0_i32_2 = arith.constant 0 : i32
    return %arg0, %c0_i32, %c0_i32_0, %c0_i32_1 : i32, i32, i32, i32
  }
  func.func @transform_1(%arg0: i32) -> (i32, i32) {
    %c0_i32 = arith.constant 0 : i32
    %c0_i32_0 = arith.constant 0 : i32
    %c0_i32_1 = arith.constant 0 : i32
    return %c0_i32, %c0_i32_0 : i32, i32
  }
  func.func @transform_2(%arg0: i32) -> (i32, i32) {
    %c0_i32 = arith.constant 0 : i32
    %c0_i32_0 = arith.constant 0 : i32
    %c0_i32_1 = arith.constant 0 : i32
    return %c0_i32, %c0_i32_0 : i32, i32
  }
  func.func @transform_3(%arg0: i32) -> (i32, i32) {
    %c0_i32 = arith.constant 0 : i32
    %c0_i32_0 = arith.constant 0 : i32
    %c0_i32_1 = arith.constant 0 : i32
    return %c0_i32, %c0_i32_0 : i32, i32
  }
  func.func @transform_4(%arg0: i32) -> (i32, i32) {
    %c0_i32 = arith.constant 0 : i32
    %c0_i32_0 = arith.constant 0 : i32
    %c0_i32_1 = arith.constant 0 : i32
    return %c0_i32, %c0_i32_0 : i32, i32
  }
  func.func @transform_5(%arg0: i32) -> (i32, i32, i32) {
    %c0_i32 = arith.constant 0 : i32
    %c0_i32_0 = arith.constant 0 : i32
    %c0_i32_1 = arith.constant 0 : i32
    return %arg0, %c0_i32, %c0_i32_0 : i32, i32, i32
  }
}

</mosaic_0001>

<bundles_post_ra>
// kernel: tpu_custom_call.1
= control target key start
LH: loop header
LB: loop body
LE: loop exit
PB: predicated region body
PF: predicated region fallthrough
CT: control target
= control target key end

     0   :  { %vm24_vm0 = vcmask 31744   ;;  %vm27_vm1 = vcmask 25600   ;;  %v8490_v0 = vmov 0.0   ;;  %s8491_s12 = smov 4   ;;  %s8492_s17 = smov 8   ;;  %vm3613_vm2 = vcmask 1043456   ;;  %s14113_s0 = inlined_call_operand.vmem [shape: f32[2,16,16,4], index: 0, kind: input, shape index: {}]   ;;  %s14114_s1 = inlined_call_operand.vmem [shape: f32[36,4], index: 1, kind: input, shape index: {}]   ;;  %s14115_s2 = inlined_call_operand.vmem [shape: f32[1,4], index: 2, kind: input, shape index: {}]   ;;  %s14116_s3 = inlined_call_operand.vmem [shape: f32[36,12], index: 3, kind: input, shape index: {}]   ;;  %s14117_s4 = inlined_call_operand.vmem [shape: f32[1,12], index: 4, kind: input, shape index: {}]   ;;  %s14118_s5 = inlined_call_operand.vmem [shape: f32[2,256,12], index: 5, kind: output, shape index: {}]  }
   0x1   :  { %25 = vst.msk [vmem:[#allocation2] sm:$0xff] %vm24_vm0, %v8490_v0  ;;  %26 = vst.msk [vmem:[#allocation2 + $0x8] sm:$0xff] %vm24_vm0, %v8490_v0  ;;  %v134_v1 = vld [vmem:[%s14113_s0] sm:$0xff]  ;;  %v135_v2 = vld [vmem:[%s14113_s0 + $0x8] sm:$0xff]  ;;  %s8494_s26 = smov 16   ;;  %s8495_s27 = smov 20  }
   0x2   :  { %29 = vst.msk [vmem:[#allocation2 + $0x18] sm:$0xff] %vm24_vm0, %v8490_v0  ;;  %30 = vst.msk [vmem:[#allocation2 + $0x20] sm:$0xff] %vm24_vm0, %v8490_v0  ;;  %v136_v3 = vld [vmem:[%s14113_s0 + $0x10] sm:$0xff]  ;;  %v137_v4 = vld [vmem:[%s14113_s0 + $0x18] sm:$0xff]  ;;  %s8496_s28 = smov 24   ;;  %s8497_s29 = smov 28  }
   0x3   :  { %32 = vst.msk [vmem:[#allocation2 + $0x30] sm:$0xff] %vm24_vm0, %v8490_v0  ;;  %33 = vst.msk [vmem:[#allocation2 + $0x38] sm:$0xff] %vm24_vm0, %v8490_v0  ;;  %v138_v5 = vld [vmem:[%s14113_s0 + $0x20] sm:$0xff]  ;;  %v139_v6 = vld [vmem:[%s14113_s0 + $0x28] sm:$0xff]  ;;  %vm2953_vm3 = vcmask 64512   ;;  %vm3018_vm4 = vcmask 97280  }
   0x4   :  { %35 = vst.msk [vmem:[#allocation2 + $0x48] sm:$0xff] %vm24_vm0, %v8490_v0  ;;  %36 = vst.msk [vmem:[#allocation2 + $0x50] sm:$0xff] %vm24_vm0, %v8490_v0  ;;  %v140_v7 = vld [vmem:[%s14113_s0 + $0x30] sm:$0xff]  ;;  %v141_v8 = vld [vmem:[%s14113_s0 + $0x38] sm:$0xff]  ;;  %vm3083_vm5 = vcmask 130048   ;;  %vm3148_vm6 = vcmask 162816  }
   0x5   :  { %38 = vst.msk [vmem:[#allocation2 + $0x60] sm:$0xff] %vm24_vm0, %v8490_v0  ;;  %39 = vst.msk [vmem:[#allocation2 + $0x68] sm:$0xff] %vm24_vm0, %v8490_v0  ;;  %v142_v9 = vld [vmem:[%s14113_s0 + $0x40] sm:$0xff]  ;;  %v143_v10 = vld [vmem:[%s14113_s0 + $0x48] sm:$0xff]  ;;  %vm3213_vm7 = vcmask 195584   ;;  %vm3278_vm8 = vcmask 228352  }
   0x6   :  { %41 = vst.msk [vmem:[#allocation2 + $0x78] sm:$0xff] %vm24_vm0, %v8490_v0  ;;  %42 = vst.msk [vmem:[#allocation2 + $0x80] sm:$0xff] %vm24_vm0, %v8490_v0  ;;  %v144_v11 = vld [vmem:[%s14113_s0 + $0x50] sm:$0xff]  ;;  %v145_v12 = vld [vmem:[%s14113_s0 + $0x58] sm:$0xff]  ;;  %vm3343_vm9 = vcmask 261120   ;;  %vm3420_vm10 = vcmask 293888  }
   0x7   :  { %44 = vst.msk [vmem:[#allocation2 + $0x90] sm:$0xff] %vm24_vm0, %v8490_v0  ;;  %45 = vst.msk [vmem:[#allocation2 + $0x98] sm:$0xff] %vm24_vm0, %v8490_v0  ;;  %v146_v13 = vld [vmem:[%s14113_s0 + $0x60] sm:$0xff]  ;;  %v147_v14 = vld [vmem:[%s14113_s0 + $0x68] sm:$0xff] }
   0x8   :  { %47 = vst.msk [vmem:[#allocation2 + $0xa8] sm:$0xff] %vm24_vm0, %v8490_v0  ;;  %48 = vst.msk [vmem:[#allocation2 + $0xb0] sm:$0xff] %vm24_vm0, %v8490_v0  ;;  %v148_v15 = vld [vmem:[%s14113_s0 + $0x70] sm:$0xff]  ;;  %v149_v16 = vld [vmem:[%s14113_s0 + $0x78] sm:$0xff] }
   0x9   :  { %50 = vst.msk [vmem:[#allocation2 + $0xc0] sm:$0xff] %vm24_vm0, %v8490_v0  ;;  %51 = vst.msk [vmem:[#allocation2 + $0xc8] sm:$0xff] %vm24_vm0, %v8490_v0  ;;  %v150_v17 = vld [vmem:[%s14113_s0 + $0x80] sm:$0xff]  ;;  %v151_v18 = vld [vmem:[%s14113_s0 + $0x88] sm:$0xff] }
   0xa   :  { %53 = vst.msk [vmem:[#allocation2 + $0xd8] sm:$0xff] %vm24_vm0, %v8490_v0  ;;  %54 = vst.msk [vmem:[#allocation2 + $0xe0] sm:$0xff] %vm24_vm0, %v8490_v0  ;;  %v152_v19 = vld [vmem:[%s14113_s0 + $0x90] sm:$0xff]  ;;  %v153_v20 = vld [vmem:[%s14113_s0 + $0x98] sm:$0xff] }
   0xb   :  { %56 = vst.msk [vmem:[#allocation2 + $0xf0] sm:$0xff] %vm24_vm0, %v8490_v0  ;;  %57 = vst.msk [vmem:[#allocation2 + $0xf8] sm:$0xff] %vm24_vm0, %v8490_v0  ;;  %v154_v21 = vld [vmem:[%s14113_s0 + $0xa0] sm:$0xff]  ;;  %v155_v23 = vld [vmem:[%s14113_s0 + $0xa8] sm:$0xff] }
   0xc   :  { %59 = vst.msk [vmem:[#allocation2 + $0x108] sm:$0xff] %vm24_vm0, %v8490_v0  ;;  %60 = vst.msk [vmem:[#allocation2 + $0x110] sm:$0xff] %vm24_vm0, %v8490_v0  ;;  %v328_v22 = vld [vmem:[#allocation2 + $0x1] sm:$0xff]  ;;  %v156_v30 = vld [vmem:[%s14113_s0 + $0xb0] sm:$0xff] }
   0xd   :  { %62 = vst.msk [vmem:[#allocation2 + $0x120] sm:$0xff] %vm24_vm0, %v8490_v0  ;;  %63 = vst.msk [vmem:[#allocation2 + $0x128] sm:$0xff] %vm24_vm0, %v8490_v0  ;;  %905 = vrot.lane.b32.xlu0 %v328_v22, %s8491_s12  ;;  %v157_v31 = vld [vmem:[%s14113_s0 + $0xb8] sm:$0xff]  ;;  %v158_v32 = vld [vmem:[%s14113_s0 + $0xc0] sm:$0xff] }
   0xe   :  { %65 = vst.msk [vmem:[#allocation2 + $0x138] sm:$0xff] %vm24_vm0, %v8490_v0  ;;  %66 = vst.msk [vmem:[#allocation2 + $0x140] sm:$0xff] %vm24_vm0, %v8490_v0  ;;  %v159_v33 = vld [vmem:[%s14113_s0 + $0xc8] sm:$0xff]  ;;  %v160_v34 = vld [vmem:[%s14113_s0 + $0xd0] sm:$0xff] }
   0xf   :  { %68 = vst.msk [vmem:[#allocation2 + $0x150] sm:$0xff] %vm24_vm0, %v8490_v0  ;;  %69 = vst.msk [vmem:[#allocation2 + $0x158] sm:$0xff] %vm24_vm0, %v8490_v0  ;;  %v161_v35 = vld [vmem:[%s14113_s0 + $0xd8] sm:$0xff]  ;;  %v162_v36 = vld [vmem:[%s14113_s0 + $0xe0] sm:$0xff] }
  0x10   :  { %71 = vst.msk [vmem:[#allocation2 + $0x168] sm:$0xff] %vm24_vm0, %v8490_v0  ;;  %72 = vst.msk [vmem:[#allocation2 + $0x170] sm:$0xff] %vm24_vm0, %v8490_v0  ;;  %v163_v37 = vld [vmem:[%s14113_s0 + $0xe8] sm:$0xff]  ;;  %v166_v39 = vld [vmem:[%s14113_s0 + $0x100] sm:$0xff] }
  0x11   :  { %74 = vst.msk [vmem:[#allocation2 + $0x180] sm:$0xff] %vm24_vm0, %v8490_v0  ;;  %75 = vst.msk [vmem:[#allocation2 + $0x188] sm:$0xff] %vm24_vm0, %v8490_v0  ;;  %v167_v41 = vld [vmem:[%s14113_s0 + $0x108] sm:$0xff]  ;;  %v168_v42 = vld [vmem:[%s14113_s0 + $0x110] sm:$0xff] }
  0x12   :  { %77 = vst.msk [vmem:[#allocation2 + $0x198] sm:$0xff] %vm24_vm0, %v8490_v0  ;;  %78 = vst.msk [vmem:[#allocation2 + $0x1a0] sm:$0xff] %vm24_vm0, %v8490_v0  ;;  %v169_v43 = vld [vmem:[%s14113_s0 + $0x118] sm:$0xff]  ;;  %v170_v45 = vld [vmem:[%s14113_s0 + $0x120] sm:$0xff] }
  0x13   :  { %80 = vst.msk [vmem:[#allocation2 + $0x1b0] sm:$0xff] %vm24_vm0, %v8490_v0  ;;  %81 = vst.msk [vmem:[#allocation2 + $0x1b8] sm:$0xff] %vm24_vm0, %v8490_v0  ;;  %v171_v46 = vld [vmem:[%s14113_s0 + $0x128] sm:$0xff]  ;;  %v172_v47 = vld [vmem:[%s14113_s0 + $0x130] sm:$0xff] }
  0x14   :  { %83 = vst.msk [vmem:[#allocation2 + $0x1c8] sm:$0xff] %vm24_vm0, %v8490_v0  ;;  %84 = vst.msk [vmem:[#allocation2 + $0x1d0] sm:$0xff] %vm24_vm0, %v8490_v0  ;;  %v173_v48 = vld [vmem:[%s14113_s0 + $0x138] sm:$0xff]  ;;  %v174_v49 = vld [vmem:[%s14113_s0 + $0x140] sm:$0xff] }
  0x15   :  { %86 = vst.msk [vmem:[#allocation2 + $0x1e0] sm:$0xff] %vm24_vm0, %v8490_v0  ;;  %87 = vst.msk [vmem:[#allocation2 + $0x1e8] sm:$0xff] %vm24_vm0, %v8490_v0  ;;  %v175_v50 = vld [vmem:[%s14113_s0 + $0x148] sm:$0xff]  ;;  %v176_v51 = vld [vmem:[%s14113_s0 + $0x150] sm:$0xff] }
  0x16   :  { %89 = vst.msk [vmem:[#allocation2 + $0x1f8] sm:$0xff] %vm24_vm0, %v8490_v0  ;;  %90 = vst.msk [vmem:[#allocation2 + $0x200] sm:$0xff] %vm24_vm0, %v8490_v0  ;;  %v177_v52 = vld [vmem:[%s14113_s0 + $0x158] sm:$0xff]  ;;  %v178_v53 = vld [vmem:[%s14113_s0 + $0x160] sm:$0xff] }
  0x17   :  { %92 = vst.msk [vmem:[#allocation2 + $0x210] sm:$0xff] %vm24_vm0, %v8490_v0  ;;  %93 = vst.msk [vmem:[#allocation2 + $0x218] sm:$0xff] %vm24_vm0, %v8490_v0  ;;  %v179_v54 = vld [vmem:[%s14113_s0 + $0x168] sm:$0xff]  ;;  %v180_v57 = vld [vmem:[%s14113_s0 + $0x170] sm:$0xff] }
  0x18   :  { %95 = vst.msk [vmem:[#allocation2 + $0x228] sm:$0xff] %vm24_vm0, %v8490_v0  ;;  %96 = vst.msk [vmem:[#allocation2 + $0x230] sm:$0xff] %vm24_vm0, %v8490_v0  ;;  %v181_v58 = vld [vmem:[%s14113_s0 + $0x178] sm:$0xff]  ;;  %v182_v62 = vld [vmem:[%s14113_s0 + $0x180] sm:$0xff] }
  0x19   :  { %98 = vst.msk [vmem:[#allocation2 + $0x240] sm:$0xff] %vm24_vm0, %v8490_v0  ;;  %99 = vst.msk [vmem:[#allocation2 + $0x248] sm:$0xff] %vm24_vm0, %v8490_v0  ;;  %v183_v63 = vld [vmem:[%s14113_s0 + $0x188] sm:$0xff] }
  0x1a   :  { %101 = vst.msk [vmem:[#allocation2 + $0x258] sm:$0xff] %vm24_vm0, %v8490_v0  ;;  %102 = vst.msk [vmem:[#allocation2 + $0x260] sm:$0xff] %vm24_vm0, %v8490_v0 }
  0x1b   :  { %104 = vst.msk [vmem:[#allocation2 + $0x270] sm:$0xff] %vm24_vm0, %v8490_v0  ;;  %105 = vst.msk [vmem:[#allocation2 + $0x278] sm:$0xff] %vm24_vm0, %v8490_v0 }
  0x1c   :  { %107 = vst.msk [vmem:[#allocation2 + $0x288] sm:$0xff] %vm24_vm0, %v8490_v0  ;;  %108 = vst.msk [vmem:[#allocation2 + $0x290] sm:$0xff] %vm24_vm0, %v8490_v0 }
  0x1d   :  { %110 = vst.msk [vmem:[#allocation2 + $0x2a0] sm:$0xff] %vm24_vm0, %v8490_v0  ;;  %111 = vst.msk [vmem:[#allocation2 + $0x2a8] sm:$0xff] %vm24_vm0, %v8490_v0 }
  0x1e   :  { %113 = vst.msk [vmem:[#allocation2 + $0x2b8] sm:$0xff] %vm24_vm0, %v8490_v0  ;;  %114 = vst.msk [vmem:[#allocation2 + $0x2c0] sm:$0xff] %vm24_vm0, %v8490_v0 }
  0x1f   :  { %116 = vst.msk [vmem:[#allocation2 + $0x2d0] sm:$0xff] %vm24_vm0, %v8490_v0  ;;  %117 = vst.msk [vmem:[#allocation2 + $0x2d8] sm:$0xff] %vm24_vm0, %v8490_v0 }
  0x20   :  { %119 = vst.msk [vmem:[#allocation2 + $0x2e8] sm:$0xff] %vm24_vm0, %v8490_v0  ;;  %120 = vst.msk [vmem:[#allocation2 + $0x2f0] sm:$0xff] %vm24_vm0, %v8490_v0 }
  0x21   :  { %122 = vst.msk [vmem:[#allocation2 + $0x300] sm:$0xff] %vm24_vm0, %v8490_v0  ;;  %123 = vst.msk [vmem:[#allocation2 + $0x308] sm:$0xff] %vm24_vm0, %v8490_v0 }
  0x22   :  { %125 = vst.msk [vmem:[#allocation2 + $0x318] sm:$0xff] %vm24_vm0, %v8490_v0  ;;  %126 = vst.msk [vmem:[#allocation2 + $0x320] sm:$0xff] %vm24_vm0, %v8490_v0 }
  0x23   :  { %128 = vst.msk [vmem:[#allocation2 + $0x330] sm:$0xff] %vm24_vm0, %v8490_v0  ;;  %129 = vst.msk [vmem:[#allocation2 + $0x338] sm:$0xff] %vm24_vm0, %v8490_v0 }
  0x24   :  { %131 = vst.msk [vmem:[#allocation2 + $0x348] sm:$0xff] %vm24_vm0, %v8490_v0  ;;  %132 = vst.msk [vmem:[#allocation2 + $0x350] sm:$0xff] %vm24_vm0, %v8490_v0 }
  0x25   :  { %28 = vst.msk [vmem:[#allocation2 + $0x10] sm:$0x3] %vm27_vm1, %v8490_v0  ;;  %31 = vst.msk [vmem:[#allocation2 + $0x28] sm:$0x3] %vm27_vm1, %v8490_v0 }
  0x26   :  { %34 = vst.msk [vmem:[#allocation2 + $0x40] sm:$0x3] %vm27_vm1, %v8490_v0  ;;  %37 = vst.msk [vmem:[#allocation2 + $0x58] sm:$0x3] %vm27_vm1, %v8490_v0 }
  0x27   :  { %40 = vst.msk [vmem:[#allocation2 + $0x70] sm:$0x3] %vm27_vm1, %v8490_v0  ;;  %43 = vst.msk [vmem:[#allocation2 + $0x88] sm:$0x3] %vm27_vm1, %v8490_v0 }
  0x28   :  { %46 = vst.msk [vmem:[#allocation2 + $0xa0] sm:$0x3] %vm27_vm1, %v8490_v0  ;;  %49 = vst.msk [vmem:[#allocation2 + $0xb8] sm:$0x3] %vm27_vm1, %v8490_v0 }
  0x29   :  { %52 = vst.msk [vmem:[#allocation2 + $0xd0] sm:$0x3] %vm27_vm1, %v8490_v0  ;;  %55 = vst.msk [vmem:[#allocation2 + $0xe8] sm:$0x3] %vm27_vm1, %v8490_v0 }
  0x2a   :  { %58 = vst.msk [vmem:[#allocation2 + $0x100] sm:$0x3] %vm27_vm1, %v8490_v0  ;;  %61 = vst.msk [vmem:[#allocation2 + $0x118] sm:$0x3] %vm27_vm1, %v8490_v0 }
  0x2b   :  { %64 = vst.msk [vmem:[#allocation2 + $0x130] sm:$0x3] %vm27_vm1, %v8490_v0  ;;  %67 = vst.msk [vmem:[#allocation2 + $0x148] sm:$0x3] %vm27_vm1, %v8490_v0 }
  0x2c   :  { %70 = vst.msk [vmem:[#allocation2 + $0x160] sm:$0x3] %vm27_vm1, %v8490_v0  ;;  %73 = vst.msk [vmem:[#allocation2 + $0x178] sm:$0x3] %vm27_vm1, %v8490_v0  ;;  %v329_v25 = vld [vmem:[#allocation2 + $0x9] sm:$0xff] }
  0x2d   :  { %76 = vst.msk [vmem:[#allocation2 + $0x190] sm:$0x3] %vm27_vm1, %v8490_v0  ;;  %79 = vst.msk [vmem:[#allocation2 + $0x1a8] sm:$0x3] %vm27_vm1, %v8490_v0  ;;  %907 = vrot.lane.b32.xlu0 %v329_v25, %s8491_s12 }
  0x2e   :  { %82 = vst.msk [vmem:[#allocation2 + $0x1c0] sm:$0x3] %vm27_vm1, %v8490_v0  ;;  %85 = vst.msk [vmem:[#allocation2 + $0x1d8] sm:$0x3] %vm27_vm1, %v8490_v0 }
  0x2f   :  { %88 = vst.msk [vmem:[#allocation2 + $0x1f0] sm:$0x3] %vm27_vm1, %v8490_v0  ;;  %91 = vst.msk [vmem:[#allocation2 + $0x208] sm:$0x3] %vm27_vm1, %v8490_v0 }
  0x30   :  { %94 = vst.msk [vmem:[#allocation2 + $0x220] sm:$0x3] %vm27_vm1, %v8490_v0  ;;  %97 = vst.msk [vmem:[#allocation2 + $0x238] sm:$0x3] %vm27_vm1, %v8490_v0 }
  0x31   :  { %100 = vst.msk [vmem:[#allocation2 + $0x250] sm:$0x3] %vm27_vm1, %v8490_v0  ;;  %103 = vst.msk [vmem:[#allocation2 + $0x268] sm:$0x3] %vm27_vm1, %v8490_v0 }
  0x32   :  { %106 = vst.msk [vmem:[#allocation2 + $0x280] sm:$0x3] %vm27_vm1, %v8490_v0  ;;  %109 = vst.msk [vmem:[#allocation2 + $0x298] sm:$0x3] %vm27_vm1, %v8490_v0 }
  0x33   :  { %112 = vst.msk [vmem:[#allocation2 + $0x2b0] sm:$0x3] %vm27_vm1, %v8490_v0  ;;  %115 = vst.msk [vmem:[#allocation2 + $0x2c8] sm:$0x3] %vm27_vm1, %v8490_v0 }
  0x34   :  { %118 = vst.msk [vmem:[#allocation2 + $0x2e0] sm:$0x3] %vm27_vm1, %v8490_v0  ;;  %121 = vst.msk [vmem:[#allocation2 + $0x2f8] sm:$0x3] %vm27_vm1, %v8490_v0 }
  0x35   :  { %124 = vst.msk [vmem:[#allocation2 + $0x310] sm:$0x3] %vm27_vm1, %v8490_v0  ;;  %127 = vst.msk [vmem:[#allocation2 + $0x328] sm:$0x3] %vm27_vm1, %v8490_v0 }
  0x36   :  { %130 = vst.msk [vmem:[#allocation2 + $0x340] sm:$0x3] %vm27_vm1, %v8490_v0  ;;  %133 = vst.msk [vmem:[#allocation2 + $0x358] sm:$0x3] %vm27_vm1, %v8490_v0  ;;  %v184_v0 = vld [vmem:[%s14113_s0 + $0x190] sm:$0xff] }
  0x37   :  { %200 = vst.msk [vmem:[#allocation2 + $0x19] sm:$0xff] %vm24_vm0, %v134_v1  ;;  %201 = vst.msk [vmem:[#allocation2 + $0x21] sm:$0xff] %vm24_vm0, %v135_v2  ;;  %v185_v1 = vld [vmem:[%s14113_s0 + $0x198] sm:$0xff]  ;;  %v186_v2 = vld [vmem:[%s14113_s0 + $0x1a0] sm:$0xff] }
  0x38   :  { %202 = vst.msk [vmem:[#allocation2 + $0x31] sm:$0xff] %vm24_vm0, %v136_v3  ;;  %203 = vst.msk [vmem:[#allocation2 + $0x39] sm:$0xff] %vm24_vm0, %v137_v4  ;;  %v187_v3 = vld [vmem:[%s14113_s0 + $0x1a8] sm:$0xff]  ;;  %v188_v4 = vld [vmem:[%s14113_s0 + $0x1b0] sm:$0xff] }
  0x39   :  { %204 = vst.msk [vmem:[#allocation2 + $0x49] sm:$0xff] %vm24_vm0, %v138_v5  ;;  %205 = vst.msk [vmem:[#allocation2 + $0x51] sm:$0xff] %vm24_vm0, %v139_v6  ;;  %v189_v5 = vld [vmem:[%s14113_s0 + $0x1b8] sm:$0xff] }
  0x3a   :  { %206 = vst.msk [vmem:[#allocation2 + $0x61] sm:$0xff] %vm24_vm0, %v140_v7  ;;  %207 = vst.msk [vmem:[#allocation2 + $0x69] sm:$0xff] %vm24_vm0, %v141_v8  ;;  %v190_v7 = vld [vmem:[%s14113_s0 + $0x1c0] sm:$0xff]  ;;  %v191_v8 = vld [vmem:[%s14113_s0 + $0x1c8] sm:$0xff] }
  0x3b   :  { %208 = vst.msk [vmem:[#allocation2 + $0x79] sm:$0xff] %vm24_vm0, %v142_v9  ;;  %209 = vst.msk [vmem:[#allocation2 + $0x81] sm:$0xff] %vm24_vm0, %v143_v10  ;;  %v192_v9 = vld [vmem:[%s14113_s0 + $0x1d0] sm:$0xff] }
  0x3c   :  { %210 = vst.msk [vmem:[#allocation2 + $0x91] sm:$0xff] %vm24_vm0, %v144_v11  ;;  %211 = vst.msk [vmem:[#allocation2 + $0x99] sm:$0xff] %vm24_vm0, %v145_v12  ;;  %v193_v11 = vld [vmem:[%s14113_s0 + $0x1d8] sm:$0xff] }
  0x3d   :  { %212 = vst.msk [vmem:[#allocation2 + $0xa9] sm:$0xff] %vm24_vm0, %v146_v13  ;;  %213 = vst.msk [vmem:[#allocation2 + $0xb1] sm:$0xff] %vm24_vm0, %v147_v14  ;;  %v194_v13 = vld [vmem:[%s14113_s0 + $0x1e0] sm:$0xff]  ;;  %v195_v14 = vld [vmem:[%s14113_s0 + $0x1e8] sm:$0xff] }
  0x3e   :  { %214 = vst.msk [vmem:[#allocation2 + $0xc1] sm:$0xff] %vm24_vm0, %v148_v15  ;;  %215 = vst.msk [vmem:[#allocation2 + $0xc9] sm:$0xff] %vm24_vm0, %v149_v16  ;;  %v330_v24 = vld [vmem:[#allocation2 + $0x19] sm:$0xff]  ;;  %v331_v26 = vld [vmem:[#allocation2 + $0x21] sm:$0xff] }
  0x3f   :  { %216 = vst.msk [vmem:[#allocation2 + $0xd9] sm:$0xff] %vm24_vm0, %v150_v17  ;;  %217 = vst.msk [vmem:[#allocation2 + $0xe1] sm:$0xff] %vm24_vm0, %v151_v18  ;;  %909 = vrot.lane.b32.xlu1 %v330_v24, %s8491_s12  ;;  %v332_v27 = vld [vmem:[#allocation2 + $0x31] sm:$0xff]  ;;  %v333_v28 = vld [vmem:[#allocation2 + $0x39] sm:$0xff] }
  0x40   :  { %218 = vst.msk [vmem:[#allocation2 + $0xf1] sm:$0xff] %vm24_vm0, %v152_v19  ;;  %219 = vst.msk [vmem:[#allocation2 + $0xf9] sm:$0xff] %vm24_vm0, %v153_v20  ;;  %v334_v29 = vld [vmem:[#allocation2 + $0x49] sm:$0xff]  ;;  %913 = vrot.lane.b32.xlu0 %v332_v27, %s8491_s12  ;;  %v335_v38 = vld [vmem:[#allocation2 + $0x51] sm:$0xff] }
  0x41   :  { %220 = vst.msk [vmem:[#allocation2 + $0x109] sm:$0xff] %vm24_vm0, %v154_v21  ;;  %221 = vst.msk [vmem:[#allocation2 + $0x111] sm:$0xff] %vm24_vm0, %v155_v23  ;;  %v336_v40 = vld [vmem:[#allocation2 + $0x61] sm:$0xff]  ;;  %v337_v44 = vld [vmem:[#allocation2 + $0x69] sm:$0xff] }
  0x42   :  { %222 = vst.msk [vmem:[#allocation2 + $0x121] sm:$0xff] %vm24_vm0, %v156_v30  ;;  %223 = vst.msk [vmem:[#allocation2 + $0x129] sm:$0xff] %vm24_vm0, %v157_v31  ;;  %v338_v55 = vld [vmem:[#allocation2 + $0x79] sm:$0xff]  ;;  %v339_v56 = vld [vmem:[#allocation2 + $0x81] sm:$0xff] }
  0x43   :  { %911 = vrot.lane.b32.xlu1 %v331_v26, %s8491_s12  ;;  %224 = vst.msk [vmem:[#allocation2 + $0x139] sm:$0xff] %vm24_vm0, %v158_v32  ;;  %225 = vst.msk [vmem:[#allocation2 + $0x141] sm:$0xff] %vm24_vm0, %v159_v33  ;;  %v340_v59 = vld [vmem:[#allocation2 + $0x91] sm:$0xff]  ;;  %v341_v60 = vld [vmem:[#allocation2 + $0x99] sm:$0xff] }
  0x44   :  { %226 = vst.msk [vmem:[#allocation2 + $0x151] sm:$0xff] %vm24_vm0, %v160_v34  ;;  %227 = vst.msk [vmem:[#allocation2 + $0x159] sm:$0xff] %vm24_vm0, %v161_v35  ;;  %917 = vrot.lane.b32.xlu0 %v334_v29, %s8491_s12  ;;  %v342_v61 = vld [vmem:[#allocation2 + $0xa9] sm:$0xff]  ;;  %v343_v6 = vld [vmem:[#allocation2 + $0xb1] sm:$0xff] }
  0x45   :  { %228 = vst.msk [vmem:[#allocation2 + $0x169] sm:$0xff] %vm24_vm0, %v162_v36  ;;  %229 = vst.msk [vmem:[#allocation2 + $0x171] sm:$0xff] %vm24_vm0, %v163_v37  ;;  %v344_v10 = vld [vmem:[#allocation2 + $0xc1] sm:$0xff]  ;;  %v345_v12 = vld [vmem:[#allocation2 + $0xc9] sm:$0xff] }
  0x46   :  { %232 = vst.msk [vmem:[#allocation2 + $0x1c9] sm:$0xff] %vm24_vm0, %v166_v39  ;;  %233 = vst.msk [vmem:[#allocation2 + $0x1d1] sm:$0xff] %vm24_vm0, %v167_v41  ;;  %v346_v15 = vld [vmem:[#allocation2 + $0xd9] sm:$0xff]  ;;  %v347_v16 = vld [vmem:[#allocation2 + $0xe1] sm:$0xff] }
  0x47   :  { %915 = vrot.lane.b32.xlu1 %v333_v28, %s8491_s12  ;;  %234 = vst.msk [vmem:[#allocation2 + $0x1e1] sm:$0xff] %vm24_vm0, %v168_v42  ;;  %235 = vst.msk [vmem:[#allocation2 + $0x1e9] sm:$0xff] %vm24_vm0, %v169_v43  ;;  %v348_v17 = vld [vmem:[#allocation2 + $0xf1] sm:$0xff]  ;;  %v349_v18 = vld [vmem:[#allocation2 + $0xf9] sm:$0xff] }
  0x48   :  { %236 = vst.msk [vmem:[#allocation2 + $0x1f9] sm:$0xff] %vm24_vm0, %v170_v45  ;;  %237 = vst.msk [vmem:[#allocation2 + $0x201] sm:$0xff] %vm24_vm0, %v171_v46  ;;  %921 = vrot.lane.b32.xlu0 %v336_v40, %s8491_s12  ;;  %v350_v19 = vld [vmem:[#allocation2 + $0x109] sm:$0xff]  ;;  %v351_v20 = vld [vmem:[#allocation2 + $0x111] sm:$0xff] }
  0x49   :  { %238 = vst.msk [vmem:[#allocation2 + $0x211] sm:$0xff] %vm24_vm0, %v172_v47  ;;  %239 = vst.msk [vmem:[#allocation2 + $0x219] sm:$0xff] %vm24_vm0, %v173_v48  ;;  %v352_v21 = vld [vmem:[#allocation2 + $0x121] sm:$0xff]  ;;  %v353_v22 = vld [vmem:[#allocation2 + $0x129] sm:$0xff] }
  0x4a   :  { %240 = vst.msk [vmem:[#allocation2 + $0x229] sm:$0xff] %vm24_vm0, %v174_v49  ;;  %241 = vst.msk [vmem:[#allocation2 + $0x231] sm:$0xff] %vm24_vm0, %v175_v50  ;;  %v354_v23 = vld [vmem:[#allocation2 + $0x139] sm:$0xff]  ;;  %v355_v24 = vld [vmem:[#allocation2 + $0x141] sm:$0xff] }
  0x4b   :  { %919 = vrot.lane.b32.xlu1 %v335_v38, %s8491_s12  ;;  %242 = vst.msk [vmem:[#allocation2 + $0x241] sm:$0xff] %vm24_vm0, %v176_v51  ;;  %243 = vst.msk [vmem:[#allocation2 + $0x249] sm:$0xff] %vm24_vm0, %v177_v52  ;;  %v356_v25 = vld [vmem:[#allocation2 + $0x151] sm:$0xff]  ;;  %v357_v26 = vld [vmem:[#allocation2 + $0x159] sm:$0xff] }
  0x4c   :  { %244 = vst.msk [vmem:[#allocation2 + $0x259] sm:$0xff] %vm24_vm0, %v178_v53  ;;  %245 = vst.msk [vmem:[#allocation2 + $0x261] sm:$0xff] %vm24_vm0, %v179_v54  ;;  %925 = vrot.lane.b32.xlu0 %v338_v55, %s8491_s12  ;;  %v358_v27 = vld [vmem:[#allocation2 + $0x169] sm:$0xff]  ;;  %v359_v28 = vld [vmem:[#allocation2 + $0x171] sm:$0xff] }
  0x4d   :  { %246 = vst.msk [vmem:[#allocation2 + $0x271] sm:$0xff] %vm24_vm0, %v180_v57  ;;  %247 = vst.msk [vmem:[#allocation2 + $0x279] sm:$0xff] %vm24_vm0, %v181_v58  ;;  %v360_v29 = vld [vmem:[#allocation2 + $0x1b1] sm:$0xff]  ;;  %v361_v30 = vld [vmem:[#allocation2 + $0x1b9] sm:$0xff] }
  0x4e   :  { %248 = vst.msk [vmem:[#allocation2 + $0x289] sm:$0xff] %vm24_vm0, %v182_v62  ;;  %249 = vst.msk [vmem:[#allocation2 + $0x291] sm:$0xff] %vm24_vm0, %v183_v63  ;;  %v362_v31 = vld [vmem:[#allocation2 + $0x1c9] sm:$0xff]  ;;  %v363_v32 = vld [vmem:[#allocation2 + $0x1d1] sm:$0xff] }
  0x4f   :  { %923 = vrot.lane.b32.xlu1 %v337_v44, %s8491_s12  ;;  %250 = vst.msk [vmem:[#allocation2 + $0x2a1] sm:$0xff] %vm24_vm0, %v184_v0  ;;  %251 = vst.msk [vmem:[#allocation2 + $0x2a9] sm:$0xff] %vm24_vm0, %v185_v1  ;;  %v364_v33 = vld [vmem:[#allocation2 + $0x1e1] sm:$0xff]  ;;  %v365_v34 = vld [vmem:[#allocation2 + $0x1e9] sm:$0xff] }
  0x50   :  { %929 = vrot.lane.b32.xlu0 %v340_v59, %s8491_s12  ;;  %252 = vst.msk [vmem:[#allocation2 + $0x2b9] sm:$0xff] %vm24_vm0, %v186_v2  ;;  %253 = vst.msk [vmem:[#allocation2 + $0x2c1] sm:$0xff] %vm24_vm0, %v187_v3  ;;  %v366_v35 = vld [vmem:[#allocation2 + $0x1f9] sm:$0xff]  ;;  %v367_v36 = vld [vmem:[#allocation2 + $0x201] sm:$0xff] }
  0x51   :  { %254 = vst.msk [vmem:[#allocation2 + $0x2d1] sm:$0xff] %vm24_vm0, %v188_v4  ;;  %255 = vst.msk [vmem:[#allocation2 + $0x2d9] sm:$0xff] %vm24_vm0, %v189_v5  ;;  %v368_v37 = vld [vmem:[#allocation2 + $0x211] sm:$0xff]  ;;  %v369_v38 = vld [vmem:[#allocation2 + $0x219] sm:$0xff] }
  0x52   :  { %256 = vst.msk [vmem:[#allocation2 + $0x2e9] sm:$0xff] %vm24_vm0, %v190_v7  ;;  %257 = vst.msk [vmem:[#allocation2 + $0x2f1] sm:$0xff] %vm24_vm0, %v191_v8  ;;  %v370_v39 = vld [vmem:[#allocation2 + $0x229] sm:$0xff]  ;;  %v371_v40 = vld [vmem:[#allocation2 + $0x231] sm:$0xff] }
  0x53   :  { %927 = vrot.lane.b32.xlu1 %v339_v56, %s8491_s12  ;;  %258 = vst.msk [vmem:[#allocation2 + $0x301] sm:$0xff] %vm24_vm0, %v192_v9  ;;  %259 = vst.msk [vmem:[#allocation2 + $0x309] sm:$0xff] %vm24_vm0, %v193_v11  ;;  %v372_v41 = vld [vmem:[#allocation2 + $0x241] sm:$0xff]  ;;  %v373_v42 = vld [vmem:[#allocation2 + $0x249] sm:$0xff] }
  0x54   :  { %933 = vrot.lane.b32.xlu0 %v342_v61, %s8491_s12  ;;  %260 = vst.msk [vmem:[#allocation2 + $0x319] sm:$0xff] %vm24_vm0, %v194_v13  ;;  %261 = vst.msk [vmem:[#allocation2 + $0x321] sm:$0xff] %vm24_vm0, %v195_v14  ;;  %v374_v43 = vld [vmem:[#allocation2 + $0x259] sm:$0xff]  ;;  %v375_v44 = vld [vmem:[#allocation2 + $0x261] sm:$0xff] }
  0x55   :  { %v376_v45 = vld [vmem:[#allocation2 + $0x271] sm:$0xff]  ;;  %v377_v46 = vld [vmem:[#allocation2 + $0x279] sm:$0xff]  ;;  %v378_v47 = vld [vmem:[#allocation2 + $0x289] sm:$0xff] }
  0x56   :  { %v379_v48 = vld [vmem:[#allocation2 + $0x291] sm:$0xff]  ;;  %v380_v49 = vld [vmem:[#allocation2 + $0x2a1] sm:$0xff]  ;;  %v381_v50 = vld [vmem:[#allocation2 + $0x2a9] sm:$0xff] }
  0x57   :  { %931 = vrot.lane.b32.xlu1 %v341_v60, %s8491_s12  ;;  %v382_v51 = vld [vmem:[#allocation2 + $0x2b9] sm:$0xff]  ;;  %v383_v52 = vld [vmem:[#allocation2 + $0x2c1] sm:$0xff]  ;;  %v393_v5 = vld [vmem:[#allocation2 + $0xa] sm:$0xff] }
  0x58   :  { %937 = vrot.lane.b32.xlu0 %v344_v10, %s8491_s12  ;;  %v384_v53 = vld [vmem:[#allocation2 + $0x2d1] sm:$0xff]  ;;  %v385_v54 = vld [vmem:[#allocation2 + $0x2d9] sm:$0xff]  ;;  %v392_v3 = vld [vmem:[#allocation2 + $0x2] sm:$0xff] }
  0x59   :  { %v386_v55 = vld [vmem:[#allocation2 + $0x2e9] sm:$0xff]  ;;  %v387_v57 = vld [vmem:[#allocation2 + $0x2f1] sm:$0xff]  ;;  %v394_v7 = vld [vmem:[#allocation2 + $0x1a] sm:$0xff] }
  0x5a   :  { %v388_v59 = vld [vmem:[#allocation2 + $0x301] sm:$0xff]  ;;  %v389_v61 = vld [vmem:[#allocation2 + $0x309] sm:$0xff]  ;;  %v396_v11 = vld [vmem:[#allocation2 + $0x32] sm:$0xff] }
  0x5b   :  { %935 = vrot.lane.b32.xlu1 %v343_v6, %s8491_s12  ;;  %v390_v63 = vld [vmem:[#allocation2 + $0x319] sm:$0xff]  ;;  %v391_v1 = vld [vmem:[#allocation2 + $0x321] sm:$0xff] }
  0x5c   :  { %941 = vrot.lane.b32.xlu0 %v346_v15, %s8491_s12  ;;  %v395_v9 = vld [vmem:[#allocation2 + $0x22] sm:$0xff]  ;;  %v397_v13 = vld [vmem:[#allocation2 + $0x3a] sm:$0xff]  ;;  %v398_v15 = vld [vmem:[#allocation2 + $0x4a] sm:$0xff] }
  0x5f   :  { %939 = vrot.lane.b32.xlu1 %v345_v12, %s8491_s12 }
  0x60   :  { %945 = vrot.lane.b32.xlu0 %v348_v17, %s8491_s12  ;;  %v399_v17 = vld [vmem:[#allocation2 + $0x52] sm:$0xff] }
  0x63   :  { %943 = vrot.lane.b32.xlu1 %v347_v16, %s8491_s12 }
  0x64   :  { %949 = vrot.lane.b32.xlu0 %v350_v19, %s8491_s12  ;;  %v400_v19 = vld [vmem:[#allocation2 + $0x62] sm:$0xff] }
  0x67   :  { %947 = vrot.lane.b32.xlu1 %v349_v18, %s8491_s12 }
  0x68   :  { %953 = vrot.lane.b32.xlu0 %v352_v21, %s8491_s12  ;;  %v401_v21 = vld [vmem:[#allocation2 + $0x6a] sm:$0xff] }
  0x6b   :  { %951 = vrot.lane.b32.xlu1 %v351_v20, %s8491_s12 }
  0x6c   :  { %957 = vrot.lane.b32.xlu0 %v354_v23, %s8491_s12  ;;  %v402_v23 = vld [vmem:[#allocation2 + $0x7a] sm:$0xff] }
  0x6f   :  { %955 = vrot.lane.b32.xlu1 %v353_v22, %s8491_s12 }
  0x70   :  { %961 = vrot.lane.b32.xlu0 %v356_v25, %s8491_s12  ;;  %v403_v25 = vld [vmem:[#allocation2 + $0x82] sm:$0xff] }
  0x73   :  { %959 = vrot.lane.b32.xlu1 %v355_v24, %s8491_s12 }
  0x74   :  { %965 = vrot.lane.b32.xlu0 %v358_v27, %s8491_s12  ;;  %v404_v27 = vld [vmem:[#allocation2 + $0x92] sm:$0xff] }
  0x77   :  { %963 = vrot.lane.b32.xlu1 %v357_v26, %s8491_s12 }
  0x78   :  { %969 = vrot.lane.b32.xlu0 %v360_v29, %s8491_s12  ;;  %v405_v29 = vld [vmem:[#allocation2 + $0x9a] sm:$0xff] }
  0x7b   :  { %967 = vrot.lane.b32.xlu1 %v359_v28, %s8491_s12 }
  0x7c   :  { %973 = vrot.lane.b32.xlu0 %v362_v31, %s8491_s12  ;;  %v406_v31 = vld [vmem:[#allocation2 + $0xaa] sm:$0xff] }
  0x7f   :  { %971 = vrot.lane.b32.xlu1 %v361_v30, %s8491_s12  ;;  %v9043_v56 = vpop.permute.xlu0 %905 }
  0x80   :  { %977 = vrot.lane.b32.xlu0 %v364_v33, %s8491_s12  ;;  %v407_v33 = vld [vmem:[#allocation2 + $0xb2] sm:$0xff] }
  0x83   :  { %975 = vrot.lane.b32.xlu1 %v363_v32, %s8491_s12 }
  0x84   :  { %981 = vrot.lane.b32.xlu0 %v366_v35, %s8491_s12  ;;  %v408_v35 = vld [vmem:[#allocation2 + $0xc2] sm:$0xff] }
  0x87   :  { %979 = vrot.lane.b32.xlu1 %v365_v34, %s8491_s12 }
  0x88   :  { %985 = vrot.lane.b32.xlu0 %v368_v37, %s8491_s12  ;;  %v409_v37 = vld [vmem:[#allocation2 + $0xca] sm:$0xff] }
  0x8b   :  { %983 = vrot.lane.b32.xlu1 %v367_v36, %s8491_s12 }
  0x8c   :  { %989 = vrot.lane.b32.xlu0 %v370_v39, %s8491_s12  ;;  %v410_v39 = vld [vmem:[#allocation2 + $0xda] sm:$0xff] }
  0x8f   :  { %987 = vrot.lane.b32.xlu1 %v369_v38, %s8491_s12 }
  0x90   :  { %993 = vrot.lane.b32.xlu0 %v372_v41, %s8491_s12  ;;  %v411_v41 = vld [vmem:[#allocation2 + $0xe2] sm:$0xff] }
  0x93   :  { %991 = vrot.lane.b32.xlu1 %v371_v40, %s8491_s12 }
  0x94   :  { %997 = vrot.lane.b32.xlu0 %v374_v43, %s8491_s12  ;;  %v412_v43 = vld [vmem:[#allocation2 + $0xf2] sm:$0xff] }
  0x97   :  { %995 = vrot.lane.b32.xlu1 %v373_v42, %s8491_s12 }
  0x98   :  { %1001 = vrot.lane.b32.xlu0 %v376_v45, %s8491_s12  ;;  %v413_v45 = vld [vmem:[#allocation2 + $0xfa] sm:$0xff] }
  0x9b   :  { %999 = vrot.lane.b32.xlu1 %v375_v44, %s8491_s12 }
  0x9c   :  { %1005 = vrot.lane.b32.xlu0 %v378_v47, %s8491_s12  ;;  %v414_v47 = vld [vmem:[#allocation2 + $0x10a] sm:$0xff] }
  0x9f   :  { %1003 = vrot.lane.b32.xlu1 %v377_v46, %s8491_s12  ;;  %v9049_v60 = vpop.permute.xlu0 %907 }
  0xa0   :  { %1009 = vrot.lane.b32.xlu0 %v380_v49, %s8491_s12  ;;  %v415_v49 = vld [vmem:[#allocation2 + $0x112] sm:$0xff] }
  0xa3   :  { %1007 = vrot.lane.b32.xlu1 %v379_v48, %s8491_s12 }
  0xa4   :  { %1013 = vrot.lane.b32.xlu0 %v382_v51, %s8491_s12  ;;  %v416_v51 = vld [vmem:[#allocation2 + $0x122] sm:$0xff] }
  0xa7   :  { %1011 = vrot.lane.b32.xlu1 %v381_v50, %s8491_s12 }
  0xa8   :  { %1017 = vrot.lane.b32.xlu0 %v384_v53, %s8491_s12  ;;  %v417_v53 = vld [vmem:[#allocation2 + $0x12a] sm:$0xff] }
  0xab   :  { %1015 = vrot.lane.b32.xlu1 %v383_v52, %s8491_s12 }
  0xac   :  { %1021 = vrot.lane.b32.xlu0 %v386_v55, %s8491_s12  ;;  %v418_v55 = vld [vmem:[#allocation2 + $0x13a] sm:$0xff] }
  0xaf   :  { %1019 = vrot.lane.b32.xlu1 %v385_v54, %s8491_s12 }
  0xb0   :  { %1025 = vrot.lane.b32.xlu0 %v388_v59, %s8491_s12  ;;  %v419_v59 = vld [vmem:[#allocation2 + $0x142] sm:$0xff] }
  0xb1   :  { %v9045_v58 = vpop.permute.xlu1 %909 }
  0xb2   :  { %v9055_v0 = vpop.permute.xlu0 %913 }
  0xb3   :  { %1023 = vrot.lane.b32.xlu1 %v387_v57, %s8491_s12 }
  0xb4   :  { %1029 = vrot.lane.b32.xlu0 %v390_v63, %s8491_s12  ;;  %v164_v63 = vld [vmem:[%s14113_s0 + $0xf0] sm:$0xff] }
  0xb5   :  { %v9051_v62 = vpop.permute.xlu1 %911  ;;  %230 = vst.msk [vmem:[#allocation2 + $0x181] sm:$0xff] %vm24_vm0, %v164_v63  ;;  %v434_v63 = vld [vmem:[#allocation2 + $0x22a] sm:$0xff] }
  0xb6   :  { %v9061_v4 = vpop.permute.xlu0 %917 }
  0xb7   :  { %1027 = vrot.lane.b32.xlu1 %v389_v61, %s8491_s12 }
  0xb8   :  { %1161 = vrot.lane.b32.xlu0 %v392_v3, %s8492_s17  ;;  %v420_v3 = vld [vmem:[#allocation2 + $0x152] sm:$0xff] }
  0xb9   :  { %v9057_v2 = vpop.permute.xlu1 %915 }
  0xba   :  { %v9067_v8 = vpop.permute.xlu0 %921 }
  0xbb   :  { %1031 = vrot.lane.b32.xlu1 %v391_v1, %s8491_s12  ;;  %v165_v1 = vld [vmem:[%s14113_s0 + $0xf8] sm:$0xff] }
  0xbc   :  { %1165 = vrot.lane.b32.xlu0 %v394_v7, %s8492_s17  ;;  %231 = vst.msk [vmem:[#allocation2 + $0x189] sm:$0xff] %vm24_vm0, %v165_v1  ;;  %v421_v7 = vld [vmem:[#allocation2 + $0x15a] sm:$0xff] }
  0xbd   :  { %v9063_v6 = vpop.permute.xlu1 %919 }
  0xbe   :  { %v9073_v12 = vpop.permute.xlu0 %925 }
  0xbf   :  { %1163 = vrot.lane.b32.xlu1 %v393_v5, %s8492_s17 }
  0xc0   :  { %1169 = vrot.lane.b32.xlu0 %v396_v11, %s8492_s17  ;;  %v422_v11 = vld [vmem:[#allocation2 + $0x16a] sm:$0xff] }
  0xc1   :  { %v9069_v10 = vpop.permute.xlu1 %923 }
  0xc2   :  { %v9079_v16 = vpop.permute.xlu0 %929 }
  0xc3   :  { %1167 = vrot.lane.b32.xlu1 %v395_v9, %s8492_s17  ;;  %14126 = vst [vmem:[#allocation4_spill] sm:$0xff] %v9079_v16  ;;  %v714_v16 = vld [vmem:[#allocation2 + $0x39] sm:$0xff] }
  0xc4   :  { %1173 = vrot.lane.b32.xlu0 %v398_v15, %s8492_s17  ;;  %v423_v15 = vld [vmem:[#allocation2 + $0x172] sm:$0xff] }
  0xc5   :  { %v9075_v14 = vpop.permute.xlu1 %927 }
  0xc6   :  { %14125 = vst [vmem:[#allocation3_spill] sm:$0xff] %v9075_v14  ;;  %v9085_v20 = vpop.permute.xlu0 %933 }
  0xc7   :  { %1171 = vrot.lane.b32.xlu1 %v397_v13, %s8492_s17  ;;  %14128 = vst [vmem:[#allocation6_spill] sm:$0xff] %v9085_v20 }
  0xc8   :  { %1177 = vrot.lane.b32.xlu0 %v400_v19, %s8492_s17  ;;  %v424_v19 = vld [vmem:[#allocation2 + $0x1b2] sm:$0xff] }
  0xc9   :  { %v9081_v18 = vpop.permute.xlu1 %931 }
  0xca   :  { %14127 = vst [vmem:[#allocation5_spill] sm:$0xff] %v9081_v18  ;;  %v9091_v24 = vpop.permute.xlu0 %937 }
  0xcb   :  { %1175 = vrot.lane.b32.xlu1 %v399_v17, %s8492_s17  ;;  %14130 = vst [vmem:[#allocation8_spill] sm:$0xff] %v9091_v24 }
  0xcc   :  { %1181 = vrot.lane.b32.xlu0 %v402_v23, %s8492_s17  ;;  %v425_v23 = vld [vmem:[#allocation2 + $0x1ba] sm:$0xff] }
  0xcd   :  { %v9087_v22 = vpop.permute.xlu1 %935 }
  0xce   :  { %14129 = vst [vmem:[#allocation7_spill] sm:$0xff] %v9087_v22  ;;  %v9097_v28 = vpop.permute.xlu0 %941  ;;  %v593_v22 = vld [vmem:[#allocation2 + $0x82] sm:$0xff] }
  0xcf   :  { %1179 = vrot.lane.b32.xlu1 %v401_v21, %s8492_s17  ;;  %14132 = vst [vmem:[#allocation10_spill] sm:$0xff] %v9097_v28 }
  0xd0   :  { %1185 = vrot.lane.b32.xlu0 %v404_v27, %s8492_s17  ;;  %v426_v27 = vld [vmem:[#allocation2 + $0x1ca] sm:$0xff] }
  0xd1   :  { %v9093_v26 = vpop.permute.xlu1 %939 }
  0xd2   :  { %14131 = vst [vmem:[#allocation9_spill] sm:$0xff] %v9093_v26  ;;  %v9103_v32 = vpop.permute.xlu0 %945  ;;  %v587_v26 = vld [vmem:[#allocation2 + $0x3a] sm:$0xff] }
  0xd3   :  { %1183 = vrot.lane.b32.xlu1 %v403_v25, %s8492_s17  ;;  %14134 = vst [vmem:[#allocation12_spill] sm:$0xff] %v9103_v32 }
  0xd4   :  { %1189 = vrot.lane.b32.xlu0 %v406_v31, %s8492_s17  ;;  %v427_v31 = vld [vmem:[#allocation2 + $0x1d2] sm:$0xff] }
  0xd5   :  { %v9099_v30 = vpop.permute.xlu1 %943 }
  0xd6   :  { %14133 = vst [vmem:[#allocation11_spill] sm:$0xff] %v9099_v30  ;;  %v9109_v36 = vpop.permute.xlu0 %949  ;;  %v535_v30 = vld [vmem:[#allocation2 + $0xc9] sm:$0xff] }
  0xd7   :  { %1187 = vrot.lane.b32.xlu1 %v405_v29, %s8492_s17  ;;  %14136 = vst [vmem:[#allocation14_spill] sm:$0xff] %v9109_v36 }
  0xd8   :  { %1193 = vrot.lane.b32.xlu0 %v408_v35, %s8492_s17  ;;  %v428_v35 = vld [vmem:[#allocation2 + $0x1e2] sm:$0xff] }
  0xd9   :  { %v9105_v34 = vpop.permute.xlu1 %947 }
  0xda   :  { %14135 = vst [vmem:[#allocation13_spill] sm:$0xff] %v9105_v34  ;;  %v9115_v40 = vpop.permute.xlu0 %953  ;;  %v531_v34 = vld [vmem:[#allocation2 + $0x99] sm:$0xff] }
  0xdb   :  { %1191 = vrot.lane.b32.xlu1 %v407_v33, %s8492_s17  ;;  %14138 = vst [vmem:[#allocation16_spill] sm:$0xff] %v9115_v40 }
  0xdc   :  { %1197 = vrot.lane.b32.xlu0 %v410_v39, %s8492_s17  ;;  %v429_v39 = vld [vmem:[#allocation2 + $0x1ea] sm:$0xff] }
  0xdd   :  { %v9111_v38 = vpop.permute.xlu1 %951 }
  0xde   :  { %14137 = vst [vmem:[#allocation15_spill] sm:$0xff] %v9111_v38  ;;  %v9121_v44 = vpop.permute.xlu0 %957  ;;  %v527_v38 = vld [vmem:[#allocation2 + $0x69] sm:$0xff] }
  0xdf   :  { %1195 = vrot.lane.b32.xlu1 %v409_v37, %s8492_s17  ;;  %14140 = vst [vmem:[#allocation18_spill] sm:$0xff] %v9121_v44 }
  0xe0   :  { %1201 = vrot.lane.b32.xlu0 %v412_v43, %s8492_s17  ;;  %v430_v43 = vld [vmem:[#allocation2 + $0x1fa] sm:$0xff] }
  0xe1   :  { %v9117_v42 = vpop.permute.xlu1 %955 }
  0xe2   :  { %14139 = vst [vmem:[#allocation17_spill] sm:$0xff] %v9117_v42  ;;  %v9127_v48 = vpop.permute.xlu0 %961  ;;  %v523_v42 = vld [vmem:[#allocation2 + $0x39] sm:$0xff] }
  0xe3   :  { %1199 = vrot.lane.b32.xlu1 %v411_v41, %s8492_s17  ;;  %14142 = vst [vmem:[#allocation20_spill] sm:$0xff] %v9127_v48  ;;  %v289_v48 = vld [vmem:[#allocation2 + $0x128] sm:$0xff] }
  0xe4   :  { %1205 = vrot.lane.b32.xlu0 %v414_v47, %s8492_s17  ;;  %v431_v47 = vld [vmem:[#allocation2 + $0x202] sm:$0xff] }
  0xe5   :  { %v9123_v46 = vpop.permute.xlu1 %959 }
  0xe6   :  { %14141 = vst [vmem:[#allocation19_spill] sm:$0xff] %v9123_v46  ;;  %v9133_v52 = vpop.permute.xlu0 %965 }
  0xe7   :  { %1203 = vrot.lane.b32.xlu1 %v413_v45, %s8492_s17  ;;  %14144 = vst [vmem:[#allocation22_spill] sm:$0xff] %v9133_v52  ;;  %v287_v52 = vld [vmem:[#allocation2 + $0x110] sm:$0xff] }
  0xe8   :  { %1209 = vrot.lane.b32.xlu0 %v416_v51, %s8492_s17  ;;  %v432_v51 = vld [vmem:[#allocation2 + $0x212] sm:$0xff] }
  0xe9   :  { %v9129_v50 = vpop.permute.xlu1 %963 }
  0xea   :  { %14143 = vst [vmem:[#allocation21_spill] sm:$0xff] %v9129_v50  ;;  %v9139_v57 = vpop.permute.xlu0 %969 }
  0xeb   :  { %1207 = vrot.lane.b32.xlu1 %v415_v49, %s8492_s17  ;;  %14146 = vst [vmem:[#allocation24_spill] sm:$0xff] %v9139_v57  ;;  %v285_v57 = vld [vmem:[#allocation2 + $0xf8] sm:$0xff] }
  0xec   :  { %1213 = vrot.lane.b32.xlu0 %v418_v55, %s8492_s17  ;;  %v433_v55 = vld [vmem:[#allocation2 + $0x21a] sm:$0xff] }
  0xed   :  { %v9135_v54 = vpop.permute.xlu1 %967 }
  0xee   :  { %14145 = vst [vmem:[#allocation23_spill] sm:$0xff] %v9135_v54  ;;  %v9153_v5 = vpop.permute.xlu0 %973 }
  0xef   :  { %1211 = vrot.lane.b32.xlu1 %v417_v53, %s8492_s17  ;;  %14148 = vst [vmem:[#allocation26_spill] sm:$0xff] %v9153_v5  ;;  %v283_v5 = vld [vmem:[#allocation2 + $0xe0] sm:$0xff] }
  0xf0   :  { %1217 = vrot.lane.b32.xlu0 %v420_v3, %s8492_s17  ;;  %v435_v3 = vld [vmem:[#allocation2 + $0x232] sm:$0xff] }
  0xf1   :  { %v9141_v61 = vpop.permute.xlu1 %971 }
  0xf2   :  { %14147 = vst [vmem:[#allocation25_spill] sm:$0xff] %v9141_v61  ;;  %v9159_v13 = vpop.permute.xlu0 %977 }
  0xf3   :  { %1215 = vrot.lane.b32.xlu1 %v419_v59, %s8492_s17  ;;  %14150 = vst [vmem:[#allocation28_spill] sm:$0xff] %v9159_v13  ;;  %v281_v13 = vld [vmem:[#allocation2 + $0xc8] sm:$0xff] }
  0xf4   :  { %1221 = vrot.lane.b32.xlu0 %v422_v11, %s8492_s17  ;;  %v436_v11 = vld [vmem:[#allocation2 + $0x242] sm:$0xff] }
  0xf5   :  { %v9155_v9 = vpop.permute.xlu1 %975 }
  0xf6   :  { %14149 = vst [vmem:[#allocation27_spill] sm:$0xff] %v9155_v9  ;;  %v9165_v21 = vpop.permute.xlu0 %981 }
  0xf7   :  { %1219 = vrot.lane.b32.xlu1 %v421_v7, %s8492_s17  ;;  %14152 = vst [vmem:[#allocation30_spill] sm:$0xff] %v9165_v21  ;;  %v279_v21 = vld [vmem:[#allocation2 + $0xb0] sm:$0xff] }
  0xf8   :  { %1225 = vrot.lane.b32.xlu0 %v424_v19, %s8492_s17  ;;  %v437_v19 = vld [vmem:[#allocation2 + $0x24a] sm:$0xff] }
  0xf9   :  { %v9161_v17 = vpop.permute.xlu1 %979 }
  0xfa   :  { %14151 = vst [vmem:[#allocation29_spill] sm:$0xff] %v9161_v17  ;;  %v9171_v29 = vpop.permute.xlu0 %985 }
  0xfb   :  { %1223 = vrot.lane.b32.xlu1 %v423_v15, %s8492_s17  ;;  %14154 = vst [vmem:[#allocation32_spill] sm:$0xff] %v9171_v29  ;;  %v277_v29 = vld [vmem:[#allocation2 + $0x98] sm:$0xff] }
  0xfc   :  { %1229 = vrot.lane.b32.xlu0 %v426_v27, %s8492_s17  ;;  %v438_v27 = vld [vmem:[#allocation2 + $0x25a] sm:$0xff] }
  0xfd   :  { %v9167_v25 = vpop.permute.xlu1 %983 }
  0xfe   :  { %14153 = vst [vmem:[#allocation31_spill] sm:$0xff] %v9167_v25  ;;  %v9177_v37 = vpop.permute.xlu0 %989 }
  0xff   :  { %1227 = vrot.lane.b32.xlu1 %v425_v23, %s8492_s17  ;;  %14156 = vst [vmem:[#allocation34_spill] sm:$0xff] %v9177_v37  ;;  %v275_v37 = vld [vmem:[#allocation2 + $0x80] sm:$0xff] }
 0x100   :  { %1233 = vrot.lane.b32.xlu0 %v428_v35, %s8492_s17  ;;  %v439_v35 = vld [vmem:[#allocation2 + $0x262] sm:$0xff] }
 0x101   :  { %v9173_v33 = vpop.permute.xlu1 %987 }
 0x102   :  { %14155 = vst [vmem:[#allocation33_spill] sm:$0xff] %v9173_v33  ;;  %v9183_v45 = vpop.permute.xlu0 %993 }
 0x103   :  { %1231 = vrot.lane.b32.xlu1 %v427_v31, %s8492_s17  ;;  %14158 = vst [vmem:[#allocation36_spill] sm:$0xff] %v9183_v45  ;;  %v273_v45 = vld [vmem:[#allocation2 + $0x68] sm:$0xff] }
 0x104   :  { %1237 = vrot.lane.b32.xlu0 %v430_v43, %s8492_s17  ;;  %v440_v43 = vld [vmem:[#allocation2 + $0x272] sm:$0xff] }
 0x105   :  { %v9179_v41 = vpop.permute.xlu1 %991 }
 0x106   :  { %14157 = vst [vmem:[#allocation35_spill] sm:$0xff] %v9179_v41  ;;  %v9189_v53 = vpop.permute.xlu0 %997 }
 0x107   :  { %1235 = vrot.lane.b32.xlu1 %v429_v39, %s8492_s17  ;;  %14160 = vst [vmem:[#allocation38_spill] sm:$0xff] %v9189_v53  ;;  %v271_v53 = vld [vmem:[#allocation2 + $0x50] sm:$0xff] }
 0x108   :  { %1241 = vrot.lane.b32.xlu0 %v432_v51, %s8492_s17  ;;  %v441_v51 = vld [vmem:[#allocation2 + $0x27a] sm:$0xff] }
 0x109   :  { %v9185_v49 = vpop.permute.xlu1 %995 }
 0x10a   :  { %14159 = vst [vmem:[#allocation37_spill] sm:$0xff] %v9185_v49  ;;  %v9195_v1 = vpop.permute.xlu0 %1001 }
 0x10b   :  { %1239 = vrot.lane.b32.xlu1 %v431_v47, %s8492_s17  ;;  %14162 = vst [vmem:[#allocation40_spill] sm:$0xff] %v9195_v1  ;;  %v269_v1 = vld [vmem:[#allocation2 + $0x38] sm:$0xff] }
 0x10c   :  { %1245 = vrot.lane.b32.xlu0 %v434_v63, %s8492_s17  ;;  %v442_v63 = vld [vmem:[#allocation2 + $0x28a] sm:$0xff] }
 0x10d   :  { %v9191_v59 = vpop.permute.xlu1 %999 }
 0x10e   :  { %14161 = vst [vmem:[#allocation39_spill] sm:$0xff] %v9191_v59  ;;  %v9201_v15 = vpop.permute.xlu0 %1005 }
 0x10f   :  { %1243 = vrot.lane.b32.xlu1 %v433_v55, %s8492_s17  ;;  %14164 = vst [vmem:[#allocation42_spill] sm:$0xff] %v9201_v15  ;;  %v267_v15 = vld [vmem:[#allocation2 + $0x20] sm:$0xff] }
 0x110   :  { %1249 = vrot.lane.b32.xlu0 %v436_v11, %s8492_s17  ;;  %v443_v11 = vld [vmem:[#allocation2 + $0x292] sm:$0xff] }
 0x111   :  { %v9197_v7 = vpop.permute.xlu1 %1003 }
 0x112   :  { %14163 = vst [vmem:[#allocation41_spill] sm:$0xff] %v9197_v7  ;;  %v9207_v31 = vpop.permute.xlu0 %1009 }
 0x113   :  { %1247 = vrot.lane.b32.xlu1 %v435_v3, %s8492_s17  ;;  %14166 = vst [vmem:[#allocation44_spill] sm:$0xff] %v9207_v31 }
 0x114   :  { %1253 = vrot.lane.b32.xlu0 %v438_v27, %s8492_s17  ;;  %v444_v27 = vld [vmem:[#allocation2 + $0x2a2] sm:$0xff] }
 0x115   :  { %v9203_v23 = vpop.permute.xlu1 %1007 }
 0x116   :  { %14165 = vst [vmem:[#allocation43_spill] sm:$0xff] %v9203_v23  ;;  %v9213_v47 = vpop.permute.xlu0 %1013 }
 0x117   :  { %1251 = vrot.lane.b32.xlu1 %v437_v19, %s8492_s17  ;;  %14168 = vst [vmem:[#allocation46_spill] sm:$0xff] %v9213_v47  ;;  %v445_v47 = vld [vmem:[#allocation2 + $0x2aa] sm:$0xff] }
 0x118   :  { %1257 = vrot.lane.b32.xlu0 %v440_v43, %s8492_s17  ;;  %v446_v43 = vld [vmem:[#allocation2 + $0x2ba] sm:$0xff] }
 0x119   :  { %v9209_v39 = vpop.permute.xlu1 %1011 }
 0x11a   :  { %14167 = vst [vmem:[#allocation45_spill] sm:$0xff] %v9209_v39  ;;  %v9219_v3 = vpop.permute.xlu0 %1017 }
 0x11b   :  { %1255 = vrot.lane.b32.xlu1 %v439_v35, %s8492_s17  ;;  %14170 = vst [vmem:[#allocation48_spill] sm:$0xff] %v9219_v3  ;;  %v447_v3 = vld [vmem:[#allocation2 + $0x2c2] sm:$0xff] }
 0x11c   :  { %1261 = vrot.lane.b32.xlu0 %v442_v63, %s8492_s17  ;;  %v448_v63 = vld [vmem:[#allocation2 + $0x2d2] sm:$0xff] }
 0x11d   :  { %v9215_v55 = vpop.permute.xlu1 %1015 }
 0x11e   :  { %14169 = vst [vmem:[#allocation47_spill] sm:$0xff] %v9215_v55  ;;  %v9225_v35 = vpop.permute.xlu0 %1021 }
 0x11f   :  { %1259 = vrot.lane.b32.xlu1 %v441_v51, %s8492_s17  ;;  %14172 = vst [vmem:[#allocation50_spill] sm:$0xff] %v9225_v35  ;;  %v449_v35 = vld [vmem:[#allocation2 + $0x2da] sm:$0xff] }
 0x120   :  { %1265 = vrot.lane.b32.xlu0 %v444_v27, %s8492_s17 }
 0x121   :  { %v9221_v19 = vpop.permute.xlu1 %1019 }
 0x122   :  { %14171 = vst [vmem:[#allocation49_spill] sm:$0xff] %v9221_v19  ;;  %v9231_v51 = vpop.permute.xlu0 %1025 }
 0x123   :  { %1263 = vrot.lane.b32.xlu1 %v443_v11, %s8492_s17  ;;  %14174 = vst [vmem:[#allocation52_spill] sm:$0xff] %v9231_v51  ;;  %v451_v51 = vld [vmem:[#allocation2 + $0x2f2] sm:$0xff] }
 0x124   :  { %1269 = vrot.lane.b32.xlu0 %v446_v43, %s8492_s17  ;;  %v197_v43 = vld [vmem:[%s14113_s0 + $0x1f8] sm:$0xff] }
 0x125   :  { %v9227_v39 = vpop.permute.xlu1 %1023  ;;  %263 = vst.msk [vmem:[#allocation2 + $0x339] sm:$0xff] %vm24_vm0, %v197_v43  ;;  %v266_v43 = vld [vmem:[#allocation2 + $0x18] sm:$0xff] }
 0x126   :  { %14173 = vst [vmem:[#allocation51_spill] sm:$0xff] %v9227_v39  ;;  %v9237_v11 = vpop.permute.xlu0 %1029 }
 0x127   :  { %1267 = vrot.lane.b32.xlu1 %v445_v47, %s8492_s17  ;;  %14176 = vst [vmem:[#allocation54_spill] sm:$0xff] %v9237_v11  ;;  %v450_v47 = vld [vmem:[#allocation2 + $0x2ea] sm:$0xff] }
 0x128   :  { %1273 = vrot.lane.b32.xlu0 %v448_v63, %s8492_s17 }
 0x129   :  { %v9233_v55 = vpop.permute.xlu1 %1027 }
 0x12a   :  { %14175 = vst [vmem:[#allocation53_spill] sm:$0xff] %v9233_v55  ;;  %v9243_v27 = vpop.permute.xlu0 %1161  ;;  %v455_v55 = vld [vmem:[#allocation2 + $0x322] sm:$0xff] }
 0x12b   :  { %1271 = vrot.lane.b32.xlu1 %v447_v3, %s8492_s17  ;;  %v196_v3 = vld [vmem:[%s14113_s0 + $0x1f0] sm:$0xff]  ;;  %s8493_s0 = smov 12  }
 0x12c   :  { %1277 = vrot.lane.b32.xlu0 %v450_v47, %s8492_s17  ;;  %262 = vst.msk [vmem:[#allocation2 + $0x331] sm:$0xff] %vm24_vm0, %v196_v3  ;;  %v454_v47 = vld [vmem:[#allocation2 + $0x31a] sm:$0xff] }
 0x12d   :  { %v9239_v19 = vpop.permute.xlu1 %1031 }
 0x12e   :  { %14177 = vst [vmem:[#allocation55_spill] sm:$0xff] %v9239_v19  ;;  %v9257_v63 = vpop.permute.xlu0 %1165  ;;  %v453_v19 = vld [vmem:[#allocation2 + $0x30a] sm:$0xff] }
 0x12f   :  { %1275 = vrot.lane.b32.xlu1 %v449_v35, %s8492_s17  ;;  %v452_v35 = vld [vmem:[#allocation2 + $0x302] sm:$0xff] }
 0x130   :  { %1281 = vrot.lane.b32.xlu0 %v452_v35, %s8492_s17  ;;  %v268_v35 = vld [vmem:[#allocation2 + $0x30] sm:$0xff] }
 0x131   :  { %v9245_v39 = vpop.permute.xlu1 %1163 }
 0x132   :  { %v9263_v3 = vpop.permute.xlu0 %1169 }
 0x133   :  { %1279 = vrot.lane.b32.xlu1 %v451_v51, %s8492_s17  ;;  %v519_v46 = vld [vmem:[#allocation2 + $0x338] sm:$0xff] }
 0x134   :  { %1285 = vrot.lane.b32.xlu0 %v454_v47, %s8492_s17  ;;  %v270_v47 = vld [vmem:[#allocation2 + $0x48] sm:$0xff] }
 0x135   :  { %v9259_v11 = vpop.permute.xlu1 %1167 }
 0x136   :  { %v9269_v51 = vpop.permute.xlu0 %1173 }
 0x137   :  { %1283 = vrot.lane.b32.xlu1 %v453_v19, %s8492_s17 }
 0x138   :  { %1417 = vrot.lane.b32.xlu0 %v266_v43, %s8493_s0  ;;  %v272_v43 = vld [vmem:[#allocation2 + $0x60] sm:$0xff] }
 0x139   :  { %v9265_v31 = vpop.permute.xlu1 %1171 }
 0x13a   :  { %v9275_v19 = vpop.permute.xlu0 %1177 }
 0x13b   :  { %1287 = vrot.lane.b32.xlu1 %v455_v55, %s8492_s17  ;;  %14178 = vst [vmem:[#allocation56_spill] sm:$0xff] %v9275_v19 }
 0x13c   :  { %1421 = vrot.lane.b32.xlu0 %v268_v35, %s8493_s0  ;;  %v274_v35 = vld [vmem:[#allocation2 + $0x78] sm:$0xff] }
 0x13d   :  { %v9271_v23 = vpop.permute.xlu1 %1175 }
 0x13e   :  { %v9281_v55 = vpop.permute.xlu0 %1181 }
 0x13f   :  { %1419 = vrot.lane.b32.xlu1 %v267_v15, %s8493_s0  ;;  %14180 = vst [vmem:[#allocation58_spill] sm:$0xff] %v9281_v55 }
 0x140   :  { %1425 = vrot.lane.b32.xlu0 %v270_v47, %s8493_s0  ;;  %v276_v47 = vld [vmem:[#allocation2 + $0x90] sm:$0xff] }
 0x141   :  { %v9277_v7 = vpop.permute.xlu1 %1179 }
 0x142   :  { %14179 = vst [vmem:[#allocation57_spill] sm:$0xff] %v9277_v7  ;;  %v9287_v15 = vpop.permute.xlu0 %1185 }
 0x143   :  { %1423 = vrot.lane.b32.xlu1 %v269_v1, %s8493_s0  ;;  %14182 = vst [vmem:[#allocation60_spill] sm:$0xff] %v9287_v15  ;;  %v650_v15 = vld [vmem:[#allocation2 + $0x38] sm:$0xff] }
 0x144   :  { %1429 = vrot.lane.b32.xlu0 %v272_v43, %s8493_s0  ;;  %v278_v43 = vld [vmem:[#allocation2 + $0xa8] sm:$0xff] }
 0x145   :  { %v9283_v59 = vpop.permute.xlu1 %1183 }
 0x146   :  { %14181 = vst [vmem:[#allocation59_spill] sm:$0xff] %v9283_v59  ;;  %v9293_v1 = vpop.permute.xlu0 %1189 }
 0x147   :  { %1427 = vrot.lane.b32.xlu1 %v271_v53, %s8493_s0  ;;  %14184 = vst [vmem:[#allocation62_spill] sm:$0xff] %v9293_v1  ;;  %v591_v1 = vld [vmem:[#allocation2 + $0x6a] sm:$0xff] }
 0x148   :  { %1433 = vrot.lane.b32.xlu0 %v274_v35, %s8493_s0  ;;  %v280_v35 = vld [vmem:[#allocation2 + $0xc0] sm:$0xff] }
 0x149   :  { %v9289_v49 = vpop.permute.xlu1 %1187 }
 0x14a   :  { %14183 = vst [vmem:[#allocation61_spill] sm:$0xff] %v9289_v49  ;;  %v9299_v53 = vpop.permute.xlu0 %1193 }
 0x14b   :  { %1431 = vrot.lane.b32.xlu1 %v273_v45, %s8493_s0  ;;  %14186 = vst [vmem:[#allocation64_spill] sm:$0xff] %v9299_v53  ;;  %v585_v53 = vld [vmem:[#allocation2 + $0x22] sm:$0xff] }
 0x14c   :  { %1437 = vrot.lane.b32.xlu0 %v276_v47, %s8493_s0  ;;  %v282_v47 = vld [vmem:[#allocation2 + $0xd8] sm:$0xff] }
 0x14d   :  { %v9295_v41 = vpop.permute.xlu1 %1191 }
 0x14e   :  { %14185 = vst [vmem:[#allocation63_spill] sm:$0xff] %v9295_v41  ;;  %v9305_v45 = vpop.permute.xlu0 %1197 }
 0x14f   :  { %1435 = vrot.lane.b32.xlu1 %v275_v37, %s8493_s0  ;;  %14188 = vst [vmem:[#allocation66_spill] sm:$0xff] %v9305_v45  ;;  %v533_v45 = vld [vmem:[#allocation2 + $0xb1] sm:$0xff] }
 0x150   :  { %1441 = vrot.lane.b32.xlu0 %v278_v43, %s8493_s0  ;;  %v284_v43 = vld [vmem:[#allocation2 + $0xf0] sm:$0xff] }
 0x151   :  { %v9301_v33 = vpop.permute.xlu1 %1195 }
 0x152   :  { %14187 = vst [vmem:[#allocation65_spill] sm:$0xff] %v9301_v33  ;;  %v9311_v37 = vpop.permute.xlu0 %1201 }
 0x153   :  { %1439 = vrot.lane.b32.xlu1 %v277_v29, %s8493_s0  ;;  %14190 = vst [vmem:[#allocation68_spill] sm:$0xff] %v9311_v37  ;;  %v529_v37 = vld [vmem:[#allocation2 + $0x81] sm:$0xff] }
 0x154   :  { %1445 = vrot.lane.b32.xlu0 %v280_v35, %s8493_s0  ;;  %v286_v35 = vld [vmem:[#allocation2 + $0x108] sm:$0xff] }
 0x155   :  { %v9307_v25 = vpop.permute.xlu1 %1199 }
 0x156   :  { %14189 = vst [vmem:[#allocation67_spill] sm:$0xff] %v9307_v25  ;;  %v9317_v29 = vpop.permute.xlu0 %1205 }
 0x157   :  { %1443 = vrot.lane.b32.xlu1 %v279_v21, %s8493_s0  ;;  %14192 = vst [vmem:[#allocation70_spill] sm:$0xff] %v9317_v29  ;;  %v525_v29 = vld [vmem:[#allocation2 + $0x51] sm:$0xff] }
 0x158   :  { %1449 = vrot.lane.b32.xlu0 %v282_v47, %s8493_s0  ;;  %v288_v47 = vld [vmem:[#allocation2 + $0x120] sm:$0xff] }
 0x159   :  { %v9313_v17 = vpop.permute.xlu1 %1203 }
 0x15a   :  { %14191 = vst [vmem:[#allocation69_spill] sm:$0xff] %v9313_v17  ;;  %v9323_v21 = vpop.permute.xlu0 %1209 }
 0x15b   :  { %1447 = vrot.lane.b32.xlu1 %v281_v13, %s8493_s0  ;;  %14194 = vst [vmem:[#allocation72_spill] sm:$0xff] %v9323_v21  ;;  %v521_v21 = vld [vmem:[#allocation2 + $0x21] sm:$0xff] }
 0x15c   :  { %1453 = vrot.lane.b32.xlu0 %v284_v43, %s8493_s0  ;;  %v290_v43 = vld [vmem:[#allocation2 + $0x138] sm:$0xff] }
 0x15d   :  { %v9319_v9 = vpop.permute.xlu1 %1207 }
 0x15e   :  { %14193 = vst [vmem:[#allocation71_spill] sm:$0xff] %v9319_v9  ;;  %v9329_v13 = vpop.permute.xlu0 %1213 }
 0x15f   :  { %1451 = vrot.lane.b32.xlu1 %v283_v5, %s8493_s0  ;;  %14196 = vst [vmem:[#allocation74_spill] sm:$0xff] %v9329_v13 }
 0x160   :  { %1457 = vrot.lane.b32.xlu0 %v286_v35, %s8493_s0  ;;  %v292_v35 = vld [vmem:[#allocation2 + $0x150] sm:$0xff] }
 0x161   :  { %v9325_v61 = vpop.permute.xlu1 %1211 }
 0x162   :  { %14195 = vst [vmem:[#allocation73_spill] sm:$0xff] %v9325_v61  ;;  %v9335_v5 = vpop.permute.xlu0 %1217 }
 0x163   :  { %1455 = vrot.lane.b32.xlu1 %v285_v57, %s8493_s0  ;;  %14198 = vst [vmem:[#allocation76_spill] sm:$0xff] %v9335_v5 }
 0x164   :  { %1461 = vrot.lane.b32.xlu0 %v288_v47, %s8493_s0  ;;  %v294_v47 = vld [vmem:[#allocation2 + $0x168] sm:$0xff] }
 0x165   :  { %v9331_v54 = vpop.permute.xlu1 %1215 }
 0x166   :  { %14197 = vst [vmem:[#allocation75_spill] sm:$0xff] %v9331_v54  ;;  %v9341_v57 = vpop.permute.xlu0 %1221  ;;  %v291_v54 = vld [vmem:[#allocation2 + $0x140] sm:$0xff] }
 0x167   :  { %1459 = vrot.lane.b32.xlu1 %v287_v52, %s8493_s0  ;;  %14200 = vst [vmem:[#allocation78_spill] sm:$0xff] %v9341_v57 }
 0x168   :  { %1465 = vrot.lane.b32.xlu0 %v290_v43, %s8493_s0 }
 0x169   :  { %v9337_v50 = vpop.permute.xlu1 %1219 }
 0x16a   :  { %14199 = vst [vmem:[#allocation77_spill] sm:$0xff] %v9337_v50  ;;  %v9347_v52 = vpop.permute.xlu0 %1225  ;;  %v293_v50 = vld [vmem:[#allocation2 + $0x158] sm:$0xff] }
 0x16b   :  { %1463 = vrot.lane.b32.xlu1 %v289_v48, %s8493_s0  ;;  %14202 = vst [vmem:[#allocation80_spill] sm:$0xff] %v9347_v52  ;;  %v487_v52 = vld [vmem:[#allocation2 + $0x188] sm:$0xff] }
 0x16c   :  { %1469 = vrot.lane.b32.xlu0 %v292_v35, %s8493_s0  ;;  %v298_v35 = vld [vmem:[#allocation2 + $0x1c8] sm:$0xff] }
 0x16d   :  { %v9343_v13 = vpop.permute.xlu1 %1223 }
 0x16e   :  { %14201 = vst [vmem:[#allocation79_spill] sm:$0xff] %v9343_v13  ;;  %v9353_v48 = vpop.permute.xlu0 %1229  ;;  %v295_v13 = vld [vmem:[#allocation2 + $0x170] sm:$0xff] }
 0x16f   :  { %1467 = vrot.lane.b32.xlu1 %v291_v54, %s8493_s0  ;;  %14204 = vst [vmem:[#allocation82_spill] sm:$0xff] %v9353_v48  ;;  %v486_v54 = vld [vmem:[#allocation2 + $0x180] sm:$0xff] }
 0x170   :  { %1473 = vrot.lane.b32.xlu0 %v294_v47, %s8493_s0  ;;  %v300_v47 = vld [vmem:[#allocation2 + $0x1e0] sm:$0xff] }
 0x171   :  { %v9349_v5 = vpop.permute.xlu1 %1227 }
 0x172   :  { %14203 = vst [vmem:[#allocation81_spill] sm:$0xff] %v9349_v5  ;;  %v9359_v43 = vpop.permute.xlu0 %1233 }
 0x173   :  { %1471 = vrot.lane.b32.xlu1 %v293_v50, %s8493_s0  ;;  %14206 = vst [vmem:[#allocation84_spill] sm:$0xff] %v9359_v43 }
 0x174   :  { %1477 = vrot.lane.b32.xlu0 %v486_v54, %s8493_s0  ;;  %v302_v54 = vld [vmem:[#allocation2 + $0x1f8] sm:$0xff] }
 0x175   :  { %v9355_v57 = vpop.permute.xlu1 %1231 }
 0x176   :  { %14205 = vst [vmem:[#allocation83_spill] sm:$0xff] %v9355_v57  ;;  %v9365_v50 = vpop.permute.xlu0 %1237  ;;  %v299_v57 = vld [vmem:[#allocation2 + $0x1d0] sm:$0xff] }
 0x177   :  { %1475 = vrot.lane.b32.xlu1 %v295_v13, %s8493_s0  ;;  %14208 = vst [vmem:[#allocation86_spill] sm:$0xff] %v9365_v50 }
 0x178   :  { %1481 = vrot.lane.b32.xlu0 %v298_v35, %s8493_s0  ;;  %v304_v35 = vld [vmem:[#allocation2 + $0x210] sm:$0xff] }
 0x179   :  { %v9361_v5 = vpop.permute.xlu1 %1235 }
 0x17a   :  { %14207 = vst [vmem:[#allocation85_spill] sm:$0xff] %v9361_v5  ;;  %v9371_v13 = vpop.permute.xlu0 %1241  ;;  %v301_v5 = vld [vmem:[#allocation2 + $0x1e8] sm:$0xff] }
 0x17b   :  { %1479 = vrot.lane.b32.xlu1 %v487_v52, %s8493_s0  ;;  %14210 = vst [vmem:[#allocation88_spill] sm:$0xff] %v9371_v13 }
 0x17c   :  { %1485 = vrot.lane.b32.xlu0 %v300_v47, %s8493_s0  ;;  %v306_v47 = vld [vmem:[#allocation2 + $0x228] sm:$0xff] }
 0x17d   :  { %v9367_v48 = vpop.permute.xlu1 %1239 }
 0x17e   :  { %14209 = vst [vmem:[#allocation87_spill] sm:$0xff] %v9367_v48  ;;  %v9377_v52 = vpop.permute.xlu0 %1245  ;;  %v303_v48 = vld [vmem:[#allocation2 + $0x200] sm:$0xff] }
 0x17f   :  { %1483 = vrot.lane.b32.xlu1 %v299_v57, %s8493_s0  ;;  %14212 = vst [vmem:[#allocation90_spill] sm:$0xff] %v9377_v52 }
 0x180   :  { %1489 = vrot.lane.b32.xlu0 %v302_v54, %s8493_s0  ;;  %v308_v54 = vld [vmem:[#allocation2 + $0x240] sm:$0xff] }
 0x181   :  { %v9373_v43 = vpop.permute.xlu1 %1243 }
 0x182   :  { %14211 = vst [vmem:[#allocation89_spill] sm:$0xff] %v9373_v43  ;;  %v9383_v57 = vpop.permute.xlu0 %1249  ;;  %v305_v43 = vld [vmem:[#allocation2 + $0x218] sm:$0xff] }
 0x183   :  { %1487 = vrot.lane.b32.xlu1 %v301_v5, %s8493_s0  ;;  %14214 = vst [vmem:[#allocation92_spill] sm:$0xff] %v9383_v57 }
 0x184   :  { %1493 = vrot.lane.b32.xlu0 %v304_v35, %s8493_s0  ;;  %v310_v35 = vld [vmem:[#allocation2 + $0x258] sm:$0xff] }
 0x185   :  { %v9379_v50 = vpop.permute.xlu1 %1247 }
 0x186   :  { %14213 = vst [vmem:[#allocation91_spill] sm:$0xff] %v9379_v50  ;;  %v9389_v5 = vpop.permute.xlu0 %1253  ;;  %v307_v50 = vld [vmem:[#allocation2 + $0x230] sm:$0xff] }
 0x187   :  { %1491 = vrot.lane.b32.xlu1 %v303_v48, %s8493_s0  ;;  %14216 = vst [vmem:[#allocation94_spill] sm:$0xff] %v9389_v5 }
 0x188   :  { %1497 = vrot.lane.b32.xlu0 %v306_v47, %s8493_s0  ;;  %v312_v47 = vld [vmem:[#allocation2 + $0x270] sm:$0xff] }
 0x189   :  { %v9385_v13 = vpop.permute.xlu1 %1251 }
 0x18a   :  { %14215 = vst [vmem:[#allocation93_spill] sm:$0xff] %v9385_v13  ;;  %v9395_v48 = vpop.permute.xlu0 %1257  ;;  %v309_v13 = vld [vmem:[#allocation2 + $0x248] sm:$0xff] }
 0x18b   :  { %1495 = vrot.lane.b32.xlu1 %v305_v43, %s8493_s0  ;;  %14218 = vst [vmem:[#allocation96_spill] sm:$0xff] %v9395_v48 }
 0x18c   :  { %1501 = vrot.lane.b32.xlu0 %v308_v54, %s8493_s0  ;;  %v314_v54 = vld [vmem:[#allocation2 + $0x288] sm:$0xff] }
 0x18d   :  { %v9391_v52 = vpop.permute.xlu1 %1255 }
 0x18e   :  { %14217 = vst [vmem:[#allocation95_spill] sm:$0xff] %v9391_v52  ;;  %v9401_v43 = vpop.permute.xlu0 %1261  ;;  %v311_v52 = vld [vmem:[#allocation2 + $0x260] sm:$0xff] }
 0x18f   :  { %1499 = vrot.lane.b32.xlu1 %v307_v50, %s8493_s0  ;;  %14220 = vst [vmem:[#allocation98_spill] sm:$0xff] %v9401_v43 }
 0x190   :  { %1505 = vrot.lane.b32.xlu0 %v310_v35, %s8493_s0  ;;  %v316_v35 = vld [vmem:[#allocation2 + $0x2a0] sm:$0xff] }
 0x191   :  { %v9397_v57 = vpop.permute.xlu1 %1259 }
 0x192   :  { %14219 = vst [vmem:[#allocation97_spill] sm:$0xff] %v9397_v57  ;;  %v9407_v50 = vpop.permute.xlu0 %1265  ;;  %v313_v57 = vld [vmem:[#allocation2 + $0x278] sm:$0xff] }
 0x193   :  { %1503 = vrot.lane.b32.xlu1 %v309_v13, %s8493_s0  ;;  %14222 = vst [vmem:[#allocation100_spill] sm:$0xff] %v9407_v50 }
 0x194   :  { %1509 = vrot.lane.b32.xlu0 %v312_v47, %s8493_s0  ;;  %v318_v47 = vld [vmem:[#allocation2 + $0x2b8] sm:$0xff] }
 0x195   :  { %v9403_v5 = vpop.permute.xlu1 %1263 }
 0x196   :  { %14221 = vst [vmem:[#allocation99_spill] sm:$0xff] %v9403_v5  ;;  %v9413_v13 = vpop.permute.xlu0 %1269  ;;  %v315_v5 = vld [vmem:[#allocation2 + $0x290] sm:$0xff] }
 0x197   :  { %1507 = vrot.lane.b32.xlu1 %v311_v52, %s8493_s0  ;;  %14224 = vst [vmem:[#allocation102_spill] sm:$0xff] %v9413_v13 }
 0x198   :  { %1513 = vrot.lane.b32.xlu0 %v314_v54, %s8493_s0  ;;  %v320_v54 = vld [vmem:[#allocation2 + $0x2d0] sm:$0xff] }
 0x199   :  { %v9409_v48 = vpop.permute.xlu1 %1267 }
 0x19a   :  { %14223 = vst [vmem:[#allocation101_spill] sm:$0xff] %v9409_v48  ;;  %v9419_v52 = vpop.permute.xlu0 %1273  ;;  %v317_v48 = vld [vmem:[#allocation2 + $0x2a8] sm:$0xff] }
 0x19b   :  { %1511 = vrot.lane.b32.xlu1 %v313_v57, %s8493_s0  ;;  %14226 = vst [vmem:[#allocation104_spill] sm:$0xff] %v9419_v52 }
 0x19c   :  { %1517 = vrot.lane.b32.xlu0 %v316_v35, %s8493_s0  ;;  %v322_v35 = vld [vmem:[#allocation2 + $0x2e8] sm:$0xff] }
 0x19d   :  { %v9415_v43 = vpop.permute.xlu1 %1271 }
 0x19e   :  { %14225 = vst [vmem:[#allocation103_spill] sm:$0xff] %v9415_v43  ;;  %v9425_v57 = vpop.permute.xlu0 %1277  ;;  %v319_v43 = vld [vmem:[#allocation2 + $0x2c0] sm:$0xff] }
 0x19f   :  { %1515 = vrot.lane.b32.xlu1 %v315_v5, %s8493_s0  ;;  %14228 = vst [vmem:[#allocation106_spill] sm:$0xff] %v9425_v57 }
 0x1a0   :  { %1521 = vrot.lane.b32.xlu0 %v318_v47, %s8493_s0  ;;  %v324_v47 = vld [vmem:[#allocation2 + $0x300] sm:$0xff] }
 0x1a1   :  { %v9421_v50 = vpop.permute.xlu1 %1275 }
 0x1a2   :  { %14227 = vst [vmem:[#allocation105_spill] sm:$0xff] %v9421_v50  ;;  %v9431_v5 = vpop.permute.xlu0 %1281  ;;  %v321_v50 = vld [vmem:[#allocation2 + $0x2d8] sm:$0xff] }
 0x1a3   :  { %1519 = vrot.lane.b32.xlu1 %v317_v48, %s8493_s0  ;;  %14230 = vst [vmem:[#allocation108_spill] sm:$0xff] %v9431_v5 }
 0x1a4   :  { %1525 = vrot.lane.b32.xlu0 %v320_v54, %s8493_s0  ;;  %v326_v54 = vld [vmem:[#allocation2 + $0x318] sm:$0xff] }
 0x1a5   :  { %v9427_v13 = vpop.permute.xlu1 %1279 }
 0x1a6   :  { %14229 = vst [vmem:[#allocation107_spill] sm:$0xff] %v9427_v13  ;;  %v9437_v48 = vpop.permute.xlu0 %1285  ;;  %v323_v13 = vld [vmem:[#allocation2 + $0x2f0] sm:$0xff] }
 0x1a7   :  { %1523 = vrot.lane.b32.xlu1 %v319_v43, %s8493_s0  ;;  %14232 = vst [vmem:[#allocation110_spill] sm:$0xff] %v9437_v48 }
 0x1a8   :  { %1529 = vrot.lane.b32.xlu0 %v322_v35, %s8493_s0 }
 0x1a9   :  { %v9433_v52 = vpop.permute.xlu1 %1283 }
 0x1aa   :  { %14231 = vst [vmem:[#allocation109_spill] sm:$0xff] %v9433_v52  ;;  %v9443_v43 = vpop.permute.xlu0 %1417  ;;  %v325_v52 = vld [vmem:[#allocation2 + $0x308] sm:$0xff] }
 0x1ab   :  { %1527 = vrot.lane.b32.xlu1 %v321_v50, %s8493_s0 }
 0x1ac   :  { %1533 = vrot.lane.b32.xlu0 %v324_v47, %s8493_s0 }
 0x1ad   :  { %v9439_v57 = vpop.permute.xlu1 %1287 }
 0x1ae   :  { %14233 = vst [vmem:[#allocation111_spill] sm:$0xff] %v9439_v57  ;;  %v9449_v50 = vpop.permute.xlu0 %1421  ;;  %v327_v57 = vld [vmem:[#allocation2 + $0x320] sm:$0xff] }
 0x1af   :  { %1531 = vrot.lane.b32.xlu1 %v323_v13, %s8493_s0  ;;  %v518_v13 = vld [vmem:[#allocation2 + $0x330] sm:$0xff] }
 0x1b0   :  { %1537 = vrot.lane.b32.xlu0 %v326_v54, %s8493_s0 }
 0x1b1   :  { %v9445_v5 = vpop.permute.xlu1 %1419 }
 0x1b2   :  { %v9455_v35 = vpop.permute.xlu0 %1425 }
 0x1b3   :  { %1535 = vrot.lane.b32.xlu1 %v325_v52, %s8493_s0  ;;  %v520_v52 = vld [vmem:[#allocation2 + $0x19] sm:$0xff] }
 0x1b4   :  { %1541 = vrot.lane.b32.xlu0 %v518_v13, %s8493_s0 }
 0x1b5   :  { %v9451_v48 = vpop.permute.xlu1 %1423 }
 0x1b6   :  { %v9461_v47 = vpop.permute.xlu0 %1429 }
 0x1b7   :  { %1539 = vrot.lane.b32.xlu1 %v327_v57, %s8493_s0  ;;  %v522_v57 = vld [vmem:[#allocation2 + $0x31] sm:$0xff] }
 0x1b8   :  { %1673 = vrot.lane.b32.xlu0 %v520_v52, %s8494_s26 }
 0x1b9   :  { %v9457_v61 = vpop.permute.xlu1 %1427 }
 0x1ba   :  { %v9467_v54 = vpop.permute.xlu0 %1433 }
 0x1bb   :  { %1543 = vrot.lane.b32.xlu1 %v519_v46, %s8493_s0  ;;  %14234 = vst [vmem:[#allocation112_spill] sm:$0xff] %v9467_v54  ;;  %v524_v46 = vld [vmem:[#allocation2 + $0x49] sm:$0xff]  ;;  %v776_v54 = vld [vmem:[#allocation2 + $0x351] sm:$0xff] }
 0x1bc   :  { %1677 = vrot.lane.b32.xlu0 %v522_v57, %s8494_s26 }
 0x1bd   :  { %v9463_v44 = vpop.permute.xlu1 %1431 }
 0x1be   :  { %v9473_v13 = vpop.permute.xlu0 %1437 }
 0x1bf   :  { %1675 = vrot.lane.b32.xlu1 %v521_v21, %s8494_s26  ;;  %14236 = vst [vmem:[#allocation114_spill] sm:$0xff] %v9473_v13  ;;  %v526_v21 = vld [vmem:[#allocation2 + $0x61] sm:$0xff] }
 0x1c0   :  { %1681 = vrot.lane.b32.xlu0 %v524_v46, %s8494_s26  ;;  %v656_v13 = vld [vmem:[#allocation2 + $0x80] sm:$0xff] }
 0x1c1   :  { %v9469_v9 = vpop.permute.xlu1 %1435 }
 0x1c2   :  { %14235 = vst [vmem:[#allocation113_spill] sm:$0xff] %v9469_v9  ;;  %v9479_v52 = vpop.permute.xlu0 %1441 }
 0x1c3   :  { %1679 = vrot.lane.b32.xlu1 %v523_v42, %s8494_s26  ;;  %14238 = vst [vmem:[#allocation116_spill] sm:$0xff] %v9479_v52  ;;  %v528_v42 = vld [vmem:[#allocation2 + $0x79] sm:$0xff] }
 0x1c4   :  { %1685 = vrot.lane.b32.xlu0 %v526_v21, %s8494_s26 }
 0x1c5   :  { %v9475_v40 = vpop.permute.xlu1 %1439 }
 0x1c6   :  { %14237 = vst [vmem:[#allocation115_spill] sm:$0xff] %v9475_v40  ;;  %v9485_v57 = vpop.permute.xlu0 %1445 }
 0x1c7   :  { %1683 = vrot.lane.b32.xlu1 %v525_v29, %s8494_s26  ;;  %14240 = vst [vmem:[#allocation118_spill] sm:$0xff] %v9485_v57  ;;  %v530_v29 = vld [vmem:[#allocation2 + $0x91] sm:$0xff] }
 0x1c8   :  { %1689 = vrot.lane.b32.xlu0 %v528_v42, %s8494_s26  ;;  %v589_v57 = vld [vmem:[#allocation2 + $0x52] sm:$0xff] }
 0x1c9   :  { %v9481_v17 = vpop.permute.xlu1 %1443 }
 0x1ca   :  { %14239 = vst [vmem:[#allocation117_spill] sm:$0xff] %v9481_v17  ;;  %v9491_v46 = vpop.permute.xlu0 %1449 }
 0x1cb   :  { %1687 = vrot.lane.b32.xlu1 %v527_v38, %s8494_s26  ;;  %14242 = vst [vmem:[#allocation120_spill] sm:$0xff] %v9491_v46  ;;  %v532_v38 = vld [vmem:[#allocation2 + $0xa9] sm:$0xff] }
 0x1cc   :  { %1693 = vrot.lane.b32.xlu0 %v530_v29, %s8494_s26 }
 0x1cd   :  { %v9487_v36 = vpop.permute.xlu1 %1447 }
 0x1ce   :  { %14241 = vst [vmem:[#allocation119_spill] sm:$0xff] %v9487_v36  ;;  %v9497_v21 = vpop.permute.xlu0 %1453 }
 0x1cf   :  { %1691 = vrot.lane.b32.xlu1 %v529_v37, %s8494_s26  ;;  %14244 = vst [vmem:[#allocation122_spill] sm:$0xff] %v9497_v21  ;;  %v534_v37 = vld [vmem:[#allocation2 + $0xc1] sm:$0xff] }
 0x1d0   :  { %1697 = vrot.lane.b32.xlu0 %v532_v38, %s8494_s26  ;;  %v537_v21 = vld [vmem:[#allocation2 + $0xe1] sm:$0xff] }
 0x1d1   :  { %v9493_v25 = vpop.permute.xlu1 %1451 }
 0x1d2   :  { %14243 = vst [vmem:[#allocation121_spill] sm:$0xff] %v9493_v25  ;;  %v9503_v42 = vpop.permute.xlu0 %1457 }
 0x1d3   :  { %1695 = vrot.lane.b32.xlu1 %v531_v34, %s8494_s26  ;;  %14246 = vst [vmem:[#allocation124_spill] sm:$0xff] %v9503_v42  ;;  %v536_v34 = vld [vmem:[#allocation2 + $0xd9] sm:$0xff] }
 0x1d4   :  { %1701 = vrot.lane.b32.xlu0 %v534_v37, %s8494_s26  ;;  %v539_v42 = vld [vmem:[#allocation2 + $0xf9] sm:$0xff] }
 0x1d5   :  { %v9499_v32 = vpop.permute.xlu1 %1455 }
 0x1d6   :  { %14245 = vst [vmem:[#allocation123_spill] sm:$0xff] %v9499_v32  ;;  %v9509_v29 = vpop.permute.xlu0 %1461 }
 0x1d7   :  { %1699 = vrot.lane.b32.xlu1 %v533_v45, %s8494_s26  ;;  %14248 = vst [vmem:[#allocation126_spill] sm:$0xff] %v9509_v29  ;;  %v538_v45 = vld [vmem:[#allocation2 + $0xf1] sm:$0xff] }
 0x1d8   :  { %1705 = vrot.lane.b32.xlu0 %v536_v34, %s8494_s26  ;;  %v541_v29 = vld [vmem:[#allocation2 + $0x111] sm:$0xff] }
 0x1d9   :  { %v9505_v46 = vpop.permute.xlu1 %1459 }
 0x1da   :  { %14247 = vst [vmem:[#allocation125_spill] sm:$0xff] %v9505_v46  ;;  %v9515_v38 = vpop.permute.xlu0 %1465 }
 0x1db   :  { %1703 = vrot.lane.b32.xlu1 %v535_v30, %s8494_s26  ;;  %14250 = vst [vmem:[#allocation128_spill] sm:$0xff] %v9515_v38  ;;  %v540_v30 = vld [vmem:[#allocation2 + $0x109] sm:$0xff] }
 0x1dc   :  { %1709 = vrot.lane.b32.xlu0 %v538_v45, %s8494_s26  ;;  %v543_v38 = vld [vmem:[#allocation2 + $0x129] sm:$0xff] }
 0x1dd   :  { %v9511_v25 = vpop.permute.xlu1 %1463 }
 0x1de   :  { %14249 = vst [vmem:[#allocation127_spill] sm:$0xff] %v9511_v25  ;;  %v9521_v37 = vpop.permute.xlu0 %1469 }
 0x1df   :  { %1707 = vrot.lane.b32.xlu1 %v537_v21, %s8494_s26  ;;  %14252 = vst [vmem:[#allocation130_spill] sm:$0xff] %v9521_v37  ;;  %v542_v21 = vld [vmem:[#allocation2 + $0x121] sm:$0xff] }
 0x1e0   :  { %1713 = vrot.lane.b32.xlu0 %v540_v30, %s8494_s26  ;;  %v545_v37 = vld [vmem:[#allocation2 + $0x141] sm:$0xff] }
 0x1e1   :  { %v9517_v32 = vpop.permute.xlu1 %1467 }
 0x1e2   :  { %14251 = vst [vmem:[#allocation129_spill] sm:$0xff] %v9517_v32  ;;  %v9527_v34 = vpop.permute.xlu0 %1473 }
 0x1e3   :  { %1711 = vrot.lane.b32.xlu1 %v539_v42, %s8494_s26  ;;  %14254 = vst [vmem:[#allocation132_spill] sm:$0xff] %v9527_v34  ;;  %v544_v42 = vld [vmem:[#allocation2 + $0x139] sm:$0xff] }
 0x1e4   :  { %1717 = vrot.lane.b32.xlu0 %v542_v21, %s8494_s26  ;;  %v547_v34 = vld [vmem:[#allocation2 + $0x159] sm:$0xff] }
 0x1e5   :  { %v9523_v46 = vpop.permute.xlu1 %1471 }
 0x1e6   :  { %14253 = vst [vmem:[#allocation131_spill] sm:$0xff] %v9523_v46  ;;  %v9533_v45 = vpop.permute.xlu0 %1477 }
 0x1e7   :  { %1715 = vrot.lane.b32.xlu1 %v541_v29, %s8494_s26  ;;  %14256 = vst [vmem:[#allocation134_spill] sm:$0xff] %v9533_v45  ;;  %v546_v29 = vld [vmem:[#allocation2 + $0x151] sm:$0xff] }
 0x1e8   :  { %1721 = vrot.lane.b32.xlu0 %v544_v42, %s8494_s26  ;;  %v549_v45 = vld [vmem:[#allocation2 + $0x171] sm:$0xff] }
 0x1e9   :  { %v9529_v25 = vpop.permute.xlu1 %1475 }
 0x1ea   :  { %14255 = vst [vmem:[#allocation133_spill] sm:$0xff] %v9529_v25  ;;  %v9539_v30 = vpop.permute.xlu0 %1481 }
 0x1eb   :  { %1719 = vrot.lane.b32.xlu1 %v543_v38, %s8494_s26  ;;  %14258 = vst [vmem:[#allocation136_spill] sm:$0xff] %v9539_v30  ;;  %v548_v38 = vld [vmem:[#allocation2 + $0x169] sm:$0xff] }
 0x1ec   :  { %1725 = vrot.lane.b32.xlu0 %v546_v29, %s8494_s26  ;;  %v551_v30 = vld [vmem:[#allocation2 + $0x189] sm:$0xff] }
 0x1ed   :  { %v9535_v32 = vpop.permute.xlu1 %1479 }
 0x1ee   :  { %14257 = vst [vmem:[#allocation135_spill] sm:$0xff] %v9535_v32  ;;  %v9545_v21 = vpop.permute.xlu0 %1485 }
 0x1ef   :  { %1723 = vrot.lane.b32.xlu1 %v545_v37, %s8494_s26  ;;  %14260 = vst [vmem:[#allocation138_spill] sm:$0xff] %v9545_v21  ;;  %v550_v37 = vld [vmem:[#allocation2 + $0x181] sm:$0xff]  ;;  %v553_v21 = vld [vmem:[#allocation2 + $0x1d1] sm:$0xff] }
 0x1f0   :  { %1729 = vrot.lane.b32.xlu0 %v548_v38, %s8494_s26 }
 0x1f1   :  { %v9541_v46 = vpop.permute.xlu1 %1483 }
 0x1f2   :  { %14259 = vst [vmem:[#allocation137_spill] sm:$0xff] %v9541_v46  ;;  %v9551_v42 = vpop.permute.xlu0 %1489 }
 0x1f3   :  { %1727 = vrot.lane.b32.xlu1 %v547_v34, %s8494_s26  ;;  %14262 = vst [vmem:[#allocation140_spill] sm:$0xff] %v9551_v42  ;;  %v552_v34 = vld [vmem:[#allocation2 + $0x1c9] sm:$0xff] }
 0x1f4   :  { %1733 = vrot.lane.b32.xlu0 %v550_v37, %s8494_s26  ;;  %v555_v42 = vld [vmem:[#allocation2 + $0x1e9] sm:$0xff] }
 0x1f5   :  { %v9547_v25 = vpop.permute.xlu1 %1487 }
 0x1f6   :  { %14261 = vst [vmem:[#allocation139_spill] sm:$0xff] %v9547_v25  ;;  %v9557_v29 = vpop.permute.xlu0 %1493 }
 0x1f7   :  { %1731 = vrot.lane.b32.xlu1 %v549_v45, %s8494_s26  ;;  %14264 = vst [vmem:[#allocation142_spill] sm:$0xff] %v9557_v29  ;;  %v554_v45 = vld [vmem:[#allocation2 + $0x1e1] sm:$0xff] }
 0x1f8   :  { %1737 = vrot.lane.b32.xlu0 %v552_v34, %s8494_s26  ;;  %v557_v29 = vld [vmem:[#allocation2 + $0x201] sm:$0xff] }
 0x1f9   :  { %v9553_v32 = vpop.permute.xlu1 %1491 }
 0x1fa   :  { %14263 = vst [vmem:[#allocation141_spill] sm:$0xff] %v9553_v32  ;;  %v9563_v38 = vpop.permute.xlu0 %1497 }
 0x1fb   :  { %1735 = vrot.lane.b32.xlu1 %v551_v30, %s8494_s26  ;;  %14266 = vst [vmem:[#allocation144_spill] sm:$0xff] %v9563_v38  ;;  %v556_v30 = vld [vmem:[#allocation2 + $0x1f9] sm:$0xff] }
 0x1fc   :  { %1741 = vrot.lane.b32.xlu0 %v554_v45, %s8494_s26  ;;  %v559_v38 = vld [vmem:[#allocation2 + $0x219] sm:$0xff] }
 0x1fd   :  { %v9559_v46 = vpop.permute.xlu1 %1495 }
 0x1fe   :  { %14265 = vst [vmem:[#allocation143_spill] sm:$0xff] %v9559_v46  ;;  %v9569_v37 = vpop.permute.xlu0 %1501 }
 0x1ff   :  { %1739 = vrot.lane.b32.xlu1 %v553_v21, %s8494_s26  ;;  %14268 = vst [vmem:[#allocation146_spill] sm:$0xff] %v9569_v37  ;;  %v558_v21 = vld [vmem:[#allocation2 + $0x211] sm:$0xff] }
 0x200   :  { %1745 = vrot.lane.b32.xlu0 %v556_v30, %s8494_s26  ;;  %v561_v37 = vld [vmem:[#allocation2 + $0x231] sm:$0xff] }
 0x201   :  { %v9565_v25 = vpop.permute.xlu1 %1499 }
 0x202   :  { %14267 = vst [vmem:[#allocation145_spill] sm:$0xff] %v9565_v25  ;;  %v9575_v34 = vpop.permute.xlu0 %1505 }
 0x203   :  { %1743 = vrot.lane.b32.xlu1 %v555_v42, %s8494_s26  ;;  %14270 = vst [vmem:[#allocation148_spill] sm:$0xff] %v9575_v34  ;;  %v560_v42 = vld [vmem:[#allocation2 + $0x229] sm:$0xff] }
 0x204   :  { %1749 = vrot.lane.b32.xlu0 %v558_v21, %s8494_s26  ;;  %v563_v34 = vld [vmem:[#allocation2 + $0x249] sm:$0xff] }
 0x205   :  { %v9571_v32 = vpop.permute.xlu1 %1503 }
 0x206   :  { %14269 = vst [vmem:[#allocation147_spill] sm:$0xff] %v9571_v32  ;;  %v9581_v45 = vpop.permute.xlu0 %1509 }
 0x207   :  { %1747 = vrot.lane.b32.xlu1 %v557_v29, %s8494_s26  ;;  %14272 = vst [vmem:[#allocation150_spill] sm:$0xff] %v9581_v45  ;;  %v562_v29 = vld [vmem:[#allocation2 + $0x241] sm:$0xff] }
 0x208   :  { %1753 = vrot.lane.b32.xlu0 %v560_v42, %s8494_s26  ;;  %v565_v45 = vld [vmem:[#allocation2 + $0x261] sm:$0xff] }
 0x209   :  { %v9577_v46 = vpop.permute.xlu1 %1507 }
 0x20a   :  { %14271 = vst [vmem:[#allocation149_spill] sm:$0xff] %v9577_v46  ;;  %v9587_v30 = vpop.permute.xlu0 %1513 }
 0x20b   :  { %1751 = vrot.lane.b32.xlu1 %v559_v38, %s8494_s26  ;;  %14274 = vst [vmem:[#allocation152_spill] sm:$0xff] %v9587_v30  ;;  %v564_v38 = vld [vmem:[#allocation2 + $0x259] sm:$0xff] }
 0x20c   :  { %1757 = vrot.lane.b32.xlu0 %v562_v29, %s8494_s26  ;;  %v567_v30 = vld [vmem:[#allocation2 + $0x279] sm:$0xff] }
 0x20d   :  { %v9583_v25 = vpop.permute.xlu1 %1511 }
 0x20e   :  { %14273 = vst [vmem:[#allocation151_spill] sm:$0xff] %v9583_v25  ;;  %v9593_v21 = vpop.permute.xlu0 %1517 }
 0x20f   :  { %1755 = vrot.lane.b32.xlu1 %v561_v37, %s8494_s26  ;;  %14276 = vst [vmem:[#allocation154_spill] sm:$0xff] %v9593_v21  ;;  %v566_v37 = vld [vmem:[#allocation2 + $0x271] sm:$0xff] }
 0x210   :  { %1761 = vrot.lane.b32.xlu0 %v564_v38, %s8494_s26  ;;  %v569_v21 = vld [vmem:[#allocation2 + $0x291] sm:$0xff] }
 0x211   :  { %v9589_v32 = vpop.permute.xlu1 %1515 }
 0x212   :  { %14275 = vst [vmem:[#allocation153_spill] sm:$0xff] %v9589_v32  ;;  %v9599_v42 = vpop.permute.xlu0 %1521 }
 0x213   :  { %1759 = vrot.lane.b32.xlu1 %v563_v34, %s8494_s26  ;;  %14278 = vst [vmem:[#allocation156_spill] sm:$0xff] %v9599_v42  ;;  %v568_v34 = vld [vmem:[#allocation2 + $0x289] sm:$0xff] }
 0x214   :  { %1765 = vrot.lane.b32.xlu0 %v566_v37, %s8494_s26  ;;  %v571_v42 = vld [vmem:[#allocation2 + $0x2a9] sm:$0xff] }
 0x215   :  { %v9595_v46 = vpop.permute.xlu1 %1519 }
 0x216   :  { %14277 = vst [vmem:[#allocation155_spill] sm:$0xff] %v9595_v46  ;;  %v9605_v29 = vpop.permute.xlu0 %1525 }
 0x217   :  { %1763 = vrot.lane.b32.xlu1 %v565_v45, %s8494_s26  ;;  %14280 = vst [vmem:[#allocation158_spill] sm:$0xff] %v9605_v29  ;;  %v570_v45 = vld [vmem:[#allocation2 + $0x2a1] sm:$0xff] }
 0x218   :  { %1769 = vrot.lane.b32.xlu0 %v568_v34, %s8494_s26  ;;  %v573_v29 = vld [vmem:[#allocation2 + $0x2c1] sm:$0xff] }
 0x219   :  { %v9601_v25 = vpop.permute.xlu1 %1523 }
 0x21a   :  { %14279 = vst [vmem:[#allocation157_spill] sm:$0xff] %v9601_v25  ;;  %v9611_v38 = vpop.permute.xlu0 %1529 }
 0x21b   :  { %1767 = vrot.lane.b32.xlu1 %v567_v30, %s8494_s26  ;;  %14282 = vst [vmem:[#allocation160_spill] sm:$0xff] %v9611_v38  ;;  %v572_v30 = vld [vmem:[#allocation2 + $0x2b9] sm:$0xff] }
 0x21c   :  { %1773 = vrot.lane.b32.xlu0 %v570_v45, %s8494_s26  ;;  %v575_v38 = vld [vmem:[#allocation2 + $0x2d9] sm:$0xff] }
 0x21d   :  { %v9607_v32 = vpop.permute.xlu1 %1527 }
 0x21e   :  { %14281 = vst [vmem:[#allocation159_spill] sm:$0xff] %v9607_v32  ;;  %v9617_v37 = vpop.permute.xlu0 %1533 }
 0x21f   :  { %1771 = vrot.lane.b32.xlu1 %v569_v21, %s8494_s26  ;;  %14284 = vst [vmem:[#allocation162_spill] sm:$0xff] %v9617_v37  ;;  %v574_v21 = vld [vmem:[#allocation2 + $0x2d1] sm:$0xff] }
 0x220   :  { %1777 = vrot.lane.b32.xlu0 %v572_v30, %s8494_s26  ;;  %v577_v37 = vld [vmem:[#allocation2 + $0x2f1] sm:$0xff] }
 0x221   :  { %v9613_v46 = vpop.permute.xlu1 %1531 }
 0x222   :  { %14283 = vst [vmem:[#allocation161_spill] sm:$0xff] %v9613_v46  ;;  %v9623_v34 = vpop.permute.xlu0 %1537 }
 0x223   :  { %1775 = vrot.lane.b32.xlu1 %v571_v42, %s8494_s26  ;;  %14286 = vst [vmem:[#allocation164_spill] sm:$0xff] %v9623_v34  ;;  %v576_v42 = vld [vmem:[#allocation2 + $0x2e9] sm:$0xff] }
 0x224   :  { %1781 = vrot.lane.b32.xlu0 %v574_v21, %s8494_s26  ;;  %v579_v34 = vld [vmem:[#allocation2 + $0x309] sm:$0xff] }
 0x225   :  { %v9619_v25 = vpop.permute.xlu1 %1535 }
 0x226   :  { %14285 = vst [vmem:[#allocation163_spill] sm:$0xff] %v9619_v25  ;;  %v9629_v45 = vpop.permute.xlu0 %1541 }
 0x227   :  { %1779 = vrot.lane.b32.xlu1 %v573_v29, %s8494_s26  ;;  %14288 = vst [vmem:[#allocation166_spill] sm:$0xff] %v9629_v45  ;;  %v578_v29 = vld [vmem:[#allocation2 + $0x301] sm:$0xff] }
 0x228   :  { %1785 = vrot.lane.b32.xlu0 %v576_v42, %s8494_s26  ;;  %v581_v45 = vld [vmem:[#allocation2 + $0x321] sm:$0xff] }
 0x229   :  { %v9625_v32 = vpop.permute.xlu1 %1539 }
 0x22a   :  { %14287 = vst [vmem:[#allocation165_spill] sm:$0xff] %v9625_v32  ;;  %v9635_v30 = vpop.permute.xlu0 %1673 }
 0x22b   :  { %1783 = vrot.lane.b32.xlu1 %v575_v38, %s8494_s26  ;;  %v580_v38 = vld [vmem:[#allocation2 + $0x319] sm:$0xff] }
 0x22c   :  { %1789 = vrot.lane.b32.xlu0 %v578_v29, %s8494_s26 }
 0x22d   :  { %v9631_v46 = vpop.permute.xlu1 %1543 }
 0x22e   :  { %14289 = vst [vmem:[#allocation167_spill] sm:$0xff] %v9631_v46  ;;  %v9641_v21 = vpop.permute.xlu0 %1677  ;;  %v583_v46 = vld [vmem:[#allocation2 + $0x339] sm:$0xff] }
 0x22f   :  { %1787 = vrot.lane.b32.xlu1 %v577_v37, %s8494_s26  ;;  %v582_v37 = vld [vmem:[#allocation2 + $0x331] sm:$0xff] }
 0x230   :  { %1793 = vrot.lane.b32.xlu0 %v580_v38, %s8494_s26 }
 0x231   :  { %v9637_v25 = vpop.permute.xlu1 %1675 }
 0x232   :  { %v9647_v42 = vpop.permute.xlu0 %1681 }
 0x233   :  { %1791 = vrot.lane.b32.xlu1 %v579_v34, %s8494_s26  ;;  %v584_v34 = vld [vmem:[#allocation2 + $0x1a] sm:$0xff] }
 0x234   :  { %1797 = vrot.lane.b32.xlu0 %v582_v37, %s8494_s26 }
 0x235   :  { %v9643_v32 = vpop.permute.xlu1 %1679 }
 0x236   :  { %v9653_v29 = vpop.permute.xlu0 %1685 }
 0x237   :  { %1795 = vrot.lane.b32.xlu1 %v581_v45, %s8494_s26  ;;  %14290 = vst [vmem:[#allocation168_spill] sm:$0xff] %v9653_v29  ;;  %v586_v45 = vld [vmem:[#allocation2 + $0x32] sm:$0xff] }
 0x238   :  { %1929 = vrot.lane.b32.xlu0 %v584_v34, %s8495_s27  ;;  %v8372_v29 = vld [vmem:[#allocation2 + $0x38] sm:$0xff] }
 0x239   :  { %v9649_v33 = vpop.permute.xlu1 %1683 }
 0x23a   :  { %v9659_v38 = vpop.permute.xlu0 %1689 }
 0x23b   :  { %1799 = vrot.lane.b32.xlu1 %v583_v46, %s8494_s26  ;;  %14292 = vst [vmem:[#allocation170_spill] sm:$0xff] %v9659_v38  ;;  %v588_v46 = vld [vmem:[#allocation2 + $0x4a] sm:$0xff] }
 0x23c   :  { %1933 = vrot.lane.b32.xlu0 %v586_v45, %s8495_s27  ;;  %v718_v38 = vld [vmem:[#allocation2 + $0x69] sm:$0xff] }
 0x23d   :  { %v9655_v28 = vpop.permute.xlu1 %1687 }
 0x23e   :  { %14291 = vst [vmem:[#allocation169_spill] sm:$0xff] %v9655_v28  ;;  %v9665_v37 = vpop.permute.xlu0 %1693 }
 0x23f   :  { %1931 = vrot.lane.b32.xlu1 %v585_v53, %s8495_s27  ;;  %14294 = vst [vmem:[#allocation172_spill] sm:$0xff] %v9665_v37  ;;  %v590_v53 = vld [vmem:[#allocation2 + $0x62] sm:$0xff] }
 0x240   :  { %1937 = vrot.lane.b32.xlu0 %v588_v46, %s8495_s27  ;;  %v654_v37 = vld [vmem:[#allocation2 + $0x68] sm:$0xff] }
 0x241   :  { %v9661_v36 = vpop.permute.xlu1 %1691 }
 0x242   :  { %14293 = vst [vmem:[#allocation171_spill] sm:$0xff] %v9661_v36  ;;  %v9671_v34 = vpop.permute.xlu0 %1697  ;;  %v716_v36 = vld [vmem:[#allocation2 + $0x51] sm:$0xff] }
 0x243   :  { %1935 = vrot.lane.b32.xlu1 %v587_v26, %s8495_s27  ;;  %14296 = vst [vmem:[#allocation174_spill] sm:$0xff] %v9671_v34  ;;  %v592_v26 = vld [vmem:[#allocation2 + $0x7a] sm:$0xff] }
 0x244   :  { %1941 = vrot.lane.b32.xlu0 %v590_v53, %s8495_s27  ;;  %v595_v34 = vld [vmem:[#allocation2 + $0x9a] sm:$0xff] }
 0x245   :  { %v9667_v41 = vpop.permute.xlu1 %1695 }
 0x246   :  { %14295 = vst [vmem:[#allocation173_spill] sm:$0xff] %v9667_v41  ;;  %v9677_v45 = vpop.permute.xlu0 %1701  ;;  %v652_v41 = vld [vmem:[#allocation2 + $0x50] sm:$0xff] }
 0x247   :  { %1939 = vrot.lane.b32.xlu1 %v589_v57, %s8495_s27  ;;  %14298 = vst [vmem:[#allocation176_spill] sm:$0xff] %v9677_v45  ;;  %v594_v57 = vld [vmem:[#allocation2 + $0x92] sm:$0xff] }
 0x248   :  { %1945 = vrot.lane.b32.xlu0 %v592_v26, %s8495_s27  ;;  %v597_v45 = vld [vmem:[#allocation2 + $0xb2] sm:$0xff] }
 0x249   :  { %v9673_v24 = vpop.permute.xlu1 %1699 }
 0x24a   :  { %14297 = vst [vmem:[#allocation175_spill] sm:$0xff] %v9673_v24  ;;  %v9683_v46 = vpop.permute.xlu0 %1705 }
 0x24b   :  { %1943 = vrot.lane.b32.xlu1 %v591_v1, %s8495_s27  ;;  %14300 = vst [vmem:[#allocation178_spill] sm:$0xff] %v9683_v46  ;;  %v596_v1 = vld [vmem:[#allocation2 + $0xaa] sm:$0xff] }
 0x24c   :  { %1949 = vrot.lane.b32.xlu0 %v594_v57, %s8495_s27  ;;  %v599_v46 = vld [vmem:[#allocation2 + $0xca] sm:$0xff] }
 0x24d   :  { %v9679_v17 = vpop.permute.xlu1 %1703 }
 0x24e   :  { %14299 = vst [vmem:[#allocation177_spill] sm:$0xff] %v9679_v17  ;;  %v9689_v53 = vpop.permute.xlu0 %1709 }
 0x24f   :  { %1947 = vrot.lane.b32.xlu1 %v593_v22, %s8495_s27  ;;  %14302 = vst [vmem:[#allocation180_spill] sm:$0xff] %v9689_v53  ;;  %v598_v22 = vld [vmem:[#allocation2 + $0xc2] sm:$0xff] }
 0x250   :  { %1953 = vrot.lane.b32.xlu0 %v596_v1, %s8495_s27  ;;  %v601_v53 = vld [vmem:[#allocation2 + $0xe2] sm:$0xff] }
 0x251   :  { %v9685_v52 = vpop.permute.xlu1 %1707 }
 0x252   :  { %14301 = vst [vmem:[#allocation179_spill] sm:$0xff] %v9685_v52  ;;  %v9695_v26 = vpop.permute.xlu0 %1713 }
 0x253   :  { %1951 = vrot.lane.b32.xlu1 %v595_v34, %s8495_s27  ;;  %14304 = vst [vmem:[#allocation182_spill] sm:$0xff] %v9695_v26  ;;  %v600_v34 = vld [vmem:[#allocation2 + $0xda] sm:$0xff] }
 0x254   :  { %1957 = vrot.lane.b32.xlu0 %v598_v22, %s8495_s27  ;;  %v603_v26 = vld [vmem:[#allocation2 + $0xfa] sm:$0xff] }
 0x255   :  { %v9691_v24 = vpop.permute.xlu1 %1711 }
 0x256   :  { %14303 = vst [vmem:[#allocation181_spill] sm:$0xff] %v9691_v24  ;;  %v9701_v57 = vpop.permute.xlu0 %1717 }
 0x257   :  { %1955 = vrot.lane.b32.xlu1 %v597_v45, %s8495_s27  ;;  %14306 = vst [vmem:[#allocation184_spill] sm:$0xff] %v9701_v57  ;;  %v602_v45 = vld [vmem:[#allocation2 + $0xf2] sm:$0xff] }
 0x258   :  { %1961 = vrot.lane.b32.xlu0 %v600_v34, %s8495_s27  ;;  %v605_v57 = vld [vmem:[#allocation2 + $0x112] sm:$0xff] }
 0x259   :  { %v9697_v17 = vpop.permute.xlu1 %1715 }
 0x25a   :  { %14305 = vst [vmem:[#allocation183_spill] sm:$0xff] %v9697_v17  ;;  %v9707_v1 = vpop.permute.xlu0 %1721 }
 0x25b   :  { %1959 = vrot.lane.b32.xlu1 %v599_v46, %s8495_s27  ;;  %14308 = vst [vmem:[#allocation186_spill] sm:$0xff] %v9707_v1  ;;  %v604_v46 = vld [vmem:[#allocation2 + $0x10a] sm:$0xff] }
 0x25c   :  { %1965 = vrot.lane.b32.xlu0 %v602_v45, %s8495_s27  ;;  %v607_v1 = vld [vmem:[#allocation2 + $0x12a] sm:$0xff] }
 0x25d   :  { %v9703_v52 = vpop.permute.xlu1 %1719 }
 0x25e   :  { %14307 = vst [vmem:[#allocation185_spill] sm:$0xff] %v9703_v52  ;;  %v9713_v22 = vpop.permute.xlu0 %1725 }
 0x25f   :  { %1963 = vrot.lane.b32.xlu1 %v601_v53, %s8495_s27  ;;  %14310 = vst [vmem:[#allocation188_spill] sm:$0xff] %v9713_v22  ;;  %v606_v53 = vld [vmem:[#allocation2 + $0x122] sm:$0xff] }
 0x260   :  { %1969 = vrot.lane.b32.xlu0 %v604_v46, %s8495_s27  ;;  %v609_v22 = vld [vmem:[#allocation2 + $0x142] sm:$0xff] }
 0x261   :  { %v9709_v24 = vpop.permute.xlu1 %1723 }
 0x262   :  { %14309 = vst [vmem:[#allocation187_spill] sm:$0xff] %v9709_v24  ;;  %v9719_v34 = vpop.permute.xlu0 %1729 }
 0x263   :  { %1967 = vrot.lane.b32.xlu1 %v603_v26, %s8495_s27  ;;  %14312 = vst [vmem:[#allocation190_spill] sm:$0xff] %v9719_v34  ;;  %v608_v26 = vld [vmem:[#allocation2 + $0x13a] sm:$0xff] }
 0x264   :  { %1973 = vrot.lane.b32.xlu0 %v606_v53, %s8495_s27  ;;  %v611_v34 = vld [vmem:[#allocation2 + $0x15a] sm:$0xff] }
 0x265   :  { %v9715_v17 = vpop.permute.xlu1 %1727 }
 0x266   :  { %14311 = vst [vmem:[#allocation189_spill] sm:$0xff] %v9715_v17  ;;  %v9725_v45 = vpop.permute.xlu0 %1733 }
 0x267   :  { %1971 = vrot.lane.b32.xlu1 %v605_v57, %s8495_s27  ;;  %14314 = vst [vmem:[#allocation192_spill] sm:$0xff] %v9725_v45  ;;  %v610_v57 = vld [vmem:[#allocation2 + $0x152] sm:$0xff] }
 0x268   :  { %1977 = vrot.lane.b32.xlu0 %v608_v26, %s8495_s27  ;;  %v613_v45 = vld [vmem:[#allocation2 + $0x172] sm:$0xff] }
 0x269   :  { %v9721_v52 = vpop.permute.xlu1 %1731 }
 0x26a   :  { %14313 = vst [vmem:[#allocation191_spill] sm:$0xff] %v9721_v52  ;;  %v9731_v46 = vpop.permute.xlu0 %1737 }
 0x26b   :  { %1975 = vrot.lane.b32.xlu1 %v607_v1, %s8495_s27  ;;  %14316 = vst [vmem:[#allocation194_spill] sm:$0xff] %v9731_v46  ;;  %v612_v1 = vld [vmem:[#allocation2 + $0x16a] sm:$0xff] }
 0x26c   :  { %1981 = vrot.lane.b32.xlu0 %v610_v57, %s8495_s27  ;;  %v615_v46 = vld [vmem:[#allocation2 + $0x18a] sm:$0xff] }
 0x26d   :  { %v9727_v24 = vpop.permute.xlu1 %1735 }
 0x26e   :  { %14315 = vst [vmem:[#allocation193_spill] sm:$0xff] %v9727_v24  ;;  %v9737_v53 = vpop.permute.xlu0 %1741 }
 0x26f   :  { %1979 = vrot.lane.b32.xlu1 %v609_v22, %s8495_s27  ;;  %14318 = vst [vmem:[#allocation196_spill] sm:$0xff] %v9737_v53  ;;  %v614_v22 = vld [vmem:[#allocation2 + $0x182] sm:$0xff]  ;;  %v617_v53 = vld [vmem:[#allocation2 + $0x1d2] sm:$0xff] }
 0x270   :  { %1985 = vrot.lane.b32.xlu0 %v612_v1, %s8495_s27 }
 0x271   :  { %v9733_v17 = vpop.permute.xlu1 %1739 }
 0x272   :  { %14317 = vst [vmem:[#allocation195_spill] sm:$0xff] %v9733_v17  ;;  %v9743_v26 = vpop.permute.xlu0 %1745 }
 0x273   :  { %1983 = vrot.lane.b32.xlu1 %v611_v34, %s8495_s27  ;;  %14320 = vst [vmem:[#allocation198_spill] sm:$0xff] %v9743_v26  ;;  %v616_v34 = vld [vmem:[#allocation2 + $0x1ca] sm:$0xff] }
 0x274   :  { %1989 = vrot.lane.b32.xlu0 %v614_v22, %s8495_s27  ;;  %v619_v26 = vld [vmem:[#allocation2 + $0x1ea] sm:$0xff] }
 0x275   :  { %v9739_v52 = vpop.permute.xlu1 %1743 }
 0x276   :  { %14319 = vst [vmem:[#allocation197_spill] sm:$0xff] %v9739_v52  ;;  %v9749_v57 = vpop.permute.xlu0 %1749 }
 0x277   :  { %1987 = vrot.lane.b32.xlu1 %v613_v45, %s8495_s27  ;;  %14322 = vst [vmem:[#allocation200_spill] sm:$0xff] %v9749_v57  ;;  %v618_v45 = vld [vmem:[#allocation2 + $0x1e2] sm:$0xff] }
 0x278   :  { %1993 = vrot.lane.b32.xlu0 %v616_v34, %s8495_s27  ;;  %v621_v57 = vld [vmem:[#allocation2 + $0x202] sm:$0xff] }
 0x279   :  { %v9745_v24 = vpop.permute.xlu1 %1747 }
 0x27a   :  { %14321 = vst [vmem:[#allocation199_spill] sm:$0xff] %v9745_v24  ;;  %v9755_v1 = vpop.permute.xlu0 %1753 }
 0x27b   :  { %1991 = vrot.lane.b32.xlu1 %v615_v46, %s8495_s27  ;;  %14324 = vst [vmem:[#allocation202_spill] sm:$0xff] %v9755_v1  ;;  %v620_v46 = vld [vmem:[#allocation2 + $0x1fa] sm:$0xff] }
 0x27c   :  { %1997 = vrot.lane.b32.xlu0 %v618_v45, %s8495_s27  ;;  %v623_v1 = vld [vmem:[#allocation2 + $0x21a] sm:$0xff] }
 0x27d   :  { %v9751_v17 = vpop.permute.xlu1 %1751 }
 0x27e   :  { %14323 = vst [vmem:[#allocation201_spill] sm:$0xff] %v9751_v17  ;;  %v9761_v22 = vpop.permute.xlu0 %1757 }
 0x27f   :  { %1995 = vrot.lane.b32.xlu1 %v617_v53, %s8495_s27  ;;  %14326 = vst [vmem:[#allocation204_spill] sm:$0xff] %v9761_v22  ;;  %v622_v53 = vld [vmem:[#allocation2 + $0x212] sm:$0xff] }
 0x280   :  { %2001 = vrot.lane.b32.xlu0 %v620_v46, %s8495_s27  ;;  %v625_v22 = vld [vmem:[#allocation2 + $0x232] sm:$0xff] }
 0x281   :  { %v9757_v52 = vpop.permute.xlu1 %1755 }
 0x282   :  { %14325 = vst [vmem:[#allocation203_spill] sm:$0xff] %v9757_v52  ;;  %v9767_v34 = vpop.permute.xlu0 %1761 }
 0x283   :  { %1999 = vrot.lane.b32.xlu1 %v619_v26, %s8495_s27  ;;  %14328 = vst [vmem:[#allocation206_spill] sm:$0xff] %v9767_v34  ;;  %v624_v26 = vld [vmem:[#allocation2 + $0x22a] sm:$0xff] }
 0x284   :  { %2005 = vrot.lane.b32.xlu0 %v622_v53, %s8495_s27  ;;  %v627_v34 = vld [vmem:[#allocation2 + $0x24a] sm:$0xff] }
 0x285   :  { %v9763_v24 = vpop.permute.xlu1 %1759 }
 0x286   :  { %14327 = vst [vmem:[#allocation205_spill] sm:$0xff] %v9763_v24  ;;  %v9773_v45 = vpop.permute.xlu0 %1765 }
 0x287   :  { %2003 = vrot.lane.b32.xlu1 %v621_v57, %s8495_s27  ;;  %14330 = vst [vmem:[#allocation208_spill] sm:$0xff] %v9773_v45  ;;  %v626_v57 = vld [vmem:[#allocation2 + $0x242] sm:$0xff] }
 0x288   :  { %2009 = vrot.lane.b32.xlu0 %v624_v26, %s8495_s27  ;;  %v629_v45 = vld [vmem:[#allocation2 + $0x262] sm:$0xff] }
 0x289   :  { %v9769_v17 = vpop.permute.xlu1 %1763 }
 0x28a   :  { %14329 = vst [vmem:[#allocation207_spill] sm:$0xff] %v9769_v17  ;;  %v9779_v46 = vpop.permute.xlu0 %1769 }
 0x28b   :  { %2007 = vrot.lane.b32.xlu1 %v623_v1, %s8495_s27  ;;  %14332 = vst [vmem:[#allocation210_spill] sm:$0xff] %v9779_v46  ;;  %v628_v1 = vld [vmem:[#allocation2 + $0x25a] sm:$0xff] }
 0x28c   :  { %2013 = vrot.lane.b32.xlu0 %v626_v57, %s8495_s27  ;;  %v631_v46 = vld [vmem:[#allocation2 + $0x27a] sm:$0xff] }
 0x28d   :  { %v9775_v52 = vpop.permute.xlu1 %1767 }
 0x28e   :  { %14331 = vst [vmem:[#allocation209_spill] sm:$0xff] %v9775_v52  ;;  %v9785_v53 = vpop.permute.xlu0 %1773 }
 0x28f   :  { %2011 = vrot.lane.b32.xlu1 %v625_v22, %s8495_s27  ;;  %14334 = vst [vmem:[#allocation212_spill] sm:$0xff] %v9785_v53  ;;  %v630_v22 = vld [vmem:[#allocation2 + $0x272] sm:$0xff] }
 0x290   :  { %2017 = vrot.lane.b32.xlu0 %v628_v1, %s8495_s27  ;;  %v633_v53 = vld [vmem:[#allocation2 + $0x292] sm:$0xff] }
 0x291   :  { %v9781_v24 = vpop.permute.xlu1 %1771 }
 0x292   :  { %14333 = vst [vmem:[#allocation211_spill] sm:$0xff] %v9781_v24  ;;  %v9791_v26 = vpop.permute.xlu0 %1777 }
 0x293   :  { %2015 = vrot.lane.b32.xlu1 %v627_v34, %s8495_s27  ;;  %14336 = vst [vmem:[#allocation214_spill] sm:$0xff] %v9791_v26  ;;  %v632_v34 = vld [vmem:[#allocation2 + $0x28a] sm:$0xff] }
 0x294   :  { %2021 = vrot.lane.b32.xlu0 %v630_v22, %s8495_s27  ;;  %v635_v26 = vld [vmem:[#allocation2 + $0x2aa] sm:$0xff] }
 0x295   :  { %v9787_v17 = vpop.permute.xlu1 %1775 }
 0x296   :  { %14335 = vst [vmem:[#allocation213_spill] sm:$0xff] %v9787_v17  ;;  %v9797_v57 = vpop.permute.xlu0 %1781 }
 0x297   :  { %2019 = vrot.lane.b32.xlu1 %v629_v45, %s8495_s27  ;;  %14338 = vst [vmem:[#allocation216_spill] sm:$0xff] %v9797_v57  ;;  %v634_v45 = vld [vmem:[#allocation2 + $0x2a2] sm:$0xff] }
 0x298   :  { %2025 = vrot.lane.b32.xlu0 %v632_v34, %s8495_s27  ;;  %v637_v57 = vld [vmem:[#allocation2 + $0x2c2] sm:$0xff] }
 0x299   :  { %v9793_v52 = vpop.permute.xlu1 %1779 }
 0x29a   :  { %14337 = vst [vmem:[#allocation215_spill] sm:$0xff] %v9793_v52  ;;  %v9803_v1 = vpop.permute.xlu0 %1785 }
 0x29b   :  { %2023 = vrot.lane.b32.xlu1 %v631_v46, %s8495_s27  ;;  %14340 = vst [vmem:[#allocation218_spill] sm:$0xff] %v9803_v1  ;;  %v636_v46 = vld [vmem:[#allocation2 + $0x2ba] sm:$0xff] }
 0x29c   :  { %2029 = vrot.lane.b32.xlu0 %v634_v45, %s8495_s27  ;;  %v639_v1 = vld [vmem:[#allocation2 + $0x2da] sm:$0xff] }
 0x29d   :  { %v9799_v24 = vpop.permute.xlu1 %1783 }
 0x29e   :  { %14339 = vst [vmem:[#allocation217_spill] sm:$0xff] %v9799_v24  ;;  %v9809_v22 = vpop.permute.xlu0 %1789 }
 0x29f   :  { %2027 = vrot.lane.b32.xlu1 %v633_v53, %s8495_s27  ;;  %14342 = vst [vmem:[#allocation220_spill] sm:$0xff] %v9809_v22  ;;  %v638_v53 = vld [vmem:[#allocation2 + $0x2d2] sm:$0xff] }
 0x2a0   :  { %2033 = vrot.lane.b32.xlu0 %v636_v46, %s8495_s27  ;;  %v641_v22 = vld [vmem:[#allocation2 + $0x2f2] sm:$0xff] }
 0x2a1   :  { %v9805_v17 = vpop.permute.xlu1 %1787 }
 0x2a2   :  { %14341 = vst [vmem:[#allocation219_spill] sm:$0xff] %v9805_v17  ;;  %v9815_v34 = vpop.permute.xlu0 %1793 }
 0x2a3   :  { %2031 = vrot.lane.b32.xlu1 %v635_v26, %s8495_s27  ;;  %14344 = vst [vmem:[#allocation222_spill] sm:$0xff] %v9815_v34  ;;  %v640_v26 = vld [vmem:[#allocation2 + $0x2ea] sm:$0xff] }
 0x2a4   :  { %2037 = vrot.lane.b32.xlu0 %v638_v53, %s8495_s27  ;;  %v643_v34 = vld [vmem:[#allocation2 + $0x30a] sm:$0xff] }
 0x2a5   :  { %v9811_v52 = vpop.permute.xlu1 %1791 }
 0x2a6   :  { %14343 = vst [vmem:[#allocation221_spill] sm:$0xff] %v9811_v52  ;;  %v9821_v45 = vpop.permute.xlu0 %1797 }
 0x2a7   :  { %2035 = vrot.lane.b32.xlu1 %v637_v57, %s8495_s27  ;;  %14346 = vst [vmem:[#allocation224_spill] sm:$0xff] %v9821_v45  ;;  %v642_v57 = vld [vmem:[#allocation2 + $0x302] sm:$0xff] }
 0x2a8   :  { %2041 = vrot.lane.b32.xlu0 %v640_v26, %s8495_s27  ;;  %v645_v45 = vld [vmem:[#allocation2 + $0x322] sm:$0xff] }
 0x2a9   :  { %v9817_v24 = vpop.permute.xlu1 %1795 }
 0x2aa   :  { %14345 = vst [vmem:[#allocation223_spill] sm:$0xff] %v9817_v24  ;;  %v9827_v46 = vpop.permute.xlu0 %1929 }
 0x2ab   :  { %2039 = vrot.lane.b32.xlu1 %v639_v1, %s8495_s27  ;;  %v644_v1 = vld [vmem:[#allocation2 + $0x31a] sm:$0xff] }
 0x2ac   :  { %2045 = vrot.lane.b32.xlu0 %v642_v57, %s8495_s27 }
 0x2ad   :  { %v9823_v17 = vpop.permute.xlu1 %1799 }
 0x2ae   :  { %14347 = vst [vmem:[#allocation225_spill] sm:$0xff] %v9823_v17  ;;  %v9833_v53 = vpop.permute.xlu0 %1933  ;;  %v647_v17 = vld [vmem:[#allocation2 + $0x33a] sm:$0xff] }
 0x2af   :  { %2043 = vrot.lane.b32.xlu1 %v641_v22, %s8495_s27  ;;  %v646_v22 = vld [vmem:[#allocation2 + $0x332] sm:$0xff] }
 0x2b0   :  { %2049 = vrot.lane.b32.xlu0 %v644_v1, %s8495_s27 }
 0x2b1   :  { %v9829_v52 = vpop.permute.xlu1 %1931 }
 0x2b2   :  { %v9839_v26 = vpop.permute.xlu0 %1937 }
 0x2b3   :  { %2047 = vrot.lane.b32.xlu1 %v643_v34, %s8495_s27  ;;  %v649_v34 = vld [vmem:[#allocation2 + $0x30] sm:$0xff] }
 0x2b4   :  { %2053 = vrot.lane.b32.xlu0 %v646_v22, %s8495_s27 }
 0x2b5   :  { %v9835_v24 = vpop.permute.xlu1 %1935 }
 0x2b6   :  { %v9845_v57 = vpop.permute.xlu0 %1941 }
 0x2b7   :  { %2051 = vrot.lane.b32.xlu1 %v645_v45, %s8495_s27  ;;  %14348 = vst [vmem:[#allocation226_spill] sm:$0xff] %v9845_v57  ;;  %v651_v45 = vld [vmem:[#allocation2 + $0x48] sm:$0xff] }
 0x2b8   :  { %2185 = vrot.lane.b32.xlu0 %v649_v34, %s8496_s28 }
 0x2b9   :  { %v9841_v49 = vpop.permute.xlu1 %1939 }
 0x2ba   :  { %v9851_v1 = vpop.permute.xlu0 %1945 }
 0x2bb   :  { %2055 = vrot.lane.b32.xlu1 %v647_v17, %s8495_s27  ;;  %14350 = vst [vmem:[#allocation228_spill] sm:$0xff] %v9851_v1  ;;  %v653_v17 = vld [vmem:[#allocation2 + $0x60] sm:$0xff] }
 0x2bc   :  { %2189 = vrot.lane.b32.xlu0 %v651_v45, %s8496_s28 }
 0x2bd   :  { %v9847_v20 = vpop.permute.xlu1 %1943 }
 0x2be   :  { %14349 = vst [vmem:[#allocation227_spill] sm:$0xff] %v9847_v20  ;;  %v9857_v22 = vpop.permute.xlu0 %1949  ;;  %v780_v20 = vld [vmem:[#allocation2 + $0x52] sm:$0xff] }
 0x2bf   :  { %2187 = vrot.lane.b32.xlu1 %v650_v15, %s8496_s28  ;;  %14352 = vst [vmem:[#allocation230_spill] sm:$0xff] %v9857_v22  ;;  %v655_v15 = vld [vmem:[#allocation2 + $0x78] sm:$0xff] }
 0x2c0   :  { %2193 = vrot.lane.b32.xlu0 %v653_v17, %s8496_s28  ;;  %v658_v22 = vld [vmem:[#allocation2 + $0x98] sm:$0xff] }
 0x2c1   :  { %v9853_v18 = vpop.permute.xlu1 %1947 }
 0x2c2   :  { %14351 = vst [vmem:[#allocation229_spill] sm:$0xff] %v9853_v18  ;;  %v9863_v34 = vpop.permute.xlu0 %1953 }
 0x2c3   :  { %2191 = vrot.lane.b32.xlu1 %v652_v41, %s8496_s28  ;;  %14354 = vst [vmem:[#allocation232_spill] sm:$0xff] %v9863_v34  ;;  %v657_v41 = vld [vmem:[#allocation2 + $0x90] sm:$0xff] }
 0x2c4   :  { %2197 = vrot.lane.b32.xlu0 %v655_v15, %s8496_s28  ;;  %v660_v34 = vld [vmem:[#allocation2 + $0xb0] sm:$0xff] }
 0x2c5   :  { %v9859_v40 = vpop.permute.xlu1 %1951 }
 0x2c6   :  { %14353 = vst [vmem:[#allocation231_spill] sm:$0xff] %v9859_v40  ;;  %v9869_v45 = vpop.permute.xlu0 %1957 }
 0x2c7   :  { %2195 = vrot.lane.b32.xlu1 %v654_v37, %s8496_s28  ;;  %14356 = vst [vmem:[#allocation234_spill] sm:$0xff] %v9869_v45  ;;  %v659_v37 = vld [vmem:[#allocation2 + $0xa8] sm:$0xff] }
 0x2c8   :  { %2201 = vrot.lane.b32.xlu0 %v657_v41, %s8496_s28  ;;  %v662_v45 = vld [vmem:[#allocation2 + $0xc8] sm:$0xff] }
 0x2c9   :  { %v9865_v59 = vpop.permute.xlu1 %1955 }
 0x2ca   :  { %14355 = vst [vmem:[#allocation233_spill] sm:$0xff] %v9865_v59  ;;  %v9875_v17 = vpop.permute.xlu0 %1961 }
 0x2cb   :  { %2199 = vrot.lane.b32.xlu1 %v656_v13, %s8496_s28  ;;  %14358 = vst [vmem:[#allocation236_spill] sm:$0xff] %v9875_v17  ;;  %v661_v13 = vld [vmem:[#allocation2 + $0xc0] sm:$0xff] }
 0x2cc   :  { %2205 = vrot.lane.b32.xlu0 %v659_v37, %s8496_s28  ;;  %v664_v17 = vld [vmem:[#allocation2 + $0xe0] sm:$0xff] }
 0x2cd   :  { %v9871_v18 = vpop.permute.xlu1 %1959 }
 0x2ce   :  { %14357 = vst [vmem:[#allocation235_spill] sm:$0xff] %v9871_v18  ;;  %v9881_v15 = vpop.permute.xlu0 %1965 }
 0x2cf   :  { %2203 = vrot.lane.b32.xlu1 %v658_v22, %s8496_s28  ;;  %14360 = vst [vmem:[#allocation238_spill] sm:$0xff] %v9881_v15  ;;  %v663_v22 = vld [vmem:[#allocation2 + $0xd8] sm:$0xff] }
 0x2d0   :  { %2209 = vrot.lane.b32.xlu0 %v661_v13, %s8496_s28  ;;  %v666_v15 = vld [vmem:[#allocation2 + $0xf8] sm:$0xff] }
 0x2d1   :  { %v9877_v40 = vpop.permute.xlu1 %1963 }
 0x2d2   :  { %14359 = vst [vmem:[#allocation237_spill] sm:$0xff] %v9877_v40  ;;  %v9887_v41 = vpop.permute.xlu0 %1969 }
 0x2d3   :  { %2207 = vrot.lane.b32.xlu1 %v660_v34, %s8496_s28  ;;  %14362 = vst [vmem:[#allocation240_spill] sm:$0xff] %v9887_v41  ;;  %v665_v34 = vld [vmem:[#allocation2 + $0xf0] sm:$0xff] }
 0x2d4   :  { %2213 = vrot.lane.b32.xlu0 %v663_v22, %s8496_s28  ;;  %v668_v41 = vld [vmem:[#allocation2 + $0x110] sm:$0xff] }
 0x2d5   :  { %v9883_v59 = vpop.permute.xlu1 %1967 }
 0x2d6   :  { %14361 = vst [vmem:[#allocation239_spill] sm:$0xff] %v9883_v59  ;;  %v9893_v37 = vpop.permute.xlu0 %1973 }
 0x2d7   :  { %2211 = vrot.lane.b32.xlu1 %v662_v45, %s8496_s28  ;;  %14364 = vst [vmem:[#allocation242_spill] sm:$0xff] %v9893_v37  ;;  %v667_v45 = vld [vmem:[#allocation2 + $0x108] sm:$0xff] }
 0x2d8   :  { %2217 = vrot.lane.b32.xlu0 %v665_v34, %s8496_s28  ;;  %v670_v37 = vld [vmem:[#allocation2 + $0x128] sm:$0xff] }
 0x2d9   :  { %v9889_v18 = vpop.permute.xlu1 %1971 }
 0x2da   :  { %14363 = vst [vmem:[#allocation241_spill] sm:$0xff] %v9889_v18  ;;  %v9899_v13 = vpop.permute.xlu0 %1977 }
 0x2db   :  { %2215 = vrot.lane.b32.xlu1 %v664_v17, %s8496_s28  ;;  %14366 = vst [vmem:[#allocation244_spill] sm:$0xff] %v9899_v13  ;;  %v669_v17 = vld [vmem:[#allocation2 + $0x120] sm:$0xff] }
 0x2dc   :  { %2221 = vrot.lane.b32.xlu0 %v667_v45, %s8496_s28  ;;  %v672_v13 = vld [vmem:[#allocation2 + $0x140] sm:$0xff] }
 0x2dd   :  { %v9895_v40 = vpop.permute.xlu1 %1975 }
 0x2de   :  { %14365 = vst [vmem:[#allocation243_spill] sm:$0xff] %v9895_v40  ;;  %v9905_v22 = vpop.permute.xlu0 %1981 }
 0x2df   :  { %2219 = vrot.lane.b32.xlu1 %v666_v15, %s8496_s28  ;;  %14368 = vst [vmem:[#allocation246_spill] sm:$0xff] %v9905_v22  ;;  %v671_v15 = vld [vmem:[#allocation2 + $0x138] sm:$0xff] }
 0x2e0   :  { %2225 = vrot.lane.b32.xlu0 %v669_v17, %s8496_s28  ;;  %v674_v22 = vld [vmem:[#allocation2 + $0x158] sm:$0xff] }
 0x2e1   :  { %v9901_v59 = vpop.permute.xlu1 %1979 }
 0x2e2   :  { %14367 = vst [vmem:[#allocation245_spill] sm:$0xff] %v9901_v59  ;;  %v9911_v34 = vpop.permute.xlu0 %1985 }
 0x2e3   :  { %2223 = vrot.lane.b32.xlu1 %v668_v41, %s8496_s28  ;;  %14370 = vst [vmem:[#allocation248_spill] sm:$0xff] %v9911_v34  ;;  %v673_v41 = vld [vmem:[#allocation2 + $0x150] sm:$0xff] }
 0x2e4   :  { %2229 = vrot.lane.b32.xlu0 %v671_v15, %s8496_s28  ;;  %v676_v34 = vld [vmem:[#allocation2 + $0x170] sm:$0xff] }
 0x2e5   :  { %v9907_v18 = vpop.permute.xlu1 %1983 }
 0x2e6   :  { %14369 = vst [vmem:[#allocation247_spill] sm:$0xff] %v9907_v18  ;;  %v9917_v45 = vpop.permute.xlu0 %1989 }
 0x2e7   :  { %2227 = vrot.lane.b32.xlu1 %v670_v37, %s8496_s28  ;;  %14372 = vst [vmem:[#allocation250_spill] sm:$0xff] %v9917_v45  ;;  %v675_v37 = vld [vmem:[#allocation2 + $0x168] sm:$0xff] }
 0x2e8   :  { %2233 = vrot.lane.b32.xlu0 %v673_v41, %s8496_s28  ;;  %v678_v45 = vld [vmem:[#allocation2 + $0x188] sm:$0xff] }
 0x2e9   :  { %v9913_v40 = vpop.permute.xlu1 %1987 }
 0x2ea   :  { %14371 = vst [vmem:[#allocation249_spill] sm:$0xff] %v9913_v40  ;;  %v9923_v17 = vpop.permute.xlu0 %1993 }
 0x2eb   :  { %2231 = vrot.lane.b32.xlu1 %v672_v13, %s8496_s28  ;;  %14374 = vst [vmem:[#allocation252_spill] sm:$0xff] %v9923_v17  ;;  %v677_v13 = vld [vmem:[#allocation2 + $0x180] sm:$0xff] }
 0x2ec   :  { %2237 = vrot.lane.b32.xlu0 %v675_v37, %s8496_s28  ;;  %v680_v17 = vld [vmem:[#allocation2 + $0x1a0] sm:$0xff] }
 0x2ed   :  { %v9919_v59 = vpop.permute.xlu1 %1991 }
 0x2ee   :  { %14373 = vst [vmem:[#allocation251_spill] sm:$0xff] %v9919_v59  ;;  %v9929_v15 = vpop.permute.xlu0 %1997 }
 0x2ef   :  { %2235 = vrot.lane.b32.xlu1 %v674_v22, %s8496_s28  ;;  %14376 = vst [vmem:[#allocation254_spill] sm:$0xff] %v9929_v15  ;;  %v679_v22 = vld [vmem:[#allocation2 + $0x198] sm:$0xff]  ;;  %v682_v15 = vld [vmem:[#allocation2 + $0x1e8] sm:$0xff] }
 0x2f0   :  { %2241 = vrot.lane.b32.xlu0 %v677_v13, %s8496_s28 }
 0x2f1   :  { %v9925_v18 = vpop.permute.xlu1 %1995 }
 0x2f2   :  { %14375 = vst [vmem:[#allocation253_spill] sm:$0xff] %v9925_v18  ;;  %v9935_v41 = vpop.permute.xlu0 %2001 }
 0x2f3   :  { %2239 = vrot.lane.b32.xlu1 %v676_v34, %s8496_s28  ;;  %14378 = vst [vmem:[#allocation256_spill] sm:$0xff] %v9935_v41  ;;  %v681_v34 = vld [vmem:[#allocation2 + $0x1e0] sm:$0xff] }
 0x2f4   :  { %2245 = vrot.lane.b32.xlu0 %v679_v22, %s8496_s28  ;;  %v684_v41 = vld [vmem:[#allocation2 + $0x200] sm:$0xff] }
 0x2f5   :  { %v9931_v40 = vpop.permute.xlu1 %1999 }
 0x2f6   :  { %14377 = vst [vmem:[#allocation255_spill] sm:$0xff] %v9931_v40  ;;  %v9941_v37 = vpop.permute.xlu0 %2005 }
 0x2f7   :  { %2243 = vrot.lane.b32.xlu1 %v678_v45, %s8496_s28  ;;  %14380 = vst [vmem:[#allocation258_spill] sm:$0xff] %v9941_v37  ;;  %v683_v45 = vld [vmem:[#allocation2 + $0x1f8] sm:$0xff] }
 0x2f8   :  { %2249 = vrot.lane.b32.xlu0 %v681_v34, %s8496_s28  ;;  %v686_v37 = vld [vmem:[#allocation2 + $0x218] sm:$0xff] }
 0x2f9   :  { %v9937_v59 = vpop.permute.xlu1 %2003 }
 0x2fa   :  { %14379 = vst [vmem:[#allocation257_spill] sm:$0xff] %v9937_v59  ;;  %v9947_v13 = vpop.permute.xlu0 %2009 }
 0x2fb   :  { %2247 = vrot.lane.b32.xlu1 %v680_v17, %s8496_s28  ;;  %14382 = vst [vmem:[#allocation260_spill] sm:$0xff] %v9947_v13  ;;  %v685_v17 = vld [vmem:[#allocation2 + $0x210] sm:$0xff] }
 0x2fc   :  { %2253 = vrot.lane.b32.xlu0 %v683_v45, %s8496_s28  ;;  %v688_v13 = vld [vmem:[#allocation2 + $0x230] sm:$0xff] }
 0x2fd   :  { %v9943_v18 = vpop.permute.xlu1 %2007 }
 0x2fe   :  { %14381 = vst [vmem:[#allocation259_spill] sm:$0xff] %v9943_v18  ;;  %v9953_v22 = vpop.permute.xlu0 %2013 }
 0x2ff   :  { %2251 = vrot.lane.b32.xlu1 %v682_v15, %s8496_s28  ;;  %14384 = vst [vmem:[#allocation262_spill] sm:$0xff] %v9953_v22  ;;  %v687_v15 = vld [vmem:[#allocation2 + $0x228] sm:$0xff] }
 0x300   :  { %2257 = vrot.lane.b32.xlu0 %v685_v17, %s8496_s28  ;;  %v690_v22 = vld [vmem:[#allocation2 + $0x248] sm:$0xff] }
 0x301   :  { %v9949_v40 = vpop.permute.xlu1 %2011 }
 0x302   :  { %14383 = vst [vmem:[#allocation261_spill] sm:$0xff] %v9949_v40  ;;  %v9959_v34 = vpop.permute.xlu0 %2017 }
 0x303   :  { %2255 = vrot.lane.b32.xlu1 %v684_v41, %s8496_s28  ;;  %14386 = vst [vmem:[#allocation264_spill] sm:$0xff] %v9959_v34  ;;  %v689_v41 = vld [vmem:[#allocation2 + $0x240] sm:$0xff] }
 0x304   :  { %2261 = vrot.lane.b32.xlu0 %v687_v15, %s8496_s28  ;;  %v692_v34 = vld [vmem:[#allocation2 + $0x260] sm:$0xff] }
 0x305   :  { %v9955_v59 = vpop.permute.xlu1 %2015 }
 0x306   :  { %14385 = vst [vmem:[#allocation263_spill] sm:$0xff] %v9955_v59  ;;  %v9965_v45 = vpop.permute.xlu0 %2021 }
 0x307   :  { %2259 = vrot.lane.b32.xlu1 %v686_v37, %s8496_s28  ;;  %14388 = vst [vmem:[#allocation266_spill] sm:$0xff] %v9965_v45  ;;  %v691_v37 = vld [vmem:[#allocation2 + $0x258] sm:$0xff] }
 0x308   :  { %2265 = vrot.lane.b32.xlu0 %v689_v41, %s8496_s28  ;;  %v694_v45 = vld [vmem:[#allocation2 + $0x278] sm:$0xff] }
 0x309   :  { %v9961_v18 = vpop.permute.xlu1 %2019 }
 0x30a   :  { %14387 = vst [vmem:[#allocation265_spill] sm:$0xff] %v9961_v18  ;;  %v9971_v17 = vpop.permute.xlu0 %2025 }
 0x30b   :  { %2263 = vrot.lane.b32.xlu1 %v688_v13, %s8496_s28  ;;  %14390 = vst [vmem:[#allocation268_spill] sm:$0xff] %v9971_v17  ;;  %v693_v13 = vld [vmem:[#allocation2 + $0x270] sm:$0xff] }
 0x30c   :  { %2269 = vrot.lane.b32.xlu0 %v691_v37, %s8496_s28  ;;  %v696_v17 = vld [vmem:[#allocation2 + $0x290] sm:$0xff] }
 0x30d   :  { %v9967_v40 = vpop.permute.xlu1 %2023 }
 0x30e   :  { %14389 = vst [vmem:[#allocation267_spill] sm:$0xff] %v9967_v40  ;;  %v9977_v15 = vpop.permute.xlu0 %2029 }
 0x30f   :  { %2267 = vrot.lane.b32.xlu1 %v690_v22, %s8496_s28  ;;  %14392 = vst [vmem:[#allocation270_spill] sm:$0xff] %v9977_v15  ;;  %v695_v22 = vld [vmem:[#allocation2 + $0x288] sm:$0xff] }
 0x310   :  { %2273 = vrot.lane.b32.xlu0 %v693_v13, %s8496_s28  ;;  %v698_v15 = vld [vmem:[#allocation2 + $0x2a8] sm:$0xff] }
 0x311   :  { %v9973_v59 = vpop.permute.xlu1 %2027 }
 0x312   :  { %14391 = vst [vmem:[#allocation269_spill] sm:$0xff] %v9973_v59  ;;  %v9983_v41 = vpop.permute.xlu0 %2033 }
 0x313   :  { %2271 = vrot.lane.b32.xlu1 %v692_v34, %s8496_s28  ;;  %14394 = vst [vmem:[#allocation272_spill] sm:$0xff] %v9983_v41  ;;  %v697_v34 = vld [vmem:[#allocation2 + $0x2a0] sm:$0xff] }
 0x314   :  { %2277 = vrot.lane.b32.xlu0 %v695_v22, %s8496_s28  ;;  %v700_v41 = vld [vmem:[#allocation2 + $0x2c0] sm:$0xff] }
 0x315   :  { %v9979_v18 = vpop.permute.xlu1 %2031 }
 0x316   :  { %14393 = vst [vmem:[#allocation271_spill] sm:$0xff] %v9979_v18  ;;  %v9989_v37 = vpop.permute.xlu0 %2037 }
 0x317   :  { %2275 = vrot.lane.b32.xlu1 %v694_v45, %s8496_s28  ;;  %14396 = vst [vmem:[#allocation274_spill] sm:$0xff] %v9989_v37  ;;  %v699_v45 = vld [vmem:[#allocation2 + $0x2b8] sm:$0xff] }
 0x318   :  { %2281 = vrot.lane.b32.xlu0 %v697_v34, %s8496_s28  ;;  %v702_v37 = vld [vmem:[#allocation2 + $0x2d8] sm:$0xff] }
 0x319   :  { %v9985_v40 = vpop.permute.xlu1 %2035 }
 0x31a   :  { %14395 = vst [vmem:[#allocation273_spill] sm:$0xff] %v9985_v40  ;;  %v9995_v13 = vpop.permute.xlu0 %2041 }
 0x31b   :  { %2279 = vrot.lane.b32.xlu1 %v696_v17, %s8496_s28  ;;  %14398 = vst [vmem:[#allocation276_spill] sm:$0xff] %v9995_v13  ;;  %v701_v17 = vld [vmem:[#allocation2 + $0x2d0] sm:$0xff] }
 0x31c   :  { %2285 = vrot.lane.b32.xlu0 %v699_v45, %s8496_s28  ;;  %v704_v13 = vld [vmem:[#allocation2 + $0x2f0] sm:$0xff] }
 0x31d   :  { %v9991_v59 = vpop.permute.xlu1 %2039 }
 0x31e   :  { %14397 = vst [vmem:[#allocation275_spill] sm:$0xff] %v9991_v59  ;;  %v10001_v22 = vpop.permute.xlu0 %2045 }
 0x31f   :  { %2283 = vrot.lane.b32.xlu1 %v698_v15, %s8496_s28  ;;  %14400 = vst [vmem:[#allocation278_spill] sm:$0xff] %v10001_v22  ;;  %v703_v15 = vld [vmem:[#allocation2 + $0x2e8] sm:$0xff] }
 0x320   :  { %2289 = vrot.lane.b32.xlu0 %v701_v17, %s8496_s28  ;;  %v706_v22 = vld [vmem:[#allocation2 + $0x308] sm:$0xff] }
 0x321   :  { %v9997_v18 = vpop.permute.xlu1 %2043 }
 0x322   :  { %14399 = vst [vmem:[#allocation277_spill] sm:$0xff] %v9997_v18  ;;  %v10007_v34 = vpop.permute.xlu0 %2049 }
 0x323   :  { %2287 = vrot.lane.b32.xlu1 %v700_v41, %s8496_s28  ;;  %14402 = vst [vmem:[#allocation280_spill] sm:$0xff] %v10007_v34  ;;  %v705_v41 = vld [vmem:[#allocation2 + $0x300] sm:$0xff] }
 0x324   :  { %2293 = vrot.lane.b32.xlu0 %v703_v15, %s8496_s28  ;;  %v708_v34 = vld [vmem:[#allocation2 + $0x320] sm:$0xff] }
 0x325   :  { %v10003_v40 = vpop.permute.xlu1 %2047 }
 0x326   :  { %14401 = vst [vmem:[#allocation279_spill] sm:$0xff] %v10003_v40  ;;  %v10013_v45 = vpop.permute.xlu0 %2053 }
 0x327   :  { %2291 = vrot.lane.b32.xlu1 %v702_v37, %s8496_s28  ;;  %14404 = vst [vmem:[#allocation282_spill] sm:$0xff] %v10013_v45  ;;  %v707_v37 = vld [vmem:[#allocation2 + $0x318] sm:$0xff] }
 0x328   :  { %2297 = vrot.lane.b32.xlu0 %v705_v41, %s8496_s28  ;;  %v710_v45 = vld [vmem:[#allocation2 + $0x338] sm:$0xff] }
 0x329   :  { %v10009_v59 = vpop.permute.xlu1 %2051 }
 0x32a   :  { %14403 = vst [vmem:[#allocation281_spill] sm:$0xff] %v10009_v59  ;;  %v10019_v17 = vpop.permute.xlu0 %2185 }
 0x32b   :  { %2295 = vrot.lane.b32.xlu1 %v704_v13, %s8496_s28  ;;  %v709_v13 = vld [vmem:[#allocation2 + $0x330] sm:$0xff] }
 0x32c   :  { %2301 = vrot.lane.b32.xlu0 %v707_v37, %s8496_s28 }
 0x32d   :  { %v10015_v18 = vpop.permute.xlu1 %2055 }
 0x32e   :  { %14405 = vst [vmem:[#allocation283_spill] sm:$0xff] %v10015_v18  ;;  %v10025_v15 = vpop.permute.xlu0 %2189  ;;  %v712_v18 = vld [vmem:[#allocation2 + $0x350] sm:$0xff] }
 0x32f   :  { %2299 = vrot.lane.b32.xlu1 %v706_v22, %s8496_s28  ;;  %v711_v22 = vld [vmem:[#allocation2 + $0x348] sm:$0xff] }
 0x330   :  { %2305 = vrot.lane.b32.xlu0 %v709_v13, %s8496_s28 }
 0x331   :  { %v10021_v40 = vpop.permute.xlu1 %2187 }
 0x332   :  { %v10031_v41 = vpop.permute.xlu0 %2193 }
 0x333   :  { %2303 = vrot.lane.b32.xlu1 %v708_v34, %s8496_s28  ;;  %v713_v34 = vld [vmem:[#allocation2 + $0x31] sm:$0xff] }
 0x334   :  { %2309 = vrot.lane.b32.xlu0 %v711_v22, %s8496_s28 }
 0x335   :  { %v10027_v59 = vpop.permute.xlu1 %2191 }
 0x336   :  { %v10037_v37 = vpop.permute.xlu0 %2197 }
 0x337   :  { %2307 = vrot.lane.b32.xlu1 %v710_v45, %s8496_s28  ;;  %14406 = vst [vmem:[#allocation284_spill] sm:$0xff] %v10037_v37  ;;  %v715_v45 = vld [vmem:[#allocation2 + $0x49] sm:$0xff] }
 0x338   :  { %2441 = vrot.lane.b32.xlu0 %v713_v34, %s8497_s29 }
 0x339   :  { %v10033_v55 = vpop.permute.xlu1 %2195 }
 0x33a   :  { %v10043_v13 = vpop.permute.xlu0 %2201 }
 0x33b   :  { %2311 = vrot.lane.b32.xlu1 %v712_v18, %s8496_s28  ;;  %14408 = vst [vmem:[#allocation286_spill] sm:$0xff] %v10043_v13  ;;  %v717_v18 = vld [vmem:[#allocation2 + $0x61] sm:$0xff] }
 0x33c   :  { %2445 = vrot.lane.b32.xlu0 %v715_v45, %s8497_s29  ;;  %v720_v13 = vld [vmem:[#allocation2 + $0x81] sm:$0xff] }
 0x33d   :  { %v10039_v1 = vpop.permute.xlu1 %2199 }
 0x33e   :  { %14407 = vst [vmem:[#allocation285_spill] sm:$0xff] %v10039_v1  ;;  %v10049_v22 = vpop.permute.xlu0 %2205 }
 0x33f   :  { %2443 = vrot.lane.b32.xlu1 %v714_v16, %s8497_s29  ;;  %14410 = vst [vmem:[#allocation288_spill] sm:$0xff] %v10049_v22  ;;  %v719_v16 = vld [vmem:[#allocation2 + $0x79] sm:$0xff] }
 0x340   :  { %2449 = vrot.lane.b32.xlu0 %v717_v18, %s8497_s29  ;;  %v722_v22 = vld [vmem:[#allocation2 + $0x99] sm:$0xff] }
 0x341   :  { %v10045_v14 = vpop.permute.xlu1 %2203 }
 0x342   :  { %14409 = vst [vmem:[#allocation287_spill] sm:$0xff] %v10045_v14  ;;  %v10055_v34 = vpop.permute.xlu0 %2209 }
 0x343   :  { %2447 = vrot.lane.b32.xlu1 %v716_v36, %s8497_s29  ;;  %14412 = vst [vmem:[#allocation290_spill] sm:$0xff] %v10055_v34  ;;  %v721_v36 = vld [vmem:[#allocation2 + $0x91] sm:$0xff] }
 0x344   :  { %2453 = vrot.lane.b32.xlu0 %v719_v16, %s8497_s29  ;;  %v724_v34 = vld [vmem:[#allocation2 + $0xb1] sm:$0xff] }
 0x345   :  { %v10051_v9 = vpop.permute.xlu1 %2207 }
 0x346   :  { %14411 = vst [vmem:[#allocation289_spill] sm:$0xff] %v10051_v9  ;;  %v10061_v45 = vpop.permute.xlu0 %2213 }
 0x347   :  { %2451 = vrot.lane.b32.xlu1 %v718_v38, %s8497_s29  ;;  %14414 = vst [vmem:[#allocation292_spill] sm:$0xff] %v10061_v45  ;;  %v723_v38 = vld [vmem:[#allocation2 + $0xa9] sm:$0xff] }
 0x348   :  { %2457 = vrot.lane.b32.xlu0 %v721_v36, %s8497_s29  ;;  %v726_v45 = vld [vmem:[#allocation2 + $0xc9] sm:$0xff] }
 0x349   :  { %v10057_v1 = vpop.permute.xlu1 %2211 }
 0x34a   :  { %14413 = vst [vmem:[#allocation291_spill] sm:$0xff] %v10057_v1  ;;  %v10067_v18 = vpop.permute.xlu0 %2217 }
 0x34b   :  { %2455 = vrot.lane.b32.xlu1 %v720_v13, %s8497_s29  ;;  %14416 = vst [vmem:[#allocation294_spill] sm:$0xff] %v10067_v18  ;;  %v725_v13 = vld [vmem:[#allocation2 + $0xc1] sm:$0xff] }
 0x34c   :  { %2461 = vrot.lane.b32.xlu0 %v723_v38, %s8497_s29  ;;  %v728_v18 = vld [vmem:[#allocation2 + $0xe1] sm:$0xff] }
 0x34d   :  { %v10063_v14 = vpop.permute.xlu1 %2215 }
 0x34e   :  { %14415 = vst [vmem:[#allocation293_spill] sm:$0xff] %v10063_v14  ;;  %v10073_v16 = vpop.permute.xlu0 %2221 }
 0x34f   :  { %2459 = vrot.lane.b32.xlu1 %v722_v22, %s8497_s29  ;;  %14418 = vst [vmem:[#allocation296_spill] sm:$0xff] %v10073_v16  ;;  %v727_v22 = vld [vmem:[#allocation2 + $0xd9] sm:$0xff] }
 0x350   :  { %2465 = vrot.lane.b32.xlu0 %v725_v13, %s8497_s29  ;;  %v730_v16 = vld [vmem:[#allocation2 + $0xf9] sm:$0xff] }
 0x351   :  { %v10069_v9 = vpop.permute.xlu1 %2219 }
 0x352   :  { %14417 = vst [vmem:[#allocation295_spill] sm:$0xff] %v10069_v9  ;;  %v10079_v36 = vpop.permute.xlu0 %2225 }
 0x353   :  { %2463 = vrot.lane.b32.xlu1 %v724_v34, %s8497_s29  ;;  %14420 = vst [vmem:[#allocation298_spill] sm:$0xff] %v10079_v36  ;;  %v729_v34 = vld [vmem:[#allocation2 + $0xf1] sm:$0xff] }
 0x354   :  { %2469 = vrot.lane.b32.xlu0 %v727_v22, %s8497_s29  ;;  %v732_v36 = vld [vmem:[#allocation2 + $0x111] sm:$0xff] }
 0x355   :  { %v10075_v1 = vpop.permute.xlu1 %2223 }
 0x356   :  { %14419 = vst [vmem:[#allocation297_spill] sm:$0xff] %v10075_v1  ;;  %v10085_v38 = vpop.permute.xlu0 %2229 }
 0x357   :  { %2467 = vrot.lane.b32.xlu1 %v726_v45, %s8497_s29  ;;  %14422 = vst [vmem:[#allocation300_spill] sm:$0xff] %v10085_v38  ;;  %v731_v45 = vld [vmem:[#allocation2 + $0x109] sm:$0xff] }
 0x358   :  { %2473 = vrot.lane.b32.xlu0 %v729_v34, %s8497_s29  ;;  %v734_v38 = vld [vmem:[#allocation2 + $0x129] sm:$0xff] }
 0x359   :  { %v10081_v14 = vpop.permute.xlu1 %2227 }
 0x35a   :  { %14421 = vst [vmem:[#allocation299_spill] sm:$0xff] %v10081_v14  ;;  %v10091_v13 = vpop.permute.xlu0 %2233 }
 0x35b   :  { %2471 = vrot.lane.b32.xlu1 %v728_v18, %s8497_s29  ;;  %14424 = vst [vmem:[#allocation302_spill] sm:$0xff] %v10091_v13  ;;  %v733_v18 = vld [vmem:[#allocation2 + $0x121] sm:$0xff] }
 0x35c   :  { %2477 = vrot.lane.b32.xlu0 %v731_v45, %s8497_s29  ;;  %v736_v13 = vld [vmem:[#allocation2 + $0x141] sm:$0xff] }
 0x35d   :  { %v10087_v9 = vpop.permute.xlu1 %2231 }
 0x35e   :  { %14423 = vst [vmem:[#allocation301_spill] sm:$0xff] %v10087_v9  ;;  %v10097_v22 = vpop.permute.xlu0 %2237 }
 0x35f   :  { %2475 = vrot.lane.b32.xlu1 %v730_v16, %s8497_s29  ;;  %14426 = vst [vmem:[#allocation304_spill] sm:$0xff] %v10097_v22  ;;  %v735_v16 = vld [vmem:[#allocation2 + $0x139] sm:$0xff] }
 0x360   :  { %2481 = vrot.lane.b32.xlu0 %v733_v18, %s8497_s29  ;;  %v738_v22 = vld [vmem:[#allocation2 + $0x159] sm:$0xff] }
 0x361   :  { %v10093_v1 = vpop.permute.xlu1 %2235 }
 0x362   :  { %14425 = vst [vmem:[#allocation303_spill] sm:$0xff] %v10093_v1  ;;  %v10103_v34 = vpop.permute.xlu0 %2241 }
 0x363   :  { %2479 = vrot.lane.b32.xlu1 %v732_v36, %s8497_s29  ;;  %14428 = vst [vmem:[#allocation306_spill] sm:$0xff] %v10103_v34  ;;  %v737_v36 = vld [vmem:[#allocation2 + $0x151] sm:$0xff] }
 0x364   :  { %2485 = vrot.lane.b32.xlu0 %v735_v16, %s8497_s29  ;;  %v740_v34 = vld [vmem:[#allocation2 + $0x171] sm:$0xff] }
 0x365   :  { %v10099_v14 = vpop.permute.xlu1 %2239 }
 0x366   :  { %14427 = vst [vmem:[#allocation305_spill] sm:$0xff] %v10099_v14  ;;  %v10109_v45 = vpop.permute.xlu0 %2245 }
 0x367   :  { %2483 = vrot.lane.b32.xlu1 %v734_v38, %s8497_s29  ;;  %14430 = vst [vmem:[#allocation308_spill] sm:$0xff] %v10109_v45  ;;  %v739_v38 = vld [vmem:[#allocation2 + $0x169] sm:$0xff] }
 0x368   :  { %2489 = vrot.lane.b32.xlu0 %v737_v36, %s8497_s29  ;;  %v742_v45 = vld [vmem:[#allocation2 + $0x189] sm:$0xff] }
 0x369   :  { %v10105_v9 = vpop.permute.xlu1 %2243 }
 0x36a   :  { %14429 = vst [vmem:[#allocation307_spill] sm:$0xff] %v10105_v9  ;;  %v10115_v18 = vpop.permute.xlu0 %2249 }
 0x36b   :  { %2487 = vrot.lane.b32.xlu1 %v736_v13, %s8497_s29  ;;  %14432 = vst [vmem:[#allocation310_spill] sm:$0xff] %v10115_v18  ;;  %v741_v13 = vld [vmem:[#allocation2 + $0x181] sm:$0xff] }
 0x36c   :  { %2493 = vrot.lane.b32.xlu0 %v739_v38, %s8497_s29  ;;  %v744_v18 = vld [vmem:[#allocation2 + $0x1a1] sm:$0xff] }
 0x36d   :  { %v10111_v1 = vpop.permute.xlu1 %2247 }
 0x36e   :  { %14431 = vst [vmem:[#allocation309_spill] sm:$0xff] %v10111_v1  ;;  %v10121_v16 = vpop.permute.xlu0 %2253 }
 0x36f   :  { %2491 = vrot.lane.b32.xlu1 %v738_v22, %s8497_s29  ;;  %14434 = vst [vmem:[#allocation312_spill] sm:$0xff] %v10121_v16  ;;  %v743_v22 = vld [vmem:[#allocation2 + $0x199] sm:$0xff]  ;;  %v746_v16 = vld [vmem:[#allocation2 + $0x1e9] sm:$0xff] }
 0x370   :  { %2497 = vrot.lane.b32.xlu0 %v741_v13, %s8497_s29 }
 0x371   :  { %v10117_v14 = vpop.permute.xlu1 %2251 }
 0x372   :  { %14433 = vst [vmem:[#allocation311_spill] sm:$0xff] %v10117_v14  ;;  %v10127_v36 = vpop.permute.xlu0 %2257 }
 0x373   :  { %2495 = vrot.lane.b32.xlu1 %v740_v34, %s8497_s29  ;;  %14436 = vst [vmem:[#allocation314_spill] sm:$0xff] %v10127_v36  ;;  %v745_v34 = vld [vmem:[#allocation2 + $0x1e1] sm:$0xff] }
 0x374   :  { %2501 = vrot.lane.b32.xlu0 %v743_v22, %s8497_s29  ;;  %v748_v36 = vld [vmem:[#allocation2 + $0x201] sm:$0xff] }
 0x375   :  { %v10123_v9 = vpop.permute.xlu1 %2255 }
 0x376   :  { %14435 = vst [vmem:[#allocation313_spill] sm:$0xff] %v10123_v9  ;;  %v10133_v38 = vpop.permute.xlu0 %2261 }
 0x377   :  { %2499 = vrot.lane.b32.xlu1 %v742_v45, %s8497_s29  ;;  %14438 = vst [vmem:[#allocation316_spill] sm:$0xff] %v10133_v38  ;;  %v747_v45 = vld [vmem:[#allocation2 + $0x1f9] sm:$0xff] }
 0x378   :  { %2505 = vrot.lane.b32.xlu0 %v745_v34, %s8497_s29  ;;  %v750_v38 = vld [vmem:[#allocation2 + $0x219] sm:$0xff] }
 0x379   :  { %v10129_v1 = vpop.permute.xlu1 %2259 }
 0x37a   :  { %14437 = vst [vmem:[#allocation315_spill] sm:$0xff] %v10129_v1  ;;  %v10139_v13 = vpop.permute.xlu0 %2265 }
 0x37b   :  { %2503 = vrot.lane.b32.xlu1 %v744_v18, %s8497_s29  ;;  %14440 = vst [vmem:[#allocation318_spill] sm:$0xff] %v10139_v13  ;;  %v749_v18 = vld [vmem:[#allocation2 + $0x211] sm:$0xff] }
 0x37c   :  { %2509 = vrot.lane.b32.xlu0 %v747_v45, %s8497_s29  ;;  %v752_v13 = vld [vmem:[#allocation2 + $0x231] sm:$0xff] }
 0x37d   :  { %v10135_v14 = vpop.permute.xlu1 %2263 }
 0x37e   :  { %14439 = vst [vmem:[#allocation317_spill] sm:$0xff] %v10135_v14  ;;  %v10145_v22 = vpop.permute.xlu0 %2269 }
 0x37f   :  { %2507 = vrot.lane.b32.xlu1 %v746_v16, %s8497_s29  ;;  %14442 = vst [vmem:[#allocation320_spill] sm:$0xff] %v10145_v22  ;;  %v751_v16 = vld [vmem:[#allocation2 + $0x229] sm:$0xff] }
 0x380   :  { %2513 = vrot.lane.b32.xlu0 %v749_v18, %s8497_s29  ;;  %v754_v22 = vld [vmem:[#allocation2 + $0x249] sm:$0xff] }
 0x381   :  { %v10141_v9 = vpop.permute.xlu1 %2267 }
 0x382   :  { %14441 = vst [vmem:[#allocation319_spill] sm:$0xff] %v10141_v9  ;;  %v10151_v34 = vpop.permute.xlu0 %2273 }
 0x383   :  { %2511 = vrot.lane.b32.xlu1 %v748_v36, %s8497_s29  ;;  %14444 = vst [vmem:[#allocation322_spill] sm:$0xff] %v10151_v34  ;;  %v753_v36 = vld [vmem:[#allocation2 + $0x241] sm:$0xff] }
 0x384   :  { %2517 = vrot.lane.b32.xlu0 %v751_v16, %s8497_s29  ;;  %v756_v34 = vld [vmem:[#allocation2 + $0x261] sm:$0xff] }
 0x385   :  { %v10147_v1 = vpop.permute.xlu1 %2271 }
 0x386   :  { %14443 = vst [vmem:[#allocation321_spill] sm:$0xff] %v10147_v1  ;;  %v10157_v45 = vpop.permute.xlu0 %2277 }
 0x387   :  { %2515 = vrot.lane.b32.xlu1 %v750_v38, %s8497_s29  ;;  %14446 = vst [vmem:[#allocation324_spill] sm:$0xff] %v10157_v45  ;;  %v755_v38 = vld [vmem:[#allocation2 + $0x259] sm:$0xff] }
 0x388   :  { %2521 = vrot.lane.b32.xlu0 %v753_v36, %s8497_s29  ;;  %v758_v45 = vld [vmem:[#allocation2 + $0x279] sm:$0xff] }
 0x389   :  { %v10153_v14 = vpop.permute.xlu1 %2275 }
 0x38a   :  { %14445 = vst [vmem:[#allocation323_spill] sm:$0xff] %v10153_v14  ;;  %v10163_v18 = vpop.permute.xlu0 %2281 }
 0x38b   :  { %2519 = vrot.lane.b32.xlu1 %v752_v13, %s8497_s29  ;;  %14448 = vst [vmem:[#allocation326_spill] sm:$0xff] %v10163_v18  ;;  %v757_v13 = vld [vmem:[#allocation2 + $0x271] sm:$0xff] }
 0x38c   :  { %2525 = vrot.lane.b32.xlu0 %v755_v38, %s8497_s29  ;;  %v760_v18 = vld [vmem:[#allocation2 + $0x291] sm:$0xff] }
 0x38d   :  { %v10159_v9 = vpop.permute.xlu1 %2279 }
 0x38e   :  { %14447 = vst [vmem:[#allocation325_spill] sm:$0xff] %v10159_v9  ;;  %v10169_v16 = vpop.permute.xlu0 %2285 }
 0x38f   :  { %2523 = vrot.lane.b32.xlu1 %v754_v22, %s8497_s29  ;;  %14450 = vst [vmem:[#allocation328_spill] sm:$0xff] %v10169_v16  ;;  %v759_v22 = vld [vmem:[#allocation2 + $0x289] sm:$0xff] }
 0x390   :  { %2529 = vrot.lane.b32.xlu0 %v757_v13, %s8497_s29  ;;  %v762_v16 = vld [vmem:[#allocation2 + $0x2a9] sm:$0xff] }
 0x391   :  { %v10165_v1 = vpop.permute.xlu1 %2283 }
 0x392   :  { %14449 = vst [vmem:[#allocation327_spill] sm:$0xff] %v10165_v1  ;;  %v10175_v36 = vpop.permute.xlu0 %2289 }
 0x393   :  { %2527 = vrot.lane.b32.xlu1 %v756_v34, %s8497_s29  ;;  %14452 = vst [vmem:[#allocation330_spill] sm:$0xff] %v10175_v36  ;;  %v761_v34 = vld [vmem:[#allocation2 + $0x2a1] sm:$0xff] }
 0x394   :  { %2533 = vrot.lane.b32.xlu0 %v759_v22, %s8497_s29  ;;  %v764_v36 = vld [vmem:[#allocation2 + $0x2c1] sm:$0xff] }
 0x395   :  { %v10171_v14 = vpop.permute.xlu1 %2287 }
 0x396   :  { %14451 = vst [vmem:[#allocation329_spill] sm:$0xff] %v10171_v14  ;;  %v10181_v38 = vpop.permute.xlu0 %2293 }
 0x397   :  { %2531 = vrot.lane.b32.xlu1 %v758_v45, %s8497_s29  ;;  %14454 = vst [vmem:[#allocation332_spill] sm:$0xff] %v10181_v38  ;;  %v763_v45 = vld [vmem:[#allocation2 + $0x2b9] sm:$0xff] }
 0x398   :  { %2537 = vrot.lane.b32.xlu0 %v761_v34, %s8497_s29  ;;  %v766_v38 = vld [vmem:[#allocation2 + $0x2d9] sm:$0xff]  ;;  %v3409_v34 = vld [vmem:[%s14114_s1 + $0x8] sm:$0xff] }
 0x399   :  { %v10177_v9 = vpop.permute.xlu1 %2291 }
 0x39a   :  { %14453 = vst [vmem:[#allocation331_spill] sm:$0xff] %v10177_v9  ;;  %v10187_v13 = vpop.permute.xlu0 %2297 }
 0x39b   :  { %2535 = vrot.lane.b32.xlu1 %v760_v18, %s8497_s29  ;;  %14456 = vst [vmem:[#allocation334_spill] sm:$0xff] %v10187_v13  ;;  %v765_v18 = vld [vmem:[#allocation2 + $0x2d1] sm:$0xff] }
 0x39c   :  { %2541 = vrot.lane.b32.xlu0 %v763_v45, %s8497_s29  ;;  %v767_v45 = vld [vmem:[#allocation2 + $0x2e9] sm:$0xff] }
 0x39d   :  { %v10183_v1 = vpop.permute.xlu1 %2295 }
 0x39e   :  { %14455 = vst [vmem:[#allocation333_spill] sm:$0xff] %v10183_v1  ;;  %v10193_v22 = vpop.permute.xlu0 %2301  ;;  %v772_v1 = vld [vmem:[#allocation2 + $0x321] sm:$0xff] }
 0x39f   :  { %2539 = vrot.lane.b32.xlu1 %v762_v16, %s8497_s29  ;;  %14458 = vst [vmem:[#allocation336_spill] sm:$0xff] %v10193_v22  ;;  %v3408_v16 = vld [vmem:[%s14114_s1] sm:$0xff]  ;;  %v768_v22 = vld [vmem:[#allocation2 + $0x2f1] sm:$0xff] }
 0x3a0   :  { %2545 = vrot.lane.b32.xlu0 %v765_v18, %s8497_s29  ;;  %v3410_v18 = vld [vmem:[%s14114_s1 + $0x10] sm:$0xff] }
 0x3a1   :  { %v10189_v14 = vpop.permute.xlu1 %2299 }
 0x3a2   :  { %14457 = vst [vmem:[#allocation335_spill] sm:$0xff] %v10189_v14  ;;  %v10205_v14 = vpop.permute.xlu0 %2305 }
 0x3a3   :  { %2543 = vrot.lane.b32.xlu1 %v764_v36, %s8497_s29  ;;  %v8344_v36 = vpack.c.bf16 %v3409_v34, %v3408_v16  ;;  %14460 = vst [vmem:[#allocation338_spill] sm:$0xff] %v10205_v14  ;;  %v770_v14 = vld [vmem:[#allocation2 + $0x309] sm:$0xff] }
 0x3a4   :  { %2549 = vrot.lane.b32.xlu0 %v767_v45, %s8497_s29  ;;  %v771_v45 = vld [vmem:[#allocation2 + $0x319] sm:$0xff] }
 0x3a5   :  { %v10195_v9 = vpop.permute.xlu1 %2303  ;;  %8345 = vmatprep.subr.bf16.mxu0 %v8344_v36 }
 0x3a6   :  { %14459 = vst [vmem:[#allocation337_spill] sm:$0xff] %v10195_v9  ;;  %8347 = vmatpush3.bf16.msra.mxu0 %v8344_v36  ;;  %v3411_v9 = vld [vmem:[%s14114_s1 + $0x18] sm:$0xff]  ;;  %v10217_v34 = vpop.permute.xlu0 %2309 }
 0x3a7   :  { %2547 = vrot.lane.b32.xlu1 %v766_v38, %s8497_s29  ;;  %v769_v38 = vld [vmem:[#allocation2 + $0x301] sm:$0xff]  ;;  %v8348_v16 = vpack.c.bf16 %v3411_v9, %v3410_v18  ;;  %14462 = vst [vmem:[#allocation340_spill] sm:$0xff] %v10217_v34 }
 0x3a8   :  { %2553 = vrot.lane.b32.xlu0 %v769_v38, %s8497_s29  ;;  %v774_v38 = vld [vmem:[#allocation2 + $0x339] sm:$0xff] }
 0x3a9   :  { %v10207_v13 = vpop.permute.xlu1 %2307  ;;  %8349 = vmatprep.subr.bf16.mxu0 %v8348_v16 }
 0x3aa   :  { %14461 = vst [vmem:[#allocation339_spill] sm:$0xff] %v10207_v13  ;;  %8351 = vmatpush3.bf16.msra.mxu0 %v8348_v16  ;;  %v10223_v36 = vpop.permute.xlu0 %2441 }
 0x3ab   :  { %2551 = vrot.lane.b32.xlu1 %v768_v22, %s8497_s29  ;;  %v3412_v22 = vld [vmem:[%s14114_s1 + $0x20] sm:$0xf]  ;;  %s8498_s1 = smov 32  }
 0x3ac   :  { %8140 = vmatprep.subr.msk.mxu0 %vm3613_vm2, %v3412_v22  ;;  %2557 = vrot.lane.b32.xlu0 %v771_v45, %s8497_s29 }
 0x3ad   :  { %v10219_v13 = vpop.permute.xlu1 %2311 }
 0x3ae   :  { %14463 = vst [vmem:[#allocation341_spill] sm:$0xff] %v10219_v13  ;;  %8141 = vmatpush3.msk.msra.mxu0 %vm3613_vm2, %v3412_v22  ;;  %v10234_v18 = vpop.permute.xlu0 %2445  ;;  %v775_v13 = vld [vmem:[#allocation2 + $0x349] sm:$0xff]  ;;  %v778_v22 = vld [vmem:[#allocation2 + $0x3a] sm:$0xff] }
 0x3af   :  { %2555 = vrot.lane.b32.xlu1 %v770_v14, %s8497_s29  ;;  %v773_v14 = vld [vmem:[#allocation2 + $0x331] sm:$0xff] }
 0x3b0   :  { %2561 = vrot.lane.b32.xlu0 %v773_v14, %s8497_s29  ;;  %v779_v14 = vld [vmem:[#allocation2 + $0x4a] sm:$0xff] }
 0x3b1   :  { %v10228_v9 = vpop.permute.xlu1 %2443 }
 0x3b2   :  { %v10240_v34 = vpop.permute.xlu0 %2449 }
 0x3b3   :  { %2559 = vrot.lane.b32.xlu1 %v772_v1, %s8497_s29  ;;  %v777_v1 = vld [vmem:[#allocation2 + $0x32] sm:$0xff] }
 0x3b4   :  { %2565 = vrot.lane.b32.xlu0 %v775_v13, %s8497_s29 }
 0x3b5   :  { %v10236_v16 = vpop.permute.xlu1 %2447 }
 0x3b6   :  { %v10246_v45 = vpop.permute.xlu0 %2453 }
 0x3b7   :  { %2563 = vrot.lane.b32.xlu1 %v774_v38, %s8497_s29  ;;  %14465 = vst [vmem:[#allocation343_spill] sm:$0xff] %v10246_v45  ;;  %v782_v45 = vld [vmem:[#allocation2 + $0x6a] sm:$0xff] }
 0x3b8   :  { %2697 = vrot.lane.b32.xlu0 %v777_v1, %s8498_s1  ;;  %v783_v1 = vld [vmem:[#allocation2 + $0x7a] sm:$0xff] }
 0x3b9   :  { %v10242_v7 = vpop.permute.xlu1 %2451 }
 0x3ba   :  { %14464 = vst [vmem:[#allocation342_spill] sm:$0xff] %v10242_v7  ;;  %v10252_v38 = vpop.permute.xlu0 %2457  ;;  %v8371_v7 = vld [vmem:[#allocation2 + $0x30] sm:$0xff] }
 0x3bb   :  { %2567 = vrot.lane.b32.xlu1 %v776_v54, %s8497_s29  ;;  %14467 = vst [vmem:[#allocation345_spill] sm:$0xff] %v10252_v38  ;;  %v781_v54 = vld [vmem:[#allocation2 + $0x62] sm:$0xff] }
 0x3bc   :  { %2701 = vrot.lane.b32.xlu0 %v779_v14, %s8498_s1  ;;  %v784_v38 = vld [vmem:[#allocation2 + $0x82] sm:$0xff] }
 0x3bd   :  { %v10248_v37 = vpop.permute.xlu1 %2455 }
 0x3be   :  { %14466 = vst [vmem:[#allocation344_spill] sm:$0xff] %v10248_v37  ;;  %v10258_v13 = vpop.permute.xlu0 %2461 }
 0x3bf   :  { %2699 = vrot.lane.b32.xlu1 %v778_v22, %s8498_s1  ;;  %14469 = vst [vmem:[#allocation347_spill] sm:$0xff] %v10258_v13  ;;  %v786_v13 = vld [vmem:[#allocation2 + $0x9a] sm:$0xff] }
 0x3c0   :  { %2705 = vrot.lane.b32.xlu0 %v781_v54, %s8498_s1 }
 0x3c1   :  { %v10254_v19 = vpop.permute.xlu1 %2459 }
 0x3c2   :  { %14468 = vst [vmem:[#allocation346_spill] sm:$0xff] %v10254_v19  ;;  %v10264_v22 = vpop.permute.xlu0 %2465 }
 0x3c3   :  { %2703 = vrot.lane.b32.xlu1 %v780_v20, %s8498_s1  ;;  %14471 = vst [vmem:[#allocation349_spill] sm:$0xff] %v10264_v22  ;;  %v785_v20 = vld [vmem:[#allocation2 + $0x92] sm:$0xff] }
 0x3c4   :  { %2709 = vrot.lane.b32.xlu0 %v783_v1, %s8498_s1  ;;  %v788_v22 = vld [vmem:[#allocation2 + $0xb2] sm:$0xff] }
 0x3c5   :  { %v10260_v37 = vpop.permute.xlu1 %2463 }
 0x3c6   :  { %14470 = vst [vmem:[#allocation348_spill] sm:$0xff] %v10260_v37  ;;  %v10270_v14 = vpop.permute.xlu0 %2469 }
 0x3c7   :  { %2707 = vrot.lane.b32.xlu1 %v782_v45, %s8498_s1  ;;  %14473 = vst [vmem:[#allocation351_spill] sm:$0xff] %v10270_v14  ;;  %v787_v45 = vld [vmem:[#allocation2 + $0xaa] sm:$0xff] }
 0x3c8   :  { %2713 = vrot.lane.b32.xlu0 %v785_v20, %s8498_s1  ;;  %v790_v14 = vld [vmem:[#allocation2 + $0xca] sm:$0xff] }
 0x3c9   :  { %v10266_v57 = vpop.permute.xlu1 %2467 }
 0x3ca   :  { %14472 = vst [vmem:[#allocation350_spill] sm:$0xff] %v10266_v57  ;;  %v10276_v54 = vpop.permute.xlu0 %2473 }
 0x3cb   :  { %2711 = vrot.lane.b32.xlu1 %v784_v38, %s8498_s1  ;;  %14475 = vst [vmem:[#allocation353_spill] sm:$0xff] %v10276_v54  ;;  %v789_v38 = vld [vmem:[#allocation2 + $0xc2] sm:$0xff] }
 0x3cc   :  { %2717 = vrot.lane.b32.xlu0 %v787_v45, %s8498_s1  ;;  %v792_v54 = vld [vmem:[#allocation2 + $0xe2] sm:$0xff] }
 0x3cd   :  { %v10272_v19 = vpop.permute.xlu1 %2471 }
 0x3ce   :  { %14474 = vst [vmem:[#allocation352_spill] sm:$0xff] %v10272_v19  ;;  %v10282_v1 = vpop.permute.xlu0 %2477 }
 0x3cf   :  { %2715 = vrot.lane.b32.xlu1 %v786_v13, %s8498_s1  ;;  %14477 = vst [vmem:[#allocation355_spill] sm:$0xff] %v10282_v1  ;;  %v791_v13 = vld [vmem:[#allocation2 + $0xda] sm:$0xff] }
 0x3d0   :  { %2721 = vrot.lane.b32.xlu0 %v789_v38, %s8498_s1  ;;  %v794_v1 = vld [vmem:[#allocation2 + $0xfa] sm:$0xff] }
 0x3d1   :  { %v10278_v37 = vpop.permute.xlu1 %2475 }
 0x3d2   :  { %14476 = vst [vmem:[#allocation354_spill] sm:$0xff] %v10278_v37  ;;  %v10288_v20 = vpop.permute.xlu0 %2481 }
 0x3d3   :  { %2719 = vrot.lane.b32.xlu1 %v788_v22, %s8498_s1  ;;  %14479 = vst [vmem:[#allocation357_spill] sm:$0xff] %v10288_v20  ;;  %v793_v22 = vld [vmem:[#allocation2 + $0xf2] sm:$0xff] }
 0x3d4   :  { %2725 = vrot.lane.b32.xlu0 %v791_v13, %s8498_s1  ;;  %v796_v20 = vld [vmem:[#allocation2 + $0x112] sm:$0xff] }
 0x3d5   :  { %v10284_v57 = vpop.permute.xlu1 %2479 }
 0x3d6   :  { %14478 = vst [vmem:[#allocation356_spill] sm:$0xff] %v10284_v57  ;;  %v10294_v45 = vpop.permute.xlu0 %2485 }
 0x3d7   :  { %2723 = vrot.lane.b32.xlu1 %v790_v14, %s8498_s1  ;;  %14481 = vst [vmem:[#allocation359_spill] sm:$0xff] %v10294_v45  ;;  %v795_v14 = vld [vmem:[#allocation2 + $0x10a] sm:$0xff] }
 0x3d8   :  { %2729 = vrot.lane.b32.xlu0 %v793_v22, %s8498_s1  ;;  %v798_v45 = vld [vmem:[#allocation2 + $0x12a] sm:$0xff] }
 0x3d9   :  { %v10290_v19 = vpop.permute.xlu1 %2483 }
 0x3da   :  { %14480 = vst [vmem:[#allocation358_spill] sm:$0xff] %v10290_v19  ;;  %v10300_v38 = vpop.permute.xlu0 %2489 }
 0x3db   :  { %2727 = vrot.lane.b32.xlu1 %v792_v54, %s8498_s1  ;;  %14483 = vst [vmem:[#allocation361_spill] sm:$0xff] %v10300_v38  ;;  %v797_v54 = vld [vmem:[#allocation2 + $0x122] sm:$0xff] }
 0x3dc   :  { %2733 = vrot.lane.b32.xlu0 %v795_v14, %s8498_s1  ;;  %v800_v38 = vld [vmem:[#allocation2 + $0x142] sm:$0xff] }
 0x3dd   :  { %v10296_v37 = vpop.permute.xlu1 %2487 }
 0x3de   :  { %14482 = vst [vmem:[#allocation360_spill] sm:$0xff] %v10296_v37  ;;  %v10306_v13 = vpop.permute.xlu0 %2493 }
 0x3df   :  { %2731 = vrot.lane.b32.xlu1 %v794_v1, %s8498_s1  ;;  %14485 = vst [vmem:[#allocation363_spill] sm:$0xff] %v10306_v13  ;;  %v799_v1 = vld [vmem:[#allocation2 + $0x13a] sm:$0xff] }
 0x3e0   :  { %2737 = vrot.lane.b32.xlu0 %v797_v54, %s8498_s1  ;;  %v802_v13 = vld [vmem:[#allocation2 + $0x15a] sm:$0xff] }
 0x3e1   :  { %v10302_v57 = vpop.permute.xlu1 %2491 }
 0x3e2   :  { %14484 = vst [vmem:[#allocation362_spill] sm:$0xff] %v10302_v57  ;;  %v10312_v22 = vpop.permute.xlu0 %2497 }
 0x3e3   :  { %2735 = vrot.lane.b32.xlu1 %v796_v20, %s8498_s1  ;;  %14487 = vst [vmem:[#allocation365_spill] sm:$0xff] %v10312_v22  ;;  %v801_v20 = vld [vmem:[#allocation2 + $0x152] sm:$0xff] }
 0x3e4   :  { %2741 = vrot.lane.b32.xlu0 %v799_v1, %s8498_s1  ;;  %v804_v22 = vld [vmem:[#allocation2 + $0x172] sm:$0xff] }
 0x3e5   :  { %v10308_v19 = vpop.permute.xlu1 %2495 }
 0x3e6   :  { %14486 = vst [vmem:[#allocation364_spill] sm:$0xff] %v10308_v19  ;;  %v10318_v14 = vpop.permute.xlu0 %2501 }
 0x3e7   :  { %2739 = vrot.lane.b32.xlu1 %v798_v45, %s8498_s1  ;;  %14489 = vst [vmem:[#allocation367_spill] sm:$0xff] %v10318_v14  ;;  %v803_v45 = vld [vmem:[#allocation2 + $0x16a] sm:$0xff] }
 0x3e8   :  { %2745 = vrot.lane.b32.xlu0 %v801_v20, %s8498_s1  ;;  %v806_v14 = vld [vmem:[#allocation2 + $0x18a] sm:$0xff] }
 0x3e9   :  { %v10314_v37 = vpop.permute.xlu1 %2499 }
 0x3ea   :  { %14488 = vst [vmem:[#allocation366_spill] sm:$0xff] %v10314_v37  ;;  %v10324_v54 = vpop.permute.xlu0 %2505 }
 0x3eb   :  { %2743 = vrot.lane.b32.xlu1 %v800_v38, %s8498_s1  ;;  %14491 = vst [vmem:[#allocation369_spill] sm:$0xff] %v10324_v54  ;;  %v805_v38 = vld [vmem:[#allocation2 + $0x182] sm:$0xff] }
 0x3ec   :  { %2749 = vrot.lane.b32.xlu0 %v803_v45, %s8498_s1  ;;  %v808_v54 = vld [vmem:[#allocation2 + $0x1a2] sm:$0xff] }
 0x3ed   :  { %v10320_v57 = vpop.permute.xlu1 %2503 }
 0x3ee   :  { %14490 = vst [vmem:[#allocation368_spill] sm:$0xff] %v10320_v57  ;;  %v10330_v1 = vpop.permute.xlu0 %2509 }
 0x3ef   :  { %2747 = vrot.lane.b32.xlu1 %v802_v13, %s8498_s1  ;;  %14493 = vst [vmem:[#allocation371_spill] sm:$0xff] %v10330_v1  ;;  %v807_v13 = vld [vmem:[#allocation2 + $0x19a] sm:$0xff]  ;;  %v810_v1 = vld [vmem:[#allocation2 + $0x1ea] sm:$0xff] }
 0x3f0   :  { %2753 = vrot.lane.b32.xlu0 %v805_v38, %s8498_s1 }
 0x3f1   :  { %v10326_v19 = vpop.permute.xlu1 %2507 }
 0x3f2   :  { %14492 = vst [vmem:[#allocation370_spill] sm:$0xff] %v10326_v19  ;;  %v10336_v20 = vpop.permute.xlu0 %2513 }
 0x3f3   :  { %2751 = vrot.lane.b32.xlu1 %v804_v22, %s8498_s1  ;;  %14495 = vst [vmem:[#allocation373_spill] sm:$0xff] %v10336_v20  ;;  %v809_v22 = vld [vmem:[#allocation2 + $0x1e2] sm:$0xff] }
 0x3f4   :  { %2757 = vrot.lane.b32.xlu0 %v807_v13, %s8498_s1  ;;  %v812_v20 = vld [vmem:[#allocation2 + $0x202] sm:$0xff] }
 0x3f5   :  { %v10332_v37 = vpop.permute.xlu1 %2511 }
 0x3f6   :  { %14494 = vst [vmem:[#allocation372_spill] sm:$0xff] %v10332_v37  ;;  %v10342_v45 = vpop.permute.xlu0 %2517 }
 0x3f7   :  { %2755 = vrot.lane.b32.xlu1 %v806_v14, %s8498_s1  ;;  %14497 = vst [vmem:[#allocation375_spill] sm:$0xff] %v10342_v45  ;;  %v811_v14 = vld [vmem:[#allocation2 + $0x1fa] sm:$0xff] }
 0x3f8   :  { %2761 = vrot.lane.b32.xlu0 %v809_v22, %s8498_s1  ;;  %v814_v45 = vld [vmem:[#allocation2 + $0x21a] sm:$0xff] }
 0x3f9   :  { %v10338_v57 = vpop.permute.xlu1 %2515 }
 0x3fa   :  { %14496 = vst [vmem:[#allocation374_spill] sm:$0xff] %v10338_v57  ;;  %v10348_v38 = vpop.permute.xlu0 %2521 }
 0x3fb   :  { %2759 = vrot.lane.b32.xlu1 %v808_v54, %s8498_s1  ;;  %14499 = vst [vmem:[#allocation377_spill] sm:$0xff] %v10348_v38  ;;  %v813_v54 = vld [vmem:[#allocation2 + $0x212] sm:$0xff] }
 0x3fc   :  { %2765 = vrot.lane.b32.xlu0 %v811_v14, %s8498_s1  ;;  %v816_v38 = vld [vmem:[#allocation2 + $0x232] sm:$0xff] }
 0x3fd   :  { %v10344_v19 = vpop.permute.xlu1 %2519 }
 0x3fe   :  { %14498 = vst [vmem:[#allocation376_spill] sm:$0xff] %v10344_v19  ;;  %v10354_v13 = vpop.permute.xlu0 %2525 }
 0x3ff   :  { %2763 = vrot.lane.b32.xlu1 %v810_v1, %s8498_s1  ;;  %14501 = vst [vmem:[#allocation379_spill] sm:$0xff] %v10354_v13  ;;  %v815_v1 = vld [vmem:[#allocation2 + $0x22a] sm:$0xff] }
 0x400   :  { %2769 = vrot.lane.b32.xlu0 %v813_v54, %s8498_s1  ;;  %v818_v13 = vld [vmem:[#allocation2 + $0x24a] sm:$0xff] }
 0x401   :  { %v10350_v37 = vpop.permute.xlu1 %2523 }
 0x402   :  { %14500 = vst [vmem:[#allocation378_spill] sm:$0xff] %v10350_v37  ;;  %v10360_v22 = vpop.permute.xlu0 %2529 }
 0x403   :  { %2767 = vrot.lane.b32.xlu1 %v812_v20, %s8498_s1  ;;  %14503 = vst [vmem:[#allocation381_spill] sm:$0xff] %v10360_v22  ;;  %v817_v20 = vld [vmem:[#allocation2 + $0x242] sm:$0xff] }
 0x404   :  { %2773 = vrot.lane.b32.xlu0 %v815_v1, %s8498_s1  ;;  %v820_v22 = vld [vmem:[#allocation2 + $0x262] sm:$0xff] }
 0x405   :  { %v10356_v57 = vpop.permute.xlu1 %2527 }
 0x406   :  { %14502 = vst [vmem:[#allocation380_spill] sm:$0xff] %v10356_v57  ;;  %v10366_v14 = vpop.permute.xlu0 %2533 }
 0x407   :  { %2771 = vrot.lane.b32.xlu1 %v814_v45, %s8498_s1  ;;  %14505 = vst [vmem:[#allocation383_spill] sm:$0xff] %v10366_v14  ;;  %v819_v45 = vld [vmem:[#allocation2 + $0x25a] sm:$0xff] }
 0x408   :  { %2777 = vrot.lane.b32.xlu0 %v817_v20, %s8498_s1  ;;  %v822_v14 = vld [vmem:[#allocation2 + $0x27a] sm:$0xff] }
 0x409   :  { %v10362_v19 = vpop.permute.xlu1 %2531 }
 0x40a   :  { %14504 = vst [vmem:[#allocation382_spill] sm:$0xff] %v10362_v19  ;;  %v10372_v54 = vpop.permute.xlu0 %2537 }
 0x40b   :  { %2775 = vrot.lane.b32.xlu1 %v816_v38, %s8498_s1  ;;  %14507 = vst [vmem:[#allocation385_spill] sm:$0xff] %v10372_v54  ;;  %v821_v38 = vld [vmem:[#allocation2 + $0x272] sm:$0xff] }
 0x40c   :  { %2781 = vrot.lane.b32.xlu0 %v819_v45, %s8498_s1  ;;  %v824_v54 = vld [vmem:[#allocation2 + $0x292] sm:$0xff] }
 0x40d   :  { %v10368_v37 = vpop.permute.xlu1 %2535 }
 0x40e   :  { %14506 = vst [vmem:[#allocation384_spill] sm:$0xff] %v10368_v37  ;;  %v10378_v1 = vpop.permute.xlu0 %2541 }
 0x40f   :  { %2779 = vrot.lane.b32.xlu1 %v818_v13, %s8498_s1  ;;  %14509 = vst [vmem:[#allocation387_spill] sm:$0xff] %v10378_v1  ;;  %v823_v13 = vld [vmem:[#allocation2 + $0x28a] sm:$0xff] }
 0x410   :  { %2785 = vrot.lane.b32.xlu0 %v821_v38, %s8498_s1  ;;  %v826_v1 = vld [vmem:[#allocation2 + $0x2aa] sm:$0xff] }
 0x411   :  { %v10374_v57 = vpop.permute.xlu1 %2539 }
 0x412   :  { %14508 = vst [vmem:[#allocation386_spill] sm:$0xff] %v10374_v57  ;;  %v10384_v20 = vpop.permute.xlu0 %2545 }
 0x413   :  { %2783 = vrot.lane.b32.xlu1 %v820_v22, %s8498_s1  ;;  %14511 = vst [vmem:[#allocation389_spill] sm:$0xff] %v10384_v20  ;;  %v825_v22 = vld [vmem:[#allocation2 + $0x2a2] sm:$0xff] }
 0x414   :  { %2789 = vrot.lane.b32.xlu0 %v823_v13, %s8498_s1  ;;  %v828_v20 = vld [vmem:[#allocation2 + $0x2c2] sm:$0xff] }
 0x415   :  { %v10380_v19 = vpop.permute.xlu1 %2543 }
 0x416   :  { %14510 = vst [vmem:[#allocation388_spill] sm:$0xff] %v10380_v19  ;;  %v10390_v45 = vpop.permute.xlu0 %2549 }
 0x417   :  { %2787 = vrot.lane.b32.xlu1 %v822_v14, %s8498_s1  ;;  %14513 = vst [vmem:[#allocation391_spill] sm:$0xff] %v10390_v45  ;;  %v827_v14 = vld [vmem:[#allocation2 + $0x2ba] sm:$0xff] }
 0x418   :  { %2793 = vrot.lane.b32.xlu0 %v825_v22, %s8498_s1  ;;  %v830_v45 = vld [vmem:[#allocation2 + $0x2da] sm:$0xff]  ;;  %v265_v22 = vld [vmem:[#allocation2 + $0x8] sm:$0xff] }
 0x419   :  { %v10386_v37 = vpop.permute.xlu1 %2547 }
 0x41a   :  { %14512 = vst [vmem:[#allocation390_spill] sm:$0xff] %v10386_v37  ;;  %v10396_v38 = vpop.permute.xlu0 %2553 }
 0x41b   :  { %2791 = vrot.lane.b32.xlu1 %v824_v54, %s8498_s1  ;;  %14515 = vst [vmem:[#allocation393_spill] sm:$0xff] %v10396_v38  ;;  %v829_v54 = vld [vmem:[#allocation2 + $0x2d2] sm:$0xff] }
 0x41c   :  { %2797 = vrot.lane.b32.xlu0 %v827_v14, %s8498_s1  ;;  %v8369_v14 = vld [vmem:[#allocation2 + $0x18] sm:$0xff] }
 0x41d   :  { %v10392_v57 = vpop.permute.xlu1 %2551 }
 0x41e   :  { %14514 = vst [vmem:[#allocation392_spill] sm:$0xff] %v10392_v57  ;;  %v10402_v13 = vpop.permute.xlu0 %2557  ;;  %v264_v57 = vld [vmem:[#allocation2] sm:$0xff] }
 0x41f   :  { %2795 = vrot.lane.b32.xlu1 %v826_v1, %s8498_s1  ;;  %14517 = vst [vmem:[#allocation395_spill] sm:$0xff] %v10402_v13  ;;  %v831_v1 = vld [vmem:[#allocation2 + $0x2ea] sm:$0xff]  ;;  %v2891_v13 = vsel %vm24_vm0, %v8369_v14, %v9045_v58 }
 0x420   :  { %2801 = vrot.lane.b32.xlu0 %v829_v54, %s8498_s1  ;;  %v8370_v54 = vld [vmem:[#allocation2 + $0x20] sm:$0xff]  ;;  %v8373_v58 = vld [vmem:[#allocation2 + $0x48] sm:$0xff] }
 0x421   :  { %v10398_v19 = vpop.permute.xlu1 %2555 }
 0x422   :  { %14516 = vst [vmem:[#allocation394_spill] sm:$0xff] %v10398_v19  ;;  %v10408_v38 = vpop.permute.xlu0 %2561  ;;  %v832_v19 = vld [vmem:[#allocation2 + $0x2f2] sm:$0xff] }
 0x423   :  { %2799 = vrot.lane.b32.xlu1 %v828_v20, %s8498_s1  ;;  %14519 = vst [vmem:[#allocation397_spill] sm:$0xff] %v10408_v38  ;;  %v2889_v20 = vsel %vm24_vm0, %v264_v57, %v9043_v56  ;;  %v2893_v38 = vsel %vm24_vm0, %v8371_v7, %v9055_v0  ;;  %v2894_v56 = vsel %vm24_vm0, %v8372_v29, %v9057_v2  ;;  %v8374_v57 = vld [vmem:[#allocation2 + $0x50] sm:$0xff]  ;;  %v833_v2 = vld [vmem:[#allocation2 + $0x302] sm:$0xff] }
 0x424   :  { %2805 = vrot.lane.b32.xlu0 %v831_v1, %s8498_s1  ;;  %v2954_v0 = vsel %vm2953_vm3, %v2889_v20, %v9243_v27  ;;  %v8375_v7 = vld [vmem:[#allocation2 + $0x60] sm:$0xff]  ;;  %v834_v1 = vld [vmem:[#allocation2 + $0x30a] sm:$0xff] }
 0x425   :  { %v10404_v37 = vpop.permute.xlu1 %2559  ;;  %v10438_v29 = vsel %vm24_vm0, %v8375_v7, %v9067_v8  ;;  %v8376_v27 = vld [vmem:[#allocation2 + $0x68] sm:$0xff]  ;;  %v838_v7 = vld [vmem:[#allocation2 + $0x33a] sm:$0xff] }
 0x426   :  { %14518 = vst [vmem:[#allocation396_spill] sm:$0xff] %v10404_v37  ;;  %v2890_v37 = vsel %vm24_vm0, %v265_v22, %v9049_v60  ;;  %v10427_v60 = vsel %vm24_vm0, %v8373_v58, %v9061_v4  ;;  %v3019_v22 = vsel %vm3018_vm4, %v2954_v0, %v9443_v43 }
 0x427   :  { %2803 = vrot.lane.b32.xlu1 %v830_v45, %s8498_s1  ;;  %v2892_v45 = vsel %vm24_vm0, %v8370_v54, %v9051_v62  ;;  %v10431_v62 = vsel %vm24_vm0, %v8374_v57, %v9063_v6  ;;  %v2955_v4 = vsel %vm2953_vm3, %v2890_v37, %v9245_v39  ;;  %v10444_v6 = vpop.permute.xlu0 %2565  ;;  %v3084_v8 = vsel %vm3083_vm5, %v3019_v22, %v9635_v30  ;;  %v8377_v37 = vld [vmem:[#allocation2 + $0x78] sm:$0xff] }
 0x428   :  { %v3020_v20 = vsel %vm3018_vm4, %v2955_v4, %v9445_v5  ;;  %v10458_v43 = vsel %vm24_vm0, %v8377_v37, %v9073_v12  ;;  %2809 = vrot.lane.b32.xlu0 %v833_v2, %s8498_s1  ;;  %v2956_v5 = vsel %vm2953_vm3, %v2891_v13, %v9257_v63  ;;  %v835_v12 = vld [vmem:[#allocation2 + $0x31a] sm:$0xff]  ;;  %v836_v13 = vld [vmem:[#allocation2 + $0x322] sm:$0xff] }
 0x429   :  { %v10416_v28 = vpop.permute.xlu1 %2563  ;;  %v3085_v14 = vsel %vm3083_vm5, %v3020_v20, %v9637_v25  ;;  %v2957_v25 = vsel %vm2953_vm3, %v2892_v45, %v9259_v11  ;;  %v14520_v20 = vld [vmem:[#allocation168_spill] sm:$0xff]  ;;  %v14521_v37 = vld [vmem:[#allocation342_spill] sm:$0xff] }
 0x42a   :  { %v3150_v30 = vsel %vm3148_vm6, %v3085_v14, %v9829_v52  ;;  %v14522_v14 = vld [vmem:[#allocation169_spill] sm:$0xff] }
 0x42b   :  { %2807 = vrot.lane.b32.xlu1 %v832_v19, %s8498_s1  ;;  %v10448_v19 = vsel %vm24_vm0, %v8376_v27, %v9069_v10  ;;  %v3149_v10 = vsel %vm3148_vm6, %v3084_v8, %v9827_v46  ;;  %v3021_v46 = vsel %vm3018_vm4, %v2956_v5, %v9449_v50  ;;  %v3215_v58 = vsel %vm3213_vm7, %v3150_v30, %v10021_v40  ;;  %v2698_v52 = vpop.permute.xlu0 %2697 }
 0x42c   :  { %v3214_v54 = vsel %vm3213_vm7, %v3149_v10, %v10019_v17  ;;  %v3022_v17 = vsel %vm3018_vm4, %v2957_v25, %v9451_v48  ;;  %v3086_v57 = vsel %vm3083_vm5, %v3021_v46, %v9641_v21  ;;  %v3280_v11 = vsel %vm3278_vm8, %v3215_v58, %v10228_v9  ;;  %2813 = vrot.lane.b32.xlu0 %v835_v12, %s8498_s1  ;;  %v14523_v10 = vld [vmem:[#allocation226_spill] sm:$0xff]  ;;  %v14526_v25 = vld [vmem:[#allocation284_spill] sm:$0xff]  ;;  %v14527_v58 = vld [vmem:[#allocation57_spill] sm:$0xff] }
 0x42d   :  { %v10454_v39 = vpop.permute.xlu1 %2567  ;;  %v3279_v63 = vsel %vm3278_vm8, %v3214_v54, %v10223_v36  ;;  %v3087_v40 = vsel %vm3083_vm5, %v3022_v17, %v9643_v32  ;;  %v3151_v36 = vsel %vm3148_vm6, %v3086_v57, %v9833_v53  ;;  %v2958_v48 = vsel %vm2953_vm3, %v2893_v38, %v9263_v3  ;;  %v837_v32 = vld [vmem:[#allocation2 + $0x332] sm:$0xff]  ;;  %v14525_v54 = vld [vmem:[#allocation227_spill] sm:$0xff] }
 0x42e   :  { %v3344_v50 = vsel %vm3343_vm9, %v3279_v63, %v2698_v52  ;;  %v3152_v21 = vsel %vm3148_vm6, %v3087_v40, %v9835_v24  ;;  %v3216_v9 = vsel %vm3213_vm7, %v3151_v36, %v10025_v15  ;;  %v2959_v53 = vsel %vm2953_vm3, %v2894_v56, %v9265_v31  ;;  %v14528_v52 = vld [vmem:[#allocation112_spill] sm:$0xff]  ;;  %v14529_v17 = vld [vmem:[#allocation285_spill] sm:$0xff]  ;;  %v14530_v57 = vld [vmem:[#allocation343_spill] sm:$0xff] }
 0x42f   :  { %2811 = vrot.lane.b32.xlu1 %v834_v1, %s8498_s1  ;;  %8142 = vmatprep.mubr.msk.f32.mxu0 %vm3420_vm10, %v3344_v50  ;;  %v3023_v2 = vsel %vm3018_vm4, %v2958_v48, %v9455_v35  ;;  %v3217_v3 = vsel %vm3213_vm7, %v3152_v21, %v10027_v59  ;;  %v3281_v24 = vsel %vm3278_vm8, %v3216_v9, %v10234_v18  ;;  %v2702_v38 = vpop.permute.xlu0 %2701  ;;  %v14531_v50 = vld [vmem:[#allocation113_spill] sm:$0xff]  ;;  %v14532_v36 = vld [vmem:[#allocation170_spill] sm:$0xff]  ;;  %v14533_v48 = vld [vmem:[#allocation344_spill] sm:$0xff] }
 0x430   :  { %v3024_v15 = vsel %vm3018_vm4, %v2959_v53, %v9457_v61  ;;  %v3088_v4 = vsel %vm3083_vm5, %v3023_v2, %v9647_v42  ;;  %v3282_v31 = vsel %vm3278_vm8, %v3217_v3, %v10236_v16  ;;  %v3346_v56 = vsel %vm3343_vm9, %v3281_v24, %v2702_v38  ;;  %2817 = vrot.lane.b32.xlu0 %v837_v32, %s8498_s1  ;;  %v8378_v32 = vld [vmem:[#allocation2 + $0x80] sm:$0xff]  ;;  %v14536_v38 = vld [vmem:[#allocation228_spill] sm:$0xff] }
 0x431   :  { %v2700_v45 = vpop.permute.xlu1 %2699  ;;  %v3089_v59 = vsel %vm3083_vm5, %v3024_v15, %v9649_v33  ;;  %v3153_v18 = vsel %vm3148_vm6, %v3088_v4, %v9839_v26  ;;  %v2960_v61 = vsel %vm2953_vm3, %v10427_v60, %v9269_v51  ;;  %v839_v33 = vld [vmem:[#allocation2 + $0x34a] sm:$0xff]  ;;  %v2961_v26 = vsel %vm2953_vm3, %v10431_v62, %v9271_v23  ;;  %v14534_v53 = vld [vmem:[#allocation3_spill] sm:$0xff] }
 0x432   :  { %v3345_v0 = vsel %vm3343_vm9, %v3280_v11, %v2700_v45  ;;  %v3154_v42 = vsel %vm3148_vm6, %v3089_v59, %v9841_v49  ;;  %v3218_v16 = vsel %vm3213_vm7, %v3153_v18, %v10031_v41  ;;  %v3025_v1 = vsel %vm3018_vm4, %v2960_v61, %v9461_v47  ;;  %v840_v41 = vld [vmem:[#allocation2 + $0x352] sm:$0xff]  ;;  %v14535_v3 = vld [vmem:[#allocation171_spill] sm:$0xff] }
 0x433   :  { %2815 = vrot.lane.b32.xlu1 %v836_v13, %s8498_s1  ;;  %8143 = vmatmul.mubr.msk.f32.vlgmr.msra.gmra.mrb[0].mxu0 %vm3420_vm10, %v3345_v0  ;;  %v3219_v51 = vsel %vm3213_vm7, %v3154_v42, %v10033_v55  ;;  %v3283_v49 = vsel %vm3278_vm8, %v3218_v16, %v10240_v34  ;;  %v2706_v60 = vpop.permute.xlu0 %2705  ;;  %v3026_v27 = vsel %vm3018_vm4, %v2961_v26, %v9463_v44  ;;  %v14524_v44 = vld [vmem:[#allocation56_spill] sm:$0xff]  ;;  %v8379_v4 = vld [vmem:[#allocation2 + $0x90] sm:$0xff]  ;;  %v14540_v61 = vld [vmem:[#allocation286_spill] sm:$0xff] }
 0x434   :  { %8145 = vmatprep.mubr.msk.f32.mxu0 %vm3420_vm10, %v3346_v56  ;;  %v3090_v8 = vsel %vm3083_vm5, %v3025_v1, %v14520_v20  ;;  %v3284_v23 = vsel %vm3278_vm8, %v3219_v51, %v14521_v37  ;;  %v3348_v62 = vsel %vm3343_vm9, %v3283_v49, %v2706_v60  ;;  %v3091_v55 = vsel %vm3083_vm5, %v3026_v27, %v14522_v14  ;;  %v14539_v18 = vld [vmem:[#allocation229_spill] sm:$0xff]  ;;  %v14541_v16 = vld [vmem:[#allocation59_spill] sm:$0xff]  ;;  %v14542_v26 = vld [vmem:[#allocation114_spill] sm:$0xff] }
 0x435   :  { %v2704_v35 = vpop.permute.xlu1 %2703  ;;  %v3155_v34 = vsel %vm3148_vm6, %v3090_v8, %v14523_v10  ;;  %2821 = vrot.lane.b32.xlu0 %v839_v33, %s8498_s1  ;;  %v2962_v30 = vsel %vm2953_vm3, %v10438_v29, %v14524_v44  ;;  %v3156_v12 = vsel %vm3148_vm6, %v3091_v55, %v14525_v54  ;;  %v2963_v63 = vsel %vm2953_vm3, %v10448_v19, %v14527_v58  ;;  %v14543_v51 = vld [vmem:[#allocation287_spill] sm:$0xff]  ;;  %v14544_v60 = vld [vmem:[#allocation345_spill] sm:$0xff]  ;;  %v14546_v8 = vld [vmem:[#allocation172_spill] sm:$0xff] }
 0x436   :  { %v3347_v22 = vsel %vm3343_vm9, %v3282_v31, %v2704_v35  ;;  %v3220_v46 = vsel %vm3213_vm7, %v3155_v34, %v14526_v25  ;;  %v3027_v13 = vsel %vm3018_vm4, %v2962_v30, %v14528_v52  ;;  %v3221_v29 = vsel %vm3213_vm7, %v3156_v12, %v14529_v17  ;;  %v14537_v31 = vld [vmem:[#allocation4_spill] sm:$0xff]  ;;  %v14538_v35 = vld [vmem:[#allocation58_spill] sm:$0xff]  ;;  %v14545_v27 = vld [vmem:[#allocation115_spill] sm:$0xff] }
 0x437   :  { %2819 = vrot.lane.b32.xlu1 %v838_v7, %s8498_s1  ;;  %8146 = vmatmul.mubr.msk.f32.gmra.mrb[2].mxu0 %vm3420_vm10, %v3347_v22  ;;  %v3285_v11 = vsel %vm3278_vm8, %v3220_v46, %v14530_v57  ;;  %v2710_v45 = vpop.permute.xlu0 %2709  ;;  %v3028_v40 = vsel %vm3018_vm4, %v2963_v63, %v14531_v50  ;;  %v3092_v0 = vsel %vm3083_vm5, %v3027_v13, %v14532_v36  ;;  %v8380_v55 = vld [vmem:[#allocation2 + $0x98] sm:$0xff]  ;;  %v14548_v10 = vld [vmem:[#allocation5_spill] sm:$0xff]  ;;  %v8381_v25 = vld [vmem:[#allocation2 + $0xa8] sm:$0xff] }
 0x438   :  { %8148 = vmatprep.mubr.msk.f32.mxu0 %vm3420_vm10, %v3348_v62  ;;  %v3286_v21 = vsel %vm3278_vm8, %v3221_v29, %v14533_v48  ;;  %v3350_v19 = vsel %vm3343_vm9, %v3285_v11, %v2710_v45  ;;  %v2900_v2 = vsel %vm24_vm0, %v8378_v32, %v14534_v53  ;;  %v3093_v24 = vsel %vm3083_vm5, %v3028_v40, %v14535_v3  ;;  %v14550_v30 = vld [vmem:[#allocation230_spill] sm:$0xff]  ;;  %v14552_v63 = vld [vmem:[#allocation60_spill] sm:$0xff]  ;;  %v14553_v13 = vld [vmem:[#allocation231_spill] sm:$0xff] }
 0x439   :  { %v2708_v47 = vpop.permute.xlu1 %2707  ;;  %v3157_v7 = vsel %vm3148_vm6, %v3092_v0, %v14536_v38  ;;  %v2901_v56 = vsel %vm24_vm0, %v8379_v4, %v14537_v31  ;;  %v2964_v59 = vsel %vm2953_vm3, %v10458_v43, %v14538_v35  ;;  %v3158_v22 = vsel %vm3148_vm6, %v3093_v24, %v14539_v18  ;;  %v14551_v46 = vld [vmem:[#allocation6_spill] sm:$0xff]  ;;  %v14554_v29 = vld [vmem:[#allocation288_spill] sm:$0xff]  ;;  %v14555_v11 = vld [vmem:[#allocation61_spill] sm:$0xff] }
 0x43a   :  { %v3349_v5 = vsel %vm3343_vm9, %v3284_v23, %v2708_v47  ;;  %v3222_v42 = vsel %vm3213_vm7, %v3157_v7, %v14540_v61  ;;  %v2965_v33 = vsel %vm2953_vm3, %v2900_v2, %v14541_v16  ;;  %v3029_v1 = vsel %vm3018_vm4, %v2964_v59, %v14542_v26  ;;  %v14547_v23 = vld [vmem:[#allocation346_spill] sm:$0xff]  ;;  %v14556_v50 = vld [vmem:[#allocation116_spill] sm:$0xff]  ;;  %v14557_v36 = vld [vmem:[#allocation289_spill] sm:$0xff] }
 0x43b   :  { %2823 = vrot.lane.b32.xlu1 %v840_v41, %s8498_s1  ;;  %8149 = vmatmul.mubr.msk.f32.gmra.mrb[4].mxu0 %vm3420_vm10, %v3349_v5  ;;  %v3223_v49 = vsel %vm3213_vm7, %v3158_v22, %v14543_v51  ;;  %v3287_v43 = vsel %vm3278_vm8, %v3222_v42, %v14544_v60  ;;  %v2714_v41 = vpop.permute.xlu0 %2713  ;;  %v3030_v20 = vsel %vm3018_vm4, %v2965_v33, %v14545_v27  ;;  %v14549_v5 = vld [vmem:[#allocation173_spill] sm:$0xff]  ;;  %v14558_v48 = vld [vmem:[#allocation347_spill] sm:$0xff]  ;;  %v14560_v53 = vld [vmem:[#allocation174_spill] sm:$0xff] }
 0x43c   :  { %8151 = vmatprep.mubr.msk.f32.mxu0 %vm3420_vm10, %v3350_v19  ;;  %v3094_v37 = vsel %vm3083_vm5, %v3029_v1, %v14546_v8  ;;  %v3288_v62 = vsel %vm3278_vm8, %v3223_v49, %v14547_v23  ;;  %v3352_v47 = vsel %vm3343_vm9, %v3287_v43, %v2714_v41  ;;  %v2902_v34 = vsel %vm24_vm0, %v8380_v55, %v14548_v10  ;;  %v14561_v3 = vld [vmem:[#allocation348_spill] sm:$0xff]  ;;  %v14562_v4 = vld [vmem:[#allocation7_spill] sm:$0xff]  ;;  %v14566_v33 = vld [vmem:[#allocation62_spill] sm:$0xff] }
 0x43d   :  { %v2712_v9 = vpop.permute.xlu1 %2711  ;;  %v3095_v44 = vsel %vm3083_vm5, %v3030_v20, %v14549_v5  ;;  %v3159_v54 = vsel %vm3148_vm6, %v3094_v37, %v14550_v30  ;;  %v2903_v58 = vsel %vm24_vm0, %v8381_v25, %v14551_v46  ;;  %v2966_v52 = vsel %vm2953_vm3, %v2901_v56, %v14552_v63  ;;  %v14563_v56 = vld [vmem:[#allocation175_spill] sm:$0xff]  ;;  %v14564_v59 = vld [vmem:[#allocation232_spill] sm:$0xff]  ;;  %v14567_v1 = vld [vmem:[#allocation233_spill] sm:$0xff] }
 0x43e   :  { %v3351_v15 = vsel %vm3343_vm9, %v3286_v21, %v2712_v9  ;;  %v3160_v17 = vsel %vm3148_vm6, %v3095_v44, %v14553_v13  ;;  %v3224_v57 = vsel %vm3213_vm7, %v3159_v54, %v14554_v29  ;;  %v2967_v45 = vsel %vm2953_vm3, %v2902_v34, %v14555_v11  ;;  %v14559_v9 = vld [vmem:[#allocation117_spill] sm:$0xff]  ;;  %v8383_v61 = vld [vmem:[#allocation2 + $0xc0] sm:$0xff]  ;;  %v14565_v42 = vld [vmem:[#allocation8_spill] sm:$0xff] }
 0x43f   :  { %8152 = vmatmul.mubr.msk.f32.gmra.mrb[6].mxu0 %vm3420_vm10, %v3351_v15  ;;  %v3031_v40 = vsel %vm3018_vm4, %v2966_v52, %v14556_v50  ;;  %v3225_v0 = vsel %vm3213_vm7, %v3160_v17, %v14557_v36  ;;  %v3289_v21 = vsel %vm3278_vm8, %v3224_v57, %v14558_v48  ;;  %v2718_v19 = vpop.permute.xlu0 %2717  ;;  %v3032_v32 = vsel %vm3018_vm4, %v2967_v45, %v14559_v9  ;;  %v8382_v15 = vld [vmem:[#allocation2 + $0xb0] sm:$0xff]  ;;  %v14568_v49 = vld [vmem:[#allocation290_spill] sm:$0xff]  ;;  %v14569_v43 = vld [vmem:[#allocation63_spill] sm:$0xff] }
 0x440   :  { %8154 = vmatprep.mubr.msk.f32.mxu0 %vm3420_vm10, %v3352_v47  ;;  %v3096_v2 = vsel %vm3083_vm5, %v3031_v40, %v14560_v53  ;;  %v3290_v24 = vsel %vm3278_vm8, %v3225_v0, %v14561_v3  ;;  %v3354_v38 = vsel %vm3343_vm9, %v3289_v21, %v2718_v19  ;;  %v2904_v31 = vsel %vm24_vm0, %v8382_v15, %v14562_v4  ;;  %v14570_v27 = vld [vmem:[#allocation118_spill] sm:$0xff]  ;;  %v14571_v8 = vld [vmem:[#allocation291_spill] sm:$0xff]  ;;  %v14572_v23 = vld [vmem:[#allocation349_spill] sm:$0xff] }
 0x441   :  { %v2716_v14 = vpop.permute.xlu1 %2715  ;;  %v3097_v35 = vsel %vm3083_vm5, %v3032_v32, %v14563_v56  ;;  %v3161_v18 = vsel %vm3148_vm6, %v3096_v2, %v14564_v59  ;;  %v2905_v16 = vsel %vm24_vm0, %v8383_v61, %v14565_v42  ;;  %v2968_v26 = vsel %vm2953_vm3, %v2903_v58, %v14566_v33  ;;  %v14574_v10 = vld [vmem:[#allocation176_spill] sm:$0xff]  ;;  %v14575_v5 = vld [vmem:[#allocation350_spill] sm:$0xff]  ;;  %v14576_v25 = vld [vmem:[#allocation9_spill] sm:$0xff] }
 0x442   :  { %v3353_v12 = vsel %vm3343_vm9, %v3288_v62, %v2716_v14  ;;  %v3162_v51 = vsel %vm3148_vm6, %v3097_v35, %v14567_v1  ;;  %v3226_v60 = vsel %vm3213_vm7, %v3161_v18, %v14568_v49  ;;  %v2969_v41 = vsel %vm2953_vm3, %v2904_v31, %v14569_v43  ;;  %v14573_v14 = vld [vmem:[#allocation119_spill] sm:$0xff]  ;;  %v14577_v58 = vld [vmem:[#allocation177_spill] sm:$0xff]  ;;  %v14578_v52 = vld [vmem:[#allocation234_spill] sm:$0xff] }
 0x443   :  { %8155 = vmatmul.mubr.msk.f32.gmra.mrb[8].mxu0 %vm3420_vm10, %v3353_v12  ;;  %v3033_v20 = vsel %vm3018_vm4, %v2968_v26, %v14570_v27  ;;  %v3227_v37 = vsel %vm3213_vm7, %v3162_v51, %v14571_v8  ;;  %v3291_v62 = vsel %vm3278_vm8, %v3226_v60, %v14572_v23  ;;  %v2722_v47 = vpop.permute.xlu0 %2721  ;;  %v3034_v55 = vsel %vm3018_vm4, %v2969_v41, %v14573_v14  ;;  %v8384_v12 = vld [vmem:[#allocation2 + $0xc8] sm:$0xff]  ;;  %v8385_v29 = vld [vmem:[#allocation2 + $0xd8] sm:$0xff]  ;;  %v14581_v40 = vld [vmem:[#allocation235_spill] sm:$0xff] }
 0x444   :  { %8157 = vmatprep.mubr.msk.f32.mxu0 %vm3420_vm10, %v3354_v38  ;;  %v3098_v34 = vsel %vm3083_vm5, %v3033_v20, %v14574_v10  ;;  %v3292_v44 = vsel %vm3278_vm8, %v3227_v37, %v14575_v5  ;;  %v3356_v30 = vsel %vm3343_vm9, %v3291_v62, %v2722_v47  ;;  %v2906_v46 = vsel %vm24_vm0, %v8384_v12, %v14576_v25  ;;  %v14579_v57 = vld [vmem:[#allocation10_spill] sm:$0xff]  ;;  %v14580_v45 = vld [vmem:[#allocation64_spill] sm:$0xff]  ;;  %v14583_v21 = vld [vmem:[#allocation65_spill] sm:$0xff] }
 0x445   :  { %v2720_v7 = vpop.permute.xlu1 %2719  ;;  %v3099_v63 = vsel %vm3083_vm5, %v3034_v55, %v14577_v58  ;;  %v3163_v13 = vsel %vm3148_vm6, %v3098_v34, %v14578_v52  ;;  %v2907_v11 = vsel %vm24_vm0, %v8385_v29, %v14579_v57  ;;  %v2970_v50 = vsel %vm2953_vm3, %v2905_v16, %v14580_v45  ;;  %v14582_v0 = vld [vmem:[#allocation292_spill] sm:$0xff]  ;;  %v14585_v53 = vld [vmem:[#allocation293_spill] sm:$0xff]  ;;  %v14586_v3 = vld [vmem:[#allocation351_spill] sm:$0xff] }
 0x446   :  { %v3355_v22 = vsel %vm3343_vm9, %v3290_v24, %v2720_v7  ;;  %v3164_v36 = vsel %vm3148_vm6, %v3099_v63, %v14581_v40  ;;  %v3228_v48 = vsel %vm3213_vm7, %v3163_v13, %v14582_v0  ;;  %v2971_v19 = vsel %vm2953_vm3, %v2906_v46, %v14583_v21  ;;  %v14584_v9 = vld [vmem:[#allocation120_spill] sm:$0xff]  ;;  %v14587_v7 = vld [vmem:[#allocation121_spill] sm:$0xff]  ;;  %v14588_v4 = vld [vmem:[#allocation178_spill] sm:$0xff] }
 0x447   :  { %8158 = vmatmul.mubr.msk.f32.gmra.mrb[10].mxu0 %vm3420_vm10, %v3355_v22  ;;  %v3035_v32 = vsel %vm3018_vm4, %v2970_v50, %v14584_v9  ;;  %v3229_v2 = vsel %vm3213_vm7, %v3164_v36, %v14585_v53  ;;  %v3293_v24 = vsel %vm3278_vm8, %v3228_v48, %v14586_v3  ;;  %v2726_v38 = vpop.permute.xlu0 %2725  ;;  %v3036_v15 = vsel %vm3018_vm4, %v2971_v19, %v14587_v7  ;;  %v14589_v56 = vld [vmem:[#allocation352_spill] sm:$0xff]  ;;  %v8386_v22 = vld [vmem:[#allocation2 + $0xe0] sm:$0xff]  ;;  %v8387_v49 = vld [vmem:[#allocation2 + $0xf0] sm:$0xff] }
 0x448   :  { %8160 = vmatprep.mubr.msk.f32.mxu0 %vm3420_vm10, %v3356_v30  ;;  %v3100_v31 = vsel %vm3083_vm5, %v3035_v32, %v14588_v4  ;;  %v3294_v35 = vsel %vm3278_vm8, %v3229_v2, %v14589_v56  ;;  %v3358_v59 = vsel %vm3343_vm9, %v3293_v24, %v2726_v38  ;;  %v14590_v61 = vld [vmem:[#allocation11_spill] sm:$0xff]  ;;  %v14592_v26 = vld [vmem:[#allocation236_spill] sm:$0xff]  ;;  %v14594_v41 = vld [vmem:[#allocation66_spill] sm:$0xff] }
 0x449   :  { %v2724_v54 = vpop.permute.xlu1 %2723  ;;  %v2908_v42 = vsel %vm24_vm0, %v8386_v22, %v14590_v61  ;;  %v14591_v16 = vld [vmem:[#allocation179_spill] sm:$0xff]  ;;  %v3165_v1 = vsel %vm3148_vm6, %v3100_v31, %v14592_v26  ;;  %v14593_v60 = vld [vmem:[#allocation12_spill] sm:$0xff]  ;;  %v2972_v27 = vsel %vm2953_vm3, %v2907_v11, %v14594_v41  ;;  %v14595_v20 = vld [vmem:[#allocation237_spill] sm:$0xff] }
 0x44a   :  { %v3357_v17 = vsel %vm3343_vm9, %v3292_v44, %v2724_v54  ;;  %v3101_v33 = vsel %vm3083_vm5, %v3036_v15, %v14591_v16  ;;  %v2909_v43 = vsel %vm24_vm0, %v8387_v49, %v14593_v60  ;;  %v14596_v37 = vld [vmem:[#allocation294_spill] sm:$0xff]  ;;  %v14597_v62 = vld [vmem:[#allocation67_spill] sm:$0xff]  ;;  %v14600_v5 = vld [vmem:[#allocation353_spill] sm:$0xff] }
 0x44b   :  { %8161 = vmatmul.mubr.msk.f32.gmra.mrb[12].mxu0 %vm3420_vm10, %v3357_v17  ;;  %v3166_v8 = vsel %vm3148_vm6, %v3101_v33, %v14595_v20  ;;  %v3230_v23 = vsel %vm3213_vm7, %v3165_v1, %v14596_v37  ;;  %v2973_v47 = vsel %vm2953_vm3, %v2908_v42, %v14597_v62  ;;  %v14598_v14 = vld [vmem:[#allocation122_spill] sm:$0xff]  ;;  %v14599_v10 = vld [vmem:[#allocation295_spill] sm:$0xff]  ;;  %v2730_v30 = vpop.permute.xlu0 %2729  ;;  %v14602_v25 = vld [vmem:[#allocation180_spill] sm:$0xff] }
 0x44c   :  { %8163 = vmatprep.mubr.msk.f32.mxu0 %vm3420_vm10, %v3358_v59  ;;  %v3037_v55 = vsel %vm3018_vm4, %v2972_v27, %v14598_v14  ;;  %v3231_v34 = vsel %vm3213_vm7, %v3166_v8, %v14599_v10  ;;  %v3295_v44 = vsel %vm3278_vm8, %v3230_v23, %v14600_v5  ;;  %v14601_v54 = vld [vmem:[#allocation123_spill] sm:$0xff]  ;;  %v14603_v58 = vld [vmem:[#allocation354_spill] sm:$0xff]  ;;  %v14604_v29 = vld [vmem:[#allocation13_spill] sm:$0xff] }
 0x44d   :  { %v2728_v18 = vpop.permute.xlu1 %2727  ;;  %v3038_v12 = vsel %vm3018_vm4, %v2973_v47, %v14601_v54  ;;  %v3102_v46 = vsel %vm3083_vm5, %v3037_v55, %v14602_v25  ;;  %v3296_v63 = vsel %vm3278_vm8, %v3231_v34, %v14603_v58  ;;  %v3360_v52 = vsel %vm3343_vm9, %v3295_v44, %v2730_v30  ;;  %v8388_v17 = vld [vmem:[#allocation2 + $0xf8] sm:$0xff]  ;;  %v14605_v11 = vld [vmem:[#allocation181_spill] sm:$0xff]  ;;  %v8389_v0 = vld [vmem:[#allocation2 + $0x108] sm:$0xff] }
 0x44e   :  { %v3359_v51 = vsel %vm3343_vm9, %v3294_v35, %v2728_v18  ;;  %v2910_v57 = vsel %vm24_vm0, %v8388_v17, %v14604_v29  ;;  %v3103_v45 = vsel %vm3083_vm5, %v3038_v12, %v14605_v11  ;;  %v14606_v50 = vld [vmem:[#allocation238_spill] sm:$0xff]  ;;  %v14608_v19 = vld [vmem:[#allocation68_spill] sm:$0xff]  ;;  %v14609_v32 = vld [vmem:[#allocation239_spill] sm:$0xff] }
 0x44f   :  { %8164 = vmatmul.mubr.msk.f32.gmra.mrb[14].mxu0 %vm3420_vm10, %v3359_v51  ;;  %v3167_v40 = vsel %vm3148_vm6, %v3102_v46, %v14606_v50  ;;  %v14607_v48 = vld [vmem:[#allocation14_spill] sm:$0xff]  ;;  %v2974_v9 = vsel %vm2953_vm3, %v2909_v43, %v14608_v19  ;;  %v3168_v53 = vsel %vm3148_vm6, %v3103_v45, %v14609_v32  ;;  %v14610_v2 = vld [vmem:[#allocation296_spill] sm:$0xff]  ;;  %v14611_v24 = vld [vmem:[#allocation69_spill] sm:$0xff]  ;;  %v2734_v59 = vpop.permute.xlu0 %2733 }
 0x450   :  { %8166 = vmatprep.mubr.msk.f32.mxu0 %vm3420_vm10, %v3360_v52  ;;  %v2911_v21 = vsel %vm24_vm0, %v8389_v0, %v14607_v48  ;;  %v3232_v3 = vsel %vm3213_vm7, %v3167_v40, %v14610_v2  ;;  %v2975_v38 = vsel %vm2953_vm3, %v2910_v57, %v14611_v24  ;;  %v14612_v7 = vld [vmem:[#allocation124_spill] sm:$0xff]  ;;  %v14613_v4 = vld [vmem:[#allocation297_spill] sm:$0xff]  ;;  %v14614_v56 = vld [vmem:[#allocation355_spill] sm:$0xff] }
 0x451   :  { %v2732_v13 = vpop.permute.xlu1 %2731  ;;  %v3039_v15 = vsel %vm3018_vm4, %v2974_v9, %v14612_v7  ;;  %v3233_v31 = vsel %vm3213_vm7, %v3168_v53, %v14613_v4  ;;  %v3297_v35 = vsel %vm3278_vm8, %v3232_v3, %v14614_v56  ;;  %v14615_v18 = vld [vmem:[#allocation125_spill] sm:$0xff]  ;;  %v14616_v61 = vld [vmem:[#allocation182_spill] sm:$0xff]  ;;  %v14617_v16 = vld [vmem:[#allocation356_spill] sm:$0xff] }
 0x452   :  { %v3361_v36 = vsel %vm3343_vm9, %v3296_v63, %v2732_v13  ;;  %v3040_v22 = vsel %vm3018_vm4, %v2975_v38, %v14615_v18  ;;  %v3104_v42 = vsel %vm3083_vm5, %v3039_v15, %v14616_v61  ;;  %v3298_v33 = vsel %vm3278_vm8, %v3233_v31, %v14617_v16  ;;  %v8390_v51 = vld [vmem:[#allocation2 + $0x110] sm:$0xff]  ;;  %v14618_v49 = vld [vmem:[#allocation15_spill] sm:$0xff]  ;;  %v14620_v27 = vld [vmem:[#allocation240_spill] sm:$0xff] }
 0x453   :  { %8167 = vmatmul.mubr.msk.f32.gmra.mrb[16].mxu0 %vm3420_vm10, %v3361_v36  ;;  %v3362_v26 = vsel %vm3343_vm9, %v3297_v35, %v2734_v59  ;;  %v2912_v60 = vsel %vm24_vm0, %v8390_v51, %v14618_v49  ;;  %v14619_v43 = vld [vmem:[#allocation183_spill] sm:$0xff]  ;;  %v3169_v20 = vsel %vm3148_vm6, %v3104_v42, %v14620_v27  ;;  %v14621_v23 = vld [vmem:[#allocation16_spill] sm:$0xff]  ;;  %v14622_v47 = vld [vmem:[#allocation70_spill] sm:$0xff]  ;;  %v2738_v52 = vpop.permute.xlu0 %2737 }
 0x454   :  { %v3105_v41 = vsel %vm3083_vm5, %v3040_v22, %v14619_v43  ;;  %8169 = vmatprep.mubr.msk.f32.mxu0 %vm3420_vm10, %v3362_v26  ;;  %v8391_v37 = vld [vmem:[#allocation2 + $0x120] sm:$0xff]  ;;  %v2976_v14 = vsel %vm2953_vm3, %v2911_v21, %v14622_v47  ;;  %v14623_v55 = vld [vmem:[#allocation241_spill] sm:$0xff]  ;;  %v14624_v34 = vld [vmem:[#allocation298_spill] sm:$0xff] }
 0x455   :  { %v2736_v1 = vpop.permute.xlu1 %2735  ;;  %v2913_v62 = vsel %vm24_vm0, %v8391_v37, %v14621_v23  ;;  %v3170_v10 = vsel %vm3148_vm6, %v3105_v41, %v14623_v55  ;;  %v3234_v5 = vsel %vm3213_vm7, %v3169_v20, %v14624_v34  ;;  %v14625_v44 = vld [vmem:[#allocation71_spill] sm:$0xff]  ;;  %v14626_v54 = vld [vmem:[#allocation126_spill] sm:$0xff]  ;;  %v14628_v58 = vld [vmem:[#allocation357_spill] sm:$0xff] }
 0x456   :  { %v3363_v8 = vsel %vm3343_vm9, %v3298_v33, %v2736_v1  ;;  %v2977_v30 = vsel %vm2953_vm3, %v2912_v60, %v14625_v44  ;;  %v3041_v12 = vsel %vm3018_vm4, %v2976_v14, %v14626_v54  ;;  %v14627_v25 = vld [vmem:[#allocation299_spill] sm:$0xff]  ;;  %v3299_v63 = vsel %vm3278_vm8, %v3234_v5, %v14628_v58  ;;  %v14630_v29 = vld [vmem:[#allocation184_spill] sm:$0xff]  ;;  %v14631_v11 = vld [vmem:[#allocation358_spill] sm:$0xff] }
 0x457   :  { %8170 = vmatmul.mubr.msk.f32.gmra.mrb[18].mxu0 %vm3420_vm10, %v3363_v8  ;;  %v3235_v46 = vsel %vm3213_vm7, %v3170_v10, %v14627_v25  ;;  %v14629_v13 = vld [vmem:[#allocation127_spill] sm:$0xff]  ;;  %v3106_v57 = vsel %vm3083_vm5, %v3041_v12, %v14630_v29  ;;  %v3364_v50 = vsel %vm3343_vm9, %v3299_v63, %v2738_v52  ;;  %v8392_v36 = vld [vmem:[#allocation2 + $0x128] sm:$0xff]  ;;  %v14632_v0 = vld [vmem:[#allocation17_spill] sm:$0xff]  ;;  %v2742_v26 = vpop.permute.xlu0 %2741 }
 0x458   :  { %v3042_v17 = vsel %vm3018_vm4, %v2977_v30, %v14629_v13  ;;  %v3300_v45 = vsel %vm3278_vm8, %v3235_v46, %v14631_v11  ;;  %v2914_v48 = vsel %vm24_vm0, %v8392_v36, %v14632_v0  ;;  %v14633_v21 = vld [vmem:[#allocation185_spill] sm:$0xff]  ;;  %v14634_v9 = vld [vmem:[#allocation242_spill] sm:$0xff]  ;;  %8172 = vmatprep.mubr.msk.f32.mxu0 %vm3420_vm10, %v3364_v50  ;;  %v14636_v38 = vld [vmem:[#allocation72_spill] sm:$0xff] }
 0x459   :  { %v2740_v40 = vpop.permute.xlu1 %2739  ;;  %v3107_v19 = vsel %vm3083_vm5, %v3042_v17, %v14633_v21  ;;  %v3171_v32 = vsel %vm3148_vm6, %v3106_v57, %v14634_v9  ;;  %v8393_v2 = vld [vmem:[#allocation2 + $0x138] sm:$0xff]  ;;  %v2978_v7 = vsel %vm2953_vm3, %v2913_v62, %v14636_v38  ;;  %v14637_v15 = vld [vmem:[#allocation243_spill] sm:$0xff]  ;;  %v14638_v31 = vld [vmem:[#allocation300_spill] sm:$0xff] }
 0x45a   :  { %v3365_v53 = vsel %vm3343_vm9, %v3300_v45, %v2740_v40  ;;  %v14635_v3 = vld [vmem:[#allocation18_spill] sm:$0xff]  ;;  %v3172_v4 = vsel %vm3148_vm6, %v3107_v19, %v14637_v15  ;;  %v3236_v56 = vsel %vm3213_vm7, %v3171_v32, %v14638_v31  ;;  %v14639_v35 = vld [vmem:[#allocation73_spill] sm:$0xff]  ;;  %v14640_v18 = vld [vmem:[#allocation128_spill] sm:$0xff] }
 0x45b   :  { %v2915_v24 = vsel %vm24_vm0, %v8393_v2, %v14635_v3  ;;  %8173 = vmatmul.mubr.msk.f32.gmra.mrb[20].mxu0 %vm3420_vm10, %v3365_v53  ;;  %v2979_v59 = vsel %vm2953_vm3, %v2914_v48, %v14639_v35  ;;  %v3043_v22 = vsel %vm3018_vm4, %v2978_v7, %v14640_v18  ;;  %v14641_v61 = vld [vmem:[#allocation301_spill] sm:$0xff]  ;;  %v14642_v16 = vld [vmem:[#allocation359_spill] sm:$0xff]  ;;  %v14644_v49 = vld [vmem:[#allocation186_spill] sm:$0xff]  ;;  %v2746_v50 = vpop.permute.xlu0 %2745 }
 0x45c   :  { %v3237_v42 = vsel %vm3213_vm7, %v3172_v4, %v14641_v61  ;;  %v3301_v33 = vsel %vm3278_vm8, %v3236_v56, %v14642_v16  ;;  %v14643_v1 = vld [vmem:[#allocation129_spill] sm:$0xff]  ;;  %v3108_v60 = vsel %vm3083_vm5, %v3043_v22, %v14644_v49  ;;  %v14645_v43 = vld [vmem:[#allocation360_spill] sm:$0xff]  ;;  %v8394_v8 = vld [vmem:[#allocation2 + $0x140] sm:$0xff] }
 0x45d   :  { %v3044_v51 = vsel %vm3018_vm4, %v2979_v59, %v14643_v1  ;;  %v3302_v41 = vsel %vm3278_vm8, %v3237_v42, %v14645_v43  ;;  %v3366_v27 = vsel %vm3343_vm9, %v3301_v33, %v2742_v26  ;;  %v2744_v20 = vpop.permute.xlu1 %2743  ;;  %v14646_v37 = vld [vmem:[#allocation19_spill] sm:$0xff]  ;;  %v14648_v14 = vld [vmem:[#allocation244_spill] sm:$0xff]  ;;  %v8395_v34 = vld [vmem:[#allocation2 + $0x150] sm:$0xff] }
 0x45e   :  { %v2916_v23 = vsel %vm24_vm0, %v8394_v8, %v14646_v37  ;;  %v14647_v62 = vld [vmem:[#allocation187_spill] sm:$0xff]  ;;  %v3173_v55 = vsel %vm3148_vm6, %v3108_v60, %v14648_v14  ;;  %v3367_v10 = vsel %vm3343_vm9, %v3302_v41, %v2744_v20  ;;  %8175 = vmatprep.mubr.msk.f32.mxu0 %vm3420_vm10, %v3366_v27  ;;  %v14649_v5 = vld [vmem:[#allocation20_spill] sm:$0xff]  ;;  %v14650_v30 = vld [vmem:[#allocation74_spill] sm:$0xff] }
 0x45f   :  { %v3109_v47 = vsel %vm3083_vm5, %v3044_v51, %v14647_v62  ;;  %v2917_v44 = vsel %vm24_vm0, %v8395_v34, %v14649_v5  ;;  %v2980_v54 = vsel %vm2953_vm3, %v2915_v24, %v14650_v30  ;;  %v14651_v12 = vld [vmem:[#allocation245_spill] sm:$0xff]  ;;  %v14652_v46 = vld [vmem:[#allocation302_spill] sm:$0xff]  ;;  %8176 = vmatmul.mubr.msk.f32.gmra.mrb[22].mxu0 %vm3420_vm10, %v3367_v10  ;;  %v14653_v63 = vld [vmem:[#allocation75_spill] sm:$0xff]  ;;  %v2750_v20 = vpop.permute.xlu0 %2749 }
 0x460   :  { %v3174_v25 = vsel %vm3148_vm6, %v3109_v47, %v14651_v12  ;;  %v3238_v58 = vsel %vm3213_vm7, %v3173_v55, %v14652_v46  ;;  %v2981_v52 = vsel %vm2953_vm3, %v2916_v23, %v14653_v63  ;;  %v14654_v13 = vld [vmem:[#allocation130_spill] sm:$0xff]  ;;  %v14655_v29 = vld [vmem:[#allocation303_spill] sm:$0xff]  ;;  %v14656_v11 = vld [vmem:[#allocation361_spill] sm:$0xff] }
 0x461   :  { %v3045_v17 = vsel %vm3018_vm4, %v2980_v54, %v14654_v13  ;;  %v3239_v57 = vsel %vm3213_vm7, %v3174_v25, %v14655_v29  ;;  %v3303_v45 = vsel %vm3278_vm8, %v3238_v58, %v14656_v11  ;;  %v14657_v40 = vld [vmem:[#allocation131_spill] sm:$0xff]  ;;  %v14658_v0 = vld [vmem:[#allocation188_spill] sm:$0xff]  ;;  %v14659_v21 = vld [vmem:[#allocation362_spill] sm:$0xff]  ;;  %v2748_v32 = vpop.permute.xlu1 %2747 }
 0x462   :  { %v3046_v36 = vsel %vm3018_vm4, %v2981_v52, %v14657_v40  ;;  %v3110_v48 = vsel %vm3083_vm5, %v3045_v17, %v14658_v0  ;;  %v3304_v19 = vsel %vm3278_vm8, %v3239_v57, %v14659_v21  ;;  %v3368_v9 = vsel %vm3343_vm9, %v3303_v45, %v2746_v50  ;;  %v8396_v53 = vld [vmem:[#allocation2 + $0x158] sm:$0xff]  ;;  %v14660_v2 = vld [vmem:[#allocation21_spill] sm:$0xff]  ;;  %v8397_v31 = vld [vmem:[#allocation2 + $0x168] sm:$0xff] }
 0x463   :  { %v2918_v3 = vsel %vm24_vm0, %v8396_v53, %v14660_v2  ;;  %v14661_v24 = vld [vmem:[#allocation189_spill] sm:$0xff]  ;;  %v14662_v7 = vld [vmem:[#allocation246_spill] sm:$0xff]  ;;  %v3369_v4 = vsel %vm3343_vm9, %v3304_v19, %v2748_v32  ;;  %8178 = vmatprep.mubr.msk.f32.mxu0 %vm3420_vm10, %v3368_v9  ;;  %v14664_v59 = vld [vmem:[#allocation76_spill] sm:$0xff]  ;;  %v2754_v32 = vpop.permute.xlu0 %2753 }
 0x464   :  { %v3111_v38 = vsel %vm3083_vm5, %v3046_v36, %v14661_v24  ;;  %v3175_v15 = vsel %vm3148_vm6, %v3110_v48, %v14662_v7  ;;  %v14663_v56 = vld [vmem:[#allocation22_spill] sm:$0xff]  ;;  %v2982_v18 = vsel %vm2953_vm3, %v2917_v44, %v14664_v59  ;;  %v14665_v22 = vld [vmem:[#allocation247_spill] sm:$0xff]  ;;  %v14666_v42 = vld [vmem:[#allocation304_spill] sm:$0xff]  ;;  %8179 = vmatmul.mubr.msk.f32.gmra.mrb[24].mxu0 %vm3420_vm10, %v3369_v4 }
 0x465   :  { %v2919_v35 = vsel %vm24_vm0, %v8397_v31, %v14663_v56  ;;  %v3176_v61 = vsel %vm3148_vm6, %v3111_v38, %v14665_v22  ;;  %v3240_v16 = vsel %vm3213_vm7, %v3175_v15, %v14666_v42  ;;  %v296_v33 = vld [vmem:[#allocation2 + $0x1b0] sm:$0xff]  ;;  %v14668_v51 = vld [vmem:[#allocation132_spill] sm:$0xff]  ;;  %v14670_v41 = vld [vmem:[#allocation363_spill] sm:$0xff]  ;;  %v2752_v10 = vpop.permute.xlu1 %2751 }
 0x466   :  { %v14667_v26 = vld [vmem:[#allocation77_spill] sm:$0xff]  ;;  %v3047_v49 = vsel %vm3018_vm4, %v2982_v18, %v14668_v51  ;;  %v3305_v27 = vsel %vm3278_vm8, %v3240_v16, %v14670_v41  ;;  %v14672_v23 = vld [vmem:[#allocation190_spill] sm:$0xff]  ;;  %v14673_v47 = vld [vmem:[#allocation364_spill] sm:$0xff] }
 0x467   :  { %v2983_v1 = vsel %vm2953_vm3, %v2918_v3, %v14667_v26  ;;  %v14669_v60 = vld [vmem:[#allocation305_spill] sm:$0xff]  ;;  %v3112_v62 = vsel %vm3083_vm5, %v3047_v49, %v14672_v23  ;;  %v3370_v55 = vsel %vm3343_vm9, %v3305_v27, %v2750_v20  ;;  %v14674_v5 = vld [vmem:[#allocation23_spill] sm:$0xff]  ;;  %v14676_v12 = vld [vmem:[#allocation248_spill] sm:$0xff] }
 0x468   :  { %v3241_v43 = vsel %vm3213_vm7, %v3176_v61, %v14669_v60  ;;  %v14671_v8 = vld [vmem:[#allocation133_spill] sm:$0xff]  ;;  %v14675_v30 = vld [vmem:[#allocation191_spill] sm:$0xff]  ;;  %v3177_v25 = vsel %vm3148_vm6, %v3112_v62, %v14676_v12  ;;  %8181 = vmatprep.mubr.msk.f32.mxu0 %vm3420_vm10, %v3370_v55  ;;  %v14677_v58 = vld [vmem:[#allocation24_spill] sm:$0xff] }
 0x469   :  { %v3048_v37 = vsel %vm3018_vm4, %v2983_v1, %v14671_v8  ;;  %v3306_v14 = vsel %vm3278_vm8, %v3241_v43, %v14673_v47  ;;  %v8398_v34 = vld [vmem:[#allocation2 + $0x170] sm:$0xff]  ;;  %v2921_v63 = vsel %vm24_vm0, %v296_v33, %v14677_v58  ;;  %v297_v52 = vld [vmem:[#allocation2 + $0x1b8] sm:$0xff]  ;;  %v14681_v50 = vld [vmem:[#allocation79_spill] sm:$0xff]  ;;  %v2756_v4 = vpop.permute.xlu1 %2755 }
 0x46a   :  { %v2920_v44 = vsel %vm24_vm0, %v8398_v34, %v14674_v5  ;;  %v3113_v54 = vsel %vm3083_vm5, %v3048_v37, %v14675_v30  ;;  %v3371_v46 = vsel %vm3343_vm9, %v3306_v14, %v2752_v10  ;;  %v14678_v13 = vld [vmem:[#allocation78_spill] sm:$0xff]  ;;  %v14679_v29 = vld [vmem:[#allocation249_spill] sm:$0xff]  ;;  %v14683_v48 = vld [vmem:[#allocation307_spill] sm:$0xff]  ;;  %v2758_v14 = vpop.permute.xlu0 %2757 }
 0x46b   :  { %v2984_v17 = vsel %vm2953_vm3, %v2919_v35, %v14678_v13  ;;  %v3178_v57 = vsel %vm3148_vm6, %v3113_v54, %v14679_v29  ;;  %v14680_v11 = vld [vmem:[#allocation306_spill] sm:$0xff]  ;;  %8182 = vmatmul.mubr.msk.f32.gmra.mrb[26].mxu0 %vm3420_vm10, %v3371_v46  ;;  %v2985_v40 = vsel %vm2953_vm3, %v2920_v44, %v14681_v50  ;;  %v14684_v19 = vld [vmem:[#allocation365_spill] sm:$0xff]  ;;  %v14685_v53 = vld [vmem:[#allocation135_spill] sm:$0xff] }
 0x46c   :  { %v3242_v45 = vsel %vm3213_vm7, %v3177_v25, %v14680_v11  ;;  %v14682_v36 = vld [vmem:[#allocation134_spill] sm:$0xff]  ;;  %v3243_v21 = vsel %vm3213_vm7, %v3178_v57, %v14683_v48  ;;  %v3050_v2 = vsel %vm3018_vm4, %v2985_v40, %v14685_v53  ;;  %v14686_v3 = vld [vmem:[#allocation192_spill] sm:$0xff]  ;;  %v14688_v31 = vld [vmem:[#allocation25_spill] sm:$0xff] }
 0x46d   :  { %v3049_v0 = vsel %vm3018_vm4, %v2984_v17, %v14682_v36  ;;  %v3307_v9 = vsel %vm3278_vm8, %v3242_v45, %v14684_v19  ;;  %v14687_v38 = vld [vmem:[#allocation366_spill] sm:$0xff]  ;;  %v2922_v56 = vsel %vm24_vm0, %v297_v52, %v14688_v31  ;;  %v14689_v35 = vld [vmem:[#allocation193_spill] sm:$0xff]  ;;  %v8399_v42 = vld [vmem:[#allocation2 + $0x1c8] sm:$0xff]  ;;  %v2760_v12 = vpop.permute.xlu1 %2759 }
 0x46e   :  { %v3114_v24 = vsel %vm3083_vm5, %v3049_v0, %v14686_v3  ;;  %v3308_v7 = vsel %vm3278_vm8, %v3243_v21, %v14687_v38  ;;  %v3372_v15 = vsel %vm3343_vm9, %v3307_v9, %v2754_v32  ;;  %v3115_v59 = vsel %vm3083_vm5, %v3050_v2, %v14689_v35  ;;  %v14690_v18 = vld [vmem:[#allocation250_spill] sm:$0xff]  ;;  %v14692_v26 = vld [vmem:[#allocation80_spill] sm:$0xff]  ;;  %v14693_v51 = vld [vmem:[#allocation251_spill] sm:$0xff] }
 0x46f   :  { %v3179_v22 = vsel %vm3148_vm6, %v3114_v24, %v14690_v18  ;;  %v3373_v61 = vsel %vm3343_vm9, %v3308_v7, %v2756_v4  ;;  %8184 = vmatprep.mubr.msk.f32.mxu0 %vm3420_vm10, %v3372_v15  ;;  %v14691_v16 = vld [vmem:[#allocation26_spill] sm:$0xff]  ;;  %v2986_v1 = vsel %vm2953_vm3, %v2921_v63, %v14692_v26  ;;  %v3180_v49 = vsel %vm3148_vm6, %v3115_v59, %v14693_v51  ;;  %v14694_v60 = vld [vmem:[#allocation308_spill] sm:$0xff]  ;;  %v14695_v41 = vld [vmem:[#allocation81_spill] sm:$0xff]  ;;  %v2762_v7 = vpop.permute.xlu0 %2761 }
 0x470   :  { %v2923_v33 = vsel %vm24_vm0, %v8399_v42, %v14691_v16  ;;  %v3244_v43 = vsel %vm3213_vm7, %v3179_v22, %v14694_v60  ;;  %8185 = vmatmul.mubr.msk.f32.gmra.mrb[28].mxu0 %vm3420_vm10, %v3373_v61  ;;  %v2987_v27 = vsel %vm2953_vm3, %v2922_v56, %v14695_v41  ;;  %v14696_v20 = vld [vmem:[#allocation136_spill] sm:$0xff]  ;;  %v14697_v37 = vld [vmem:[#allocation309_spill] sm:$0xff]  ;;  %v14698_v62 = vld [vmem:[#allocation367_spill] sm:$0xff] }
 0x471   :  { %v3051_v8 = vsel %vm3018_vm4, %v2986_v1, %v14696_v20  ;;  %v3245_v23 = vsel %vm3213_vm7, %v3180_v49, %v14697_v37  ;;  %v3309_v47 = vsel %vm3278_vm8, %v3244_v43, %v14698_v62  ;;  %v14699_v55 = vld [vmem:[#allocation137_spill] sm:$0xff]  ;;  %v14700_v34 = vld [vmem:[#allocation194_spill] sm:$0xff]  ;;  %v14701_v44 = vld [vmem:[#allocation368_spill] sm:$0xff]  ;;  %v2764_v22 = vpop.permute.xlu1 %2763 }
 0x472   :  { %v3052_v10 = vsel %vm3018_vm4, %v2987_v27, %v14699_v55  ;;  %v3116_v5 = vsel %vm3083_vm5, %v3051_v8, %v14700_v34  ;;  %v3310_v30 = vsel %vm3278_vm8, %v3245_v23, %v14701_v44  ;;  %v3374_v54 = vsel %vm3343_vm9, %v3309_v47, %v2758_v14  ;;  %v8400_v25 = vld [vmem:[#allocation2 + $0x1d0] sm:$0xff]  ;;  %v14702_v46 = vld [vmem:[#allocation27_spill] sm:$0xff]  ;;  %v14704_v13 = vld [vmem:[#allocation252_spill] sm:$0xff] }
 0x473   :  { %v2924_v58 = vsel %vm24_vm0, %v8400_v25, %v14702_v46  ;;  %v14703_v63 = vld [vmem:[#allocation195_spill] sm:$0xff]  ;;  %v3181_v17 = vsel %vm3148_vm6, %v3116_v5, %v14704_v13  ;;  %v3375_v29 = vsel %vm3343_vm9, %v3310_v30, %v2760_v12  ;;  %8187 = vmatprep.mubr.msk.f32.mxu0 %vm3420_vm10, %v3374_v54  ;;  %v14705_v11 = vld [vmem:[#allocation28_spill] sm:$0xff]  ;;  %v14706_v50 = vld [vmem:[#allocation82_spill] sm:$0xff]  ;;  %v2766_v54 = vpop.permute.xlu0 %2765 }
 0x474   :  { %v3117_v52 = vsel %vm3083_vm5, %v3052_v10, %v14703_v63  ;;  %v8401_v57 = vld [vmem:[#allocation2 + $0x1e0] sm:$0xff]  ;;  %v2988_v40 = vsel %vm2953_vm3, %v2923_v33, %v14706_v50  ;;  %v14707_v36 = vld [vmem:[#allocation253_spill] sm:$0xff]  ;;  %v14708_v48 = vld [vmem:[#allocation310_spill] sm:$0xff]  ;;  %8188 = vmatmul.mubr.msk.f32.gmra.mrb[30].mxu0 %vm3420_vm10, %v3375_v29 }
 0x475   :  { %v2925_v45 = vsel %vm24_vm0, %v8401_v57, %v14705_v11  ;;  %v3182_v0 = vsel %vm3148_vm6, %v3117_v52, %v14707_v36  ;;  %v3246_v21 = vsel %vm3213_vm7, %v3181_v17, %v14708_v48  ;;  %v14709_v19 = vld [vmem:[#allocation83_spill] sm:$0xff]  ;;  %v14710_v32 = vld [vmem:[#allocation138_spill] sm:$0xff]  ;;  %v14712_v24 = vld [vmem:[#allocation369_spill] sm:$0xff]  ;;  %v2768_v17 = vpop.permute.xlu1 %2767 }
 0x476   :  { %v2989_v9 = vsel %vm2953_vm3, %v2924_v58, %v14709_v19  ;;  %v3053_v53 = vsel %vm3018_vm4, %v2988_v40, %v14710_v32  ;;  %v14711_v2 = vld [vmem:[#allocation311_spill] sm:$0xff]  ;;  %v3311_v38 = vsel %vm3278_vm8, %v3246_v21, %v14712_v24  ;;  %v14714_v31 = vld [vmem:[#allocation196_spill] sm:$0xff]  ;;  %v14715_v35 = vld [vmem:[#allocation370_spill] sm:$0xff] }
 0x477   :  { %v3247_v3 = vsel %vm3213_vm7, %v3182_v0, %v14711_v2  ;;  %v14713_v15 = vld [vmem:[#allocation139_spill] sm:$0xff]  ;;  %v3118_v56 = vsel %vm3083_vm5, %v3053_v53, %v14714_v31  ;;  %v3376_v18 = vsel %vm3343_vm9, %v3311_v38, %v2762_v7  ;;  %v8402_v61 = vld [vmem:[#allocation2 + $0x1e8] sm:$0xff]  ;;  %v14716_v42 = vld [vmem:[#allocation29_spill] sm:$0xff] }
 0x478   :  { %v3054_v4 = vsel %vm3018_vm4, %v2989_v9, %v14713_v15  ;;  %v3312_v59 = vsel %vm3278_vm8, %v3247_v3, %v14715_v35  ;;  %v2926_v16 = vsel %vm24_vm0, %v8402_v61, %v14716_v42  ;;  %v14717_v33 = vld [vmem:[#allocation197_spill] sm:$0xff]  ;;  %v14718_v1 = vld [vmem:[#allocation254_spill] sm:$0xff]  ;;  %8190 = vmatprep.mubr.msk.f32.mxu0 %vm3420_vm10, %v3376_v18  ;;  %v14720_v27 = vld [vmem:[#allocation84_spill] sm:$0xff]  ;;  %v2770_v18 = vpop.permute.xlu0 %2769 }
 0x479   :  { %v3119_v26 = vsel %vm3083_vm5, %v3054_v4, %v14717_v33  ;;  %v3183_v51 = vsel %vm3148_vm6, %v3118_v56, %v14718_v1  ;;  %v3377_v49 = vsel %vm3343_vm9, %v3312_v59, %v2764_v22  ;;  %v8403_v60 = vld [vmem:[#allocation2 + $0x1f8] sm:$0xff]  ;;  %v2990_v20 = vsel %vm2953_vm3, %v2925_v45, %v14720_v27  ;;  %v14721_v8 = vld [vmem:[#allocation255_spill] sm:$0xff]  ;;  %v14722_v23 = vld [vmem:[#allocation312_spill] sm:$0xff] }
 0x47a   :  { %v14719_v43 = vld [vmem:[#allocation30_spill] sm:$0xff]  ;;  %v3184_v37 = vsel %vm3148_vm6, %v3119_v26, %v14721_v8  ;;  %v3248_v62 = vsel %vm3213_vm7, %v3183_v51, %v14722_v23  ;;  %8191 = vmatmul.mubr.msk.f32.gmra.mrb[32].mxu0 %vm3420_vm10, %v3377_v49  ;;  %v14723_v47 = vld [vmem:[#allocation85_spill] sm:$0xff]  ;;  %v14724_v55 = vld [vmem:[#allocation140_spill] sm:$0xff]  ;;  %v2772_v51 = vpop.permute.xlu1 %2771 }
 0x47b   :  { %v2927_v41 = vsel %vm24_vm0, %v8403_v60, %v14719_v43  ;;  %v2991_v14 = vsel %vm2953_vm3, %v2926_v16, %v14723_v47  ;;  %v3055_v10 = vsel %vm3018_vm4, %v2990_v20, %v14724_v55  ;;  %v14725_v34 = vld [vmem:[#allocation313_spill] sm:$0xff]  ;;  %v14726_v44 = vld [vmem:[#allocation371_spill] sm:$0xff]  ;;  %v14728_v46 = vld [vmem:[#allocation198_spill] sm:$0xff] }
 0x47c   :  { %v3249_v5 = vsel %vm3213_vm7, %v3184_v37, %v14725_v34  ;;  %v3313_v30 = vsel %vm3278_vm8, %v3248_v62, %v14726_v44  ;;  %v14727_v12 = vld [vmem:[#allocation141_spill] sm:$0xff]  ;;  %v3120_v58 = vsel %vm3083_vm5, %v3055_v10, %v14728_v46  ;;  %v14729_v63 = vld [vmem:[#allocation372_spill] sm:$0xff]  ;;  %v8404_v29 = vld [vmem:[#allocation2 + $0x200] sm:$0xff] }
 0x47d   :  { %v3056_v25 = vsel %vm3018_vm4, %v2991_v14, %v14727_v12  ;;  %v3314_v52 = vsel %vm3278_vm8, %v3249_v5, %v14729_v63  ;;  %v3378_v13 = vsel %vm3343_vm9, %v3313_v30, %v2766_v54  ;;  %v14730_v57 = vld [vmem:[#allocation31_spill] sm:$0xff]  ;;  %v14732_v40 = vld [vmem:[#allocation256_spill] sm:$0xff]  ;;  %v8405_v48 = vld [vmem:[#allocation2 + $0x210] sm:$0xff] }
 0x47e   :  { %v2928_v11 = vsel %vm24_vm0, %v8404_v29, %v14730_v57  ;;  %v14731_v45 = vld [vmem:[#allocation199_spill] sm:$0xff]  ;;  %v3185_v36 = vsel %vm3148_vm6, %v3120_v58, %v14732_v40  ;;  %v3379_v0 = vsel %vm3343_vm9, %v3314_v52, %v2768_v17  ;;  %8193 = vmatprep.mubr.msk.f32.mxu0 %vm3420_vm10, %v3378_v13  ;;  %v14733_v21 = vld [vmem:[#allocation32_spill] sm:$0xff]  ;;  %v14734_v9 = vld [vmem:[#allocation86_spill] sm:$0xff]  ;;  %v2774_v13 = vpop.permute.xlu0 %2773 }
 0x47f   :  { %v3121_v50 = vsel %vm3083_vm5, %v3056_v25, %v14731_v45  ;;  %v2929_v19 = vsel %vm24_vm0, %v8405_v48, %v14733_v21  ;;  %v2992_v32 = vsel %vm2953_vm3, %v2927_v41, %v14734_v9  ;;  %v14735_v53 = vld [vmem:[#allocation257_spill] sm:$0xff]  ;;  %v14736_v3 = vld [vmem:[#allocation314_spill] sm:$0xff]  ;;  %8194 = vmatmul.mubr.msk.f32.gmra.mrb[34].mxu0 %vm3420_vm10, %v3379_v0  ;;  %v14737_v38 = vld [vmem:[#allocation87_spill] sm:$0xff] }
 0x480   :  { %v3186_v2 = vsel %vm3148_vm6, %v3121_v50, %v14735_v53  ;;  %v3250_v24 = vsel %vm3213_vm7, %v3185_v36, %v14736_v3  ;;  %v2993_v7 = vsel %vm2953_vm3, %v2928_v11, %v14737_v38  ;;  %v14738_v15 = vld [vmem:[#allocation142_spill] sm:$0xff]  ;;  %v14739_v31 = vld [vmem:[#allocation315_spill] sm:$0xff]  ;;  %v14740_v35 = vld [vmem:[#allocation373_spill] sm:$0xff]  ;;  %v2776_v36 = vpop.permute.xlu1 %2775 }
 0x481   :  { %v3057_v4 = vsel %vm3018_vm4, %v2992_v32, %v14738_v15  ;;  %v3251_v56 = vsel %vm3213_vm7, %v3186_v2, %v14739_v31  ;;  %v3315_v59 = vsel %vm3278_vm8, %v3250_v24, %v14740_v35  ;;  %v14741_v22 = vld [vmem:[#allocation143_spill] sm:$0xff]  ;;  %v14742_v42 = vld [vmem:[#allocation200_spill] sm:$0xff]  ;;  %v14743_v33 = vld [vmem:[#allocation374_spill] sm:$0xff] }
 0x482   :  { %v3058_v61 = vsel %vm3018_vm4, %v2993_v7, %v14741_v22  ;;  %v3122_v16 = vsel %vm3083_vm5, %v3057_v4, %v14742_v42  ;;  %v3316_v26 = vsel %vm3278_vm8, %v3251_v56, %v14743_v33  ;;  %v3380_v1 = vsel %vm3343_vm9, %v3315_v59, %v2770_v18  ;;  %v8406_v49 = vld [vmem:[#allocation2 + $0x218] sm:$0xff]  ;;  %v14744_v60 = vld [vmem:[#allocation33_spill] sm:$0xff]  ;;  %v8407_v23 = vld [vmem:[#allocation2 + $0x228] sm:$0xff] }
 0x483   :  { %v2930_v43 = vsel %vm24_vm0, %v8406_v49, %v14744_v60  ;;  %v14745_v41 = vld [vmem:[#allocation201_spill] sm:$0xff]  ;;  %v14746_v20 = vld [vmem:[#allocation258_spill] sm:$0xff]  ;;  %v3381_v37 = vsel %vm3343_vm9, %v3316_v26, %v2772_v51  ;;  %8196 = vmatprep.mubr.msk.f32.mxu0 %vm3420_vm10, %v3380_v1  ;;  %v14748_v14 = vld [vmem:[#allocation88_spill] sm:$0xff]  ;;  %v2778_v1 = vpop.permute.xlu0 %2777 }
 0x484   :  { %v3123_v27 = vsel %vm3083_vm5, %v3058_v61, %v14745_v41  ;;  %v3187_v8 = vsel %vm3148_vm6, %v3122_v16, %v14746_v20  ;;  %v14747_v62 = vld [vmem:[#allocation34_spill] sm:$0xff]  ;;  %v2994_v55 = vsel %vm2953_vm3, %v2929_v19, %v14748_v14  ;;  %v14749_v10 = vld [vmem:[#allocation259_spill] sm:$0xff]  ;;  %v14750_v5 = vld [vmem:[#allocation316_spill] sm:$0xff]  ;;  %8197 = vmatmul.mubr.msk.f32.gmra.mrb[36].mxu0 %vm3420_vm10, %v3381_v37 }
 0x485   :  { %v2931_v47 = vsel %vm24_vm0, %v8407_v23, %v14747_v62  ;;  %v3188_v34 = vsel %vm3148_vm6, %v3123_v27, %v14749_v10  ;;  %v3252_v44 = vsel %vm3213_vm7, %v3187_v8, %v14750_v5  ;;  %v14751_v30 = vld [vmem:[#allocation89_spill] sm:$0xff]  ;;  %v14752_v12 = vld [vmem:[#allocation144_spill] sm:$0xff]  ;;  %v14754_v63 = vld [vmem:[#allocation375_spill] sm:$0xff]  ;;  %v2780_v8 = vpop.permute.xlu1 %2779 }
 0x486   :  { %v2995_v54 = vsel %vm2953_vm3, %v2930_v43, %v14751_v30  ;;  %v3059_v25 = vsel %vm3018_vm4, %v2994_v55, %v14752_v12  ;;  %v14753_v46 = vld [vmem:[#allocation317_spill] sm:$0xff]  ;;  %v3317_v52 = vsel %vm3278_vm8, %v3252_v44, %v14754_v63  ;;  %v14756_v57 = vld [vmem:[#allocation202_spill] sm:$0xff]  ;;  %v14757_v45 = vld [vmem:[#allocation376_spill] sm:$0xff] }
 0x487   :  { %v3253_v58 = vsel %vm3213_vm7, %v3188_v34, %v14753_v46  ;;  %v14755_v17 = vld [vmem:[#allocation145_spill] sm:$0xff]  ;;  %v3124_v11 = vsel %vm3083_vm5, %v3059_v25, %v14756_v57  ;;  %v3382_v40 = vsel %vm3343_vm9, %v3317_v52, %v2774_v13  ;;  %v14758_v48 = vld [vmem:[#allocation35_spill] sm:$0xff]  ;;  %v14760_v32 = vld [vmem:[#allocation260_spill] sm:$0xff] }
 0x488   :  { %v3060_v29 = vsel %vm3018_vm4, %v2995_v54, %v14755_v17  ;;  %v3318_v50 = vsel %vm3278_vm8, %v3253_v58, %v14757_v45  ;;  %v8408_v0 = vld [vmem:[#allocation2 + $0x230] sm:$0xff]  ;;  %v14759_v19 = vld [vmem:[#allocation203_spill] sm:$0xff]  ;;  %v3189_v53 = vsel %vm3148_vm6, %v3124_v11, %v14760_v32  ;;  %8199 = vmatprep.mubr.msk.f32.mxu0 %vm3420_vm10, %v3382_v40  ;;  %v14761_v24 = vld [vmem:[#allocation36_spill] sm:$0xff]  ;;  %v2782_v40 = vpop.permute.xlu0 %2781 }
 0x489   :  { %v2932_v21 = vsel %vm24_vm0, %v8408_v0, %v14758_v48  ;;  %v3125_v9 = vsel %vm3083_vm5, %v3060_v29, %v14759_v19  ;;  %v3383_v2 = vsel %vm3343_vm9, %v3318_v50, %v2776_v36  ;;  %v8409_v3 = vld [vmem:[#allocation2 + $0x240] sm:$0xff]  ;;  %v14762_v7 = vld [vmem:[#allocation90_spill] sm:$0xff]  ;;  %v14763_v4 = vld [vmem:[#allocation261_spill] sm:$0xff] }
 0x48a   :  { %v2933_v38 = vsel %vm24_vm0, %v8409_v3, %v14761_v24  ;;  %v2996_v15 = vsel %vm2953_vm3, %v2931_v47, %v14762_v7  ;;  %v3190_v31 = vsel %vm3148_vm6, %v3125_v9, %v14763_v4  ;;  %v14764_v56 = vld [vmem:[#allocation318_spill] sm:$0xff]  ;;  %8200 = vmatmul.mubr.msk.f32.gmra.mrb[38].mxu0 %vm3420_vm10, %v3383_v2  ;;  %v14765_v59 = vld [vmem:[#allocation91_spill] sm:$0xff]  ;;  %v14768_v33 = vld [vmem:[#allocation377_spill] sm:$0xff] }
 0x48b   :  { %v3254_v35 = vsel %vm3213_vm7, %v3189_v53, %v14764_v56  ;;  %v2997_v18 = vsel %vm2953_vm3, %v2932_v21, %v14765_v59  ;;  %v14766_v22 = vld [vmem:[#allocation146_spill] sm:$0xff]  ;;  %v14767_v42 = vld [vmem:[#allocation319_spill] sm:$0xff]  ;;  %v14770_v60 = vld [vmem:[#allocation204_spill] sm:$0xff]  ;;  %v2784_v53 = vpop.permute.xlu1 %2783 }
 0x48c   :  { %v3061_v61 = vsel %vm3018_vm4, %v2996_v15, %v14766_v22  ;;  %v3255_v16 = vsel %vm3213_vm7, %v3190_v31, %v14767_v42  ;;  %v3319_v26 = vsel %vm3278_vm8, %v3254_v35, %v14768_v33  ;;  %v14769_v51 = vld [vmem:[#allocation147_spill] sm:$0xff]  ;;  %v14771_v41 = vld [vmem:[#allocation378_spill] sm:$0xff]  ;;  %v8410_v37 = vld [vmem:[#allocation2 + $0x248] sm:$0xff] }
 0x48d   :  { %v3062_v49 = vsel %vm3018_vm4, %v2997_v18, %v14769_v51  ;;  %v3126_v43 = vsel %vm3083_vm5, %v3061_v61, %v14770_v60  ;;  %v3320_v27 = vsel %vm3278_vm8, %v3255_v16, %v14771_v41  ;;  %v3384_v20 = vsel %vm3343_vm9, %v3319_v26, %v2778_v1  ;;  %v14772_v23 = vld [vmem:[#allocation37_spill] sm:$0xff]  ;;  %v14774_v55 = vld [vmem:[#allocation262_spill] sm:$0xff]  ;;  %v14776_v54 = vld [vmem:[#allocation92_spill] sm:$0xff] }
 0x48e   :  { %v2934_v62 = vsel %vm24_vm0, %v8410_v37, %v14772_v23  ;;  %v14773_v47 = vld [vmem:[#allocation205_spill] sm:$0xff]  ;;  %v3191_v10 = vsel %vm3148_vm6, %v3126_v43, %v14774_v55  ;;  %v3385_v34 = vsel %vm3343_vm9, %v3320_v27, %v2780_v8  ;;  %8202 = vmatprep.mubr.msk.f32.mxu0 %vm3420_vm10, %v3384_v20  ;;  %v8411_v5 = vld [vmem:[#allocation2 + $0x258] sm:$0xff]  ;;  %v2998_v12 = vsel %vm2953_vm3, %v2933_v38, %v14776_v54  ;;  %v14777_v25 = vld [vmem:[#allocation263_spill] sm:$0xff]  ;;  %v2786_v20 = vpop.permute.xlu0 %2785 }
 0x48f   :  { %v3127_v14 = vsel %vm3083_vm5, %v3062_v49, %v14773_v47  ;;  %v14775_v44 = vld [vmem:[#allocation38_spill] sm:$0xff]  ;;  %v14778_v58 = vld [vmem:[#allocation320_spill] sm:$0xff]  ;;  %8203 = vmatmul.mubr.msk.f32.gmra.mrb[40].mxu0 %vm3420_vm10, %v3385_v34  ;;  %v14779_v52 = vld [vmem:[#allocation93_spill] sm:$0xff] }
 0x490   :  { %v2935_v30 = vsel %vm24_vm0, %v8411_v5, %v14775_v44  ;;  %v3192_v46 = vsel %vm3148_vm6, %v3127_v14, %v14777_v25  ;;  %v3256_v63 = vsel %vm3213_vm7, %v3191_v10, %v14778_v58  ;;  %v2999_v13 = vsel %vm2953_vm3, %v2934_v62, %v14779_v52  ;;  %v14780_v17 = vld [vmem:[#allocation148_spill] sm:$0xff]  ;;  %v14781_v57 = vld [vmem:[#allocation321_spill] sm:$0xff]  ;;  %v14782_v45 = vld [vmem:[#allocation379_spill] sm:$0xff]  ;;  %v2788_v10 = vpop.permute.xlu1 %2787 }
 0x491   :  { %v3063_v29 = vsel %vm3018_vm4, %v2998_v12, %v14780_v17  ;;  %v3257_v11 = vsel %vm3213_vm7, %v3192_v46, %v14781_v57  ;;  %v3321_v50 = vsel %vm3278_vm8, %v3256_v63, %v14782_v45  ;;  %v14783_v36 = vld [vmem:[#allocation149_spill] sm:$0xff]  ;;  %v14784_v48 = vld [vmem:[#allocation206_spill] sm:$0xff]  ;;  %v14785_v19 = vld [vmem:[#allocation380_spill] sm:$0xff] }
 0x492   :  { %v3064_v0 = vsel %vm3018_vm4, %v2999_v13, %v14783_v36  ;;  %v3128_v21 = vsel %vm3083_vm5, %v3063_v29, %v14784_v48  ;;  %v3322_v9 = vsel %vm3278_vm8, %v3257_v11, %v14785_v19  ;;  %v3386_v32 = vsel %vm3343_vm9, %v3321_v50, %v2782_v40  ;;  %v8412_v2 = vld [vmem:[#allocation2 + $0x260] sm:$0xff]  ;;  %v14788_v15 = vld [vmem:[#allocation264_spill] sm:$0xff]  ;;  %v8413_v56 = vld [vmem:[#allocation2 + $0x270] sm:$0xff] }
 0x493   :  { %v14786_v3 = vld [vmem:[#allocation39_spill] sm:$0xff]  ;;  %v3193_v4 = vsel %vm3148_vm6, %v3128_v21, %v14788_v15  ;;  %v3387_v31 = vsel %vm3343_vm9, %v3322_v9, %v2784_v53  ;;  %8205 = vmatprep.mubr.msk.f32.mxu0 %vm3420_vm10, %v3386_v32  ;;  %v14789_v35 = vld [vmem:[#allocation40_spill] sm:$0xff]  ;;  %v14790_v18 = vld [vmem:[#allocation94_spill] sm:$0xff]  ;;  %v2790_v32 = vpop.permute.xlu0 %2789 }
 0x494   :  { %v2936_v24 = vsel %vm24_vm0, %v8412_v2, %v14786_v3  ;;  %v14787_v38 = vld [vmem:[#allocation207_spill] sm:$0xff]  ;;  %v2937_v59 = vsel %vm24_vm0, %v8413_v56, %v14789_v35  ;;  %v3000_v22 = vsel %vm2953_vm3, %v2935_v30, %v14790_v18  ;;  %v14791_v61 = vld [vmem:[#allocation265_spill] sm:$0xff]  ;;  %v14792_v16 = vld [vmem:[#allocation322_spill] sm:$0xff]  ;;  %8206 = vmatmul.mubr.msk.f32.gmra.mrb[42].mxu0 %vm3420_vm10, %v3387_v31  ;;  %v2792_v31 = vpop.permute.xlu1 %2791 }
 0x495   :  { %v3129_v7 = vsel %vm3083_vm5, %v3064_v0, %v14787_v38  ;;  %v3258_v33 = vsel %vm3213_vm7, %v3193_v4, %v14792_v16  ;;  %v14793_v26 = vld [vmem:[#allocation95_spill] sm:$0xff]  ;;  %v14794_v51 = vld [vmem:[#allocation150_spill] sm:$0xff]  ;;  %v14796_v41 = vld [vmem:[#allocation381_spill] sm:$0xff] }
 0x496   :  { %v3194_v42 = vsel %vm3148_vm6, %v3129_v7, %v14791_v61  ;;  %v3001_v1 = vsel %vm2953_vm3, %v2936_v24, %v14793_v26  ;;  %v3065_v49 = vsel %vm3018_vm4, %v3000_v22, %v14794_v51  ;;  %v14795_v60 = vld [vmem:[#allocation323_spill] sm:$0xff]  ;;  %v3323_v27 = vsel %vm3278_vm8, %v3258_v33, %v14796_v41  ;;  %v14798_v23 = vld [vmem:[#allocation208_spill] sm:$0xff]  ;;  %v14799_v47 = vld [vmem:[#allocation382_spill] sm:$0xff] }
 0x497   :  { %v3259_v43 = vsel %vm3213_vm7, %v3194_v42, %v14795_v60  ;;  %v14797_v8 = vld [vmem:[#allocation151_spill] sm:$0xff]  ;;  %v3130_v62 = vsel %vm3083_vm5, %v3065_v49, %v14798_v23  ;;  %v3388_v55 = vsel %vm3343_vm9, %v3323_v27, %v2786_v20  ;;  %v8414_v34 = vld [vmem:[#allocation2 + $0x278] sm:$0xff]  ;;  %v14800_v5 = vld [vmem:[#allocation41_spill] sm:$0xff] }
 0x498   :  { %v3066_v37 = vsel %vm3018_vm4, %v3001_v1, %v14797_v8  ;;  %v3324_v14 = vsel %vm3278_vm8, %v3259_v43, %v14799_v47  ;;  %v2938_v44 = vsel %vm24_vm0, %v8414_v34, %v14800_v5  ;;  %v14801_v30 = vld [vmem:[#allocation209_spill] sm:$0xff]  ;;  %v14802_v12 = vld [vmem:[#allocation266_spill] sm:$0xff]  ;;  %8208 = vmatprep.mubr.msk.f32.mxu0 %vm3420_vm10, %v3388_v55  ;;  %v8415_v58 = vld [vmem:[#allocation2 + $0x288] sm:$0xff] }
 0x499   :  { %v3131_v54 = vsel %vm3083_vm5, %v3066_v37, %v14801_v30  ;;  %v3195_v25 = vsel %vm3148_vm6, %v3130_v62, %v14802_v12  ;;  %v3389_v46 = vsel %vm3343_vm9, %v3324_v14, %v2788_v10  ;;  %v14803_v63 = vld [vmem:[#allocation42_spill] sm:$0xff]  ;;  %v14804_v13 = vld [vmem:[#allocation96_spill] sm:$0xff]  ;;  %v14805_v29 = vld [vmem:[#allocation267_spill] sm:$0xff]  ;;  %v2794_v14 = vpop.permute.xlu0 %2793  ;;  %v2796_v12 = vpop.permute.xlu1 %2795 }
 0x49a   :  { %v2939_v52 = vsel %vm24_vm0, %v8415_v58, %v14803_v63  ;;  %v3002_v17 = vsel %vm2953_vm3, %v2937_v59, %v14804_v13  ;;  %v3196_v57 = vsel %vm3148_vm6, %v3131_v54, %v14805_v29  ;;  %v14806_v11 = vld [vmem:[#allocation324_spill] sm:$0xff]  ;;  %8209 = vmatmul.mubr.msk.f32.gmra.mrb[44].mxu0 %vm3420_vm10, %v3389_v46  ;;  %v14807_v50 = vld [vmem:[#allocation97_spill] sm:$0xff]  ;;  %v14810_v19 = vld [vmem:[#allocation383_spill] sm:$0xff] }
 0x49b   :  { %v3260_v45 = vsel %vm3213_vm7, %v3195_v25, %v14806_v11  ;;  %v3003_v40 = vsel %vm2953_vm3, %v2938_v44, %v14807_v50  ;;  %v14808_v36 = vld [vmem:[#allocation152_spill] sm:$0xff]  ;;  %v14809_v48 = vld [vmem:[#allocation325_spill] sm:$0xff]  ;;  %v14812_v24 = vld [vmem:[#allocation210_spill] sm:$0xff] }
 0x49c   :  { %v3067_v0 = vsel %vm3018_vm4, %v3002_v17, %v14808_v36  ;;  %v3261_v21 = vsel %vm3213_vm7, %v3196_v57, %v14809_v48  ;;  %v3325_v9 = vsel %vm3278_vm8, %v3260_v45, %v14810_v19  ;;  %v4131_v53 = vld [vmem:[#allocation2 + $0x9] sm:$0xff]  ;;  %v4130_v56 = vld [vmem:[#allocation2 + $0x1] sm:$0xff]  ;;  %v14817_v26 = vld [vmem:[#allocation98_spill] sm:$0xff] }
 0x49d   :  { %v14811_v2 = vld [vmem:[#allocation153_spill] sm:$0xff]  ;;  %v3132_v38 = vsel %vm3083_vm5, %v3067_v0, %v14812_v24  ;;  %v14813_v7 = vld [vmem:[#allocation384_spill] sm:$0xff]  ;;  %v3390_v4 = vsel %vm3343_vm9, %v3325_v9, %v2790_v32  ;;  %4708 = vrot.lane.b32.xlu1 %v4131_v53, %s8491_s12  ;;  %v14814_v35 = vld [vmem:[#allocation211_spill] sm:$0xff]  ;;  %4706 = vrot.lane.b32.xlu0 %v4130_v56, %s8491_s12  ;;  %v3004_v1 = vsel %vm2953_vm3, %v2939_v52, %v14817_v26 }
 0x49e   :  { %v3068_v3 = vsel %vm3018_vm4, %v3003_v40, %v14811_v2  ;;  %v3326_v15 = vsel %vm3278_vm8, %v3261_v21, %v14813_v7  ;;  %v14815_v18 = vld [vmem:[#allocation268_spill] sm:$0xff]  ;;  %8211 = vmatprep.mubr.msk.f32.mxu0 %vm3420_vm10, %v3390_v4  ;;  %v8416_v42 = vld [vmem:[#allocation2 + $0x290] sm:$0xff]  ;;  %v14816_v16 = vld [vmem:[#allocation43_spill] sm:$0xff]  ;;  %v2798_v7 = vpop.permute.xlu0 %2797 }
 0x49f   :  { %v3133_v59 = vsel %vm3083_vm5, %v3068_v3, %v14814_v35  ;;  %v3197_v22 = vsel %vm3148_vm6, %v3132_v38, %v14815_v18  ;;  %v3391_v61 = vsel %vm3343_vm9, %v3326_v15, %v2792_v31  ;;  %v2940_v33 = vsel %vm24_vm0, %v8416_v42, %v14816_v16  ;;  %v14818_v51 = vld [vmem:[#allocation269_spill] sm:$0xff]  ;;  %v14819_v60 = vld [vmem:[#allocation326_spill] sm:$0xff]  ;;  %v14820_v41 = vld [vmem:[#allocation99_spill] sm:$0xff] }
 0x4a0   :  { %v3198_v49 = vsel %vm3148_vm6, %v3133_v59, %v14818_v51  ;;  %v3262_v43 = vsel %vm3213_vm7, %v3197_v22, %v14819_v60  ;;  %8212 = vmatmul.mubr.msk.f32.gmra.mrb[46].mxu0 %vm3420_vm10, %v3391_v61  ;;  %v3005_v27 = vsel %vm2953_vm3, %v2940_v33, %v14820_v41  ;;  %v14821_v20 = vld [vmem:[#allocation154_spill] sm:$0xff]  ;;  %v14822_v37 = vld [vmem:[#allocation327_spill] sm:$0xff]  ;;  %v14823_v62 = vld [vmem:[#allocation385_spill] sm:$0xff]  ;;  %v2800_v22 = vpop.permute.xlu1 %2799 }
 0x4a1   :  { %v3069_v8 = vsel %vm3018_vm4, %v3004_v1, %v14821_v20  ;;  %v3263_v23 = vsel %vm3213_vm7, %v3198_v49, %v14822_v37  ;;  %v3327_v47 = vsel %vm3278_vm8, %v3262_v43, %v14823_v62  ;;  %v14824_v55 = vld [vmem:[#allocation155_spill] sm:$0xff]  ;;  %v14825_v34 = vld [vmem:[#allocation212_spill] sm:$0xff]  ;;  %v14826_v44 = vld [vmem:[#allocation386_spill] sm:$0xff] }
 0x4a2   :  { %v3070_v10 = vsel %vm3018_vm4, %v3005_v27, %v14824_v55  ;;  %v3134_v5 = vsel %vm3083_vm5, %v3069_v8, %v14825_v34  ;;  %v3328_v30 = vsel %vm3278_vm8, %v3263_v23, %v14826_v44  ;;  %v3392_v54 = vsel %vm3343_vm9, %v3327_v47, %v2794_v14  ;;  %v8417_v25 = vld [vmem:[#allocation2 + $0x2a0] sm:$0xff]  ;;  %v14827_v46 = vld [vmem:[#allocation44_spill] sm:$0xff]  ;;  %v14828_v63 = vld [vmem:[#allocation213_spill] sm:$0xff] }
 0x4a3   :  { %v2941_v58 = vsel %vm24_vm0, %v8417_v25, %v14827_v46  ;;  %v3135_v52 = vsel %vm3083_vm5, %v3070_v10, %v14828_v63  ;;  %v14829_v13 = vld [vmem:[#allocation270_spill] sm:$0xff]  ;;  %v3393_v29 = vsel %vm3343_vm9, %v3328_v30, %v2796_v12  ;;  %8214 = vmatprep.mubr.msk.f32.mxu0 %vm3420_vm10, %v3392_v54  ;;  %v8418_v57 = vld [vmem:[#allocation2 + $0x2a8] sm:$0xff]  ;;  %v14830_v11 = vld [vmem:[#allocation45_spill] sm:$0xff]  ;;  %v2802_v54 = vpop.permute.xlu0 %2801 }
 0x4a4   :  { %v3199_v17 = vsel %vm3148_vm6, %v3134_v5, %v14829_v13  ;;  %v2942_v45 = vsel %vm24_vm0, %v8418_v57, %v14830_v11  ;;  %v14831_v50 = vld [vmem:[#allocation100_spill] sm:$0xff]  ;;  %v14832_v36 = vld [vmem:[#allocation271_spill] sm:$0xff]  ;;  %8215 = vmatmul.mubr.msk.f32.gmra.mrb[48].mxu0 %vm3420_vm10, %v3393_v29  ;;  %v14834_v19 = vld [vmem:[#allocation101_spill] sm:$0xff] }
 0x4a5   :  { %v3006_v40 = vsel %vm2953_vm3, %v2941_v58, %v14831_v50  ;;  %v3200_v0 = vsel %vm3148_vm6, %v3135_v52, %v14832_v36  ;;  %v14833_v48 = vld [vmem:[#allocation328_spill] sm:$0xff]  ;;  %v3007_v9 = vsel %vm2953_vm3, %v2942_v45, %v14834_v19  ;;  %v14836_v2 = vld [vmem:[#allocation329_spill] sm:$0xff]  ;;  %v14837_v24 = vld [vmem:[#allocation387_spill] sm:$0xff] }
 0x4a6   :  { %v3264_v21 = vsel %vm3213_vm7, %v3199_v17, %v14833_v48  ;;  %v14835_v32 = vld [vmem:[#allocation156_spill] sm:$0xff]  ;;  %v3265_v3 = vsel %vm3213_vm7, %v3200_v0, %v14836_v2  ;;  %v14838_v15 = vld [vmem:[#allocation157_spill] sm:$0xff]  ;;  %v14839_v31 = vld [vmem:[#allocation214_spill] sm:$0xff]  ;;  %v2804_v17 = vpop.permute.xlu1 %2803 }
 0x4a7   :  { %v3071_v53 = vsel %vm3018_vm4, %v3006_v40, %v14835_v32  ;;  %v3329_v38 = vsel %vm3278_vm8, %v3264_v21, %v14837_v24  ;;  %v3072_v4 = vsel %vm3018_vm4, %v3007_v9, %v14838_v15  ;;  %v14840_v35 = vld [vmem:[#allocation388_spill] sm:$0xff]  ;;  %v8419_v61 = vld [vmem:[#allocation2 + $0x2b8] sm:$0xff]  ;;  %v14842_v33 = vld [vmem:[#allocation215_spill] sm:$0xff] }
 0x4a8   :  { %v3136_v56 = vsel %vm3083_vm5, %v3071_v53, %v14839_v31  ;;  %v3330_v59 = vsel %vm3278_vm8, %v3265_v3, %v14840_v35  ;;  %v3394_v18 = vsel %vm3343_vm9, %v3329_v38, %v2798_v7  ;;  %v14841_v42 = vld [vmem:[#allocation46_spill] sm:$0xff]  ;;  %v3137_v26 = vsel %vm3083_vm5, %v3072_v4, %v14842_v33  ;;  %v14843_v1 = vld [vmem:[#allocation272_spill] sm:$0xff]  ;;  %v8420_v60 = vld [vmem:[#allocation2 + $0x2c0] sm:$0xff] }
 0x4a9   :  { %v2943_v16 = vsel %vm24_vm0, %v8419_v61, %v14841_v42  ;;  %v3201_v51 = vsel %vm3148_vm6, %v3136_v56, %v14843_v1  ;;  %v3395_v49 = vsel %vm3343_vm9, %v3330_v59, %v2800_v22  ;;  %8217 = vmatprep.mubr.msk.f32.mxu0 %vm3420_vm10, %v3394_v18  ;;  %v14844_v43 = vld [vmem:[#allocation47_spill] sm:$0xff]  ;;  %v14845_v27 = vld [vmem:[#allocation102_spill] sm:$0xff]  ;;  %v14846_v8 = vld [vmem:[#allocation273_spill] sm:$0xff]  ;;  %v2806_v18 = vpop.permute.xlu0 %2805 }
 0x4aa   :  { %v2944_v41 = vsel %vm24_vm0, %v8420_v60, %v14844_v43  ;;  %v3008_v20 = vsel %vm2953_vm3, %v2943_v16, %v14845_v27  ;;  %v3202_v37 = vsel %vm3148_vm6, %v3137_v26, %v14846_v8  ;;  %v14847_v23 = vld [vmem:[#allocation330_spill] sm:$0xff]  ;;  %8218 = vmatmul.mubr.msk.f32.gmra.mrb[50].mxu0 %vm3420_vm10, %v3395_v49  ;;  %v14848_v47 = vld [vmem:[#allocation103_spill] sm:$0xff]  ;;  %v14851_v44 = vld [vmem:[#allocation389_spill] sm:$0xff] }
 0x4ab   :  { %v3266_v62 = vsel %vm3213_vm7, %v3201_v51, %v14847_v23  ;;  %v3009_v14 = vsel %vm2953_vm3, %v2944_v41, %v14848_v47  ;;  %v14849_v55 = vld [vmem:[#allocation158_spill] sm:$0xff]  ;;  %v14850_v34 = vld [vmem:[#allocation331_spill] sm:$0xff]  ;;  %v14853_v46 = vld [vmem:[#allocation216_spill] sm:$0xff]  ;;  %v2808_v51 = vpop.permute.xlu1 %2807 }
 0x4ac   :  { %v3073_v10 = vsel %vm3018_vm4, %v3008_v20, %v14849_v55  ;;  %v3267_v5 = vsel %vm3213_vm7, %v3202_v37, %v14850_v34  ;;  %v3331_v30 = vsel %vm3278_vm8, %v3266_v62, %v14851_v44  ;;  %v14852_v12 = vld [vmem:[#allocation159_spill] sm:$0xff]  ;;  %v14854_v63 = vld [vmem:[#allocation390_spill] sm:$0xff]  ;;  %v8421_v29 = vld [vmem:[#allocation2 + $0x2d0] sm:$0xff] }
 0x4ad   :  { %v3074_v25 = vsel %vm3018_vm4, %v3009_v14, %v14852_v12  ;;  %v3138_v58 = vsel %vm3083_vm5, %v3073_v10, %v14853_v46  ;;  %v3332_v52 = vsel %vm3278_vm8, %v3267_v5, %v14854_v63  ;;  %v3396_v13 = vsel %vm3343_vm9, %v3331_v30, %v2802_v54  ;;  %v14855_v57 = vld [vmem:[#allocation48_spill] sm:$0xff]  ;;  %v14856_v45 = vld [vmem:[#allocation217_spill] sm:$0xff]  ;;  %v14857_v40 = vld [vmem:[#allocation274_spill] sm:$0xff] }
 0x4ae   :  { %v2945_v11 = vsel %vm24_vm0, %v8421_v29, %v14855_v57  ;;  %v3139_v50 = vsel %vm3083_vm5, %v3074_v25, %v14856_v45  ;;  %v3203_v36 = vsel %vm3148_vm6, %v3138_v58, %v14857_v40  ;;  %v3397_v0 = vsel %vm3343_vm9, %v3332_v52, %v2804_v17  ;;  %8220 = vmatprep.mubr.msk.f32.mxu0 %vm3420_vm10, %v3396_v13  ;;  %v8422_v48 = vld [vmem:[#allocation2 + $0x2d8] sm:$0xff]  ;;  %v14858_v21 = vld [vmem:[#allocation49_spill] sm:$0xff]  ;;  %v14859_v9 = vld [vmem:[#allocation104_spill] sm:$0xff]  ;;  %v2810_v13 = vpop.permute.xlu0 %2809 }
 0x4af   :  { %v2946_v19 = vsel %vm24_vm0, %v8422_v48, %v14858_v21  ;;  %v3010_v32 = vsel %vm2953_vm3, %v2945_v11, %v14859_v9  ;;  %v14860_v53 = vld [vmem:[#allocation275_spill] sm:$0xff]  ;;  %v14861_v3 = vld [vmem:[#allocation332_spill] sm:$0xff]  ;;  %8221 = vmatmul.mubr.msk.f32.gmra.mrb[52].mxu0 %vm3420_vm10, %v3397_v0  ;;  %v14862_v38 = vld [vmem:[#allocation105_spill] sm:$0xff] }
 0x4b0   :  { %v3204_v2 = vsel %vm3148_vm6, %v3139_v50, %v14860_v53  ;;  %v3268_v24 = vsel %vm3213_vm7, %v3203_v36, %v14861_v3  ;;  %v3011_v7 = vsel %vm2953_vm3, %v2946_v19, %v14862_v38  ;;  %v14863_v15 = vld [vmem:[#allocation160_spill] sm:$0xff]  ;;  %v14864_v31 = vld [vmem:[#allocation333_spill] sm:$0xff]  ;;  %v14865_v35 = vld [vmem:[#allocation391_spill] sm:$0xff]  ;;  %v2812_v36 = vpop.permute.xlu1 %2811 }
 0x4b1   :  { %v3075_v4 = vsel %vm3018_vm4, %v3010_v32, %v14863_v15  ;;  %v3269_v56 = vsel %vm3213_vm7, %v3204_v2, %v14864_v31  ;;  %v3333_v59 = vsel %vm3278_vm8, %v3268_v24, %v14865_v35  ;;  %v14866_v22 = vld [vmem:[#allocation161_spill] sm:$0xff]  ;;  %v14867_v42 = vld [vmem:[#allocation218_spill] sm:$0xff]  ;;  %v14868_v33 = vld [vmem:[#allocation392_spill] sm:$0xff] }
 0x4b2   :  { %v3076_v61 = vsel %vm3018_vm4, %v3011_v7, %v14866_v22  ;;  %v3140_v16 = vsel %vm3083_vm5, %v3075_v4, %v14867_v42  ;;  %v3334_v26 = vsel %vm3278_vm8, %v3269_v56, %v14868_v33  ;;  %v3398_v1 = vsel %vm3343_vm9, %v3333_v59, %v2806_v18  ;;  %v8423_v49 = vld [vmem:[#allocation2 + $0x2e8] sm:$0xff]  ;;  %v14869_v60 = vld [vmem:[#allocation50_spill] sm:$0xff]  ;;  %v14870_v41 = vld [vmem:[#allocation219_spill] sm:$0xff] }
 0x4b3   :  { %v2947_v43 = vsel %vm24_vm0, %v8423_v49, %v14869_v60  ;;  %v3141_v27 = vsel %vm3083_vm5, %v3076_v61, %v14870_v41  ;;  %v14871_v20 = vld [vmem:[#allocation276_spill] sm:$0xff]  ;;  %v3399_v37 = vsel %vm3343_vm9, %v3334_v26, %v2808_v51  ;;  %8223 = vmatprep.mubr.msk.f32.mxu0 %vm3420_vm10, %v3398_v1  ;;  %v8424_v23 = vld [vmem:[#allocation2 + $0x2f0] sm:$0xff]  ;;  %v14872_v62 = vld [vmem:[#allocation51_spill] sm:$0xff]  ;;  %v2814_v1 = vpop.permute.xlu0 %2813 }
 0x4b4   :  { %v3205_v8 = vsel %vm3148_vm6, %v3140_v16, %v14871_v20  ;;  %v2948_v47 = vsel %vm24_vm0, %v8424_v23, %v14872_v62  ;;  %v14873_v14 = vld [vmem:[#allocation106_spill] sm:$0xff]  ;;  %v14874_v10 = vld [vmem:[#allocation277_spill] sm:$0xff]  ;;  %8224 = vmatmul.mubr.msk.f32.gmra.mrb[54].mxu0 %vm3420_vm10, %v3399_v37  ;;  %v14876_v30 = vld [vmem:[#allocation107_spill] sm:$0xff] }
 0x4b5   :  { %v3012_v55 = vsel %vm2953_vm3, %v2947_v43, %v14873_v14  ;;  %v3206_v34 = vsel %vm3148_vm6, %v3141_v27, %v14874_v10  ;;  %v14875_v5 = vld [vmem:[#allocation334_spill] sm:$0xff]  ;;  %v3013_v54 = vsel %vm2953_vm3, %v2948_v47, %v14876_v30  ;;  %v14878_v46 = vld [vmem:[#allocation335_spill] sm:$0xff]  ;;  %v14879_v63 = vld [vmem:[#allocation393_spill] sm:$0xff] }
 0x4b6   :  { %v3270_v44 = vsel %vm3213_vm7, %v3205_v8, %v14875_v5  ;;  %v14877_v12 = vld [vmem:[#allocation162_spill] sm:$0xff]  ;;  %v3271_v58 = vsel %vm3213_vm7, %v3206_v34, %v14878_v46  ;;  %v14880_v17 = vld [vmem:[#allocation163_spill] sm:$0xff]  ;;  %v14881_v57 = vld [vmem:[#allocation220_spill] sm:$0xff]  ;;  %v2816_v8 = vpop.permute.xlu1 %2815 }
 0x4b7   :  { %v3077_v25 = vsel %vm3018_vm4, %v3012_v55, %v14877_v12  ;;  %v3335_v52 = vsel %vm3278_vm8, %v3270_v44, %v14879_v63  ;;  %v3078_v29 = vsel %vm3018_vm4, %v3013_v54, %v14880_v17  ;;  %v14882_v45 = vld [vmem:[#allocation394_spill] sm:$0xff]  ;;  %v8425_v0 = vld [vmem:[#allocation2 + $0x300] sm:$0xff]  ;;  %v14883_v48 = vld [vmem:[#allocation52_spill] sm:$0xff] }
 0x4b8   :  { %v3142_v11 = vsel %vm3083_vm5, %v3077_v25, %v14881_v57  ;;  %v3336_v50 = vsel %vm3278_vm8, %v3271_v58, %v14882_v45  ;;  %v3400_v40 = vsel %vm3343_vm9, %v3335_v52, %v2810_v13  ;;  %v2949_v21 = vsel %vm24_vm0, %v8425_v0, %v14883_v48  ;;  %v14884_v19 = vld [vmem:[#allocation221_spill] sm:$0xff]  ;;  %v14885_v32 = vld [vmem:[#allocation278_spill] sm:$0xff]  ;;  %v8426_v3 = vld [vmem:[#allocation2 + $0x308] sm:$0xff] }
 0x4b9   :  { %v3143_v9 = vsel %vm3083_vm5, %v3078_v29, %v14884_v19  ;;  %v3207_v53 = vsel %vm3148_vm6, %v3142_v11, %v14885_v32  ;;  %v3401_v2 = vsel %vm3343_vm9, %v3336_v50, %v2812_v36  ;;  %8226 = vmatprep.mubr.msk.f32.mxu0 %vm3420_vm10, %v3400_v40  ;;  %v14886_v24 = vld [vmem:[#allocation53_spill] sm:$0xff]  ;;  %v14887_v7 = vld [vmem:[#allocation108_spill] sm:$0xff]  ;;  %v14888_v4 = vld [vmem:[#allocation279_spill] sm:$0xff]  ;;  %v2818_v40 = vpop.permute.xlu0 %2817 }
 0x4ba   :  { %v2950_v38 = vsel %vm24_vm0, %v8426_v3, %v14886_v24  ;;  %v3014_v15 = vsel %vm2953_vm3, %v2949_v21, %v14887_v7  ;;  %v3208_v31 = vsel %vm3148_vm6, %v3143_v9, %v14888_v4  ;;  %v14889_v56 = vld [vmem:[#allocation336_spill] sm:$0xff]  ;;  %8227 = vmatmul.mubr.msk.f32.gmra.mrb[56].mxu0 %vm3420_vm10, %v3401_v2  ;;  %v14890_v59 = vld [vmem:[#allocation109_spill] sm:$0xff]  ;;  %v14893_v33 = vld [vmem:[#allocation395_spill] sm:$0xff]  ;;  %v2820_v32 = vpop.permute.xlu1 %2819 }
 0x4bb   :  { %v3272_v35 = vsel %vm3213_vm7, %v3207_v53, %v14889_v56  ;;  %v3015_v18 = vsel %vm2953_vm3, %v2950_v38, %v14890_v59  ;;  %v14891_v22 = vld [vmem:[#allocation164_spill] sm:$0xff]  ;;  %v14892_v42 = vld [vmem:[#allocation337_spill] sm:$0xff]  ;;  %v14895_v60 = vld [vmem:[#allocation222_spill] sm:$0xff] }
 0x4bc   :  { %v3079_v61 = vsel %vm3018_vm4, %v3014_v15, %v14891_v22  ;;  %v3273_v16 = vsel %vm3213_vm7, %v3208_v31, %v14892_v42  ;;  %v3337_v26 = vsel %vm3278_vm8, %v3272_v35, %v14893_v33  ;;  %v14894_v51 = vld [vmem:[#allocation165_spill] sm:$0xff]  ;;  %v14896_v41 = vld [vmem:[#allocation396_spill] sm:$0xff]  ;;  %v8427_v37 = vld [vmem:[#allocation2 + $0x318] sm:$0xff] }
 0x4bd   :  { %v3080_v49 = vsel %vm3018_vm4, %v3015_v18, %v14894_v51  ;;  %v3144_v43 = vsel %vm3083_vm5, %v3079_v61, %v14895_v60  ;;  %v3338_v27 = vsel %vm3278_vm8, %v3273_v16, %v14896_v41  ;;  %v3402_v20 = vsel %vm3343_vm9, %v3337_v26, %v2814_v1  ;;  %v14897_v23 = vld [vmem:[#allocation54_spill] sm:$0xff]  ;;  %v14898_v47 = vld [vmem:[#allocation223_spill] sm:$0xff]  ;;  %v14899_v55 = vld [vmem:[#allocation280_spill] sm:$0xff]  ;;  %v2822_v59 = vpop.permute.xlu0 %2821 }
 0x4be   :  { %v2951_v62 = vsel %vm24_vm0, %v8427_v37, %v14897_v23  ;;  %v3145_v14 = vsel %vm3083_vm5, %v3080_v49, %v14898_v47  ;;  %v3209_v10 = vsel %vm3148_vm6, %v3144_v43, %v14899_v55  ;;  %v3403_v34 = vsel %vm3343_vm9, %v3338_v27, %v2816_v8  ;;  %8229 = vmatprep.mubr.msk.f32.mxu0 %vm3420_vm10, %v3402_v20  ;;  %v8428_v5 = vld [vmem:[#allocation2 + $0x320] sm:$0xff]  ;;  %v14901_v54 = vld [vmem:[#allocation110_spill] sm:$0xff]  ;;  %v14902_v25 = vld [vmem:[#allocation281_spill] sm:$0xff]  ;;  %v2824_v61 = vpop.permute.xlu1 %2823 }
 0x4bf   :  { %v14900_v44 = vld [vmem:[#allocation55_spill] sm:$0xff]  ;;  %v3016_v12 = vsel %vm2953_vm3, %v2951_v62, %v14901_v54  ;;  %v3210_v46 = vsel %vm3148_vm6, %v3145_v14, %v14902_v25  ;;  %v14903_v58 = vld [vmem:[#allocation338_spill] sm:$0xff]  ;;  %8230 = vmatmul.mubr.msk.f32.gmra.mrb[58].mxu0 %vm3420_vm10, %v3403_v34  ;;  %v14907_v45 = vld [vmem:[#allocation397_spill] sm:$0xff] }
 0x4c0   :  { %v2952_v30 = vsel %vm24_vm0, %v8428_v5, %v14900_v44  ;;  %v3274_v63 = vsel %vm3213_vm7, %v3209_v10, %v14903_v58  ;;  %v14904_v52 = vld [vmem:[#allocation111_spill] sm:$0xff]  ;;  %v14905_v17 = vld [vmem:[#allocation166_spill] sm:$0xff]  ;;  %v14909_v48 = vld [vmem:[#allocation224_spill] sm:$0xff] }
 0x4c1   :  { %v3017_v13 = vsel %vm2953_vm3, %v2952_v30, %v14904_v52  ;;  %v3081_v29 = vsel %vm3018_vm4, %v3016_v12, %v14905_v17  ;;  %v14906_v57 = vld [vmem:[#allocation339_spill] sm:$0xff]  ;;  %v3339_v50 = vsel %vm3278_vm8, %v3274_v63, %v14907_v45  ;;  %v14910_v53 = vld [vmem:[#allocation225_spill] sm:$0xff]  ;;  %v14911_v3 = vld [vmem:[#allocation282_spill] sm:$0xff] }
 0x4c2   :  { %v3275_v11 = vsel %vm3213_vm7, %v3210_v46, %v14906_v57  ;;  %v14908_v36 = vld [vmem:[#allocation167_spill] sm:$0xff]  ;;  %v3146_v21 = vsel %vm3083_vm5, %v3081_v29, %v14909_v48  ;;  %v3404_v9 = vsel %vm3343_vm9, %v3339_v50, %v2818_v40  ;;  %v14913_v4 = vld [vmem:[#allocation340_spill] sm:$0xff] }
 0x4c3   :  { %v3082_v0 = vsel %vm3018_vm4, %v3017_v13, %v14908_v36  ;;  %v3340_v19 = vsel %vm3278_vm8, %v3275_v11, %v10416_v28  ;;  %v3211_v24 = vsel %vm3148_vm6, %v3146_v21, %v14911_v3  ;;  %8232 = vmatprep.mubr.msk.f32.mxu0 %vm3420_vm10, %v3404_v9  ;;  %v14912_v7 = vld [vmem:[#allocation283_spill] sm:$0xff]  ;;  %v14914_v28 = vld [vmem:[#allocation341_spill] sm:$0xff] }
 0x4c4   :  { %v3147_v2 = vsel %vm3083_vm5, %v3082_v0, %v14910_v53  ;;  %v3405_v38 = vsel %vm3343_vm9, %v3340_v19, %v2820_v32  ;;  %v3276_v31 = vsel %vm3213_vm7, %v3211_v24, %v14913_v4  ;;  %v11470_v16 = vld [vmem:[%s14115_s2] ss:$0 sm:$0xff] }
 0x4c5   :  { %v3212_v15 = vsel %vm3148_vm6, %v3147_v2, %v14912_v7  ;;  %8233 = vmatmul.mubr.msk.f32.gmra.mrb[60].mxu0 %vm3420_vm10, %v3405_v38  ;;  %v3341_v35 = vsel %vm3278_vm8, %v3276_v31, %v10444_v6 }
 0x4c6   :  { %v3277_v56 = vsel %vm3213_vm7, %v3212_v15, %v14914_v28  ;;  %v3406_v22 = vsel %vm3343_vm9, %v3341_v35, %v2822_v59 }
 0x4c7   :  { %v3342_v18 = vsel %vm3278_vm8, %v3277_v56, %v10454_v39  ;;  %8235 = vmatprep.mubr.msk.f32.mxu0 %vm3420_vm10, %v3406_v22 }
 0x4c8   :  { %v3407_v42 = vsel %vm3343_vm9, %v3342_v18, %v2824_v61 }
 0x4c9   :  { %8236 = vmatmul.mubr.msk.f32.gmra.mrb[62].mxu0 %vm3420_vm10, %v3407_v42 }
 0x506   :  { %v8144_v33 = vpop.f32.mrb[0].mxu0 }
 0x507   :  { %v3689_v6 = vadd.f32 %v8144_v33, %v11470_v16  ;;  %v3683_v26 = vpop.f32.mrb[1].mxu0 }
 0x508   :  { %v3684_v39 = vadd.f32 %v11470_v16, %v3683_v26 }
 0x509   :  { %4003 = vst.msk [vmem:[#allocation2 + $0x21] sm:$0xff] %vm24_vm0, %v3689_v6 }
 0x50a   :  { %4002 = vst.msk [vmem:[#allocation2 + $0x19] sm:$0xff] %vm24_vm0, %v3684_v39  ;;  %v8147_v1 = vpop.f32.mrb[2].mxu0 }
 0x50b   :  { %v3699_v51 = vadd.f32 %v8147_v1, %v11470_v16  ;;  %v3693_v49 = vpop.f32.mrb[3].mxu0 }
 0x50c   :  { %v3694_v60 = vadd.f32 %v11470_v16, %v3693_v49 }
 0x50d   :  { %4005 = vst.msk [vmem:[#allocation2 + $0x39] sm:$0xff] %vm24_vm0, %v3699_v51 }
 0x50e   :  { %4004 = vst.msk [vmem:[#allocation2 + $0x31] sm:$0xff] %vm24_vm0, %v3694_v60  ;;  %v8150_v43 = vpop.f32.mrb[4].mxu0 }
 0x50f   :  { %v3709_v41 = vadd.f32 %v8150_v43, %v11470_v16  ;;  %v3703_v27 = vpop.f32.mrb[5].mxu0 }
 0x510   :  { %v3704_v20 = vadd.f32 %v11470_v16, %v3703_v27  ;;  %v4133_v8 = vld [vmem:[#allocation2 + $0x21] sm:$0xff] }
 0x511   :  { %4007 = vst.msk [vmem:[#allocation2 + $0x51] sm:$0xff] %vm24_vm0, %v3709_v41  ;;  %4712 = vrot.lane.b32.xlu1 %v4133_v8, %s8491_s12  ;;  %v4132_v37 = vld [vmem:[#allocation2 + $0x19] sm:$0xff] }
 0x512   :  { %4006 = vst.msk [vmem:[#allocation2 + $0x49] sm:$0xff] %vm24_vm0, %v3704_v20  ;;  %4710 = vrot.lane.b32.xlu0 %v4132_v37, %s8491_s12  ;;  %v8153_v23 = vpop.f32.mrb[6].mxu0 }
 0x513   :  { %v3719_v62 = vadd.f32 %v8153_v23, %v11470_v16  ;;  %v3713_v47 = vpop.f32.mrb[7].mxu0 }
 0x514   :  { %v3714_v14 = vadd.f32 %v11470_v16, %v3713_v47  ;;  %v4135_v55 = vld [vmem:[#allocation2 + $0x39] sm:$0xff] }
 0x515   :  { %4009 = vst.msk [vmem:[#allocation2 + $0x69] sm:$0xff] %vm24_vm0, %v3719_v62  ;;  %4716 = vrot.lane.b32.xlu1 %v4135_v55, %s8491_s12  ;;  %v4134_v10 = vld [vmem:[#allocation2 + $0x31] sm:$0xff] }
 0x516   :  { %4008 = vst.msk [vmem:[#allocation2 + $0x61] sm:$0xff] %vm24_vm0, %v3714_v14  ;;  %v8156_v34 = vpop.f32.mrb[8].mxu0  ;;  %4714 = vrot.lane.b32.xlu0 %v4134_v10, %s8491_s12 }
 0x517   :  { %v3729_v5 = vadd.f32 %v8156_v34, %v11470_v16  ;;  %v3723_v44 = vpop.f32.mrb[9].mxu0 }
 0x518   :  { %v3724_v30 = vadd.f32 %v11470_v16, %v3723_v44  ;;  %v4137_v54 = vld [vmem:[#allocation2 + $0x51] sm:$0xff] }
 0x519   :  { %4011 = vst.msk [vmem:[#allocation2 + $0x81] sm:$0xff] %vm24_vm0, %v3729_v5  ;;  %4720 = vrot.lane.b32.xlu1 %v4137_v54, %s8491_s12  ;;  %v4136_v12 = vld [vmem:[#allocation2 + $0x49] sm:$0xff] }
 0x51a   :  { %4010 = vst.msk [vmem:[#allocation2 + $0x79] sm:$0xff] %vm24_vm0, %v3724_v30  ;;  %v8159_v25 = vpop.f32.mrb[10].mxu0  ;;  %4718 = vrot.lane.b32.xlu0 %v4136_v12, %s8491_s12 }
 0x51b   :  { %v3739_v46 = vadd.f32 %v8159_v25, %v11470_v16  ;;  %v3733_v58 = vpop.f32.mrb[11].mxu0 }
 0x51c   :  { %v3734_v63 = vadd.f32 %v11470_v16, %v3733_v58  ;;  %v4139_v52 = vld [vmem:[#allocation2 + $0x69] sm:$0xff] }
 0x51d   :  { %4013 = vst.msk [vmem:[#allocation2 + $0x99] sm:$0xff] %vm24_vm0, %v3739_v46  ;;  %4724 = vrot.lane.b32.xlu1 %v4139_v52, %s8491_s12  ;;  %v4138_v13 = vld [vmem:[#allocation2 + $0x61] sm:$0xff] }
 0x51e   :  { %4012 = vst.msk [vmem:[#allocation2 + $0x91] sm:$0xff] %vm24_vm0, %v3734_v63  ;;  %v8162_v17 = vpop.f32.mrb[12].mxu0  ;;  %4722 = vrot.lane.b32.xlu0 %v4138_v13, %s8491_s12 }
 0x51f   :  { %v3749_v29 = vadd.f32 %v8162_v17, %v11470_v16  ;;  %v3743_v57 = vpop.f32.mrb[13].mxu0 }
 0x520   :  { %v3744_v11 = vadd.f32 %v11470_v16, %v3743_v57  ;;  %v4141_v45 = vld [vmem:[#allocation2 + $0x81] sm:$0xff] }
 0x521   :  { %4015 = vst.msk [vmem:[#allocation2 + $0xb1] sm:$0xff] %vm24_vm0, %v3749_v29  ;;  %4728 = vrot.lane.b32.xlu1 %v4141_v45, %s8491_s12  ;;  %v4140_v50 = vld [vmem:[#allocation2 + $0x79] sm:$0xff] }
 0x522   :  { %4014 = vst.msk [vmem:[#allocation2 + $0xa9] sm:$0xff] %vm24_vm0, %v3744_v11  ;;  %v8165_v40 = vpop.f32.mrb[14].mxu0  ;;  %4726 = vrot.lane.b32.xlu0 %v4140_v50, %s8491_s12  ;;  %v4163_v45 = vld [vmem:[#allocation2 + $0x1b9] sm:$0xff] }
 0x523   :  { %v3759_v36 = vadd.f32 %v8165_v40, %v11470_v16  ;;  %v3753_v0 = vpop.f32.mrb[15].mxu0 }
 0x524   :  { %v3754_v48 = vadd.f32 %v11470_v16, %v3753_v0  ;;  %v4143_v21 = vld [vmem:[#allocation2 + $0x99] sm:$0xff] }
 0x525   :  { %4017 = vst.msk [vmem:[#allocation2 + $0xc9] sm:$0xff] %vm24_vm0, %v3759_v36  ;;  %4732 = vrot.lane.b32.xlu1 %v4143_v21, %s8491_s12  ;;  %v4142_v19 = vld [vmem:[#allocation2 + $0x91] sm:$0xff] }
 0x526   :  { %4016 = vst.msk [vmem:[#allocation2 + $0xc1] sm:$0xff] %vm24_vm0, %v3754_v48  ;;  %v8168_v9 = vpop.f32.mrb[16].mxu0  ;;  %4730 = vrot.lane.b32.xlu0 %v4142_v19, %s8491_s12  ;;  %v4162_v36 = vld [vmem:[#allocation2 + $0x1b1] sm:$0xff] }
 0x527   :  { %v3769_v32 = vadd.f32 %v8168_v9, %v11470_v16  ;;  %v3763_v53 = vpop.f32.mrb[17].mxu0 }
 0x528   :  { %v3764_v2 = vadd.f32 %v11470_v16, %v3763_v53  ;;  %v4145_v3 = vld [vmem:[#allocation2 + $0xb1] sm:$0xff] }
 0x529   :  { %4019 = vst.msk [vmem:[#allocation2 + $0xe1] sm:$0xff] %vm24_vm0, %v3769_v32  ;;  %4736 = vrot.lane.b32.xlu1 %v4145_v3, %s8491_s12  ;;  %v4144_v24 = vld [vmem:[#allocation2 + $0xa9] sm:$0xff] }
 0x52a   :  { %4018 = vst.msk [vmem:[#allocation2 + $0xd9] sm:$0xff] %vm24_vm0, %v3764_v2  ;;  %v8171_v38 = vpop.f32.mrb[18].mxu0  ;;  %4734 = vrot.lane.b32.xlu0 %v4144_v24, %s8491_s12 }
 0x52b   :  { %v3779_v7 = vadd.f32 %v8171_v38, %v11470_v16  ;;  %v3773_v15 = vpop.f32.mrb[19].mxu0 }
 0x52c   :  { %v3774_v4 = vadd.f32 %v11470_v16, %v3773_v15  ;;  %v4147_v31 = vld [vmem:[#allocation2 + $0xc9] sm:$0xff] }
 0x52d   :  { %4021 = vst.msk [vmem:[#allocation2 + $0xf9] sm:$0xff] %vm24_vm0, %v3779_v7  ;;  %4740 = vrot.lane.b32.xlu1 %v4147_v31, %s8491_s12  ;;  %v4146_v28 = vld [vmem:[#allocation2 + $0xc1] sm:$0xff] }
 0x52e   :  { %4020 = vst.msk [vmem:[#allocation2 + $0xf1] sm:$0xff] %vm24_vm0, %v3774_v4  ;;  %v8174_v56 = vpop.f32.mrb[20].mxu0  ;;  %4738 = vrot.lane.b32.xlu0 %v4146_v28, %s8491_s12 }
 0x52f   :  { %v3789_v35 = vadd.f32 %v8174_v56, %v11470_v16  ;;  %v3783_v59 = vpop.f32.mrb[21].mxu0 }
 0x530   :  { %v3784_v18 = vadd.f32 %v11470_v16, %v3783_v59  ;;  %v4149_v22 = vld [vmem:[#allocation2 + $0xe1] sm:$0xff] }
 0x531   :  { %4023 = vst.msk [vmem:[#allocation2 + $0x111] sm:$0xff] %vm24_vm0, %v3789_v35  ;;  %4744 = vrot.lane.b32.xlu1 %v4149_v22, %s8491_s12  ;;  %v4148_v61 = vld [vmem:[#allocation2 + $0xd9] sm:$0xff] }
 0x532   :  { %4022 = vst.msk [vmem:[#allocation2 + $0x109] sm:$0xff] %vm24_vm0, %v3784_v18  ;;  %v8177_v42 = vpop.f32.mrb[22].mxu0  ;;  %4742 = vrot.lane.b32.xlu0 %v4148_v61, %s8491_s12 }
 0x533   :  { %v3799_v33 = vadd.f32 %v8177_v42, %v11470_v16  ;;  %v3793_v6 = vpop.f32.mrb[23].mxu0 }
 0x534   :  { %v3794_v26 = vadd.f32 %v11470_v16, %v3793_v6  ;;  %v4151_v39 = vld [vmem:[#allocation2 + $0xf9] sm:$0xff] }
 0x535   :  { %4025 = vst.msk [vmem:[#allocation2 + $0x129] sm:$0xff] %vm24_vm0, %v3799_v33  ;;  %4748 = vrot.lane.b32.xlu1 %v4151_v39, %s8491_s12  ;;  %v4150_v1 = vld [vmem:[#allocation2 + $0xf1] sm:$0xff] }
 0x536   :  { %4024 = vst.msk [vmem:[#allocation2 + $0x121] sm:$0xff] %vm24_vm0, %v3794_v26  ;;  %4746 = vrot.lane.b32.xlu0 %v4150_v1, %s8491_s12 }
 0x537   :  { %v8180_v51 = vpop.f32.mrb[24].mxu0 }
 0x538   :  { %v3809_v49 = vadd.f32 %v8180_v51, %v11470_v16  ;;  %v3803_v60 = vpop.f32.mrb[25].mxu0  ;;  %v4153_v41 = vld [vmem:[#allocation2 + $0x111] sm:$0xff] }
 0x539   :  { %v3804_v43 = vadd.f32 %v11470_v16, %v3803_v60  ;;  %4752 = vrot.lane.b32.xlu1 %v4153_v41, %s8491_s12  ;;  %v4152_v27 = vld [vmem:[#allocation2 + $0x109] sm:$0xff] }
 0x53a   :  { %4027 = vst.msk [vmem:[#allocation2 + $0x141] sm:$0xff] %vm24_vm0, %v3809_v49  ;;  %4750 = vrot.lane.b32.xlu0 %v4152_v27, %s8491_s12 }
 0x53b   :  { %4026 = vst.msk [vmem:[#allocation2 + $0x139] sm:$0xff] %vm24_vm0, %v3804_v43 }
 0x53c   :  { %v4155_v62 = vld [vmem:[#allocation2 + $0x129] sm:$0xff] }
 0x53d   :  { %4756 = vrot.lane.b32.xlu1 %v4155_v62, %s8491_s12  ;;  %v4154_v47 = vld [vmem:[#allocation2 + $0x121] sm:$0xff] }
 0x53e   :  { %v8183_v20 = vpop.f32.mrb[26].mxu0  ;;  %4754 = vrot.lane.b32.xlu0 %v4154_v47, %s8491_s12 }
 0x53f   :  { %v3819_v8 = vadd.f32 %v8183_v20, %v11470_v16  ;;  %v3813_v37 = vpop.f32.mrb[27].mxu0 }
 0x540   :  { %v3814_v23 = vadd.f32 %v11470_v16, %v3813_v37 }
 0x541   :  { %4029 = vst.msk [vmem:[#allocation2 + $0x159] sm:$0xff] %vm24_vm0, %v3819_v8  ;;  %v4157_v5 = vld [vmem:[#allocation2 + $0x141] sm:$0xff] }
 0x542   :  { %4028 = vst.msk [vmem:[#allocation2 + $0x151] sm:$0xff] %vm24_vm0, %v3814_v23  ;;  %4760 = vrot.lane.b32.xlu1 %v4157_v5, %s8491_s12  ;;  %v4156_v44 = vld [vmem:[#allocation2 + $0x139] sm:$0xff] }
 0x543   :  { %v8186_v14 = vpop.f32.mrb[28].mxu0  ;;  %4758 = vrot.lane.b32.xlu0 %v4156_v44, %s8491_s12 }
 0x544   :  { %v3829_v55 = vadd.f32 %v8186_v14, %v11470_v16  ;;  %v3823_v10 = vpop.f32.mrb[29].mxu0 }
 0x545   :  { %v3824_v34 = vadd.f32 %v11470_v16, %v3823_v10 }
 0x546   :  { %4031 = vst.msk [vmem:[#allocation2 + $0x171] sm:$0xff] %vm24_vm0, %v3829_v55 }
 0x547   :  { %4030 = vst.msk [vmem:[#allocation2 + $0x169] sm:$0xff] %vm24_vm0, %v3824_v34  ;;  %v8189_v30 = vpop.f32.mrb[30].mxu0 }
 0x548   :  { %v3839_v54 = vadd.f32 %v8189_v30, %v11470_v16  ;;  %v3833_v12 = vpop.f32.mrb[31].mxu0  ;;  %v4159_v46 = vld [vmem:[#allocation2 + $0x159] sm:$0xff] }
 0x549   :  { %v3834_v25 = vadd.f32 %v11470_v16, %v3833_v12  ;;  %4764 = vrot.lane.b32.xlu1 %v4159_v46, %s8491_s12  ;;  %v4158_v58 = vld [vmem:[#allocation2 + $0x151] sm:$0xff] }
 0x54a   :  { %4033 = vst.msk [vmem:[#allocation2 + $0x189] sm:$0xff] %vm24_vm0, %v3839_v54  ;;  %4762 = vrot.lane.b32.xlu0 %v4158_v58, %s8491_s12 }
 0x54b   :  { %4032 = vst.msk [vmem:[#allocation2 + $0x181] sm:$0xff] %vm24_vm0, %v3834_v25 }
 0x54d   :  { %v8192_v63 = vpop.f32.mrb[32].mxu0  ;;  %v4161_v29 = vld [vmem:[#allocation2 + $0x171] sm:$0xff] }
 0x54e   :  { %v3849_v52 = vadd.f32 %v8192_v63, %v11470_v16  ;;  %v3843_v13 = vpop.f32.mrb[33].mxu0  ;;  %4768 = vrot.lane.b32.xlu1 %v4161_v29, %s8491_s12  ;;  %v4160_v57 = vld [vmem:[#allocation2 + $0x169] sm:$0xff] }
 0x54f   :  { %v3844_v17 = vadd.f32 %v11470_v16, %v3843_v13  ;;  %4766 = vrot.lane.b32.xlu0 %v4160_v57, %s8491_s12 }
 0x550   :  { %4035 = vst.msk [vmem:[#allocation2 + $0x1d1] sm:$0xff] %vm24_vm0, %v3849_v52 }
 0x551   :  { %4034 = vst.msk [vmem:[#allocation2 + $0x1c9] sm:$0xff] %vm24_vm0, %v3844_v17 }
 0x552   :  { %v8195_v11 = vpop.f32.mrb[34].mxu0  ;;  %4772 = vrot.lane.b32.xlu1 %v4163_v45, %s8491_s12 }
 0x553   :  { %v3859_v50 = vadd.f32 %v8195_v11, %v11470_v16  ;;  %v3853_v40 = vpop.f32.mrb[35].mxu0  ;;  %4770 = vrot.lane.b32.xlu0 %v4162_v36, %s8491_s12 }
 0x554   :  { %v3854_v0 = vadd.f32 %v11470_v16, %v3853_v40 }
 0x555   :  { %4037 = vst.msk [vmem:[#allocation2 + $0x1e9] sm:$0xff] %vm24_vm0, %v3859_v50 }
 0x556   :  { %4036 = vst.msk [vmem:[#allocation2 + $0x1e1] sm:$0xff] %vm24_vm0, %v3854_v0 }
 0x557   :  { %v8198_v48 = vpop.f32.mrb[36].mxu0  ;;  %v4165_v32 = vld [vmem:[#allocation2 + $0x1d1] sm:$0xff] }
 0x558   :  { %v3869_v21 = vadd.f32 %v8198_v48, %v11470_v16  ;;  %v3863_v19 = vpop.f32.mrb[37].mxu0  ;;  %4776 = vrot.lane.b32.xlu1 %v4165_v32, %s8491_s12  ;;  %v4164_v53 = vld [vmem:[#allocation2 + $0x1c9] sm:$0xff] }
 0x559   :  { %v3864_v9 = vadd.f32 %v11470_v16, %v3863_v19  ;;  %4774 = vrot.lane.b32.xlu0 %v4164_v53, %s8491_s12 }
 0x55a   :  { %4039 = vst.msk [vmem:[#allocation2 + $0x201] sm:$0xff] %vm24_vm0, %v3869_v21 }
 0x55b   :  { %4038 = vst.msk [vmem:[#allocation2 + $0x1f9] sm:$0xff] %vm24_vm0, %v3864_v9 }
 0x55c   :  { %v4167_v7 = vld [vmem:[#allocation2 + $0x1e9] sm:$0xff] }
 0x55d   :  { %v8201_v2 = vpop.f32.mrb[38].mxu0  ;;  %4780 = vrot.lane.b32.xlu1 %v4167_v7, %s8491_s12  ;;  %v4166_v15 = vld [vmem:[#allocation2 + $0x1e1] sm:$0xff] }
 0x55e   :  { %v3879_v3 = vadd.f32 %v8201_v2, %v11470_v16  ;;  %v3873_v24 = vpop.f32.mrb[39].mxu0  ;;  %4778 = vrot.lane.b32.xlu0 %v4166_v15, %s8491_s12  ;;  %v11650_v15 = vpop.permute.xlu0 %4706 }
 0x55f   :  { %v3874_v38 = vadd.f32 %v11470_v16, %v3873_v24 }
 0x560   :  { %4041 = vst.msk [vmem:[#allocation2 + $0x219] sm:$0xff] %vm24_vm0, %v3879_v3 }
 0x561   :  { %4040 = vst.msk [vmem:[#allocation2 + $0x211] sm:$0xff] %vm24_vm0, %v3874_v38  ;;  %v4169_v35 = vld [vmem:[#allocation2 + $0x201] sm:$0xff]  ;;  %v11646_v38 = vpop.permute.xlu1 %4708 }
 0x562   :  { %v8204_v4 = vpop.f32.mrb[40].mxu0  ;;  %4784 = vrot.lane.b32.xlu1 %v4169_v35, %s8491_s12  ;;  %v4168_v59 = vld [vmem:[#allocation2 + $0x1f9] sm:$0xff] }
 0x563   :  { %v3889_v31 = vadd.f32 %v8204_v4, %v11470_v16  ;;  %v3883_v28 = vpop.f32.mrb[41].mxu0  ;;  %4782 = vrot.lane.b32.xlu0 %v4168_v59, %s8491_s12 }
 0x564   :  { %v3884_v56 = vadd.f32 %v11470_v16, %v3883_v28 }
 0x565   :  { %4043 = vst.msk [vmem:[#allocation2 + $0x231] sm:$0xff] %vm24_vm0, %v3889_v31 }
 0x566   :  { %4042 = vst.msk [vmem:[#allocation2 + $0x229] sm:$0xff] %vm24_vm0, %v3884_v56 }
 0x567   :  { %v8207_v18 = vpop.f32.mrb[42].mxu0  ;;  %v4171_v33 = vld [vmem:[#allocation2 + $0x219] sm:$0xff] }
 0x568   :  { %v3899_v22 = vadd.f32 %v8207_v18, %v11470_v16  ;;  %v3893_v61 = vpop.f32.mrb[43].mxu0  ;;  %4788 = vrot.lane.b32.xlu1 %v4171_v33, %s8491_s12  ;;  %v4170_v6 = vld [vmem:[#allocation2 + $0x211] sm:$0xff] }
 0x569   :  { %v3894_v42 = vadd.f32 %v11470_v16, %v3893_v61  ;;  %4786 = vrot.lane.b32.xlu0 %v4170_v6, %s8491_s12 }
 0x56a   :  { %4045 = vst.msk [vmem:[#allocation2 + $0x249] sm:$0xff] %vm24_vm0, %v3899_v22 }
 0x56b   :  { %4044 = vst.msk [vmem:[#allocation2 + $0x241] sm:$0xff] %vm24_vm0, %v3894_v42 }
 0x56c   :  { %v4173_v49 = vld [vmem:[#allocation2 + $0x231] sm:$0xff] }
 0x56d   :  { %v8210_v26 = vpop.f32.mrb[44].mxu0  ;;  %4792 = vrot.lane.b32.xlu1 %v4173_v49, %s8491_s12  ;;  %v4172_v60 = vld [vmem:[#allocation2 + $0x229] sm:$0xff] }
 0x56e   :  { %v3909_v39 = vadd.f32 %v8210_v26, %v11470_v16  ;;  %v3903_v1 = vpop.f32.mrb[45].mxu0  ;;  %4790 = vrot.lane.b32.xlu0 %v4172_v60, %s8491_s12  ;;  %v4195_v49 = vld [vmem:[#allocation2 + $0xa] sm:$0xff] }
 0x56f   :  { %v3904_v51 = vadd.f32 %v11470_v16, %v3903_v1 }
 0x570   :  { %4047 = vst.msk [vmem:[#allocation2 + $0x261] sm:$0xff] %vm24_vm0, %v3909_v39 }
 0x571   :  { %4046 = vst.msk [vmem:[#allocation2 + $0x259] sm:$0xff] %vm24_vm0, %v3904_v51  ;;  %v4175_v8 = vld [vmem:[#allocation2 + $0x249] sm:$0xff] }
 0x572   :  { %4796 = vrot.lane.b32.xlu1 %v4175_v8, %s8491_s12  ;;  %v4174_v37 = vld [vmem:[#allocation2 + $0x241] sm:$0xff] }
 0x573   :  { %v8213_v43 = vpop.f32.mrb[46].mxu0  ;;  %4794 = vrot.lane.b32.xlu0 %v4174_v37, %s8491_s12  ;;  %v4197_v8 = vld [vmem:[#allocation2 + $0x22] sm:$0xff]  ;;  %v4196_v37 = vld [vmem:[#allocation2 + $0x1a] sm:$0xff] }
 0x574   :  { %v3919_v41 = vadd.f32 %v8213_v43, %v11470_v16  ;;  %v3913_v27 = vpop.f32.mrb[47].mxu0  ;;  %v4194_v43 = vld [vmem:[#allocation2 + $0x2] sm:$0xff] }
 0x575   :  { %v3914_v20 = vadd.f32 %v11470_v16, %v3913_v27 }
 0x576   :  { %4049 = vst.msk [vmem:[#allocation2 + $0x279] sm:$0xff] %vm24_vm0, %v3919_v41 }
 0x577   :  { %4048 = vst.msk [vmem:[#allocation2 + $0x271] sm:$0xff] %vm24_vm0, %v3914_v20  ;;  %v8216_v23 = vpop.f32.mrb[48].mxu0  ;;  %v4177_v55 = vld [vmem:[#allocation2 + $0x261] sm:$0xff] }
 0x578   :  { %v3929_v62 = vadd.f32 %v8216_v23, %v11470_v16  ;;  %v3923_v47 = vpop.f32.mrb[49].mxu0  ;;  %4800 = vrot.lane.b32.xlu1 %v4177_v55, %s8491_s12  ;;  %v4176_v10 = vld [vmem:[#allocation2 + $0x259] sm:$0xff] }
 0x579   :  { %v3924_v14 = vadd.f32 %v11470_v16, %v3923_v47  ;;  %4798 = vrot.lane.b32.xlu0 %v4176_v10, %s8491_s12  ;;  %v4199_v47 = vld [vmem:[#allocation2 + $0x3a] sm:$0xff] }
 0x57a   :  { %4051 = vst.msk [vmem:[#allocation2 + $0x291] sm:$0xff] %vm24_vm0, %v3929_v62 }
 0x57b   :  { %4050 = vst.msk [vmem:[#allocation2 + $0x289] sm:$0xff] %vm24_vm0, %v3924_v14  ;;  %v4198_v14 = vld [vmem:[#allocation2 + $0x32] sm:$0xff] }
 0x57d   :  { %v8219_v34 = vpop.f32.mrb[50].mxu0  ;;  %v4179_v54 = vld [vmem:[#allocation2 + $0x279] sm:$0xff] }
 0x57e   :  { %v3939_v5 = vadd.f32 %v8219_v34, %v11470_v16  ;;  %v3933_v44 = vpop.f32.mrb[51].mxu0  ;;  %4804 = vrot.lane.b32.xlu1 %v4179_v54, %s8491_s12  ;;  %v4178_v12 = vld [vmem:[#allocation2 + $0x271] sm:$0xff] }
 0x57f   :  { %v3934_v30 = vadd.f32 %v11470_v16, %v3933_v44  ;;  %4802 = vrot.lane.b32.xlu0 %v4178_v12, %s8491_s12  ;;  %v4201_v34 = vld [vmem:[#allocation2 + $0x52] sm:$0xff]  ;;  %v4203_v54 = vld [vmem:[#allocation2 + $0x6a] sm:$0xff]  ;;  %v4202_v12 = vld [vmem:[#allocation2 + $0x62] sm:$0xff] }
 0x580   :  { %4053 = vst.msk [vmem:[#allocation2 + $0x2a9] sm:$0xff] %vm24_vm0, %v3939_v5  ;;  %v4200_v5 = vld [vmem:[#allocation2 + $0x4a] sm:$0xff] }
 0x581   :  { %4052 = vst.msk [vmem:[#allocation2 + $0x2a1] sm:$0xff] %vm24_vm0, %v3934_v30  ;;  %v4181_v52 = vld [vmem:[#allocation2 + $0x291] sm:$0xff] }
 0x582   :  { %v8222_v25 = vpop.f32.mrb[52].mxu0  ;;  %4808 = vrot.lane.b32.xlu1 %v4181_v52, %s8491_s12  ;;  %v4180_v13 = vld [vmem:[#allocation2 + $0x289] sm:$0xff] }
 0x583   :  { %v3949_v46 = vadd.f32 %v8222_v25, %v11470_v16  ;;  %v3943_v58 = vpop.f32.mrb[53].mxu0  ;;  %4806 = vrot.lane.b32.xlu0 %v4180_v13, %s8491_s12  ;;  %v11659_v22 = vpop.permute.xlu1 %4712 }
 0x584   :  { %v3944_v63 = vadd.f32 %v11470_v16, %v3943_v58  ;;  %v11662_v33 = vpop.permute.xlu0 %4710  ;;  %v4205_v58 = vld [vmem:[#allocation2 + $0x82] sm:$0xff] }
 0x585   :  { %4055 = vst.msk [vmem:[#allocation2 + $0x2c1] sm:$0xff] %vm24_vm0, %v3949_v46 }
 0x586   :  { %4054 = vst.msk [vmem:[#allocation2 + $0x2b9] sm:$0xff] %vm24_vm0, %v3944_v63  ;;  %v4204_v63 = vld [vmem:[#allocation2 + $0x7a] sm:$0xff] }
 0x587   :  { %v8225_v17 = vpop.f32.mrb[54].mxu0  ;;  %v4183_v45 = vld [vmem:[#allocation2 + $0x2a9] sm:$0xff]  ;;  %v11668_v39 = vpop.permute.xlu1 %4716 }
 0x588   :  { %v3959_v29 = vadd.f32 %v8225_v17, %v11470_v16  ;;  %v3953_v57 = vpop.f32.mrb[55].mxu0  ;;  %4812 = vrot.lane.b32.xlu1 %v4183_v45, %s8491_s12  ;;  %v4182_v50 = vld [vmem:[#allocation2 + $0x2a1] sm:$0xff]  ;;  %v11670_v1 = vpop.permute.xlu0 %4714  ;;  %v4209_v45 = vld [vmem:[#allocation2 + $0xb2] sm:$0xff] }
 0x589   :  { %v3954_v11 = vadd.f32 %v11470_v16, %v3953_v57  ;;  %4810 = vrot.lane.b32.xlu0 %v4182_v50, %s8491_s12  ;;  %v4207_v17 = vld [vmem:[#allocation2 + $0x9a] sm:$0xff]  ;;  %v4208_v50 = vld [vmem:[#allocation2 + $0xaa] sm:$0xff] }
 0x58a   :  { %4057 = vst.msk [vmem:[#allocation2 + $0x2d9] sm:$0xff] %vm24_vm0, %v3959_v29  ;;  %v4206_v29 = vld [vmem:[#allocation2 + $0x92] sm:$0xff] }
 0x58b   :  { %4056 = vst.msk [vmem:[#allocation2 + $0x2d1] sm:$0xff] %vm24_vm0, %v3954_v11  ;;  %v11674_v60 = vpop.permute.xlu1 %4720 }
 0x58c   :  { %v4185_v21 = vld [vmem:[#allocation2 + $0x2c1] sm:$0xff]  ;;  %14915 = vst [vmem:[#allocation168_spill] sm:$0xff] %v11674_v60  ;;  %v11676_v41 = vpop.permute.xlu0 %4718  ;;  %v12446_v60 = vld [vmem:[#allocation2 + $0x18a] sm:$0xff] }
 0x58d   :  { %v8228_v40 = vpop.f32.mrb[56].mxu0  ;;  %4816 = vrot.lane.b32.xlu1 %v4185_v21, %s8491_s12  ;;  %v4184_v19 = vld [vmem:[#allocation2 + $0x2b9] sm:$0xff]  ;;  %14916 = vst [vmem:[#allocation342_spill] sm:$0xff] %v11676_v41  ;;  %15126 = vst [vmem:[#allocation199_spill] sm:$0xff] %v12446_v60  ;;  %v4420_v41 = vld [vmem:[#allocation2 + $0x1e2] sm:$0xff] }
 0x58e   :  { %v3969_v36 = vadd.f32 %v8228_v40, %v11470_v16  ;;  %v3963_v0 = vpop.f32.mrb[57].mxu0  ;;  %4814 = vrot.lane.b32.xlu0 %v4184_v19, %s8491_s12 }
 0x58f   :  { %v3964_v48 = vadd.f32 %v11470_v16, %v3963_v0  ;;  %v11680_v27 = vpop.permute.xlu1 %4724  ;;  %v4211_v0 = vld [vmem:[#allocation2 + $0xca] sm:$0xff] }
 0x590   :  { %4059 = vst.msk [vmem:[#allocation2 + $0x2f1] sm:$0xff] %vm24_vm0, %v3969_v36  ;;  %14917 = vst [vmem:[#allocation169_spill] sm:$0xff] %v11680_v27  ;;  %v11682_v20 = vpop.permute.xlu0 %4722  ;;  %v12398_v27 = vld [vmem:[#allocation2 + $0x12a] sm:$0xff] }
 0x591   :  { %4058 = vst.msk [vmem:[#allocation2 + $0x2e9] sm:$0xff] %vm24_vm0, %v3964_v48  ;;  %v4187_v3 = vld [vmem:[#allocation2 + $0x2d9] sm:$0xff]  ;;  %14918 = vst [vmem:[#allocation226_spill] sm:$0xff] %v11682_v20  ;;  %v4210_v48 = vld [vmem:[#allocation2 + $0xc2] sm:$0xff] }
 0x592   :  { %v8231_v9 = vpop.f32.mrb[58].mxu0  ;;  %4820 = vrot.lane.b32.xlu1 %v4187_v3, %s8491_s12  ;;  %v4186_v24 = vld [vmem:[#allocation2 + $0x2d1] sm:$0xff]  ;;  %v4215_v3 = vld [vmem:[#allocation2 + $0xfa] sm:$0xff] }
 0x593   :  { %v3979_v32 = vadd.f32 %v8231_v9, %v11470_v16  ;;  %v3973_v53 = vpop.f32.mrb[59].mxu0  ;;  %4818 = vrot.lane.b32.xlu0 %v4186_v24, %s8491_s12  ;;  %v11686_v23 = vpop.permute.xlu1 %4728  ;;  %v4213_v9 = vld [vmem:[#allocation2 + $0xe2] sm:$0xff]  ;;  %v4214_v24 = vld [vmem:[#allocation2 + $0xf2] sm:$0xff] }
 0x594   :  { %v3974_v2 = vadd.f32 %v11470_v16, %v3973_v53  ;;  %14919 = vst [vmem:[#allocation56_spill] sm:$0xff] %v11686_v23  ;;  %v11688_v62 = vpop.permute.xlu0 %4726  ;;  %v12350_v23 = vld [vmem:[#allocation2 + $0xca] sm:$0xff] }
 0x595   :  { %4061 = vst.msk [vmem:[#allocation2 + $0x309] sm:$0xff] %vm24_vm0, %v3979_v32  ;;  %14920 = vst [vmem:[#allocation227_spill] sm:$0xff] %v11688_v62  ;;  %v4212_v32 = vld [vmem:[#allocation2 + $0xda] sm:$0xff] }
 0x596   :  { %4060 = vst.msk [vmem:[#allocation2 + $0x301] sm:$0xff] %vm24_vm0, %v3974_v2 }
 0x597   :  { %v4189_v56 = vld [vmem:[#allocation2 + $0x2f1] sm:$0xff]  ;;  %v11692_v55 = vpop.permute.xlu1 %4732 }
 0x598   :  { %v8234_v7 = vpop.f32.mrb[60].mxu0  ;;  %4824 = vrot.lane.b32.xlu1 %v4189_v56, %s8491_s12  ;;  %v4188_v35 = vld [vmem:[#allocation2 + $0x2e9] sm:$0xff]  ;;  %14921 = vst [vmem:[#allocation284_spill] sm:$0xff] %v11692_v55  ;;  %v11694_v10 = vpop.permute.xlu0 %4730 }
 0x599   :  { %v3989_v4 = vadd.f32 %v8234_v7, %v11470_v16  ;;  %v3983_v31 = vpop.f32.mrb[61].mxu0  ;;  %4822 = vrot.lane.b32.xlu0 %v4188_v35, %s8491_s12  ;;  %14922 = vst [vmem:[#allocation57_spill] sm:$0xff] %v11694_v10 }
 0x59a   :  { %v3984_v28 = vadd.f32 %v11470_v16, %v3983_v31  ;;  %v4217_v31 = vld [vmem:[#allocation2 + $0x112] sm:$0xff] }
 0x59b   :  { %4063 = vst.msk [vmem:[#allocation2 + $0x321] sm:$0xff] %vm24_vm0, %v3989_v4  ;;  %v11698_v44 = vpop.permute.xlu1 %4736 }
 0x59c   :  { %4062 = vst.msk [vmem:[#allocation2 + $0x319] sm:$0xff] %vm24_vm0, %v3984_v28  ;;  %v8237_v59 = vpop.f32.mrb[62].mxu0  ;;  %v4191_v6 = vld [vmem:[#allocation2 + $0x309] sm:$0xff]  ;;  %14923 = vst [vmem:[#allocation112_spill] sm:$0xff] %v11698_v44  ;;  %v11700_v30 = vpop.permute.xlu0 %4734  ;;  %v12278_v44 = vld [vmem:[#allocation2 + $0x3a] sm:$0xff] }
 0x59d   :  { %v3999_v18 = vadd.f32 %v8237_v59, %v11470_v16  ;;  %v3993_v61 = vpop.f32.mrb[63].mxu0  ;;  %4828 = vrot.lane.b32.xlu1 %v4191_v6, %s8491_s12  ;;  %v4190_v26 = vld [vmem:[#allocation2 + $0x301] sm:$0xff]  ;;  %14924 = vst [vmem:[#allocation285_spill] sm:$0xff] %v11700_v30  ;;  %v4216_v28 = vld [vmem:[#allocation2 + $0x10a] sm:$0xff]  ;;  %v12290_v30 = vld [vmem:[#allocation2 + $0x52] sm:$0xff] }
 0x59e   :  { %v3994_v42 = vadd.f32 %v11470_v16, %v3993_v61  ;;  %4826 = vrot.lane.b32.xlu0 %v4190_v26, %s8491_s12  ;;  %v4219_v59 = vld [vmem:[#allocation2 + $0x12a] sm:$0xff]  ;;  %v4221_v6 = vld [vmem:[#allocation2 + $0x142] sm:$0xff]  ;;  %v4220_v26 = vld [vmem:[#allocation2 + $0x13a] sm:$0xff] }
 0x59f   :  { %4065 = vst.msk [vmem:[#allocation2 + $0x339] sm:$0xff] %vm24_vm0, %v3999_v18  ;;  %v11704_v25 = vpop.permute.xlu1 %4740  ;;  %v4218_v18 = vld [vmem:[#allocation2 + $0x122] sm:$0xff] }
 0x5a0   :  { %4064 = vst.msk [vmem:[#allocation2 + $0x331] sm:$0xff] %vm24_vm0, %v3994_v42  ;;  %14925 = vst [vmem:[#allocation343_spill] sm:$0xff] %v11704_v25  ;;  %v11706_v46 = vpop.permute.xlu0 %4738  ;;  %v4335_v25 = vld [vmem:[#allocation2 + $0xb1] sm:$0xff] }
 0x5a1   :  { %14926 = vst [vmem:[#allocation113_spill] sm:$0xff] %v11706_v46 }
 0x5a2   :  { %v4193_v51 = vld [vmem:[#allocation2 + $0x321] sm:$0xff] }
 0x5a3   :  { %4832 = vrot.lane.b32.xlu1 %v4193_v51, %s8491_s12  ;;  %v4192_v16 = vld [vmem:[#allocation2 + $0x319] sm:$0xff]  ;;  %v11710_v52 = vpop.permute.xlu1 %4744 }
 0x5a4   :  { %4830 = vrot.lane.b32.xlu0 %v4192_v16, %s8491_s12  ;;  %14927 = vst [vmem:[#allocation170_spill] sm:$0xff] %v11710_v52  ;;  %v11712_v13 = vpop.permute.xlu0 %4742  ;;  %v4333_v52 = vld [vmem:[#allocation2 + $0x99] sm:$0xff] }
 0x5a5   :  { %14928 = vst [vmem:[#allocation344_spill] sm:$0xff] %v11712_v13  ;;  %v4332_v13 = vld [vmem:[#allocation2 + $0x91] sm:$0xff] }
 0x5a7   :  { %4964 = vrot.lane.b32.xlu1 %v4195_v49, %s8492_s17  ;;  %v11716_v57 = vpop.permute.xlu1 %4748  ;;  %v4223_v49 = vld [vmem:[#allocation2 + $0x15a] sm:$0xff] }
 0x5a8   :  { %4962 = vrot.lane.b32.xlu0 %v4194_v43, %s8492_s17  ;;  %14929 = vst [vmem:[#allocation3_spill] sm:$0xff] %v11716_v57  ;;  %v11718_v11 = vpop.permute.xlu0 %4746  ;;  %v4222_v43 = vld [vmem:[#allocation2 + $0x152] sm:$0xff]  ;;  %v4331_v57 = vld [vmem:[#allocation2 + $0x81] sm:$0xff] }
 0x5a9   :  { %14930 = vst [vmem:[#allocation171_spill] sm:$0xff] %v11718_v11  ;;  %v4330_v11 = vld [vmem:[#allocation2 + $0x79] sm:$0xff] }
 0x5ab   :  { %4968 = vrot.lane.b32.xlu1 %v4197_v8, %s8492_s17  ;;  %v11722_v40 = vpop.permute.xlu1 %4752 }
 0x5ac   :  { %4966 = vrot.lane.b32.xlu0 %v4196_v37, %s8492_s17  ;;  %14931 = vst [vmem:[#allocation228_spill] sm:$0xff] %v11722_v40  ;;  %v11724_v36 = vpop.permute.xlu0 %4750  ;;  %v12092_v40 = vld [vmem:[#allocation2 + $0x69] sm:$0xff] }
 0x5ad   :  { %14932 = vst [vmem:[#allocation4_spill] sm:$0xff] %v11724_v36  ;;  %v12096_v36 = vld [vmem:[#allocation2 + $0x61] sm:$0xff] }
 0x5af   :  { %4972 = vrot.lane.b32.xlu1 %v4199_v47, %s8492_s17  ;;  %v11728_v21 = vpop.permute.xlu1 %4756  ;;  %v4225_v47 = vld [vmem:[#allocation2 + $0x172] sm:$0xff] }
 0x5b0   :  { %4970 = vrot.lane.b32.xlu0 %v4198_v14, %s8492_s17  ;;  %14933 = vst [vmem:[#allocation58_spill] sm:$0xff] %v11728_v21  ;;  %v11730_v19 = vpop.permute.xlu0 %4754  ;;  %v4224_v14 = vld [vmem:[#allocation2 + $0x16a] sm:$0xff]  ;;  %v12068_v21 = vld [vmem:[#allocation2 + $0x39] sm:$0xff] }
 0x5b1   :  { %14934 = vst [vmem:[#allocation229_spill] sm:$0xff] %v11730_v19  ;;  %v12080_v19 = vld [vmem:[#allocation2 + $0x51] sm:$0xff] }
 0x5b3   :  { %4976 = vrot.lane.b32.xlu1 %v4201_v34, %s8492_s17  ;;  %v4227_v34 = vld [vmem:[#allocation2 + $0x1ba] sm:$0xff] }
 0x5b4   :  { %4974 = vrot.lane.b32.xlu0 %v4200_v5, %s8492_s17  ;;  %v11734_v53 = vpop.permute.xlu1 %4760 }
 0x5b5   :  { %14935 = vst [vmem:[#allocation286_spill] sm:$0xff] %v11734_v53  ;;  %v11736_v2 = vpop.permute.xlu0 %4758  ;;  %v4321_v53 = vld [vmem:[#allocation2 + $0x338] sm:$0xff] }
 0x5b6   :  { %14936 = vst [vmem:[#allocation59_spill] sm:$0xff] %v11736_v2 }
 0x5b7   :  { %4980 = vrot.lane.b32.xlu1 %v4203_v54, %s8492_s17  ;;  %v4226_v54 = vld [vmem:[#allocation2 + $0x1b2] sm:$0xff] }
 0x5b8   :  { %4978 = vrot.lane.b32.xlu0 %v4202_v12, %s8492_s17 }
 0x5bb   :  { %4984 = vrot.lane.b32.xlu1 %v4205_v58, %s8492_s17  ;;  %v11740_v7 = vpop.permute.xlu1 %4764 }
 0x5bc   :  { %4982 = vrot.lane.b32.xlu0 %v4204_v63, %s8492_s17  ;;  %14937 = vst [vmem:[#allocation114_spill] sm:$0xff] %v11740_v7  ;;  %v11742_v4 = vpop.permute.xlu0 %4762 }
 0x5bd   :  { %14938 = vst [vmem:[#allocation287_spill] sm:$0xff] %v11742_v4  ;;  %v4090_v4 = vld [vmem:[#allocation2 + $0x120] sm:$0xff] }
 0x5bf   :  { %4988 = vrot.lane.b32.xlu1 %v4207_v17, %s8492_s17  ;;  %v4229_v17 = vld [vmem:[#allocation2 + $0x1d2] sm:$0xff] }
 0x5c0   :  { %4986 = vrot.lane.b32.xlu0 %v4206_v29, %s8492_s17  ;;  %v11746_v56 = vpop.permute.xlu1 %4768  ;;  %v4228_v29 = vld [vmem:[#allocation2 + $0x1ca] sm:$0xff] }
 0x5c1   :  { %14939 = vst [vmem:[#allocation345_spill] sm:$0xff] %v11746_v56  ;;  %v11748_v35 = vpop.permute.xlu0 %4766 }
 0x5c2   :  { %14940 = vst [vmem:[#allocation115_spill] sm:$0xff] %v11748_v35  ;;  %v4088_v35 = vld [vmem:[#allocation2 + $0x108] sm:$0xff] }
 0x5c3   :  { %4992 = vrot.lane.b32.xlu1 %v4209_v45, %s8492_s17 }
 0x5c4   :  { %4990 = vrot.lane.b32.xlu0 %v4208_v50, %s8492_s17  ;;  %v11752_v61 = vpop.permute.xlu1 %4772 }
 0x5c5   :  { %14941 = vst [vmem:[#allocation172_spill] sm:$0xff] %v11752_v61  ;;  %v11754_v42 = vpop.permute.xlu0 %4770 }
 0x5c6   :  { %14942 = vst [vmem:[#allocation346_spill] sm:$0xff] %v11754_v42  ;;  %v4086_v42 = vld [vmem:[#allocation2 + $0xf0] sm:$0xff] }
 0x5c7   :  { %4996 = vrot.lane.b32.xlu1 %v4211_v0, %s8492_s17  ;;  %v4231_v0 = vld [vmem:[#allocation2 + $0x1ea] sm:$0xff] }
 0x5c8   :  { %4994 = vrot.lane.b32.xlu0 %v4210_v48, %s8492_s17  ;;  %v4230_v48 = vld [vmem:[#allocation2 + $0x1e2] sm:$0xff] }
 0x5ca   :  { %v11758_v51 = vpop.permute.xlu1 %4776 }
 0x5cb   :  { %5000 = vrot.lane.b32.xlu1 %v4213_v9, %s8492_s17  ;;  %14943 = vst [vmem:[#allocation5_spill] sm:$0xff] %v11758_v51  ;;  %v11760_v16 = vpop.permute.xlu0 %4774 }
 0x5cc   :  { %4998 = vrot.lane.b32.xlu0 %v4212_v32, %s8492_s17  ;;  %14944 = vst [vmem:[#allocation173_spill] sm:$0xff] %v11760_v16  ;;  %v4084_v16 = vld [vmem:[#allocation2 + $0xd8] sm:$0xff] }
 0x5cf   :  { %5004 = vrot.lane.b32.xlu1 %v4215_v3, %s8492_s17  ;;  %v11764_v8 = vpop.permute.xlu1 %4780  ;;  %v4233_v3 = vld [vmem:[#allocation2 + $0x202] sm:$0xff] }
 0x5d0   :  { %5002 = vrot.lane.b32.xlu0 %v4214_v24, %s8492_s17  ;;  %14945 = vst [vmem:[#allocation230_spill] sm:$0xff] %v11764_v8  ;;  %v11766_v37 = vpop.permute.xlu0 %4778  ;;  %v4232_v24 = vld [vmem:[#allocation2 + $0x1fa] sm:$0xff] }
 0x5d1   :  { %14946 = vst [vmem:[#allocation6_spill] sm:$0xff] %v11766_v37  ;;  %v4082_v37 = vld [vmem:[#allocation2 + $0xc0] sm:$0xff] }
 0x5d3   :  { %5008 = vrot.lane.b32.xlu1 %v4217_v31, %s8492_s17 }
 0x5d4   :  { %5006 = vrot.lane.b32.xlu0 %v4216_v28, %s8492_s17  ;;  %v11770_v5 = vpop.permute.xlu1 %4784 }
 0x5d5   :  { %14947 = vst [vmem:[#allocation60_spill] sm:$0xff] %v11770_v5  ;;  %v11772_v12 = vpop.permute.xlu0 %4782 }
 0x5d6   :  { %14948 = vst [vmem:[#allocation231_spill] sm:$0xff] %v11772_v12  ;;  %v4080_v12 = vld [vmem:[#allocation2 + $0xa8] sm:$0xff] }
 0x5d7   :  { %5012 = vrot.lane.b32.xlu1 %v4219_v59, %s8492_s17  ;;  %v4235_v59 = vld [vmem:[#allocation2 + $0x21a] sm:$0xff] }
 0x5d8   :  { %5010 = vrot.lane.b32.xlu0 %v4218_v18, %s8492_s17  ;;  %v4234_v18 = vld [vmem:[#allocation2 + $0x212] sm:$0xff] }
 0x5da   :  { %v11776_v58 = vpop.permute.xlu1 %4788 }
 0x5db   :  { %5016 = vrot.lane.b32.xlu1 %v4221_v6, %s8492_s17  ;;  %14949 = vst [vmem:[#allocation288_spill] sm:$0xff] %v11776_v58  ;;  %v11778_v63 = vpop.permute.xlu0 %4786 }
 0x5dc   :  { %5014 = vrot.lane.b32.xlu0 %v4220_v26, %s8492_s17  ;;  %14950 = vst [vmem:[#allocation61_spill] sm:$0xff] %v11778_v63  ;;  %v4078_v63 = vld [vmem:[#allocation2 + $0x90] sm:$0xff] }
 0x5df   :  { %5020 = vrot.lane.b32.xlu1 %v4223_v49, %s8492_s17  ;;  %v11782_v45 = vpop.permute.xlu1 %4792  ;;  %v4237_v49 = vld [vmem:[#allocation2 + $0x232] sm:$0xff] }
 0x5e0   :  { %5018 = vrot.lane.b32.xlu0 %v4222_v43, %s8492_s17  ;;  %14951 = vst [vmem:[#allocation116_spill] sm:$0xff] %v11782_v45  ;;  %v11784_v50 = vpop.permute.xlu0 %4790  ;;  %v4236_v43 = vld [vmem:[#allocation2 + $0x22a] sm:$0xff] }
 0x5e1   :  { %14952 = vst [vmem:[#allocation289_spill] sm:$0xff] %v11784_v50  ;;  %v4076_v50 = vld [vmem:[#allocation2 + $0x78] sm:$0xff] }
 0x5e3   :  { %5024 = vrot.lane.b32.xlu1 %v4225_v47, %s8492_s17 }
 0x5e4   :  { %5022 = vrot.lane.b32.xlu0 %v4224_v14, %s8492_s17  ;;  %v11788_v9 = vpop.permute.xlu1 %4796 }
 0x5e5   :  { %14953 = vst [vmem:[#allocation347_spill] sm:$0xff] %v11788_v9  ;;  %v11790_v32 = vpop.permute.xlu0 %4794 }
 0x5e6   :  { %14954 = vst [vmem:[#allocation117_spill] sm:$0xff] %v11790_v32  ;;  %v4074_v32 = vld [vmem:[#allocation2 + $0x60] sm:$0xff] }
 0x5e7   :  { %5028 = vrot.lane.b32.xlu1 %v4227_v34, %s8492_s17  ;;  %v4239_v34 = vld [vmem:[#allocation2 + $0x24a] sm:$0xff] }
 0x5e8   :  { %5026 = vrot.lane.b32.xlu0 %v4226_v54, %s8492_s17  ;;  %v4238_v54 = vld [vmem:[#allocation2 + $0x242] sm:$0xff] }
 0x5ea   :  { %v11794_v31 = vpop.permute.xlu1 %4800 }
 0x5eb   :  { %5032 = vrot.lane.b32.xlu1 %v4229_v17, %s8492_s17  ;;  %14955 = vst [vmem:[#allocation174_spill] sm:$0xff] %v11794_v31  ;;  %v11796_v28 = vpop.permute.xlu0 %4798 }
 0x5ec   :  { %5030 = vrot.lane.b32.xlu0 %v4228_v29, %s8492_s17  ;;  %14956 = vst [vmem:[#allocation348_spill] sm:$0xff] %v11796_v28  ;;  %v4072_v28 = vld [vmem:[#allocation2 + $0x48] sm:$0xff] }
 0x5ef   :  { %5036 = vrot.lane.b32.xlu1 %v4231_v0, %s8492_s17  ;;  %v4241_v0 = vld [vmem:[#allocation2 + $0x262] sm:$0xff] }
 0x5f0   :  { %5034 = vrot.lane.b32.xlu0 %v4230_v48, %s8492_s17  ;;  %v11800_v6 = vpop.permute.xlu1 %4804  ;;  %v4240_v48 = vld [vmem:[#allocation2 + $0x25a] sm:$0xff] }
 0x5f1   :  { %14957 = vst [vmem:[#allocation7_spill] sm:$0xff] %v11800_v6  ;;  %v11802_v26 = vpop.permute.xlu0 %4802 }
 0x5f2   :  { %14958 = vst [vmem:[#allocation175_spill] sm:$0xff] %v11802_v26  ;;  %v4070_v26 = vld [vmem:[#allocation2 + $0x30] sm:$0xff] }
 0x5f3   :  { %5040 = vrot.lane.b32.xlu1 %v4233_v3, %s8492_s17 }
 0x5f4   :  { %5038 = vrot.lane.b32.xlu0 %v4232_v24, %s8492_s17  ;;  %v11806_v47 = vpop.permute.xlu1 %4808 }
 0x5f5   :  { %14959 = vst [vmem:[#allocation232_spill] sm:$0xff] %v11806_v47  ;;  %v11808_v14 = vpop.permute.xlu0 %4806 }
 0x5f6   :  { %14960 = vst [vmem:[#allocation8_spill] sm:$0xff] %v11808_v14  ;;  %v4068_v14 = vld [vmem:[#allocation2 + $0x18] sm:$0xff] }
 0x5f7   :  { %5044 = vrot.lane.b32.xlu1 %v4235_v59, %s8492_s17  ;;  %v4243_v59 = vld [vmem:[#allocation2 + $0x27a] sm:$0xff] }
 0x5f8   :  { %5042 = vrot.lane.b32.xlu0 %v4234_v18, %s8492_s17  ;;  %v4242_v18 = vld [vmem:[#allocation2 + $0x272] sm:$0xff] }
 0x5fa   :  { %v11812_v17 = vpop.permute.xlu1 %4812 }
 0x5fb   :  { %5048 = vrot.lane.b32.xlu1 %v4237_v49, %s8492_s17  ;;  %14961 = vst [vmem:[#allocation62_spill] sm:$0xff] %v11812_v17  ;;  %v11814_v29 = vpop.permute.xlu0 %4810  ;;  %v4257_v17 = vld [vmem:[#allocation2 + $0x322] sm:$0xff] }
 0x5fc   :  { %5046 = vrot.lane.b32.xlu0 %v4236_v43, %s8492_s17  ;;  %14962 = vst [vmem:[#allocation233_spill] sm:$0xff] %v11814_v29  ;;  %v4069_v29 = vld [vmem:[#allocation2 + $0x20] sm:$0xff] }
 0x5ff   :  { %5052 = vrot.lane.b32.xlu1 %v4239_v34, %s8492_s17  ;;  %v11818_v3 = vpop.permute.xlu1 %4816  ;;  %v4245_v34 = vld [vmem:[#allocation2 + $0x292] sm:$0xff] }
 0x600   :  { %5050 = vrot.lane.b32.xlu0 %v4238_v54, %s8492_s17  ;;  %14963 = vst [vmem:[#allocation290_spill] sm:$0xff] %v11818_v3  ;;  %v11820_v24 = vpop.permute.xlu0 %4814  ;;  %v4244_v54 = vld [vmem:[#allocation2 + $0x28a] sm:$0xff] }
 0x601   :  { %14964 = vst [vmem:[#allocation63_spill] sm:$0xff] %v11820_v24  ;;  %v4247_v3 = vld [vmem:[#allocation2 + $0x2aa] sm:$0xff] }
 0x603   :  { %5056 = vrot.lane.b32.xlu1 %v4241_v0, %s8492_s17 }
 0x604   :  { %5054 = vrot.lane.b32.xlu0 %v4240_v48, %s8492_s17  ;;  %v11824_v49 = vpop.permute.xlu1 %4820 }
 0x605   :  { %14965 = vst [vmem:[#allocation118_spill] sm:$0xff] %v11824_v49  ;;  %v11826_v43 = vpop.permute.xlu0 %4818 }
 0x606   :  { %14966 = vst [vmem:[#allocation291_spill] sm:$0xff] %v11826_v43  ;;  %v4249_v43 = vld [vmem:[#allocation2 + $0x2c2] sm:$0xff] }
 0x607   :  { %5060 = vrot.lane.b32.xlu1 %v4243_v59, %s8492_s17  ;;  %v4246_v59 = vld [vmem:[#allocation2 + $0x2a2] sm:$0xff] }
 0x608   :  { %5058 = vrot.lane.b32.xlu0 %v4242_v18, %s8492_s17 }
 0x60a   :  { %v11830_v0 = vpop.permute.xlu1 %4824 }
 0x60b   :  { %5064 = vrot.lane.b32.xlu1 %v4245_v34, %s8492_s17  ;;  %14967 = vst [vmem:[#allocation349_spill] sm:$0xff] %v11830_v0  ;;  %v11832_v48 = vpop.permute.xlu0 %4822  ;;  %v4248_v34 = vld [vmem:[#allocation2 + $0x2ba] sm:$0xff] }
 0x60c   :  { %5062 = vrot.lane.b32.xlu0 %v4244_v54, %s8492_s17  ;;  %14968 = vst [vmem:[#allocation119_spill] sm:$0xff] %v11832_v48  ;;  %v4251_v48 = vld [vmem:[#allocation2 + $0x2da] sm:$0xff] }
 0x60f   :  { %5068 = vrot.lane.b32.xlu1 %v4247_v3, %s8492_s17  ;;  %v11836_v18 = vpop.permute.xlu1 %4828  ;;  %v4250_v3 = vld [vmem:[#allocation2 + $0x2d2] sm:$0xff] }
 0x610   :  { %5066 = vrot.lane.b32.xlu0 %v4246_v59, %s8492_s17  ;;  %14969 = vst [vmem:[#allocation176_spill] sm:$0xff] %v11836_v18  ;;  %v11838_v49 = vpop.permute.xlu0 %4826 }
 0x611   :  { %14970 = vst [vmem:[#allocation350_spill] sm:$0xff] %v11838_v49  ;;  %v4253_v49 = vld [vmem:[#allocation2 + $0x2f2] sm:$0xff] }
 0x613   :  { %5072 = vrot.lane.b32.xlu1 %v4249_v43, %s8492_s17  ;;  %v4252_v43 = vld [vmem:[#allocation2 + $0x2ea] sm:$0xff] }
 0x614   :  { %5070 = vrot.lane.b32.xlu0 %v4248_v34, %s8492_s17 }
 0x615   :  { %v11842_v54 = vpop.permute.xlu1 %4832 }
 0x616   :  { %14971 = vst [vmem:[#allocation9_spill] sm:$0xff] %v11842_v54  ;;  %v11844_v0 = vpop.permute.xlu0 %4830 }
 0x617   :  { %14972 = vst [vmem:[#allocation177_spill] sm:$0xff] %v11844_v0  ;;  %5076 = vrot.lane.b32.xlu1 %v4251_v48, %s8492_s17  ;;  %v4255_v0 = vld [vmem:[#allocation2 + $0x30a] sm:$0xff]  ;;  %v4254_v48 = vld [vmem:[#allocation2 + $0x302] sm:$0xff] }
 0x618   :  { %5074 = vrot.lane.b32.xlu0 %v4250_v3, %s8492_s17 }
 0x619   :  { %v11848_v59 = vpop.permute.xlu1 %4964 }
 0x61a   :  { %v11850_v18 = vpop.permute.xlu0 %4962 }
 0x61b   :  { %5080 = vrot.lane.b32.xlu1 %v4253_v49, %s8492_s17  ;;  %v4256_v49 = vld [vmem:[#allocation2 + $0x31a] sm:$0xff] }
 0x61c   :  { %5078 = vrot.lane.b32.xlu0 %v4252_v43, %s8492_s17 }
 0x61d   :  { %v11854_v34 = vpop.permute.xlu1 %4968 }
 0x61e   :  { %v11856_v54 = vpop.permute.xlu0 %4966 }
 0x61f   :  { %5084 = vrot.lane.b32.xlu1 %v4255_v0, %s8492_s17 }
 0x620   :  { %5082 = vrot.lane.b32.xlu0 %v4254_v48, %s8492_s17  ;;  %v4071_v48 = vld [vmem:[#allocation2 + $0x38] sm:$0xff] }
 0x621   :  { %v11860_v3 = vpop.permute.xlu1 %4972 }
 0x622   :  { %v11862_v24 = vpop.permute.xlu0 %4970 }
 0x623   :  { %5088 = vrot.lane.b32.xlu1 %v4257_v17, %s8492_s17 }
 0x624   :  { %5086 = vrot.lane.b32.xlu0 %v4256_v49, %s8492_s17  ;;  %v4073_v49 = vld [vmem:[#allocation2 + $0x50] sm:$0xff] }
 0x625   :  { %v11866_v43 = vpop.permute.xlu1 %4976 }
 0x626   :  { %14973 = vst [vmem:[#allocation234_spill] sm:$0xff] %v11866_v43  ;;  %v11868_v47 = vpop.permute.xlu0 %4974  ;;  %v12434_v43 = vld [vmem:[#allocation2 + $0x172] sm:$0xff] }
 0x627   :  { %14974 = vst [vmem:[#allocation10_spill] sm:$0xff] %v11868_v47  ;;  %5220 = vrot.lane.b32.xlu1 %v4069_v29, %s8493_s0  ;;  %v4075_v29 = vld [vmem:[#allocation2 + $0x68] sm:$0xff]  ;;  %15122 = vst [vmem:[#allocation141_spill] sm:$0xff] %v12434_v43 }
 0x628   :  { %5218 = vrot.lane.b32.xlu0 %v4068_v14, %s8493_s0 }
 0x629   :  { %v11872_v0 = vpop.permute.xlu1 %4980 }
 0x62a   :  { %14975 = vst [vmem:[#allocation64_spill] sm:$0xff] %v11872_v0  ;;  %v11874_v6 = vpop.permute.xlu0 %4978  ;;  %v12386_v0 = vld [vmem:[#allocation2 + $0x112] sm:$0xff] }
 0x62b   :  { %14976 = vst [vmem:[#allocation235_spill] sm:$0xff] %v11874_v6  ;;  %5224 = vrot.lane.b32.xlu1 %v4071_v48, %s8493_s0  ;;  %v4077_v48 = vld [vmem:[#allocation2 + $0x80] sm:$0xff] }
 0x62c   :  { %5222 = vrot.lane.b32.xlu0 %v4070_v26, %s8493_s0 }
 0x62d   :  { %v11878_v17 = vpop.permute.xlu1 %4984 }
 0x62e   :  { %14977 = vst [vmem:[#allocation292_spill] sm:$0xff] %v11878_v17  ;;  %v11880_v31 = vpop.permute.xlu0 %4982  ;;  %v12338_v17 = vld [vmem:[#allocation2 + $0xb2] sm:$0xff] }
 0x62f   :  { %14978 = vst [vmem:[#allocation65_spill] sm:$0xff] %v11880_v31  ;;  %5228 = vrot.lane.b32.xlu1 %v4073_v49, %s8493_s0  ;;  %v4079_v49 = vld [vmem:[#allocation2 + $0x98] sm:$0xff] }
 0x630   :  { %5226 = vrot.lane.b32.xlu0 %v4072_v28, %s8493_s0 }
 0x631   :  { %v11884_v14 = vpop.permute.xlu1 %4988 }
 0x632   :  { %14979 = vst [vmem:[#allocation120_spill] sm:$0xff] %v11884_v14  ;;  %v11886_v9 = vpop.permute.xlu0 %4986  ;;  %v12302_v14 = vld [vmem:[#allocation2 + $0x6a] sm:$0xff] }
 0x633   :  { %14980 = vst [vmem:[#allocation293_spill] sm:$0xff] %v11886_v9  ;;  %5232 = vrot.lane.b32.xlu1 %v4075_v29, %s8493_s0  ;;  %v4081_v29 = vld [vmem:[#allocation2 + $0xb0] sm:$0xff]  ;;  %v12306_v9 = vld [vmem:[#allocation2 + $0x62] sm:$0xff] }
 0x634   :  { %5230 = vrot.lane.b32.xlu0 %v4074_v32, %s8493_s0 }
 0x635   :  { %v11890_v26 = vpop.permute.xlu1 %4992 }
 0x636   :  { %14981 = vst [vmem:[#allocation351_spill] sm:$0xff] %v11890_v26  ;;  %v11892_v45 = vpop.permute.xlu0 %4990  ;;  %v4387_v26 = vld [vmem:[#allocation2 + $0x22] sm:$0xff] }
 0x637   :  { %14982 = vst [vmem:[#allocation121_spill] sm:$0xff] %v11892_v45  ;;  %5236 = vrot.lane.b32.xlu1 %v4077_v48, %s8493_s0  ;;  %v4083_v48 = vld [vmem:[#allocation2 + $0xc8] sm:$0xff] }
 0x638   :  { %5234 = vrot.lane.b32.xlu0 %v4076_v50, %s8493_s0 }
 0x639   :  { %v11896_v28 = vpop.permute.xlu1 %4996 }
 0x63a   :  { %14983 = vst [vmem:[#allocation178_spill] sm:$0xff] %v11896_v28  ;;  %v11898_v58 = vpop.permute.xlu0 %4994 }
 0x63b   :  { %14984 = vst [vmem:[#allocation352_spill] sm:$0xff] %v11898_v58  ;;  %5240 = vrot.lane.b32.xlu1 %v4079_v49, %s8493_s0  ;;  %v4085_v49 = vld [vmem:[#allocation2 + $0xe0] sm:$0xff] }
 0x63c   :  { %5238 = vrot.lane.b32.xlu0 %v4078_v63, %s8493_s0 }
 0x63d   :  { %v11902_v32 = vpop.permute.xlu1 %5000 }
 0x63e   :  { %14985 = vst [vmem:[#allocation11_spill] sm:$0xff] %v11902_v32  ;;  %v11904_v5 = vpop.permute.xlu0 %4998 }
 0x63f   :  { %14986 = vst [vmem:[#allocation179_spill] sm:$0xff] %v11904_v5  ;;  %5244 = vrot.lane.b32.xlu1 %v4081_v29, %s8493_s0  ;;  %v4087_v29 = vld [vmem:[#allocation2 + $0xf8] sm:$0xff] }
 0x640   :  { %5242 = vrot.lane.b32.xlu0 %v4080_v12, %s8493_s0 }
 0x641   :  { %v11908_v50 = vpop.permute.xlu1 %5004 }
 0x642   :  { %14987 = vst [vmem:[#allocation236_spill] sm:$0xff] %v11908_v50  ;;  %v11910_v8 = vpop.permute.xlu0 %5002 }
 0x643   :  { %14988 = vst [vmem:[#allocation12_spill] sm:$0xff] %v11910_v8  ;;  %5248 = vrot.lane.b32.xlu1 %v4083_v48, %s8493_s0  ;;  %v4089_v48 = vld [vmem:[#allocation2 + $0x110] sm:$0xff] }
 0x644   :  { %5246 = vrot.lane.b32.xlu0 %v4082_v37, %s8493_s0 }
 0x645   :  { %v11914_v63 = vpop.permute.xlu1 %5008 }
 0x646   :  { %14989 = vst [vmem:[#allocation66_spill] sm:$0xff] %v11914_v63  ;;  %v11916_v51 = vpop.permute.xlu0 %5006 }
 0x647   :  { %14990 = vst [vmem:[#allocation237_spill] sm:$0xff] %v11916_v51  ;;  %5252 = vrot.lane.b32.xlu1 %v4085_v49, %s8493_s0  ;;  %v4091_v49 = vld [vmem:[#allocation2 + $0x128] sm:$0xff] }
 0x648   :  { %5250 = vrot.lane.b32.xlu0 %v4084_v16, %s8493_s0 }
 0x649   :  { %v11920_v12 = vpop.permute.xlu1 %5012 }
 0x64a   :  { %14991 = vst [vmem:[#allocation294_spill] sm:$0xff] %v11920_v12  ;;  %v11922_v61 = vpop.permute.xlu0 %5010  ;;  %v4323_v12 = vld [vmem:[#allocation2 + $0x21] sm:$0xff] }
 0x64b   :  { %14992 = vst [vmem:[#allocation67_spill] sm:$0xff] %v11922_v61  ;;  %5256 = vrot.lane.b32.xlu1 %v4087_v29, %s8493_s0  ;;  %v4093_v29 = vld [vmem:[#allocation2 + $0x140] sm:$0xff] }
 0x64c   :  { %5254 = vrot.lane.b32.xlu0 %v4086_v42, %s8493_s0 }
 0x64d   :  { %v11926_v37 = vpop.permute.xlu1 %5016 }
 0x64e   :  { %14993 = vst [vmem:[#allocation122_spill] sm:$0xff] %v11926_v37  ;;  %v11928_v56 = vpop.permute.xlu0 %5014 }
 0x64f   :  { %14994 = vst [vmem:[#allocation295_spill] sm:$0xff] %v11928_v56  ;;  %5260 = vrot.lane.b32.xlu1 %v4089_v48, %s8493_s0  ;;  %v4092_v56 = vld [vmem:[#allocation2 + $0x138] sm:$0xff] }
 0x650   :  { %5258 = vrot.lane.b32.xlu0 %v4088_v35, %s8493_s0  ;;  %v4095_v48 = vld [vmem:[#allocation2 + $0x158] sm:$0xff] }
 0x651   :  { %v11932_v16 = vpop.permute.xlu1 %5020 }
 0x652   :  { %14995 = vst [vmem:[#allocation353_spill] sm:$0xff] %v11932_v16  ;;  %v11934_v7 = vpop.permute.xlu0 %5018 }
 0x653   :  { %14996 = vst [vmem:[#allocation123_spill] sm:$0xff] %v11934_v7  ;;  %5264 = vrot.lane.b32.xlu1 %v4091_v49, %s8493_s0  ;;  %v4094_v7 = vld [vmem:[#allocation2 + $0x150] sm:$0xff] }
 0x654   :  { %5262 = vrot.lane.b32.xlu0 %v4090_v4, %s8493_s0  ;;  %v4097_v49 = vld [vmem:[#allocation2 + $0x170] sm:$0xff] }
 0x655   :  { %v11938_v42 = vpop.permute.xlu1 %5024 }
 0x656   :  { %14997 = vst [vmem:[#allocation180_spill] sm:$0xff] %v11938_v42  ;;  %v11940_v37 = vpop.permute.xlu0 %5022 }
 0x657   :  { %14998 = vst [vmem:[#allocation354_spill] sm:$0xff] %v11940_v37  ;;  %5268 = vrot.lane.b32.xlu1 %v4093_v29, %s8493_s0  ;;  %v4096_v37 = vld [vmem:[#allocation2 + $0x168] sm:$0xff] }
 0x658   :  { %5266 = vrot.lane.b32.xlu0 %v4092_v56, %s8493_s0 }
 0x659   :  { %v11944_v35 = vpop.permute.xlu1 %5028 }
 0x65a   :  { %14999 = vst [vmem:[#allocation13_spill] sm:$0xff] %v11944_v35  ;;  %v11946_v16 = vpop.permute.xlu0 %5026  ;;  %v4289_v35 = vld [vmem:[#allocation2 + $0x188] sm:$0xff] }
 0x65b   :  { %15000 = vst [vmem:[#allocation181_spill] sm:$0xff] %v11946_v16  ;;  %5272 = vrot.lane.b32.xlu1 %v4095_v48, %s8493_s0  ;;  %v4288_v48 = vld [vmem:[#allocation2 + $0x180] sm:$0xff] }
 0x65c   :  { %5270 = vrot.lane.b32.xlu0 %v4094_v7, %s8493_s0 }
 0x65d   :  { %v11950_v4 = vpop.permute.xlu1 %5032 }
 0x65e   :  { %15001 = vst [vmem:[#allocation238_spill] sm:$0xff] %v11950_v4  ;;  %v11952_v42 = vpop.permute.xlu0 %5030  ;;  %v4101_v4 = vld [vmem:[#allocation2 + $0x1d0] sm:$0xff] }
 0x65f   :  { %15002 = vst [vmem:[#allocation14_spill] sm:$0xff] %v11952_v42  ;;  %5276 = vrot.lane.b32.xlu1 %v4097_v49, %s8493_s0  ;;  %v4100_v42 = vld [vmem:[#allocation2 + $0x1c8] sm:$0xff] }
 0x660   :  { %5274 = vrot.lane.b32.xlu0 %v4096_v37, %s8493_s0  ;;  %v4103_v49 = vld [vmem:[#allocation2 + $0x1e8] sm:$0xff] }
 0x661   :  { %v11956_v56 = vpop.permute.xlu1 %5036 }
 0x662   :  { %15003 = vst [vmem:[#allocation68_spill] sm:$0xff] %v11956_v56  ;;  %v11958_v29 = vpop.permute.xlu0 %5034 }
 0x663   :  { %15004 = vst [vmem:[#allocation239_spill] sm:$0xff] %v11958_v29  ;;  %5280 = vrot.lane.b32.xlu1 %v4289_v35, %s8493_s0  ;;  %v4102_v29 = vld [vmem:[#allocation2 + $0x1e0] sm:$0xff] }
 0x664   :  { %5278 = vrot.lane.b32.xlu0 %v4288_v48, %s8493_s0  ;;  %v4105_v48 = vld [vmem:[#allocation2 + $0x200] sm:$0xff] }
 0x665   :  { %v11962_v7 = vpop.permute.xlu1 %5040 }
 0x666   :  { %15005 = vst [vmem:[#allocation296_spill] sm:$0xff] %v11962_v7  ;;  %v11964_v16 = vpop.permute.xlu0 %5038 }
 0x667   :  { %15006 = vst [vmem:[#allocation69_spill] sm:$0xff] %v11964_v16  ;;  %5284 = vrot.lane.b32.xlu1 %v4101_v4, %s8493_s0  ;;  %v4104_v16 = vld [vmem:[#allocation2 + $0x1f8] sm:$0xff] }
 0x668   :  { %5282 = vrot.lane.b32.xlu0 %v4100_v42, %s8493_s0  ;;  %v4107_v4 = vld [vmem:[#allocation2 + $0x218] sm:$0xff] }
 0x669   :  { %v11968_v37 = vpop.permute.xlu1 %5044 }
 0x66a   :  { %15007 = vst [vmem:[#allocation124_spill] sm:$0xff] %v11968_v37  ;;  %v11970_v56 = vpop.permute.xlu0 %5042 }
 0x66b   :  { %15008 = vst [vmem:[#allocation297_spill] sm:$0xff] %v11970_v56  ;;  %5288 = vrot.lane.b32.xlu1 %v4103_v49, %s8493_s0  ;;  %v4106_v56 = vld [vmem:[#allocation2 + $0x210] sm:$0xff] }
 0x66c   :  { %5286 = vrot.lane.b32.xlu0 %v4102_v29, %s8493_s0  ;;  %v4109_v49 = vld [vmem:[#allocation2 + $0x230] sm:$0xff] }
 0x66d   :  { %v11974_v35 = vpop.permute.xlu1 %5048 }
 0x66e   :  { %15009 = vst [vmem:[#allocation355_spill] sm:$0xff] %v11974_v35  ;;  %v11976_v7 = vpop.permute.xlu0 %5046 }
 0x66f   :  { %15010 = vst [vmem:[#allocation125_spill] sm:$0xff] %v11976_v7  ;;  %5292 = vrot.lane.b32.xlu1 %v4105_v48, %s8493_s0  ;;  %v4108_v7 = vld [vmem:[#allocation2 + $0x228] sm:$0xff] }
 0x670   :  { %5290 = vrot.lane.b32.xlu0 %v4104_v16, %s8493_s0  ;;  %v4111_v48 = vld [vmem:[#allocation2 + $0x248] sm:$0xff] }
 0x671   :  { %v11980_v42 = vpop.permute.xlu1 %5052 }
 0x672   :  { %15011 = vst [vmem:[#allocation182_spill] sm:$0xff] %v11980_v42  ;;  %v11982_v37 = vpop.permute.xlu0 %5050 }
 0x673   :  { %15012 = vst [vmem:[#allocation356_spill] sm:$0xff] %v11982_v37  ;;  %5296 = vrot.lane.b32.xlu1 %v4107_v4, %s8493_s0  ;;  %v4110_v37 = vld [vmem:[#allocation2 + $0x240] sm:$0xff] }
 0x674   :  { %5294 = vrot.lane.b32.xlu0 %v4106_v56, %s8493_s0  ;;  %v4113_v4 = vld [vmem:[#allocation2 + $0x260] sm:$0xff] }
 0x675   :  { %v11986_v29 = vpop.permute.xlu1 %5056 }
 0x676   :  { %15013 = vst [vmem:[#allocation15_spill] sm:$0xff] %v11986_v29  ;;  %v11988_v35 = vpop.permute.xlu0 %5054 }
 0x677   :  { %15014 = vst [vmem:[#allocation183_spill] sm:$0xff] %v11988_v35  ;;  %5300 = vrot.lane.b32.xlu1 %v4109_v49, %s8493_s0  ;;  %v4112_v35 = vld [vmem:[#allocation2 + $0x258] sm:$0xff] }
 0x678   :  { %5298 = vrot.lane.b32.xlu0 %v4108_v7, %s8493_s0  ;;  %v4115_v49 = vld [vmem:[#allocation2 + $0x278] sm:$0xff] }
 0x679   :  { %v11992_v16 = vpop.permute.xlu1 %5060 }
 0x67a   :  { %15015 = vst [vmem:[#allocation240_spill] sm:$0xff] %v11992_v16  ;;  %v11994_v42 = vpop.permute.xlu0 %5058 }
 0x67b   :  { %15016 = vst [vmem:[#allocation16_spill] sm:$0xff] %v11994_v42  ;;  %5304 = vrot.lane.b32.xlu1 %v4111_v48, %s8493_s0  ;;  %v4114_v42 = vld [vmem:[#allocation2 + $0x270] sm:$0xff] }
 0x67c   :  { %5302 = vrot.lane.b32.xlu0 %v4110_v37, %s8493_s0  ;;  %v4117_v48 = vld [vmem:[#allocation2 + $0x290] sm:$0xff] }
 0x67d   :  { %v11998_v56 = vpop.permute.xlu1 %5064 }
 0x67e   :  { %15017 = vst [vmem:[#allocation70_spill] sm:$0xff] %v11998_v56  ;;  %v12000_v29 = vpop.permute.xlu0 %5062 }
 0x67f   :  { %15018 = vst [vmem:[#allocation241_spill] sm:$0xff] %v12000_v29  ;;  %5308 = vrot.lane.b32.xlu1 %v4113_v4, %s8493_s0  ;;  %v4116_v29 = vld [vmem:[#allocation2 + $0x288] sm:$0xff] }
 0x680   :  { %5306 = vrot.lane.b32.xlu0 %v4112_v35, %s8493_s0  ;;  %v4119_v4 = vld [vmem:[#allocation2 + $0x2a8] sm:$0xff] }
 0x681   :  { %v12004_v7 = vpop.permute.xlu1 %5068 }
 0x682   :  { %15019 = vst [vmem:[#allocation298_spill] sm:$0xff] %v12004_v7  ;;  %v12006_v16 = vpop.permute.xlu0 %5066 }
 0x683   :  { %15020 = vst [vmem:[#allocation71_spill] sm:$0xff] %v12006_v16  ;;  %5312 = vrot.lane.b32.xlu1 %v4115_v49, %s8493_s0  ;;  %v4118_v16 = vld [vmem:[#allocation2 + $0x2a0] sm:$0xff] }
 0x684   :  { %5310 = vrot.lane.b32.xlu0 %v4114_v42, %s8493_s0  ;;  %v4121_v49 = vld [vmem:[#allocation2 + $0x2c0] sm:$0xff] }
 0x685   :  { %v12010_v37 = vpop.permute.xlu1 %5072 }
 0x686   :  { %15021 = vst [vmem:[#allocation126_spill] sm:$0xff] %v12010_v37  ;;  %v12012_v56 = vpop.permute.xlu0 %5070 }
 0x687   :  { %15022 = vst [vmem:[#allocation299_spill] sm:$0xff] %v12012_v56  ;;  %5316 = vrot.lane.b32.xlu1 %v4117_v48, %s8493_s0  ;;  %v4120_v56 = vld [vmem:[#allocation2 + $0x2b8] sm:$0xff] }
 0x688   :  { %5314 = vrot.lane.b32.xlu0 %v4116_v29, %s8493_s0  ;;  %v4123_v48 = vld [vmem:[#allocation2 + $0x2d8] sm:$0xff] }
 0x689   :  { %v12016_v35 = vpop.permute.xlu1 %5076 }
 0x68a   :  { %15023 = vst [vmem:[#allocation357_spill] sm:$0xff] %v12016_v35  ;;  %v12018_v7 = vpop.permute.xlu0 %5074 }
 0x68b   :  { %15024 = vst [vmem:[#allocation127_spill] sm:$0xff] %v12018_v7  ;;  %5320 = vrot.lane.b32.xlu1 %v4119_v4, %s8493_s0  ;;  %v4122_v7 = vld [vmem:[#allocation2 + $0x2d0] sm:$0xff] }
 0x68c   :  { %5318 = vrot.lane.b32.xlu0 %v4118_v16, %s8493_s0  ;;  %v4125_v4 = vld [vmem:[#allocation2 + $0x2f0] sm:$0xff] }
 0x68d   :  { %v12022_v42 = vpop.permute.xlu1 %5080 }
 0x68e   :  { %15025 = vst [vmem:[#allocation184_spill] sm:$0xff] %v12022_v42  ;;  %v12024_v37 = vpop.permute.xlu0 %5078 }
 0x68f   :  { %15026 = vst [vmem:[#allocation358_spill] sm:$0xff] %v12024_v37  ;;  %5324 = vrot.lane.b32.xlu1 %v4121_v49, %s8493_s0  ;;  %v4124_v37 = vld [vmem:[#allocation2 + $0x2e8] sm:$0xff] }
 0x690   :  { %5322 = vrot.lane.b32.xlu0 %v4120_v56, %s8493_s0  ;;  %v4127_v49 = vld [vmem:[#allocation2 + $0x308] sm:$0xff] }
 0x691   :  { %v12028_v29 = vpop.permute.xlu1 %5084 }
 0x692   :  { %15027 = vst [vmem:[#allocation17_spill] sm:$0xff] %v12028_v29  ;;  %v12030_v35 = vpop.permute.xlu0 %5082 }
 0x693   :  { %15028 = vst [vmem:[#allocation185_spill] sm:$0xff] %v12030_v35  ;;  %5328 = vrot.lane.b32.xlu1 %v4123_v48, %s8493_s0  ;;  %v4126_v35 = vld [vmem:[#allocation2 + $0x300] sm:$0xff] }
 0x694   :  { %5326 = vrot.lane.b32.xlu0 %v4122_v7, %s8493_s0  ;;  %v4129_v48 = vld [vmem:[#allocation2 + $0x320] sm:$0xff] }
 0x695   :  { %v12034_v16 = vpop.permute.xlu1 %5088 }
 0x696   :  { %15029 = vst [vmem:[#allocation242_spill] sm:$0xff] %v12034_v16  ;;  %v12036_v42 = vpop.permute.xlu0 %5086 }
 0x697   :  { %15030 = vst [vmem:[#allocation18_spill] sm:$0xff] %v12036_v42  ;;  %5332 = vrot.lane.b32.xlu1 %v4125_v4, %s8493_s0  ;;  %v4128_v42 = vld [vmem:[#allocation2 + $0x318] sm:$0xff] }
 0x698   :  { %5330 = vrot.lane.b32.xlu0 %v4124_v37, %s8493_s0 }
 0x699   :  { %v12040_v56 = vpop.permute.xlu1 %5220 }
 0x69a   :  { %v12042_v29 = vpop.permute.xlu0 %5218 }
 0x69b   :  { %5336 = vrot.lane.b32.xlu1 %v4127_v49, %s8493_s0  ;;  %v4320_v49 = vld [vmem:[#allocation2 + $0x330] sm:$0xff] }
 0x69c   :  { %5334 = vrot.lane.b32.xlu0 %v4126_v35, %s8493_s0 }
 0x69d   :  { %v12046_v7 = vpop.permute.xlu1 %5224 }
 0x69e   :  { %v12048_v16 = vpop.permute.xlu0 %5222 }
 0x69f   :  { %5340 = vrot.lane.b32.xlu1 %v4129_v48, %s8493_s0  ;;  %v4322_v48 = vld [vmem:[#allocation2 + $0x19] sm:$0xff] }
 0x6a0   :  { %5338 = vrot.lane.b32.xlu0 %v4128_v42, %s8493_s0 }
 0x6a1   :  { %v12052_v37 = vpop.permute.xlu1 %5228 }
 0x6a2   :  { %v12054_v4 = vpop.permute.xlu0 %5226 }
 0x6a3   :  { %5344 = vrot.lane.b32.xlu1 %v4321_v53, %s8493_s0  ;;  %v12072_v53 = vld [vmem:[#allocation2 + $0x31] sm:$0xff] }
 0x6a4   :  { %5342 = vrot.lane.b32.xlu0 %v4320_v49, %s8493_s0 }
 0x6a5   :  { %v12058_v35 = vpop.permute.xlu1 %5232 }
 0x6a6   :  { %15031 = vst [vmem:[#allocation72_spill] sm:$0xff] %v12058_v35  ;;  %v12060_v2 = vpop.permute.xlu0 %5230  ;;  %v12422_v35 = vld [vmem:[#allocation2 + $0x15a] sm:$0xff] }
 0x6a7   :  { %15032 = vst [vmem:[#allocation243_spill] sm:$0xff] %v12060_v2  ;;  %5476 = vrot.lane.b32.xlu1 %v4323_v12, %s8494_s26  ;;  %15118 = vst [vmem:[#allocation85_spill] sm:$0xff] %v12422_v35 }
 0x6a8   :  { %5474 = vrot.lane.b32.xlu0 %v4322_v48, %s8494_s26  ;;  %v12084_v48 = vld [vmem:[#allocation2 + $0x49] sm:$0xff] }
 0x6a9   :  { %v12064_v42 = vpop.permute.xlu1 %5236 }
 0x6aa   :  { %15033 = vst [vmem:[#allocation300_spill] sm:$0xff] %v12064_v42  ;;  %v12066_v61 = vpop.permute.xlu0 %5234  ;;  %v12374_v42 = vld [vmem:[#allocation2 + $0xfa] sm:$0xff] }
 0x6ab   :  { %15034 = vst [vmem:[#allocation73_spill] sm:$0xff] %v12066_v61  ;;  %5480 = vrot.lane.b32.xlu1 %v12068_v21, %s8494_s26 }
 0x6ac   :  { %5478 = vrot.lane.b32.xlu0 %v12072_v53, %s8494_s26 }
 0x6ad   :  { %v12076_v49 = vpop.permute.xlu1 %5240 }
 0x6ae   :  { %15035 = vst [vmem:[#allocation128_spill] sm:$0xff] %v12076_v49  ;;  %v12078_v12 = vpop.permute.xlu0 %5238  ;;  %v12326_v49 = vld [vmem:[#allocation2 + $0x9a] sm:$0xff] }
 0x6af   :  { %15036 = vst [vmem:[#allocation301_spill] sm:$0xff] %v12078_v12  ;;  %5484 = vrot.lane.b32.xlu1 %v12080_v19, %s8494_s26 }
 0x6b0   :  { %5482 = vrot.lane.b32.xlu0 %v12084_v48, %s8494_s26 }
 0x6b1   :  { %v12088_v63 = vpop.permute.xlu1 %5244 }
 0x6b2   :  { %15037 = vst [vmem:[#allocation359_spill] sm:$0xff] %v12088_v63  ;;  %v12090_v51 = vpop.permute.xlu0 %5242 }
 0x6b3   :  { %15038 = vst [vmem:[#allocation129_spill] sm:$0xff] %v12090_v51  ;;  %5488 = vrot.lane.b32.xlu1 %v12092_v40, %s8494_s26 }
 0x6b4   :  { %5486 = vrot.lane.b32.xlu0 %v12096_v36, %s8494_s26 }
 0x6b5   :  { %v12100_v50 = vpop.permute.xlu1 %5248 }
 0x6b6   :  { %15039 = vst [vmem:[#allocation186_spill] sm:$0xff] %v12100_v50  ;;  %v12102_v8 = vpop.permute.xlu0 %5246  ;;  %v4385_v50 = vld [vmem:[#allocation2 + $0x339] sm:$0xff] }
 0x6b7   :  { %15040 = vst [vmem:[#allocation360_spill] sm:$0xff] %v12102_v8  ;;  %5492 = vrot.lane.b32.xlu1 %v4331_v57, %s8494_s26  ;;  %v4334_v57 = vld [vmem:[#allocation2 + $0xa9] sm:$0xff] }
 0x6b8   :  { %5490 = vrot.lane.b32.xlu0 %v4330_v11, %s8494_s26 }
 0x6b9   :  { %v12106_v32 = vpop.permute.xlu1 %5252 }
 0x6ba   :  { %15041 = vst [vmem:[#allocation19_spill] sm:$0xff] %v12106_v32  ;;  %v12108_v5 = vpop.permute.xlu0 %5250 }
 0x6bb   :  { %15042 = vst [vmem:[#allocation187_spill] sm:$0xff] %v12108_v5  ;;  %5496 = vrot.lane.b32.xlu1 %v4333_v52, %s8494_s26  ;;  %v4337_v5 = vld [vmem:[#allocation2 + $0xc9] sm:$0xff]  ;;  %v4336_v52 = vld [vmem:[#allocation2 + $0xc1] sm:$0xff] }
 0x6bc   :  { %5494 = vrot.lane.b32.xlu0 %v4332_v13, %s8494_s26 }
 0x6bd   :  { %v12112_v28 = vpop.permute.xlu1 %5256 }
 0x6be   :  { %15043 = vst [vmem:[#allocation244_spill] sm:$0xff] %v12112_v28  ;;  %v12114_v58 = vpop.permute.xlu0 %5254 }
 0x6bf   :  { %15044 = vst [vmem:[#allocation20_spill] sm:$0xff] %v12114_v58  ;;  %5500 = vrot.lane.b32.xlu1 %v4335_v25, %s8494_s26  ;;  %v4339_v58 = vld [vmem:[#allocation2 + $0xe1] sm:$0xff]  ;;  %v4338_v25 = vld [vmem:[#allocation2 + $0xd9] sm:$0xff] }
 0x6c0   :  { %5498 = vrot.lane.b32.xlu0 %v4334_v57, %s8494_s26 }
 0x6c1   :  { %v12118_v11 = vpop.permute.xlu1 %5260 }
 0x6c2   :  { %15045 = vst [vmem:[#allocation74_spill] sm:$0xff] %v12118_v11  ;;  %v12120_v32 = vpop.permute.xlu0 %5258 }
 0x6c3   :  { %15046 = vst [vmem:[#allocation245_spill] sm:$0xff] %v12120_v32  ;;  %5504 = vrot.lane.b32.xlu1 %v4337_v5, %s8494_s26  ;;  %v4341_v32 = vld [vmem:[#allocation2 + $0xf9] sm:$0xff]  ;;  %v4340_v5 = vld [vmem:[#allocation2 + $0xf1] sm:$0xff] }
 0x6c4   :  { %5502 = vrot.lane.b32.xlu0 %v4336_v52, %s8494_s26 }
 0x6c5   :  { %v12124_v13 = vpop.permute.xlu1 %5264 }
 0x6c6   :  { %15047 = vst [vmem:[#allocation302_spill] sm:$0xff] %v12124_v13  ;;  %v12126_v28 = vpop.permute.xlu0 %5262 }
 0x6c7   :  { %15048 = vst [vmem:[#allocation75_spill] sm:$0xff] %v12126_v28  ;;  %5508 = vrot.lane.b32.xlu1 %v4339_v58, %s8494_s26  ;;  %v4343_v28 = vld [vmem:[#allocation2 + $0x111] sm:$0xff]  ;;  %v4342_v58 = vld [vmem:[#allocation2 + $0x109] sm:$0xff] }
 0x6c8   :  { %5506 = vrot.lane.b32.xlu0 %v4338_v25, %s8494_s26 }
 0x6c9   :  { %v12130_v57 = vpop.permute.xlu1 %5268 }
 0x6ca   :  { %15049 = vst [vmem:[#allocation130_spill] sm:$0xff] %v12130_v57  ;;  %v12132_v11 = vpop.permute.xlu0 %5266 }
 0x6cb   :  { %15050 = vst [vmem:[#allocation303_spill] sm:$0xff] %v12132_v11  ;;  %5512 = vrot.lane.b32.xlu1 %v4341_v32, %s8494_s26  ;;  %v4345_v11 = vld [vmem:[#allocation2 + $0x129] sm:$0xff]  ;;  %v4344_v32 = vld [vmem:[#allocation2 + $0x121] sm:$0xff] }
 0x6cc   :  { %5510 = vrot.lane.b32.xlu0 %v4340_v5, %s8494_s26 }
 0x6cd   :  { %v12136_v52 = vpop.permute.xlu1 %5272 }
 0x6ce   :  { %15051 = vst [vmem:[#allocation361_spill] sm:$0xff] %v12136_v52  ;;  %v12138_v13 = vpop.permute.xlu0 %5270 }
 0x6cf   :  { %15052 = vst [vmem:[#allocation131_spill] sm:$0xff] %v12138_v13  ;;  %5516 = vrot.lane.b32.xlu1 %v4343_v28, %s8494_s26  ;;  %v4347_v13 = vld [vmem:[#allocation2 + $0x141] sm:$0xff]  ;;  %v4346_v28 = vld [vmem:[#allocation2 + $0x139] sm:$0xff] }
 0x6d0   :  { %5514 = vrot.lane.b32.xlu0 %v4342_v58, %s8494_s26 }
 0x6d1   :  { %v12142_v25 = vpop.permute.xlu1 %5276 }
 0x6d2   :  { %15053 = vst [vmem:[#allocation188_spill] sm:$0xff] %v12142_v25  ;;  %v12144_v57 = vpop.permute.xlu0 %5274 }
 0x6d3   :  { %15054 = vst [vmem:[#allocation362_spill] sm:$0xff] %v12144_v57  ;;  %5520 = vrot.lane.b32.xlu1 %v4345_v11, %s8494_s26  ;;  %v4349_v57 = vld [vmem:[#allocation2 + $0x159] sm:$0xff]  ;;  %v4348_v11 = vld [vmem:[#allocation2 + $0x151] sm:$0xff] }
 0x6d4   :  { %5518 = vrot.lane.b32.xlu0 %v4344_v32, %s8494_s26 }
 0x6d5   :  { %v12148_v5 = vpop.permute.xlu1 %5280 }
 0x6d6   :  { %15055 = vst [vmem:[#allocation21_spill] sm:$0xff] %v12148_v5  ;;  %v12150_v52 = vpop.permute.xlu0 %5278 }
 0x6d7   :  { %15056 = vst [vmem:[#allocation189_spill] sm:$0xff] %v12150_v52  ;;  %5524 = vrot.lane.b32.xlu1 %v4347_v13, %s8494_s26  ;;  %v4351_v52 = vld [vmem:[#allocation2 + $0x171] sm:$0xff]  ;;  %v4350_v13 = vld [vmem:[#allocation2 + $0x169] sm:$0xff] }
 0x6d8   :  { %5522 = vrot.lane.b32.xlu0 %v4346_v28, %s8494_s26 }
 0x6d9   :  { %v12154_v58 = vpop.permute.xlu1 %5284 }
 0x6da   :  { %15057 = vst [vmem:[#allocation246_spill] sm:$0xff] %v12154_v58  ;;  %v12156_v25 = vpop.permute.xlu0 %5282 }
 0x6db   :  { %15058 = vst [vmem:[#allocation22_spill] sm:$0xff] %v12156_v25  ;;  %5528 = vrot.lane.b32.xlu1 %v4349_v57, %s8494_s26  ;;  %v4353_v25 = vld [vmem:[#allocation2 + $0x189] sm:$0xff]  ;;  %v4352_v57 = vld [vmem:[#allocation2 + $0x181] sm:$0xff] }
 0x6dc   :  { %5526 = vrot.lane.b32.xlu0 %v4348_v11, %s8494_s26 }
 0x6dd   :  { %v12160_v32 = vpop.permute.xlu1 %5288 }
 0x6de   :  { %15059 = vst [vmem:[#allocation76_spill] sm:$0xff] %v12160_v32  ;;  %v12162_v5 = vpop.permute.xlu0 %5286 }
 0x6df   :  { %15060 = vst [vmem:[#allocation247_spill] sm:$0xff] %v12162_v5  ;;  %5532 = vrot.lane.b32.xlu1 %v4351_v52, %s8494_s26  ;;  %v4355_v5 = vld [vmem:[#allocation2 + $0x1d1] sm:$0xff]  ;;  %v4354_v52 = vld [vmem:[#allocation2 + $0x1c9] sm:$0xff] }
 0x6e0   :  { %5530 = vrot.lane.b32.xlu0 %v4350_v13, %s8494_s26 }
 0x6e1   :  { %v12166_v28 = vpop.permute.xlu1 %5292 }
 0x6e2   :  { %15061 = vst [vmem:[#allocation304_spill] sm:$0xff] %v12166_v28  ;;  %v12168_v58 = vpop.permute.xlu0 %5290 }
 0x6e3   :  { %15062 = vst [vmem:[#allocation77_spill] sm:$0xff] %v12168_v58  ;;  %5536 = vrot.lane.b32.xlu1 %v4353_v25, %s8494_s26  ;;  %v4357_v58 = vld [vmem:[#allocation2 + $0x1e9] sm:$0xff]  ;;  %v4356_v25 = vld [vmem:[#allocation2 + $0x1e1] sm:$0xff] }
 0x6e4   :  { %5534 = vrot.lane.b32.xlu0 %v4352_v57, %s8494_s26 }
 0x6e5   :  { %v12172_v11 = vpop.permute.xlu1 %5296 }
 0x6e6   :  { %15063 = vst [vmem:[#allocation132_spill] sm:$0xff] %v12172_v11  ;;  %v12174_v32 = vpop.permute.xlu0 %5294 }
 0x6e7   :  { %15064 = vst [vmem:[#allocation305_spill] sm:$0xff] %v12174_v32  ;;  %5540 = vrot.lane.b32.xlu1 %v4355_v5, %s8494_s26  ;;  %v4359_v32 = vld [vmem:[#allocation2 + $0x201] sm:$0xff]  ;;  %v4358_v5 = vld [vmem:[#allocation2 + $0x1f9] sm:$0xff] }
 0x6e8   :  { %5538 = vrot.lane.b32.xlu0 %v4354_v52, %s8494_s26 }
 0x6e9   :  { %v12178_v13 = vpop.permute.xlu1 %5300 }
 0x6ea   :  { %15065 = vst [vmem:[#allocation363_spill] sm:$0xff] %v12178_v13  ;;  %v12180_v28 = vpop.permute.xlu0 %5298 }
 0x6eb   :  { %15066 = vst [vmem:[#allocation133_spill] sm:$0xff] %v12180_v28  ;;  %5544 = vrot.lane.b32.xlu1 %v4357_v58, %s8494_s26  ;;  %v4361_v28 = vld [vmem:[#allocation2 + $0x219] sm:$0xff]  ;;  %v4360_v58 = vld [vmem:[#allocation2 + $0x211] sm:$0xff] }
 0x6ec   :  { %5542 = vrot.lane.b32.xlu0 %v4356_v25, %s8494_s26 }
 0x6ed   :  { %v12184_v57 = vpop.permute.xlu1 %5304 }
 0x6ee   :  { %15067 = vst [vmem:[#allocation190_spill] sm:$0xff] %v12184_v57  ;;  %v12186_v11 = vpop.permute.xlu0 %5302 }
 0x6ef   :  { %15068 = vst [vmem:[#allocation364_spill] sm:$0xff] %v12186_v11  ;;  %5548 = vrot.lane.b32.xlu1 %v4359_v32, %s8494_s26  ;;  %v4363_v11 = vld [vmem:[#allocation2 + $0x231] sm:$0xff]  ;;  %v4362_v32 = vld [vmem:[#allocation2 + $0x229] sm:$0xff] }
 0x6f0   :  { %5546 = vrot.lane.b32.xlu0 %v4358_v5, %s8494_s26 }
 0x6f1   :  { %v12190_v52 = vpop.permute.xlu1 %5308 }
 0x6f2   :  { %15069 = vst [vmem:[#allocation23_spill] sm:$0xff] %v12190_v52  ;;  %v12192_v13 = vpop.permute.xlu0 %5306 }
 0x6f3   :  { %15070 = vst [vmem:[#allocation191_spill] sm:$0xff] %v12192_v13  ;;  %5552 = vrot.lane.b32.xlu1 %v4361_v28, %s8494_s26  ;;  %v4365_v13 = vld [vmem:[#allocation2 + $0x249] sm:$0xff]  ;;  %v4364_v28 = vld [vmem:[#allocation2 + $0x241] sm:$0xff] }
 0x6f4   :  { %5550 = vrot.lane.b32.xlu0 %v4360_v58, %s8494_s26 }
 0x6f5   :  { %v12196_v25 = vpop.permute.xlu1 %5312 }
 0x6f6   :  { %15071 = vst [vmem:[#allocation248_spill] sm:$0xff] %v12196_v25  ;;  %v12198_v57 = vpop.permute.xlu0 %5310 }
 0x6f7   :  { %15072 = vst [vmem:[#allocation24_spill] sm:$0xff] %v12198_v57  ;;  %5556 = vrot.lane.b32.xlu1 %v4363_v11, %s8494_s26  ;;  %v4367_v57 = vld [vmem:[#allocation2 + $0x261] sm:$0xff]  ;;  %v4366_v11 = vld [vmem:[#allocation2 + $0x259] sm:$0xff] }
 0x6f8   :  { %5554 = vrot.lane.b32.xlu0 %v4362_v32, %s8494_s26 }
 0x6f9   :  { %v12202_v5 = vpop.permute.xlu1 %5316 }
 0x6fa   :  { %15073 = vst [vmem:[#allocation78_spill] sm:$0xff] %v12202_v5  ;;  %v12204_v52 = vpop.permute.xlu0 %5314 }
 0x6fb   :  { %15074 = vst [vmem:[#allocation249_spill] sm:$0xff] %v12204_v52  ;;  %5560 = vrot.lane.b32.xlu1 %v4365_v13, %s8494_s26  ;;  %v4369_v52 = vld [vmem:[#allocation2 + $0x279] sm:$0xff]  ;;  %v4368_v13 = vld [vmem:[#allocation2 + $0x271] sm:$0xff] }
 0x6fc   :  { %5558 = vrot.lane.b32.xlu0 %v4364_v28, %s8494_s26 }
 0x6fd   :  { %v12208_v58 = vpop.permute.xlu1 %5320 }
 0x6fe   :  { %15075 = vst [vmem:[#allocation306_spill] sm:$0xff] %v12208_v58  ;;  %v12210_v25 = vpop.permute.xlu0 %5318 }
 0x6ff   :  { %15076 = vst [vmem:[#allocation79_spill] sm:$0xff] %v12210_v25  ;;  %5564 = vrot.lane.b32.xlu1 %v4367_v57, %s8494_s26  ;;  %v4371_v25 = vld [vmem:[#allocation2 + $0x291] sm:$0xff]  ;;  %v4370_v57 = vld [vmem:[#allocation2 + $0x289] sm:$0xff] }
 0x700   :  { %5562 = vrot.lane.b32.xlu0 %v4366_v11, %s8494_s26 }
 0x701   :  { %v12214_v32 = vpop.permute.xlu1 %5324 }
 0x702   :  { %15077 = vst [vmem:[#allocation134_spill] sm:$0xff] %v12214_v32  ;;  %v12216_v5 = vpop.permute.xlu0 %5322 }
 0x703   :  { %15078 = vst [vmem:[#allocation307_spill] sm:$0xff] %v12216_v5  ;;  %5568 = vrot.lane.b32.xlu1 %v4369_v52, %s8494_s26  ;;  %v4373_v5 = vld [vmem:[#allocation2 + $0x2a9] sm:$0xff]  ;;  %v4372_v52 = vld [vmem:[#allocation2 + $0x2a1] sm:$0xff] }
 0x704   :  { %5566 = vrot.lane.b32.xlu0 %v4368_v13, %s8494_s26 }
 0x705   :  { %v12220_v28 = vpop.permute.xlu1 %5328 }
 0x706   :  { %15079 = vst [vmem:[#allocation365_spill] sm:$0xff] %v12220_v28  ;;  %v12222_v58 = vpop.permute.xlu0 %5326 }
 0x707   :  { %15080 = vst [vmem:[#allocation135_spill] sm:$0xff] %v12222_v58  ;;  %5572 = vrot.lane.b32.xlu1 %v4371_v25, %s8494_s26  ;;  %v4375_v58 = vld [vmem:[#allocation2 + $0x2c1] sm:$0xff]  ;;  %v4374_v25 = vld [vmem:[#allocation2 + $0x2b9] sm:$0xff] }
 0x708   :  { %5570 = vrot.lane.b32.xlu0 %v4370_v57, %s8494_s26 }
 0x709   :  { %v12226_v11 = vpop.permute.xlu1 %5332 }
 0x70a   :  { %15081 = vst [vmem:[#allocation192_spill] sm:$0xff] %v12226_v11  ;;  %v12228_v32 = vpop.permute.xlu0 %5330 }
 0x70b   :  { %15082 = vst [vmem:[#allocation366_spill] sm:$0xff] %v12228_v32  ;;  %5576 = vrot.lane.b32.xlu1 %v4373_v5, %s8494_s26  ;;  %v4377_v32 = vld [vmem:[#allocation2 + $0x2d9] sm:$0xff]  ;;  %v4376_v5 = vld [vmem:[#allocation2 + $0x2d1] sm:$0xff] }
 0x70c   :  { %5574 = vrot.lane.b32.xlu0 %v4372_v52, %s8494_s26 }
 0x70d   :  { %v12232_v13 = vpop.permute.xlu1 %5336 }
 0x70e   :  { %15083 = vst [vmem:[#allocation25_spill] sm:$0xff] %v12232_v13  ;;  %v12234_v28 = vpop.permute.xlu0 %5334 }
 0x70f   :  { %15084 = vst [vmem:[#allocation193_spill] sm:$0xff] %v12234_v28  ;;  %5580 = vrot.lane.b32.xlu1 %v4375_v58, %s8494_s26  ;;  %v4379_v28 = vld [vmem:[#allocation2 + $0x2f1] sm:$0xff]  ;;  %v4378_v58 = vld [vmem:[#allocation2 + $0x2e9] sm:$0xff] }
 0x710   :  { %5578 = vrot.lane.b32.xlu0 %v4374_v25, %s8494_s26 }
 0x711   :  { %v12238_v57 = vpop.permute.xlu1 %5340 }
 0x712   :  { %15085 = vst [vmem:[#allocation250_spill] sm:$0xff] %v12238_v57  ;;  %v12240_v11 = vpop.permute.xlu0 %5338 }
 0x713   :  { %15086 = vst [vmem:[#allocation26_spill] sm:$0xff] %v12240_v11  ;;  %5584 = vrot.lane.b32.xlu1 %v4377_v32, %s8494_s26  ;;  %v4381_v11 = vld [vmem:[#allocation2 + $0x309] sm:$0xff]  ;;  %v4380_v32 = vld [vmem:[#allocation2 + $0x301] sm:$0xff] }
 0x714   :  { %5582 = vrot.lane.b32.xlu0 %v4376_v5, %s8494_s26 }
 0x715   :  { %v12244_v52 = vpop.permute.xlu1 %5344 }
 0x716   :  { %15087 = vst [vmem:[#allocation80_spill] sm:$0xff] %v12244_v52  ;;  %v12246_v13 = vpop.permute.xlu0 %5342 }
 0x717   :  { %15088 = vst [vmem:[#allocation251_spill] sm:$0xff] %v12246_v13  ;;  %5588 = vrot.lane.b32.xlu1 %v4379_v28, %s8494_s26  ;;  %v4383_v13 = vld [vmem:[#allocation2 + $0x321] sm:$0xff]  ;;  %v4382_v28 = vld [vmem:[#allocation2 + $0x319] sm:$0xff] }
 0x718   :  { %5586 = vrot.lane.b32.xlu0 %v4378_v58, %s8494_s26 }
 0x719   :  { %v12250_v25 = vpop.permute.xlu1 %5476 }
 0x71a   :  { %v12252_v57 = vpop.permute.xlu0 %5474 }
 0x71b   :  { %5592 = vrot.lane.b32.xlu1 %v4381_v11, %s8494_s26  ;;  %v4384_v11 = vld [vmem:[#allocation2 + $0x331] sm:$0xff] }
 0x71c   :  { %5590 = vrot.lane.b32.xlu0 %v4380_v32, %s8494_s26 }
 0x71d   :  { %v12256_v5 = vpop.permute.xlu1 %5480 }
 0x71e   :  { %v12258_v52 = vpop.permute.xlu0 %5478 }
 0x71f   :  { %5596 = vrot.lane.b32.xlu1 %v4383_v13, %s8494_s26  ;;  %v4386_v13 = vld [vmem:[#allocation2 + $0x1a] sm:$0xff] }
 0x720   :  { %5594 = vrot.lane.b32.xlu0 %v4382_v28, %s8494_s26 }
 0x721   :  { %v12262_v58 = vpop.permute.xlu1 %5484 }
 0x722   :  { %15089 = vst [vmem:[#allocation308_spill] sm:$0xff] %v12262_v58  ;;  %v12264_v46 = vpop.permute.xlu0 %5482 }
 0x723   :  { %5600 = vrot.lane.b32.xlu1 %v4385_v50, %s8494_s26  ;;  %v12282_v50 = vld [vmem:[#allocation2 + $0x32] sm:$0xff] }
 0x724   :  { %5598 = vrot.lane.b32.xlu0 %v4384_v11, %s8494_s26 }
 0x725   :  { %v12268_v32 = vpop.permute.xlu1 %5488 }
 0x726   :  { %15090 = vst [vmem:[#allocation81_spill] sm:$0xff] %v12268_v32  ;;  %v12270_v8 = vpop.permute.xlu0 %5486  ;;  %v12410_v32 = vld [vmem:[#allocation2 + $0x142] sm:$0xff] }
 0x727   :  { %15091 = vst [vmem:[#allocation136_spill] sm:$0xff] %v12270_v8  ;;  %5732 = vrot.lane.b32.xlu1 %v4387_v26, %s8495_s27 }
 0x728   :  { %5730 = vrot.lane.b32.xlu0 %v4386_v13, %s8495_s27  ;;  %v12294_v13 = vld [vmem:[#allocation2 + $0x4a] sm:$0xff] }
 0x729   :  { %v12274_v28 = vpop.permute.xlu1 %5492 }
 0x72a   :  { %15092 = vst [vmem:[#allocation309_spill] sm:$0xff] %v12274_v28  ;;  %v12276_v45 = vpop.permute.xlu0 %5490  ;;  %v12362_v28 = vld [vmem:[#allocation2 + $0xe2] sm:$0xff] }
 0x72b   :  { %15093 = vst [vmem:[#allocation367_spill] sm:$0xff] %v12276_v45  ;;  %5736 = vrot.lane.b32.xlu1 %v12278_v44, %s8495_s27 }
 0x72c   :  { %5734 = vrot.lane.b32.xlu0 %v12282_v50, %s8495_s27 }
 0x72d   :  { %v12286_v11 = vpop.permute.xlu1 %5496 }
 0x72e   :  { %15094 = vst [vmem:[#allocation137_spill] sm:$0xff] %v12286_v11  ;;  %v12288_v26 = vpop.permute.xlu0 %5494  ;;  %v12314_v11 = vld [vmem:[#allocation2 + $0x82] sm:$0xff] }
 0x72f   :  { %15095 = vst [vmem:[#allocation194_spill] sm:$0xff] %v12288_v26  ;;  %5740 = vrot.lane.b32.xlu1 %v12290_v30, %s8495_s27 }
 0x730   :  { %5738 = vrot.lane.b32.xlu0 %v12294_v13, %s8495_s27 }
 0x731   :  { %v12298_v63 = vpop.permute.xlu1 %5500 }
 0x732   :  { %15096 = vst [vmem:[#allocation368_spill] sm:$0xff] %v12298_v63  ;;  %v12300_v51 = vpop.permute.xlu0 %5498  ;;  %v12318_v63 = vld [vmem:[#allocation2 + $0x7a] sm:$0xff] }
 0x733   :  { %15097 = vst [vmem:[#allocation27_spill] sm:$0xff] %v12300_v51  ;;  %5744 = vrot.lane.b32.xlu1 %v12302_v14, %s8495_s27 }
 0x734   :  { %5742 = vrot.lane.b32.xlu0 %v12306_v9, %s8495_s27 }
 0x735   :  { %v12310_v55 = vpop.permute.xlu1 %5504 }
 0x736   :  { %15098 = vst [vmem:[#allocation195_spill] sm:$0xff] %v12310_v55  ;;  %v12312_v10 = vpop.permute.xlu0 %5502  ;;  %v12330_v55 = vld [vmem:[#allocation2 + $0x92] sm:$0xff] }
 0x737   :  { %15099 = vst [vmem:[#allocation252_spill] sm:$0xff] %v12312_v10  ;;  %5748 = vrot.lane.b32.xlu1 %v12314_v11, %s8495_s27 }
 0x738   :  { %5746 = vrot.lane.b32.xlu0 %v12318_v63, %s8495_s27 }
 0x739   :  { %v12322_v51 = vpop.permute.xlu1 %5508 }
 0x73a   :  { %15100 = vst [vmem:[#allocation28_spill] sm:$0xff] %v12322_v51  ;;  %v12324_v26 = vpop.permute.xlu0 %5506  ;;  %v12342_v51 = vld [vmem:[#allocation2 + $0xaa] sm:$0xff] }
 0x73b   :  { %15101 = vst [vmem:[#allocation82_spill] sm:$0xff] %v12324_v26  ;;  %5752 = vrot.lane.b32.xlu1 %v12326_v49, %s8495_s27 }
 0x73c   :  { %5750 = vrot.lane.b32.xlu0 %v12330_v55, %s8495_s27 }
 0x73d   :  { %v12334_v10 = vpop.permute.xlu1 %5512 }
 0x73e   :  { %15102 = vst [vmem:[#allocation253_spill] sm:$0xff] %v12334_v10  ;;  %v12336_v12 = vpop.permute.xlu0 %5510  ;;  %v12354_v10 = vld [vmem:[#allocation2 + $0xc2] sm:$0xff] }
 0x73f   :  { %15103 = vst [vmem:[#allocation310_spill] sm:$0xff] %v12336_v12  ;;  %5756 = vrot.lane.b32.xlu1 %v12338_v17, %s8495_s27 }
 0x740   :  { %5754 = vrot.lane.b32.xlu0 %v12342_v51, %s8495_s27 }
 0x741   :  { %v12346_v26 = vpop.permute.xlu1 %5516 }
 0x742   :  { %15104 = vst [vmem:[#allocation83_spill] sm:$0xff] %v12346_v26  ;;  %v12348_v31 = vpop.permute.xlu0 %5514  ;;  %v12366_v26 = vld [vmem:[#allocation2 + $0xda] sm:$0xff] }
 0x743   :  { %15105 = vst [vmem:[#allocation138_spill] sm:$0xff] %v12348_v31  ;;  %5760 = vrot.lane.b32.xlu1 %v12350_v23, %s8495_s27 }
 0x744   :  { %5758 = vrot.lane.b32.xlu0 %v12354_v10, %s8495_s27 }
 0x745   :  { %v12358_v12 = vpop.permute.xlu1 %5520 }
 0x746   :  { %15106 = vst [vmem:[#allocation311_spill] sm:$0xff] %v12358_v12  ;;  %v12360_v62 = vpop.permute.xlu0 %5518  ;;  %v12378_v12 = vld [vmem:[#allocation2 + $0xf2] sm:$0xff] }
 0x747   :  { %15107 = vst [vmem:[#allocation369_spill] sm:$0xff] %v12360_v62  ;;  %5764 = vrot.lane.b32.xlu1 %v12362_v28, %s8495_s27 }
 0x748   :  { %5762 = vrot.lane.b32.xlu0 %v12366_v26, %s8495_s27 }
 0x749   :  { %v12370_v31 = vpop.permute.xlu1 %5524 }
 0x74a   :  { %15108 = vst [vmem:[#allocation139_spill] sm:$0xff] %v12370_v31  ;;  %v12372_v45 = vpop.permute.xlu0 %5522  ;;  %v12390_v31 = vld [vmem:[#allocation2 + $0x10a] sm:$0xff] }
 0x74b   :  { %15109 = vst [vmem:[#allocation196_spill] sm:$0xff] %v12372_v45  ;;  %5768 = vrot.lane.b32.xlu1 %v12374_v42, %s8495_s27 }
 0x74c   :  { %5766 = vrot.lane.b32.xlu0 %v12378_v12, %s8495_s27 }
 0x74d   :  { %v12382_v62 = vpop.permute.xlu1 %5528 }
 0x74e   :  { %15110 = vst [vmem:[#allocation370_spill] sm:$0xff] %v12382_v62  ;;  %v12384_v61 = vpop.permute.xlu0 %5526  ;;  %v12402_v62 = vld [vmem:[#allocation2 + $0x122] sm:$0xff] }
 0x74f   :  { %15111 = vst [vmem:[#allocation29_spill] sm:$0xff] %v12384_v61  ;;  %5772 = vrot.lane.b32.xlu1 %v12386_v0, %s8495_s27 }
 0x750   :  { %5770 = vrot.lane.b32.xlu0 %v12390_v31, %s8495_s27 }
 0x751   :  { %v12394_v45 = vpop.permute.xlu1 %5532 }
 0x752   :  { %15112 = vst [vmem:[#allocation197_spill] sm:$0xff] %v12394_v45  ;;  %v12396_v6 = vpop.permute.xlu0 %5530  ;;  %v12414_v45 = vld [vmem:[#allocation2 + $0x13a] sm:$0xff] }
 0x753   :  { %15113 = vst [vmem:[#allocation254_spill] sm:$0xff] %v12396_v6  ;;  %5776 = vrot.lane.b32.xlu1 %v12398_v27, %s8495_s27 }
 0x754   :  { %5774 = vrot.lane.b32.xlu0 %v12402_v62, %s8495_s27 }
 0x755   :  { %v12406_v61 = vpop.permute.xlu1 %5536 }
 0x756   :  { %15114 = vst [vmem:[#allocation30_spill] sm:$0xff] %v12406_v61  ;;  %v12408_v20 = vpop.permute.xlu0 %5534  ;;  %v12426_v61 = vld [vmem:[#allocation2 + $0x152] sm:$0xff] }
 0x757   :  { %15115 = vst [vmem:[#allocation84_spill] sm:$0xff] %v12408_v20  ;;  %5780 = vrot.lane.b32.xlu1 %v12410_v32, %s8495_s27  ;;  %15119 = vst [vmem:[#allocation140_spill] sm:$0xff] %v12426_v61 }
 0x758   :  { %5778 = vrot.lane.b32.xlu0 %v12414_v45, %s8495_s27 }
 0x759   :  { %v12418_v6 = vpop.permute.xlu1 %5540 }
 0x75a   :  { %15116 = vst [vmem:[#allocation255_spill] sm:$0xff] %v12418_v6  ;;  %v12420_v8 = vpop.permute.xlu0 %5538  ;;  %v12438_v6 = vld [vmem:[#allocation2 + $0x16a] sm:$0xff] }
 0x75b   :  { %15117 = vst [vmem:[#allocation312_spill] sm:$0xff] %v12420_v8  ;;  %5784 = vrot.lane.b32.xlu1 %v12422_v35, %s8495_s27  ;;  %15123 = vst [vmem:[#allocation198_spill] sm:$0xff] %v12438_v6  ;;  %v4440_v35 = vld [vmem:[#allocation2 + $0x2d2] sm:$0xff] }
 0x75c   :  { %5782 = vrot.lane.b32.xlu0 %v12426_v61, %s8495_s27  ;;  %v4419_v61 = vld [vmem:[#allocation2 + $0x1d2] sm:$0xff] }
 0x75d   :  { %v12430_v20 = vpop.permute.xlu1 %5544 }
 0x75e   :  { %15120 = vst [vmem:[#allocation313_spill] sm:$0xff] %v12430_v20  ;;  %v12432_v2 = vpop.permute.xlu0 %5542  ;;  %v12450_v20 = vld [vmem:[#allocation2 + $0x182] sm:$0xff] }
 0x75f   :  { %15121 = vst [vmem:[#allocation371_spill] sm:$0xff] %v12432_v2  ;;  %5788 = vrot.lane.b32.xlu1 %v12434_v43, %s8495_s27  ;;  %15127 = vst [vmem:[#allocation256_spill] sm:$0xff] %v12450_v20 }
 0x760   :  { %5786 = vrot.lane.b32.xlu0 %v12438_v6, %s8495_s27 }
 0x761   :  { %v12442_v8 = vpop.permute.xlu1 %5548 }
 0x762   :  { %15124 = vst [vmem:[#allocation372_spill] sm:$0xff] %v12442_v8  ;;  %v12444_v47 = vpop.permute.xlu0 %5546  ;;  %v4418_v8 = vld [vmem:[#allocation2 + $0x1ca] sm:$0xff] }
 0x763   :  { %15125 = vst [vmem:[#allocation31_spill] sm:$0xff] %v12444_v47  ;;  %5792 = vrot.lane.b32.xlu1 %v12446_v60, %s8495_s27  ;;  %v4421_v60 = vld [vmem:[#allocation2 + $0x1ea] sm:$0xff] }
 0x764   :  { %5790 = vrot.lane.b32.xlu0 %v12450_v20, %s8495_s27 }
 0x765   :  { %v12454_v2 = vpop.permute.xlu1 %5552 }
 0x766   :  { %15128 = vst [vmem:[#allocation32_spill] sm:$0xff] %v12454_v2  ;;  %v12456_v43 = vpop.permute.xlu0 %5550 }
 0x767   :  { %15129 = vst [vmem:[#allocation86_spill] sm:$0xff] %v12456_v43  ;;  %5796 = vrot.lane.b32.xlu1 %v4419_v61, %s8495_s27  ;;  %v4423_v43 = vld [vmem:[#allocation2 + $0x202] sm:$0xff]  ;;  %v4422_v61 = vld [vmem:[#allocation2 + $0x1fa] sm:$0xff] }
 0x768   :  { %5794 = vrot.lane.b32.xlu0 %v4418_v8, %s8495_s27 }
 0x769   :  { %v12460_v47 = vpop.permute.xlu1 %5556 }
 0x76a   :  { %15130 = vst [vmem:[#allocation257_spill] sm:$0xff] %v12460_v47  ;;  %v12462_v6 = vpop.permute.xlu0 %5554 }
 0x76b   :  { %15131 = vst [vmem:[#allocation314_spill] sm:$0xff] %v12462_v6  ;;  %5800 = vrot.lane.b32.xlu1 %v4421_v60, %s8495_s27  ;;  %v4425_v6 = vld [vmem:[#allocation2 + $0x21a] sm:$0xff]  ;;  %v4424_v60 = vld [vmem:[#allocation2 + $0x212] sm:$0xff] }
 0x76c   :  { %5798 = vrot.lane.b32.xlu0 %v4420_v41, %s8495_s27 }
 0x76d   :  { %v12466_v20 = vpop.permute.xlu1 %5560 }
 0x76e   :  { %15132 = vst [vmem:[#allocation87_spill] sm:$0xff] %v12466_v20  ;;  %v12468_v2 = vpop.permute.xlu0 %5558 }
 0x76f   :  { %15133 = vst [vmem:[#allocation142_spill] sm:$0xff] %v12468_v2  ;;  %5804 = vrot.lane.b32.xlu1 %v4423_v43, %s8495_s27  ;;  %v4427_v2 = vld [vmem:[#allocation2 + $0x232] sm:$0xff]  ;;  %v4426_v43 = vld [vmem:[#allocation2 + $0x22a] sm:$0xff] }
 0x770   :  { %5802 = vrot.lane.b32.xlu0 %v4422_v61, %s8495_s27 }
 0x771   :  { %v12472_v8 = vpop.permute.xlu1 %5564 }
 0x772   :  { %15134 = vst [vmem:[#allocation315_spill] sm:$0xff] %v12472_v8  ;;  %v12474_v47 = vpop.permute.xlu0 %5562 }
 0x773   :  { %15135 = vst [vmem:[#allocation373_spill] sm:$0xff] %v12474_v47  ;;  %5808 = vrot.lane.b32.xlu1 %v4425_v6, %s8495_s27  ;;  %v4429_v47 = vld [vmem:[#allocation2 + $0x24a] sm:$0xff]  ;;  %v4428_v6 = vld [vmem:[#allocation2 + $0x242] sm:$0xff] }
 0x774   :  { %5806 = vrot.lane.b32.xlu0 %v4424_v60, %s8495_s27 }
 0x775   :  { %v12478_v41 = vpop.permute.xlu1 %5568 }
 0x776   :  { %15136 = vst [vmem:[#allocation143_spill] sm:$0xff] %v12478_v41  ;;  %v12480_v20 = vpop.permute.xlu0 %5566 }
 0x777   :  { %15137 = vst [vmem:[#allocation200_spill] sm:$0xff] %v12480_v20  ;;  %5812 = vrot.lane.b32.xlu1 %v4427_v2, %s8495_s27  ;;  %v4431_v20 = vld [vmem:[#allocation2 + $0x262] sm:$0xff]  ;;  %v4430_v2 = vld [vmem:[#allocation2 + $0x25a] sm:$0xff] }
 0x778   :  { %5810 = vrot.lane.b32.xlu0 %v4426_v43, %s8495_s27 }
 0x779   :  { %v12484_v61 = vpop.permute.xlu1 %5572 }
 0x77a   :  { %15138 = vst [vmem:[#allocation374_spill] sm:$0xff] %v12484_v61  ;;  %v12486_v8 = vpop.permute.xlu0 %5570 }
 0x77b   :  { %15139 = vst [vmem:[#allocation33_spill] sm:$0xff] %v12486_v8  ;;  %5816 = vrot.lane.b32.xlu1 %v4429_v47, %s8495_s27  ;;  %v4433_v8 = vld [vmem:[#allocation2 + $0x27a] sm:$0xff]  ;;  %v4432_v47 = vld [vmem:[#allocation2 + $0x272] sm:$0xff] }
 0x77c   :  { %5814 = vrot.lane.b32.xlu0 %v4428_v6, %s8495_s27 }
 0x77d   :  { %v12490_v60 = vpop.permute.xlu1 %5576 }
 0x77e   :  { %15140 = vst [vmem:[#allocation201_spill] sm:$0xff] %v12490_v60  ;;  %v12492_v41 = vpop.permute.xlu0 %5574 }
 0x77f   :  { %15141 = vst [vmem:[#allocation258_spill] sm:$0xff] %v12492_v41  ;;  %5820 = vrot.lane.b32.xlu1 %v4431_v20, %s8495_s27  ;;  %v4435_v41 = vld [vmem:[#allocation2 + $0x292] sm:$0xff]  ;;  %v4434_v20 = vld [vmem:[#allocation2 + $0x28a] sm:$0xff] }
 0x780   :  { %5818 = vrot.lane.b32.xlu0 %v4430_v2, %s8495_s27 }
 0x781   :  { %v12496_v43 = vpop.permute.xlu1 %5580 }
 0x782   :  { %15142 = vst [vmem:[#allocation34_spill] sm:$0xff] %v12496_v43  ;;  %v12498_v61 = vpop.permute.xlu0 %5578 }
 0x783   :  { %15143 = vst [vmem:[#allocation88_spill] sm:$0xff] %v12498_v61  ;;  %5824 = vrot.lane.b32.xlu1 %v4433_v8, %s8495_s27  ;;  %v4437_v61 = vld [vmem:[#allocation2 + $0x2aa] sm:$0xff]  ;;  %v4436_v8 = vld [vmem:[#allocation2 + $0x2a2] sm:$0xff] }
 0x784   :  { %5822 = vrot.lane.b32.xlu0 %v4432_v47, %s8495_s27  ;;  %v7202_v47 = vld [vmem:[%s14116_s3] sm:$0xff] }
 0x785   :  { %v12502_v6 = vpop.permute.xlu1 %5584 }
 0x786   :  { %15144 = vst [vmem:[#allocation259_spill] sm:$0xff] %v12502_v6  ;;  %v12504_v60 = vpop.permute.xlu0 %5582 }
 0x787   :  { %15145 = vst [vmem:[#allocation316_spill] sm:$0xff] %v12504_v60  ;;  %5828 = vrot.lane.b32.xlu1 %v4435_v41, %s8495_s27  ;;  %v7203_v41 = vld [vmem:[%s14116_s3 + $0x8] sm:$0xff]  ;;  %v7205_v60 = vld [vmem:[%s14116_s3 + $0x18] sm:$0xff] }
 0x788   :  { %5826 = vrot.lane.b32.xlu0 %v4434_v20, %s8495_s27  ;;  %v8352_v20 = vpack.c.bf16 %v7203_v41, %v7202_v47 }
 0x789   :  { %v12508_v2 = vpop.permute.xlu1 %5588 }
 0x78a   :  { %15146 = vst [vmem:[#allocation89_spill] sm:$0xff] %v12508_v2  ;;  %v12510_v43 = vpop.permute.xlu0 %5586  ;;  %8353 = vmatprep.subr.bf16.mxu1 %v8352_v20 }
 0x78b   :  { %15147 = vst [vmem:[#allocation144_spill] sm:$0xff] %v12510_v43  ;;  %5832 = vrot.lane.b32.xlu1 %v4437_v61, %s8495_s27  ;;  %v4439_v43 = vld [vmem:[#allocation2 + $0x2c2] sm:$0xff]  ;;  %v4438_v61 = vld [vmem:[#allocation2 + $0x2ba] sm:$0xff]  ;;  %8355 = vmatpush3.bf16.msra.mxu1 %v8352_v20 }
 0x78c   :  { %5830 = vrot.lane.b32.xlu0 %v4436_v8, %s8495_s27  ;;  %v7204_v8 = vld [vmem:[%s14116_s3 + $0x10] sm:$0xff]  ;;  %v4451_v20 = vld [vmem:[#allocation2 + $0x38] sm:$0xff] }
 0x78d   :  { %v12520_v6 = vpop.permute.xlu1 %5592 }
 0x78e   :  { %15148 = vst [vmem:[#allocation317_spill] sm:$0xff] %v12520_v6  ;;  %v12522_v2 = vpop.permute.xlu0 %5590  ;;  %v8356_v6 = vpack.c.bf16 %v7205_v60, %v7204_v8 }
 0x78f   :  { %15149 = vst [vmem:[#allocation375_spill] sm:$0xff] %v12522_v2  ;;  %5836 = vrot.lane.b32.xlu1 %v4439_v43, %s8495_s27  ;;  %v4441_v2 = vld [vmem:[#allocation2 + $0x2da] sm:$0xff] }
 0x790   :  { %5834 = vrot.lane.b32.xlu0 %v4438_v61, %s8495_s27  ;;  %8357 = vmatprep.subr.bf16.mxu1 %v8356_v6  ;;  %v7206_v43 = vld [vmem:[%s14116_s3 + $0x20] sm:$0xf]  ;;  %v4450_v61 = vld [vmem:[#allocation2 + $0x30] sm:$0xff] }
 0x791   :  { %v12532_v47 = vpop.permute.xlu1 %5596  ;;  %8359 = vmatpush3.bf16.msra.mxu1 %v8356_v6 }
 0x792   :  { %15150 = vst [vmem:[#allocation145_spill] sm:$0xff] %v12532_v47  ;;  %v12534_v41 = vpop.permute.xlu0 %5594  ;;  %8246 = vmatprep.subr.msk.mxu1 %vm3613_vm2, %v7206_v43 }
 0x793   :  { %15151 = vst [vmem:[#allocation202_spill] sm:$0xff] %v12534_v41  ;;  %5840 = vrot.lane.b32.xlu1 %v4441_v2, %s8495_s27  ;;  %v4457_v41 = vld [vmem:[#allocation2 + $0x80] sm:$0xff] }
 0x794   :  { %5838 = vrot.lane.b32.xlu0 %v4440_v35, %s8495_s27 }
 0x795   :  { %v12541_v58 = vpop.permute.xlu1 %5600  ;;  %8247 = vmatpush3.msk.msra.mxu1 %vm3613_vm2, %v7206_v43 }
 0x796   :  { %15152 = vst [vmem:[#allocation376_spill] sm:$0xff] %v12541_v58  ;;  %v12544_v60 = vpop.permute.xlu0 %5598 }
 0x797   :  { %15153 = vst [vmem:[#allocation35_spill] sm:$0xff] %v12544_v60  ;;  %5988 = vrot.lane.b32.xlu1 %v4451_v20, %s8496_s28  ;;  %v4455_v60 = vld [vmem:[#allocation2 + $0x68] sm:$0xff] }
 0x798   :  { %5986 = vrot.lane.b32.xlu0 %v4450_v61, %s8496_s28  ;;  %v4453_v61 = vld [vmem:[#allocation2 + $0x50] sm:$0xff] }
 0x799   :  { %v12549_v8 = vpop.permute.xlu1 %5732 }
 0x79a   :  { %v12551_v2 = vpop.permute.xlu0 %5730 }
 0x79b   :  { %6244 = vrot.lane.b32.xlu1 %v12068_v21, %s8497_s29  ;;  %v4452_v21 = vld [vmem:[#allocation2 + $0x48] sm:$0xff] }
 0x79c   :  { %6242 = vrot.lane.b32.xlu0 %v12072_v53, %s8497_s29 }
 0x79d   :  { %v12557_v35 = vpop.permute.xlu1 %5736 }
 0x79e   :  { %v12559_v6 = vpop.permute.xlu0 %5734 }
 0x79f   :  { %6500 = vrot.lane.b32.xlu1 %v12278_v44, %s8498_s1 }
 0x7a0   :  { %6498 = vrot.lane.b32.xlu0 %v12282_v50, %s8498_s1 }
 0x7a1   :  { %v12565_v43 = vpop.permute.xlu1 %5740 }
 0x7a2   :  { %v12567_v20 = vpop.permute.xlu0 %5738 }
 0x7a3   :  { %5992 = vrot.lane.b32.xlu1 %v4453_v61, %s8496_s28 }
 0x7a4   :  { %5990 = vrot.lane.b32.xlu0 %v4452_v21, %s8496_s28 }
 0x7a5   :  { %v12571_v53 = vpop.permute.xlu1 %5744 }
 0x7a6   :  { %v12573_v58 = vpop.permute.xlu0 %5742 }
 0x7a7   :  { %6248 = vrot.lane.b32.xlu1 %v12080_v19, %s8497_s29  ;;  %v4454_v19 = vld [vmem:[#allocation2 + $0x60] sm:$0xff] }
 0x7a8   :  { %6246 = vrot.lane.b32.xlu0 %v12084_v48, %s8497_s29 }
 0x7a9   :  { %v12579_v44 = vpop.permute.xlu1 %5748 }
 0x7aa   :  { %v12581_v50 = vpop.permute.xlu0 %5746 }
 0x7ab   :  { %6504 = vrot.lane.b32.xlu1 %v12290_v30, %s8498_s1 }
 0x7ac   :  { %6502 = vrot.lane.b32.xlu0 %v12294_v13, %s8498_s1 }
 0x7ad   :  { %v12587_v61 = vpop.permute.xlu1 %5752 }
 0x7ae   :  { %v12589_v21 = vpop.permute.xlu0 %5750 }
 0x7af   :  { %5996 = vrot.lane.b32.xlu1 %v4455_v60, %s8496_s28 }
 0x7b0   :  { %5994 = vrot.lane.b32.xlu0 %v4454_v19, %s8496_s28 }
 0x7b1   :  { %v12593_v48 = vpop.permute.xlu1 %5756 }
 0x7b2   :  { %v12595_v47 = vpop.permute.xlu0 %5754 }
 0x7b3   :  { %6252 = vrot.lane.b32.xlu1 %v12092_v40, %s8497_s29  ;;  %v4456_v40 = vld [vmem:[#allocation2 + $0x78] sm:$0xff] }
 0x7b4   :  { %6250 = vrot.lane.b32.xlu0 %v12096_v36, %s8497_s29 }
 0x7b5   :  { %v12601_v30 = vpop.permute.xlu1 %5760 }
 0x7b6   :  { %15154 = vst [vmem:[#allocation203_spill] sm:$0xff] %v12601_v30  ;;  %v12603_v13 = vpop.permute.xlu0 %5758 }
 0x7b7   :  { %15155 = vst [vmem:[#allocation260_spill] sm:$0xff] %v12603_v13  ;;  %6508 = vrot.lane.b32.xlu1 %v12302_v14, %s8498_s1  ;;  %v4521_v13 = vld [vmem:[#allocation2 + $0x81] sm:$0xff]  ;;  %v4520_v14 = vld [vmem:[#allocation2 + $0x79] sm:$0xff] }
 0x7b8   :  { %6506 = vrot.lane.b32.xlu0 %v12306_v9, %s8498_s1 }
 0x7b9   :  { %v12609_v60 = vpop.permute.xlu1 %5764 }
 0x7ba   :  { %15156 = vst [vmem:[#allocation36_spill] sm:$0xff] %v12609_v60  ;;  %v12611_v19 = vpop.permute.xlu0 %5762 }
 0x7bb   :  { %6000 = vrot.lane.b32.xlu1 %v4457_v41, %s8496_s28 }
 0x7bc   :  { %5998 = vrot.lane.b32.xlu0 %v4456_v40, %s8496_s28 }
 0x7bd   :  { %v12615_v36 = vpop.permute.xlu1 %5768 }
 0x7be   :  { %15157 = vst [vmem:[#allocation90_spill] sm:$0xff] %v12615_v36  ;;  %v12617_v30 = vpop.permute.xlu0 %5766  ;;  %v4459_v36 = vld [vmem:[#allocation2 + $0x98] sm:$0xff] }
 0x7bf   :  { %6256 = vrot.lane.b32.xlu1 %v4521_v13, %s8497_s29  ;;  %v4458_v13 = vld [vmem:[#allocation2 + $0x90] sm:$0xff] }
 0x7c0   :  { %6254 = vrot.lane.b32.xlu0 %v4520_v14, %s8497_s29 }
 0x7c1   :  { %v12621_v9 = vpop.permute.xlu1 %5772 }
 0x7c2   :  { %15158 = vst [vmem:[#allocation261_spill] sm:$0xff] %v12621_v9  ;;  %v12623_v60 = vpop.permute.xlu0 %5770 }
 0x7c3   :  { %15159 = vst [vmem:[#allocation318_spill] sm:$0xff] %v12623_v60  ;;  %6512 = vrot.lane.b32.xlu1 %v12314_v11, %s8498_s1  ;;  %v4523_v60 = vld [vmem:[#allocation2 + $0x99] sm:$0xff]  ;;  %v4522_v11 = vld [vmem:[#allocation2 + $0x91] sm:$0xff] }
 0x7c4   :  { %6510 = vrot.lane.b32.xlu0 %v12318_v63, %s8498_s1 }
 0x7c5   :  { %v12629_v41 = vpop.permute.xlu1 %5776 }
 0x7c6   :  { %15160 = vst [vmem:[#allocation91_spill] sm:$0xff] %v12629_v41  ;;  %v12631_v40 = vpop.permute.xlu0 %5774 }
 0x7c7   :  { %6004 = vrot.lane.b32.xlu1 %v4459_v36, %s8496_s28 }
 0x7c8   :  { %6002 = vrot.lane.b32.xlu0 %v4458_v13, %s8496_s28 }
 0x7c9   :  { %v12635_v14 = vpop.permute.xlu1 %5780 }
 0x7ca   :  { %15161 = vst [vmem:[#allocation146_spill] sm:$0xff] %v12635_v14  ;;  %v12637_v9 = vpop.permute.xlu0 %5778  ;;  %v4461_v14 = vld [vmem:[#allocation2 + $0xb0] sm:$0xff] }
 0x7cb   :  { %6260 = vrot.lane.b32.xlu1 %v4523_v60, %s8497_s29  ;;  %v4460_v60 = vld [vmem:[#allocation2 + $0xa8] sm:$0xff] }
 0x7cc   :  { %6258 = vrot.lane.b32.xlu0 %v4522_v11, %s8497_s29 }
 0x7cd   :  { %v12641_v63 = vpop.permute.xlu1 %5784 }
 0x7ce   :  { %15162 = vst [vmem:[#allocation319_spill] sm:$0xff] %v12641_v63  ;;  %v12643_v41 = vpop.permute.xlu0 %5782 }
 0x7cf   :  { %15163 = vst [vmem:[#allocation377_spill] sm:$0xff] %v12643_v41  ;;  %6516 = vrot.lane.b32.xlu1 %v12326_v49, %s8498_s1  ;;  %v4525_v41 = vld [vmem:[#allocation2 + $0xb1] sm:$0xff]  ;;  %v4524_v49 = vld [vmem:[#allocation2 + $0xa9] sm:$0xff] }
 0x7d0   :  { %6514 = vrot.lane.b32.xlu0 %v12330_v55, %s8498_s1 }
 0x7d1   :  { %v12649_v36 = vpop.permute.xlu1 %5788 }
 0x7d2   :  { %15164 = vst [vmem:[#allocation147_spill] sm:$0xff] %v12649_v36  ;;  %v12651_v13 = vpop.permute.xlu0 %5786 }
 0x7d3   :  { %6008 = vrot.lane.b32.xlu1 %v4461_v14, %s8496_s28 }
 0x7d4   :  { %6006 = vrot.lane.b32.xlu0 %v4460_v60, %s8496_s28 }
 0x7d5   :  { %v12655_v11 = vpop.permute.xlu1 %5792 }
 0x7d6   :  { %15165 = vst [vmem:[#allocation204_spill] sm:$0xff] %v12655_v11  ;;  %v12657_v63 = vpop.permute.xlu0 %5790  ;;  %v4463_v11 = vld [vmem:[#allocation2 + $0xc8] sm:$0xff] }
 0x7d7   :  { %6264 = vrot.lane.b32.xlu1 %v4525_v41, %s8497_s29  ;;  %v4462_v41 = vld [vmem:[#allocation2 + $0xc0] sm:$0xff] }
 0x7d8   :  { %6262 = vrot.lane.b32.xlu0 %v4524_v49, %s8497_s29 }
 0x7d9   :  { %v12661_v55 = vpop.permute.xlu1 %5796 }
 0x7da   :  { %15166 = vst [vmem:[#allocation378_spill] sm:$0xff] %v12661_v55  ;;  %v12663_v36 = vpop.permute.xlu0 %5794 }
 0x7db   :  { %15167 = vst [vmem:[#allocation37_spill] sm:$0xff] %v12663_v36  ;;  %6520 = vrot.lane.b32.xlu1 %v12338_v17, %s8498_s1  ;;  %v4527_v36 = vld [vmem:[#allocation2 + $0xc9] sm:$0xff]  ;;  %v4526_v17 = vld [vmem:[#allocation2 + $0xc1] sm:$0xff] }
 0x7dc   :  { %6518 = vrot.lane.b32.xlu0 %v12342_v51, %s8498_s1 }
 0x7dd   :  { %v12669_v14 = vpop.permute.xlu1 %5800 }
 0x7de   :  { %15168 = vst [vmem:[#allocation205_spill] sm:$0xff] %v12669_v14  ;;  %v12671_v60 = vpop.permute.xlu0 %5798 }
 0x7df   :  { %6012 = vrot.lane.b32.xlu1 %v4463_v11, %s8496_s28 }
 0x7e0   :  { %6010 = vrot.lane.b32.xlu0 %v4462_v41, %s8496_s28 }
 0x7e1   :  { %v12675_v49 = vpop.permute.xlu1 %5804 }
 0x7e2   :  { %15169 = vst [vmem:[#allocation262_spill] sm:$0xff] %v12675_v49  ;;  %v12677_v55 = vpop.permute.xlu0 %5802  ;;  %v4465_v49 = vld [vmem:[#allocation2 + $0xe0] sm:$0xff] }
 0x7e3   :  { %6268 = vrot.lane.b32.xlu1 %v4527_v36, %s8497_s29  ;;  %v4464_v36 = vld [vmem:[#allocation2 + $0xd8] sm:$0xff] }
 0x7e4   :  { %6266 = vrot.lane.b32.xlu0 %v4526_v17, %s8497_s29 }
 0x7e5   :  { %v12681_v51 = vpop.permute.xlu1 %5808 }
 0x7e6   :  { %15170 = vst [vmem:[#allocation38_spill] sm:$0xff] %v12681_v51  ;;  %v12683_v14 = vpop.permute.xlu0 %5806 }
 0x7e7   :  { %15171 = vst [vmem:[#allocation92_spill] sm:$0xff] %v12683_v14  ;;  %6524 = vrot.lane.b32.xlu1 %v12350_v23, %s8498_s1  ;;  %v4529_v14 = vld [vmem:[#allocation2 + $0xe1] sm:$0xff]  ;;  %v4528_v23 = vld [vmem:[#allocation2 + $0xd9] sm:$0xff] }
 0x7e8   :  { %6522 = vrot.lane.b32.xlu0 %v12354_v10, %s8498_s1 }
 0x7e9   :  { %v12689_v11 = vpop.permute.xlu1 %5812 }
 0x7ea   :  { %15172 = vst [vmem:[#allocation263_spill] sm:$0xff] %v12689_v11  ;;  %v12691_v41 = vpop.permute.xlu0 %5810 }
 0x7eb   :  { %6016 = vrot.lane.b32.xlu1 %v4465_v49, %s8496_s28 }
 0x7ec   :  { %6014 = vrot.lane.b32.xlu0 %v4464_v36, %s8496_s28 }
 0x7ed   :  { %v12695_v17 = vpop.permute.xlu1 %5816 }
 0x7ee   :  { %15173 = vst [vmem:[#allocation320_spill] sm:$0xff] %v12695_v17  ;;  %v12697_v51 = vpop.permute.xlu0 %5814  ;;  %v4467_v17 = vld [vmem:[#allocation2 + $0xf8] sm:$0xff] }
 0x7ef   :  { %6272 = vrot.lane.b32.xlu1 %v4529_v14, %s8497_s29  ;;  %v4466_v14 = vld [vmem:[#allocation2 + $0xf0] sm:$0xff] }
 0x7f0   :  { %6270 = vrot.lane.b32.xlu0 %v4528_v23, %s8497_s29 }
 0x7f1   :  { %v12701_v10 = vpop.permute.xlu1 %5820 }
 0x7f2   :  { %15174 = vst [vmem:[#allocation93_spill] sm:$0xff] %v12701_v10  ;;  %v12703_v11 = vpop.permute.xlu0 %5818 }
 0x7f3   :  { %15175 = vst [vmem:[#allocation148_spill] sm:$0xff] %v12703_v11  ;;  %6528 = vrot.lane.b32.xlu1 %v12362_v28, %s8498_s1  ;;  %v4531_v11 = vld [vmem:[#allocation2 + $0xf9] sm:$0xff]  ;;  %v4530_v28 = vld [vmem:[#allocation2 + $0xf1] sm:$0xff] }
 0x7f4   :  { %6526 = vrot.lane.b32.xlu0 %v12366_v26, %s8498_s1 }
 0x7f5   :  { %v12709_v49 = vpop.permute.xlu1 %5824 }
 0x7f6   :  { %15176 = vst [vmem:[#allocation321_spill] sm:$0xff] %v12709_v49  ;;  %v12711_v36 = vpop.permute.xlu0 %5822 }
 0x7f7   :  { %15177 = vst [vmem:[#allocation379_spill] sm:$0xff] %v12711_v36  ;;  %6020 = vrot.lane.b32.xlu1 %v4467_v17, %s8496_s28  ;;  %v4471_v36 = vld [vmem:[#allocation2 + $0x128] sm:$0xff] }
 0x7f8   :  { %6018 = vrot.lane.b32.xlu0 %v4466_v14, %s8496_s28 }
 0x7f9   :  { %v12715_v23 = vpop.permute.xlu1 %5828 }
 0x7fa   :  { %15178 = vst [vmem:[#allocation149_spill] sm:$0xff] %v12715_v23  ;;  %v12717_v10 = vpop.permute.xlu0 %5826  ;;  %v4469_v23 = vld [vmem:[#allocation2 + $0x110] sm:$0xff] }
 0x7fb   :  { %15179 = vst [vmem:[#allocation206_spill] sm:$0xff] %v12717_v10  ;;  %6276 = vrot.lane.b32.xlu1 %v4531_v11, %s8497_s29  ;;  %v4468_v11 = vld [vmem:[#allocation2 + $0x108] sm:$0xff] }
 0x7fc   :  { %6274 = vrot.lane.b32.xlu0 %v4530_v28, %s8497_s29  ;;  %v4067_v10 = vld [vmem:[#allocation2 + $0x8] sm:$0xff] }
 0x7fd   :  { %v12721_v26 = vpop.permute.xlu1 %5832 }
 0x7fe   :  { %15180 = vst [vmem:[#allocation380_spill] sm:$0xff] %v12721_v26  ;;  %v12723_v49 = vpop.permute.xlu0 %5830 }
 0x7ff   :  { %15181 = vst [vmem:[#allocation39_spill] sm:$0xff] %v12723_v49  ;;  %6532 = vrot.lane.b32.xlu1 %v12374_v42, %s8498_s1  ;;  %v4533_v49 = vld [vmem:[#allocation2 + $0x111] sm:$0xff]  ;;  %v4532_v42 = vld [vmem:[#allocation2 + $0x109] sm:$0xff] }
 0x800   :  { %6530 = vrot.lane.b32.xlu0 %v12378_v12, %s8498_s1  ;;  %v4066_v12 = vld [vmem:[#allocation2] sm:$0xff] }
 0x801   :  { %v12729_v17 = vpop.permute.xlu1 %5836 }
 0x802   :  { %15182 = vst [vmem:[#allocation207_spill] sm:$0xff] %v12729_v17  ;;  %v12731_v14 = vpop.permute.xlu0 %5834 }
 0x803   :  { %15183 = vst [vmem:[#allocation264_spill] sm:$0xff] %v12731_v14  ;;  %6024 = vrot.lane.b32.xlu1 %v4469_v23, %s8496_s28  ;;  %v6690_v23 = vsel %vm24_vm0, %v4066_v12, %v11650_v15 }
 0x804   :  { %6022 = vrot.lane.b32.xlu0 %v4468_v11, %s8496_s28  ;;  %v6691_v11 = vsel %vm24_vm0, %v4067_v10, %v11646_v38  ;;  %v4470_v38 = vld [vmem:[#allocation2 + $0x120] sm:$0xff] }
 0x805   :  { %v12735_v28 = vpop.permute.xlu1 %5840 }
 0x806   :  { %15184 = vst [vmem:[#allocation40_spill] sm:$0xff] %v12735_v28  ;;  %v12737_v26 = vpop.permute.xlu0 %5838  ;;  %v6755_v28 = vsel %vm2953_vm3, %v6691_v11, %v11848_v59 }
 0x807   :  { %15185 = vst [vmem:[#allocation94_spill] sm:$0xff] %v12737_v26  ;;  %6280 = vrot.lane.b32.xlu1 %v4533_v49, %s8497_s29  ;;  %v6754_v49 = vsel %vm2953_vm3, %v6690_v23, %v11850_v18  ;;  %v6819_v15 = vsel %vm3018_vm4, %v6755_v28, %v12040_v56 }
 0x808   :  { %6278 = vrot.lane.b32.xlu0 %v4532_v42, %s8497_s29  ;;  %v6818_v26 = vsel %vm3018_vm4, %v6754_v49, %v12042_v29  ;;  %v6883_v18 = vsel %vm3083_vm5, %v6819_v15, %v12250_v25  ;;  %v4534_v25 = vld [vmem:[#allocation2 + $0x121] sm:$0xff] }
 0x809   :  { %v5989_v17 = vpop.permute.xlu1 %5988  ;;  %v6947_v29 = vsel %vm3148_vm6, %v6883_v18, %v12549_v8  ;;  %v8430_v49 = vld [vmem:[#allocation2 + $0x20] sm:$0xff] }
 0x80a   :  { %v5987_v14 = vpop.permute.xlu0 %5986  ;;  %v7011_v28 = vsel %vm3213_vm7, %v6947_v29, %v5989_v17  ;;  %v4473_v18 = vld [vmem:[#allocation2 + $0x140] sm:$0xff] }
 0x80b   :  { %6536 = vrot.lane.b32.xlu1 %v12386_v0, %s8498_s1 }
 0x80c   :  { %6534 = vrot.lane.b32.xlu0 %v12390_v31, %s8498_s1  ;;  %v6882_v31 = vsel %vm3083_vm5, %v6818_v26, %v12252_v57  ;;  %v4535_v26 = vld [vmem:[#allocation2 + $0x129] sm:$0xff] }
 0x80d   :  { %v6245_v42 = vpop.permute.xlu1 %6244  ;;  %v6946_v59 = vsel %vm3148_vm6, %v6882_v31, %v12551_v2 }
 0x80e   :  { %v6243_v0 = vpop.permute.xlu0 %6242  ;;  %v7010_v10 = vsel %vm3213_vm7, %v6946_v59, %v5987_v14  ;;  %v7075_v12 = vsel %vm3278_vm8, %v7011_v28, %v6245_v42  ;;  %v8429_v14 = vld [vmem:[#allocation2 + $0x18] sm:$0xff]  ;;  %v6693_v42 = vsel %vm24_vm0, %v8430_v49, %v11659_v22  ;;  %v15186_v49 = vld [vmem:[#allocation308_spill] sm:$0xff] }
 0x80f   :  { %6028 = vrot.lane.b32.xlu1 %v4471_v36, %s8496_s28  ;;  %v7074_v57 = vsel %vm3278_vm8, %v7010_v10, %v6243_v0  ;;  %v6692_v11 = vsel %vm24_vm0, %v8429_v14, %v11662_v33  ;;  %v6757_v31 = vsel %vm2953_vm3, %v6693_v42, %v11854_v34  ;;  %v4472_v22 = vld [vmem:[#allocation2 + $0x138] sm:$0xff] }
 0x810   :  { %6026 = vrot.lane.b32.xlu0 %v4470_v38, %s8496_s28  ;;  %v6756_v0 = vsel %vm2953_vm3, %v6692_v11, %v11856_v54  ;;  %v6821_v33 = vsel %vm3018_vm4, %v6757_v31, %v12046_v7  ;;  %v4475_v11 = vld [vmem:[#allocation2 + $0x158] sm:$0xff] }
 0x811   :  { %v6501_v56 = vpop.permute.xlu1 %6500  ;;  %v6885_v54 = vsel %vm3083_vm5, %v6821_v33, %v12256_v5  ;;  %v4539_v31 = vld [vmem:[#allocation2 + $0x159] sm:$0xff] }
 0x812   :  { %v6499_v36 = vpop.permute.xlu0 %6498  ;;  %v7139_v23 = vsel %vm3343_vm9, %v7075_v12, %v6501_v56  ;;  %v4537_v56 = vld [vmem:[#allocation2 + $0x141] sm:$0xff] }
 0x813   :  { %6284 = vrot.lane.b32.xlu1 %v4535_v26, %s8497_s29  ;;  %v7138_v2 = vsel %vm3343_vm9, %v7074_v57, %v6499_v36  ;;  %v8431_v26 = vld [vmem:[#allocation2 + $0x30] sm:$0xff] }
 0x814   :  { %6282 = vrot.lane.b32.xlu0 %v4534_v25, %s8497_s29  ;;  %8248 = vmatprep.mubr.msk.f32.mxu1 %vm3420_vm10, %v7138_v2  ;;  %v6694_v12 = vsel %vm24_vm0, %v8431_v26, %v11670_v1  ;;  %v8432_v25 = vld [vmem:[#allocation2 + $0x38] sm:$0xff]  ;;  %v15194_v26 = vld [vmem:[#allocation72_spill] sm:$0xff] }
 0x815   :  { %v5993_v8 = vpop.permute.xlu1 %5992  ;;  %8249 = vmatmul.mubr.msk.f32.vlgmr.msra.gmra.mrb[0].mxu1 %vm3420_vm10, %v7139_v23  ;;  %v6695_v2 = vsel %vm24_vm0, %v8432_v25, %v11668_v39  ;;  %v6758_v23 = vsel %vm2953_vm3, %v6694_v12, %v11862_v24  ;;  %v4474_v39 = vld [vmem:[#allocation2 + $0x150] sm:$0xff]  ;;  %v15195_v25 = vld [vmem:[#allocation136_spill] sm:$0xff] }
 0x816   :  { %v5991_v17 = vpop.permute.xlu0 %5990 }
 0x817   :  { %6540 = vrot.lane.b32.xlu1 %v12398_v27, %s8498_s1  ;;  %v6820_v27 = vsel %vm3018_vm4, %v6756_v0, %v12048_v16  ;;  %v6949_v16 = vsel %vm3148_vm6, %v6885_v54, %v12557_v35  ;;  %v15188_v54 = vld [vmem:[#allocation342_spill] sm:$0xff] }
 0x818   :  { %6538 = vrot.lane.b32.xlu0 %v12402_v62, %s8498_s1  ;;  %v6884_v62 = vsel %vm3083_vm5, %v6820_v27, %v12258_v52  ;;  %v7013_v29 = vsel %vm3213_vm7, %v6949_v16, %v5993_v8  ;;  %v15189_v16 = vld [vmem:[#allocation140_spill] sm:$0xff] }
 0x819   :  { %v6249_v15 = vpop.permute.xlu1 %6248  ;;  %v6948_v34 = vsel %vm3148_vm6, %v6884_v62, %v12559_v6  ;;  %v4536_v6 = vld [vmem:[#allocation2 + $0x139] sm:$0xff]  ;;  %v15187_v62 = vld [vmem:[#allocation85_spill] sm:$0xff] }
 0x81a   :  { %v6247_v38 = vpop.permute.xlu0 %6246  ;;  %v7012_v59 = vsel %vm3213_vm7, %v6948_v34, %v5991_v17  ;;  %v7077_v28 = vsel %vm3278_vm8, %v7013_v29, %v6249_v15  ;;  %v6759_v17 = vsel %vm2953_vm3, %v6695_v2, %v11860_v3 }
 0x81b   :  { %6032 = vrot.lane.b32.xlu1 %v4473_v18, %s8496_s28  ;;  %v7076_v52 = vsel %vm3278_vm8, %v7012_v59, %v6247_v38  ;;  %v6823_v1 = vsel %vm3018_vm4, %v6759_v17, %v12052_v37  ;;  %v8434_v59 = vld [vmem:[#allocation2 + $0x50] sm:$0xff] }
 0x81c   :  { %6030 = vrot.lane.b32.xlu0 %v4472_v22, %s8496_s28  ;;  %v6887_v24 = vsel %vm3083_vm5, %v6823_v1, %v15186_v49  ;;  %v8433_v22 = vld [vmem:[#allocation2 + $0x48] sm:$0xff] }
 0x81d   :  { %v6505_v7 = vpop.permute.xlu1 %6504  ;;  %v6696_v34 = vsel %vm24_vm0, %v8433_v22, %v15188_v54  ;;  %v15202_v22 = vld [vmem:[#allocation64_spill] sm:$0xff] }
 0x81e   :  { %v6503_v10 = vpop.permute.xlu0 %6502  ;;  %v7141_v57 = vsel %vm3343_vm9, %v7077_v28, %v6505_v7  ;;  %v15190_v7 = vld [vmem:[#allocation168_spill] sm:$0xff]  ;;  %v15192_v28 = vld [vmem:[#allocation234_spill] sm:$0xff] }
 0x81f   :  { %v7140_v5 = vsel %vm3343_vm9, %v7076_v52, %v6503_v10  ;;  %6288 = vrot.lane.b32.xlu1 %v4537_v56, %s8497_s29  ;;  %v6697_v29 = vsel %vm24_vm0, %v8434_v59, %v15190_v7  ;;  %v15191_v52 = vld [vmem:[#allocation10_spill] sm:$0xff]  ;;  %v4479_v7 = vld [vmem:[#allocation2 + $0x188] sm:$0xff] }
 0x820   :  { %6286 = vrot.lane.b32.xlu0 %v4536_v6, %s8497_s29  ;;  %8251 = vmatprep.mubr.msk.f32.mxu1 %vm3420_vm10, %v7140_v5  ;;  %v6760_v10 = vsel %vm2953_vm3, %v6696_v34, %v15191_v52  ;;  %v6761_v5 = vsel %vm2953_vm3, %v6697_v29, %v15192_v28  ;;  %v15193_v6 = vld [vmem:[#allocation243_spill] sm:$0xff]  ;;  %v15203_v34 = vld [vmem:[#allocation73_spill] sm:$0xff]  ;;  %v15204_v29 = vld [vmem:[#allocation300_spill] sm:$0xff] }
 0x821   :  { %v5997_v35 = vpop.permute.xlu1 %5996  ;;  %8252 = vmatmul.mubr.msk.f32.gmra.mrb[2].mxu1 %vm3420_vm10, %v7141_v57  ;;  %v6824_v57 = vsel %vm3018_vm4, %v6760_v10, %v15193_v6  ;;  %v6825_v12 = vsel %vm3018_vm4, %v6761_v5, %v15194_v26  ;;  %v15205_v10 = vld [vmem:[#allocation367_spill] sm:$0xff]  ;;  %v15206_v5 = vld [vmem:[#allocation309_spill] sm:$0xff] }
 0x822   :  { %v5995_v36 = vpop.permute.xlu0 %5994  ;;  %v6888_v2 = vsel %vm3083_vm5, %v6824_v57, %v15195_v25  ;;  %v4478_v28 = vld [vmem:[#allocation2 + $0x180] sm:$0xff] }
 0x823   :  { %6544 = vrot.lane.b32.xlu1 %v12410_v32, %s8498_s1  ;;  %v6822_v32 = vsel %vm3018_vm4, %v6758_v23, %v12054_v4  ;;  %v6951_v4 = vsel %vm3148_vm6, %v6887_v24, %v12565_v43  ;;  %v4476_v23 = vld [vmem:[#allocation2 + $0x168] sm:$0xff]  ;;  %v4541_v24 = vld [vmem:[#allocation2 + $0x171] sm:$0xff] }
 0x824   :  { %6542 = vrot.lane.b32.xlu0 %v12414_v45, %s8498_s1  ;;  %v6886_v45 = vsel %vm3083_vm5, %v6822_v32, %v12264_v46  ;;  %v7015_v0 = vsel %vm3213_vm7, %v6951_v4, %v5997_v35  ;;  %v6952_v32 = vsel %vm3148_vm6, %v6888_v2, %v12573_v58  ;;  %v4540_v58 = vld [vmem:[#allocation2 + $0x169] sm:$0xff] }
 0x825   :  { %v6253_v8 = vpop.permute.xlu1 %6252  ;;  %v6950_v3 = vsel %vm3148_vm6, %v6886_v45, %v12567_v20  ;;  %v4538_v20 = vld [vmem:[#allocation2 + $0x151] sm:$0xff] }
 0x826   :  { %v6251_v14 = vpop.permute.xlu0 %6250  ;;  %v7014_v42 = vsel %vm3213_vm7, %v6950_v3, %v5995_v36  ;;  %v7079_v27 = vsel %vm3278_vm8, %v7015_v0, %v6253_v8  ;;  %v4477_v36 = vld [vmem:[#allocation2 + $0x170] sm:$0xff] }
 0x827   :  { %6036 = vrot.lane.b32.xlu1 %v4475_v11, %s8496_s28  ;;  %v7078_v46 = vsel %vm3278_vm8, %v7014_v42, %v6251_v14  ;;  %v15196_v8 = vld [vmem:[#allocation81_spill] sm:$0xff] }
 0x828   :  { %6034 = vrot.lane.b32.xlu0 %v4474_v39, %s8496_s28  ;;  %v6889_v17 = vsel %vm3083_vm5, %v6825_v12, %v15196_v8  ;;  %v15197_v0 = vld [vmem:[#allocation141_spill] sm:$0xff] }
 0x829   :  { %v6509_v37 = vpop.permute.xlu1 %6508  ;;  %v6953_v14 = vsel %vm3148_vm6, %v6889_v17, %v12571_v53 }
 0x82a   :  { %v6507_v15 = vpop.permute.xlu0 %6506  ;;  %v7143_v18 = vsel %vm3343_vm9, %v7079_v27, %v6509_v37  ;;  %v15199_v27 = vld [vmem:[#allocation198_spill] sm:$0xff] }
 0x82b   :  { %v7142_v38 = vsel %vm3343_vm9, %v7078_v46, %v6507_v15  ;;  %6292 = vrot.lane.b32.xlu1 %v4539_v31, %s8497_s29  ;;  %v8435_v46 = vld [vmem:[#allocation2 + $0x60] sm:$0xff]  ;;  %v15198_v15 = vld [vmem:[#allocation226_spill] sm:$0xff] }
 0x82c   :  { %6290 = vrot.lane.b32.xlu0 %v4538_v20, %s8497_s29  ;;  %8254 = vmatprep.mubr.msk.f32.mxu1 %vm3420_vm10, %v7142_v38  ;;  %v6698_v31 = vsel %vm24_vm0, %v8435_v46, %v15198_v15  ;;  %v8436_v38 = vld [vmem:[#allocation2 + $0x68] sm:$0xff]  ;;  %v15200_v20 = vld [vmem:[#allocation169_spill] sm:$0xff] }
 0x82d   :  { %v6001_v43 = vpop.permute.xlu1 %6000  ;;  %8255 = vmatmul.mubr.msk.f32.gmra.mrb[4].mxu1 %vm3420_vm10, %v7143_v18  ;;  %v6699_v18 = vsel %vm24_vm0, %v8436_v38, %v15200_v20  ;;  %v15212_v46 = vld [vmem:[#allocation292_spill] sm:$0xff] }
 0x82e   :  { %v5999_v33 = vpop.permute.xlu0 %5998  ;;  %v7017_v45 = vsel %vm3213_vm7, %v6953_v14, %v6001_v43  ;;  %v15201_v43 = vld [vmem:[#allocation235_spill] sm:$0xff]  ;;  %v6763_v54 = vsel %vm2953_vm3, %v6699_v18, %v15202_v22  ;;  %v15214_v20 = vld [vmem:[#allocation128_spill] sm:$0xff] }
 0x82f   :  { %6548 = vrot.lane.b32.xlu1 %v15187_v62, %s8498_s1  ;;  %v7016_v11 = vsel %vm3213_vm7, %v6952_v32, %v5999_v33  ;;  %v6762_v33 = vsel %vm2953_vm3, %v6698_v31, %v15201_v43  ;;  %v6827_v52 = vsel %vm3018_vm4, %v6763_v54, %v15204_v29  ;;  %v15213_v31 = vld [vmem:[#allocation301_spill] sm:$0xff]  ;;  %v15215_v43 = vld [vmem:[#allocation194_spill] sm:$0xff] }
 0x830   :  { %6546 = vrot.lane.b32.xlu0 %v15189_v16, %s8498_s1  ;;  %v6826_v16 = vsel %vm3018_vm4, %v6762_v33, %v15203_v34  ;;  %v6891_v6 = vsel %vm3083_vm5, %v6827_v52, %v15206_v5  ;;  %v4545_v34 = vld [vmem:[#allocation2 + $0x1a1] sm:$0xff]  ;;  %v4544_v29 = vld [vmem:[#allocation2 + $0x199] sm:$0xff] }
 0x831   :  { %v6257_v56 = vpop.permute.xlu1 %6256 }
 0x832   :  { %v6255_v35 = vpop.permute.xlu0 %6254  ;;  %v7081_v3 = vsel %vm3278_vm8, %v7017_v45, %v6257_v56  ;;  %v6890_v56 = vsel %vm3083_vm5, %v6826_v16, %v15205_v10  ;;  %v15208_v45 = vld [vmem:[#allocation227_spill] sm:$0xff] }
 0x833   :  { %6040 = vrot.lane.b32.xlu1 %v4477_v36, %s8496_s28  ;;  %v7080_v39 = vsel %vm3278_vm8, %v7016_v11, %v6255_v35  ;;  %v6954_v57 = vsel %vm3148_vm6, %v6890_v56, %v12581_v50  ;;  %v6955_v35 = vsel %vm3148_vm6, %v6891_v6, %v12579_v44  ;;  %v4542_v50 = vld [vmem:[#allocation2 + $0x181] sm:$0xff] }
 0x834   :  { %6038 = vrot.lane.b32.xlu0 %v4476_v23, %s8496_s28  ;;  %v4543_v23 = vld [vmem:[#allocation2 + $0x189] sm:$0xff]  ;;  %v15207_v11 = vld [vmem:[#allocation199_spill] sm:$0xff] }
 0x835   :  { %v6513_v1 = vpop.permute.xlu1 %6512 }
 0x836   :  { %v6511_v49 = vpop.permute.xlu0 %6510  ;;  %v7145_v42 = vsel %vm3343_vm9, %v7081_v3, %v6513_v1  ;;  %v8437_v1 = vld [vmem:[#allocation2 + $0x78] sm:$0xff]  ;;  %v8438_v3 = vld [vmem:[#allocation2 + $0x80] sm:$0xff] }
 0x837   :  { %v7144_v4 = vsel %vm3343_vm9, %v7080_v39, %v6511_v49  ;;  %6296 = vrot.lane.b32.xlu1 %v4541_v24, %s8497_s29  ;;  %v6700_v39 = vsel %vm24_vm0, %v8437_v1, %v15208_v45  ;;  %v15209_v49 = vld [vmem:[#allocation256_spill] sm:$0xff]  ;;  %v4481_v24 = vld [vmem:[#allocation2 + $0x1a0] sm:$0xff] }
 0x838   :  { %6294 = vrot.lane.b32.xlu0 %v4540_v58, %s8497_s29  ;;  %8257 = vmatprep.mubr.msk.f32.mxu1 %vm3420_vm10, %v7144_v4  ;;  %v15210_v4 = vld [vmem:[#allocation56_spill] sm:$0xff] }
 0x839   :  { %v6005_v53 = vpop.permute.xlu1 %6004  ;;  %8258 = vmatmul.mubr.msk.f32.gmra.mrb[6].mxu1 %vm3420_vm10, %v7145_v42  ;;  %v6701_v58 = vsel %vm24_vm0, %v8438_v3, %v15210_v4  ;;  %v15211_v42 = vld [vmem:[#allocation65_spill] sm:$0xff]  ;;  %v4483_v45 = vld [vmem:[#allocation2 + $0x1e8] sm:$0xff]  ;;  %v4482_v4 = vld [vmem:[#allocation2 + $0x1e0] sm:$0xff] }
 0x83a   :  { %v6003_v37 = vpop.permute.xlu0 %6002  ;;  %v7019_v12 = vsel %vm3213_vm7, %v6955_v35, %v6005_v53  ;;  %v6764_v53 = vsel %vm2953_vm3, %v6700_v39, %v15211_v42  ;;  %v6765_v15 = vsel %vm2953_vm3, %v6701_v58, %v15212_v46  ;;  %v15222_v39 = vld [vmem:[#allocation359_spill] sm:$0xff]  ;;  %v15224_v58 = vld [vmem:[#allocation368_spill] sm:$0xff] }
 0x83b   :  { %6552 = vrot.lane.b32.xlu1 %v15197_v0, %s8498_s1  ;;  %v7018_v36 = vsel %vm3213_vm7, %v6954_v57, %v6003_v37  ;;  %v4480_v0 = vld [vmem:[#allocation2 + $0x198] sm:$0xff]  ;;  %v6829_v18 = vsel %vm3018_vm4, %v6765_v15, %v15214_v20 }
 0x83c   :  { %6550 = vrot.lane.b32.xlu0 %v15199_v27, %s8498_s1  ;;  %v6828_v27 = vsel %vm3018_vm4, %v6764_v53, %v15213_v31  ;;  %v4608_v57 = vld [vmem:[#allocation2 + $0x19a] sm:$0xff] }
 0x83d   :  { %v6261_v62 = vpop.permute.xlu1 %6260  ;;  %v6892_v33 = vsel %vm3083_vm5, %v6828_v27, %v15215_v43 }
 0x83e   :  { %v6259_v59 = vpop.permute.xlu0 %6258  ;;  %v7083_v8 = vsel %vm3278_vm8, %v7019_v12, %v6261_v62  ;;  %v15216_v62 = vld [vmem:[#allocation137_spill] sm:$0xff]  ;;  %v6956_v54 = vsel %vm3148_vm6, %v6892_v33, %v12589_v21 }
 0x83f   :  { %6044 = vrot.lane.b32.xlu1 %v4479_v7, %s8496_s28  ;;  %v7082_v25 = vsel %vm3278_vm8, %v7018_v36, %v6259_v59  ;;  %v6893_v22 = vsel %vm3083_vm5, %v6829_v18, %v15216_v62  ;;  %v8439_v36 = vld [vmem:[#allocation2 + $0x90] sm:$0xff] }
 0x840   :  { %6042 = vrot.lane.b32.xlu0 %v4478_v28, %s8496_s28  ;;  %v6957_v16 = vsel %vm3148_vm6, %v6893_v22, %v12587_v61  ;;  %v4609_v61 = vld [vmem:[#allocation2 + $0x1a2] sm:$0xff]  ;;  %v4611_v62 = vld [vmem:[#allocation2 + $0x1ea] sm:$0xff] }
 0x841   :  { %v6517_v26 = vpop.permute.xlu1 %6516  ;;  %v4610_v22 = vld [vmem:[#allocation2 + $0x1e2] sm:$0xff] }
 0x842   :  { %v6515_v2 = vpop.permute.xlu0 %6514  ;;  %v7147_v32 = vsel %vm3343_vm9, %v7083_v8, %v6517_v26  ;;  %v15217_v26 = vld [vmem:[#allocation57_spill] sm:$0xff] }
 0x843   :  { %v7146_v17 = vsel %vm3343_vm9, %v7082_v25, %v6515_v2  ;;  %6300 = vrot.lane.b32.xlu1 %v4543_v23, %s8497_s29  ;;  %v6702_v12 = vsel %vm24_vm0, %v8439_v36, %v15217_v26  ;;  %v8440_v25 = vld [vmem:[#allocation2 + $0x98] sm:$0xff]  ;;  %v15218_v2 = vld [vmem:[#allocation284_spill] sm:$0xff]  ;;  %v15219_v8 = vld [vmem:[#allocation293_spill] sm:$0xff] }
 0x844   :  { %6298 = vrot.lane.b32.xlu0 %v4542_v50, %s8497_s29  ;;  %8260 = vmatprep.mubr.msk.f32.mxu1 %vm3420_vm10, %v7146_v17  ;;  %v6703_v23 = vsel %vm24_vm0, %v8440_v25, %v15218_v2  ;;  %v6766_v17 = vsel %vm2953_vm3, %v6702_v12, %v15219_v8  ;;  %v15231_v26 = vld [vmem:[#allocation252_spill] sm:$0xff]  ;;  %v4484_v25 = vld [vmem:[#allocation2 + $0x1f8] sm:$0xff]  ;;  %v15232_v2 = vld [vmem:[#allocation195_spill] sm:$0xff] }
 0x845   :  { %v6009_v44 = vpop.permute.xlu1 %6008  ;;  %8261 = vmatmul.mubr.msk.f32.gmra.mrb[8].mxu1 %vm3420_vm10, %v7147_v32  ;;  %v15220_v32 = vld [vmem:[#allocation120_spill] sm:$0xff] }
 0x846   :  { %v6007_v14 = vpop.permute.xlu0 %6006  ;;  %v7021_v52 = vsel %vm3213_vm7, %v6957_v16, %v6009_v44  ;;  %v6767_v44 = vsel %vm2953_vm3, %v6703_v23, %v15220_v32  ;;  %v15233_v8 = vld [vmem:[#allocation260_spill] sm:$0xff] }
 0x847   :  { %6556 = vrot.lane.b32.xlu1 %v15207_v11, %s8498_s1  ;;  %v7020_v59 = vsel %vm3213_vm7, %v6956_v54, %v6007_v14  ;;  %v15221_v14 = vld [vmem:[#allocation129_spill] sm:$0xff]  ;;  %v8441_v54 = vld [vmem:[#allocation2 + $0xa8] sm:$0xff] }
 0x848   :  { %6554 = vrot.lane.b32.xlu0 %v15209_v49, %s8498_s1  ;;  %v6830_v11 = vsel %vm3018_vm4, %v6766_v17, %v15221_v14  ;;  %v6831_v49 = vsel %vm3018_vm4, %v6767_v44, %v15222_v39  ;;  %v4549_v39 = vld [vmem:[#allocation2 + $0x201] sm:$0xff] }
 0x849   :  { %v6265_v37 = vpop.permute.xlu1 %6264  ;;  %v6895_v42 = vsel %vm3083_vm5, %v6831_v49, %v15224_v58 }
 0x84a   :  { %v6263_v38 = vpop.permute.xlu0 %6262  ;;  %v7085_v28 = vsel %vm3278_vm8, %v7021_v52, %v6265_v37  ;;  %v6959_v37 = vsel %vm3148_vm6, %v6895_v42, %v12593_v48  ;;  %v15227_v52 = vld [vmem:[#allocation121_spill] sm:$0xff] }
 0x84b   :  { %6048 = vrot.lane.b32.xlu1 %v4481_v24, %s8496_s28  ;;  %v7084_v10 = vsel %vm3278_vm8, %v7020_v59, %v6263_v38  ;;  %v15223_v24 = vld [vmem:[#allocation27_spill] sm:$0xff]  ;;  %v4547_v38 = vld [vmem:[#allocation2 + $0x1e9] sm:$0xff] }
 0x84c   :  { %6046 = vrot.lane.b32.xlu0 %v4480_v0, %s8496_s28  ;;  %v6894_v3 = vsel %vm3083_vm5, %v6830_v11, %v15223_v24  ;;  %v8442_v59 = vld [vmem:[#allocation2 + $0xb0] sm:$0xff] }
 0x84d   :  { %v6521_v7 = vpop.permute.xlu1 %6520  ;;  %v6958_v53 = vsel %vm3148_vm6, %v6894_v3, %v12595_v47  ;;  %v4546_v47 = vld [vmem:[#allocation2 + $0x1e1] sm:$0xff]  ;;  %v4548_v3 = vld [vmem:[#allocation2 + $0x1f9] sm:$0xff] }
 0x84e   :  { %v6519_v56 = vpop.permute.xlu0 %6518  ;;  %v7149_v21 = vsel %vm3343_vm9, %v7085_v28, %v6521_v7  ;;  %v15226_v7 = vld [vmem:[#allocation112_spill] sm:$0xff]  ;;  %v15228_v28 = vld [vmem:[#allocation351_spill] sm:$0xff] }
 0x84f   :  { %v7148_v5 = vsel %vm3343_vm9, %v7084_v10, %v6519_v56  ;;  %6304 = vrot.lane.b32.xlu1 %v4545_v34, %s8497_s29  ;;  %v15225_v34 = vld [vmem:[#allocation285_spill] sm:$0xff] }
 0x850   :  { %6302 = vrot.lane.b32.xlu0 %v4544_v29, %s8497_s29  ;;  %8263 = vmatprep.mubr.msk.f32.mxu1 %vm3420_vm10, %v7148_v5  ;;  %v6704_v16 = vsel %vm24_vm0, %v8441_v54, %v15225_v34  ;;  %v6705_v29 = vsel %vm24_vm0, %v8442_v59, %v15226_v7  ;;  %v4487_v54 = vld [vmem:[#allocation2 + $0x218] sm:$0xff]  ;;  %v15240_v34 = vld [vmem:[#allocation19_spill] sm:$0xff] }
 0x851   :  { %v6013_v6 = vpop.permute.xlu1 %6012  ;;  %8264 = vmatmul.mubr.msk.f32.gmra.mrb[10].mxu1 %vm3420_vm10, %v7149_v21  ;;  %v6768_v10 = vsel %vm2953_vm3, %v6704_v16, %v15227_v52  ;;  %v6769_v5 = vsel %vm2953_vm3, %v6705_v29, %v15228_v28  ;;  %v15229_v21 = vld [vmem:[#allocation360_spill] sm:$0xff]  ;;  %v15241_v59 = vld [vmem:[#allocation82_spill] sm:$0xff]  ;;  %v4486_v29 = vld [vmem:[#allocation2 + $0x210] sm:$0xff] }
 0x852   :  { %v6011_v35 = vpop.permute.xlu0 %6010  ;;  %v7023_v15 = vsel %vm3213_vm7, %v6959_v37, %v6013_v6  ;;  %v4612_v37 = vld [vmem:[#allocation2 + $0x1fa] sm:$0xff]  ;;  %v15242_v52 = vld [vmem:[#allocation28_spill] sm:$0xff] }
 0x853   :  { %6560 = vrot.lane.b32.xlu1 %v4609_v61, %s8498_s1  ;;  %v7022_v0 = vsel %vm3213_vm7, %v6958_v53, %v6011_v35  ;;  %v6832_v61 = vsel %vm3018_vm4, %v6768_v10, %v15229_v21  ;;  %v15230_v35 = vld [vmem:[#allocation186_spill] sm:$0xff]  ;;  %v4613_v53 = vld [vmem:[#allocation2 + $0x202] sm:$0xff] }
 0x854   :  { %6558 = vrot.lane.b32.xlu0 %v4608_v57, %s8498_s1  ;;  %v4485_v57 = vld [vmem:[#allocation2 + $0x200] sm:$0xff]  ;;  %v6833_v36 = vsel %vm3018_vm4, %v6769_v5, %v15230_v35  ;;  %v6896_v12 = vsel %vm3083_vm5, %v6832_v61, %v15231_v26  ;;  %v15243_v28 = vld [vmem:[#allocation36_spill] sm:$0xff] }
 0x855   :  { %v6269_v50 = vpop.permute.xlu1 %6268  ;;  %v6897_v23 = vsel %vm3083_vm5, %v6833_v36, %v15232_v2  ;;  %v6960_v17 = vsel %vm3148_vm6, %v6896_v12, %v15233_v8  ;;  %v4551_v36 = vld [vmem:[#allocation2 + $0x219] sm:$0xff] }
 0x856   :  { %v6267_v1 = vpop.permute.xlu0 %6266  ;;  %v7087_v20 = vsel %vm3278_vm8, %v7023_v15, %v6269_v50  ;;  %v15234_v50 = vld [vmem:[#allocation203_spill] sm:$0xff] }
 0x857   :  { %6052 = vrot.lane.b32.xlu1 %v4483_v45, %s8496_s28  ;;  %v7086_v31 = vsel %vm3278_vm8, %v7022_v0, %v6267_v1  ;;  %v6961_v32 = vsel %vm3148_vm6, %v6897_v23, %v15234_v50  ;;  %v8443_v0 = vld [vmem:[#allocation2 + $0xc0] sm:$0xff]  ;;  %v8445_v50 = vld [vmem:[#allocation2 + $0xd8] sm:$0xff] }
 0x858   :  { %6050 = vrot.lane.b32.xlu0 %v4482_v4, %s8496_s28  ;;  %v4615_v8 = vld [vmem:[#allocation2 + $0x21a] sm:$0xff] }
 0x859   :  { %v6525_v46 = vpop.permute.xlu1 %6524 }
 0x85a   :  { %v6523_v27 = vpop.permute.xlu0 %6522  ;;  %v7151_v43 = vsel %vm3343_vm9, %v7087_v20, %v6525_v46  ;;  %v15235_v46 = vld [vmem:[#allocation113_spill] sm:$0xff]  ;;  %v15237_v20 = vld [vmem:[#allocation352_spill] sm:$0xff] }
 0x85b   :  { %v7150_v18 = vsel %vm3343_vm9, %v7086_v31, %v6523_v27  ;;  %6308 = vrot.lane.b32.xlu1 %v4547_v38, %s8497_s29  ;;  %v6706_v15 = vsel %vm24_vm0, %v8443_v0, %v15235_v46  ;;  %v8444_v31 = vld [vmem:[#allocation2 + $0xc8] sm:$0xff]  ;;  %v15236_v27 = vld [vmem:[#allocation343_spill] sm:$0xff]  ;;  %v15250_v46 = vld [vmem:[#allocation310_spill] sm:$0xff] }
 0x85c   :  { %6306 = vrot.lane.b32.xlu0 %v4546_v47, %s8497_s29  ;;  %8266 = vmatprep.mubr.msk.f32.mxu1 %vm3420_vm10, %v7150_v18  ;;  %v6707_v38 = vsel %vm24_vm0, %v8444_v31, %v15236_v27  ;;  %v6770_v18 = vsel %vm2953_vm3, %v6706_v15, %v15237_v20  ;;  %v4488_v31 = vld [vmem:[#allocation2 + $0x228] sm:$0xff]  ;;  %v15251_v27 = vld [vmem:[#allocation253_spill] sm:$0xff] }
 0x85d   :  { %v6017_v48 = vpop.permute.xlu1 %6016  ;;  %8267 = vmatmul.mubr.msk.f32.gmra.mrb[12].mxu1 %vm3420_vm10, %v7151_v43  ;;  %v15238_v43 = vld [vmem:[#allocation178_spill] sm:$0xff] }
 0x85e   :  { %v6015_v33 = vpop.permute.xlu0 %6014  ;;  %v7025_v11 = vsel %vm3213_vm7, %v6961_v32, %v6017_v48  ;;  %v6771_v48 = vsel %vm2953_vm3, %v6707_v38, %v15238_v43  ;;  %v15244_v32 = vld [vmem:[#allocation344_spill] sm:$0xff] }
 0x85f   :  { %6564 = vrot.lane.b32.xlu1 %v4611_v62, %s8498_s1  ;;  %v7024_v44 = vsel %vm3213_vm7, %v6960_v17, %v6015_v33  ;;  %v15239_v33 = vld [vmem:[#allocation187_spill] sm:$0xff]  ;;  %v6835_v16 = vsel %vm3018_vm4, %v6771_v48, %v15240_v34  ;;  %v4614_v17 = vld [vmem:[#allocation2 + $0x212] sm:$0xff] }
 0x860   :  { %6562 = vrot.lane.b32.xlu0 %v4610_v22, %s8498_s1  ;;  %v6834_v62 = vsel %vm3018_vm4, %v6770_v18, %v15239_v33  ;;  %v6899_v10 = vsel %vm3083_vm5, %v6835_v16, %v15242_v52  ;;  %v15252_v18 = vld [vmem:[#allocation90_spill] sm:$0xff] }
 0x861   :  { %v6273_v56 = vpop.permute.xlu1 %6272  ;;  %v6898_v7 = vsel %vm3083_vm5, %v6834_v62, %v15241_v59  ;;  %v6963_v5 = vsel %vm3148_vm6, %v6899_v10, %v15243_v28  ;;  %v4617_v52 = vld [vmem:[#allocation2 + $0x232] sm:$0xff]  ;;  %v4616_v10 = vld [vmem:[#allocation2 + $0x22a] sm:$0xff]  ;;  %v15253_v28 = vld [vmem:[#allocation171_spill] sm:$0xff] }
 0x862   :  { %v6271_v6 = vpop.permute.xlu0 %6270  ;;  %v7089_v49 = vsel %vm3278_vm8, %v7025_v11, %v6273_v56  ;;  %v6962_v56 = vsel %vm3148_vm6, %v6898_v7, %v12611_v19  ;;  %v4550_v19 = vld [vmem:[#allocation2 + $0x211] sm:$0xff] }
 0x863   :  { %6056 = vrot.lane.b32.xlu1 %v4485_v57, %s8496_s28  ;;  %v7088_v1 = vsel %vm3278_vm8, %v7024_v44, %v6271_v6  ;;  %v6708_v44 = vsel %vm24_vm0, %v8445_v50, %v15244_v32  ;;  %v15245_v11 = vld [vmem:[#allocation170_spill] sm:$0xff] }
 0x864   :  { %6054 = vrot.lane.b32.xlu0 %v4484_v25, %s8496_s28  ;;  %v15259_v50 = vld [vmem:[#allocation138_spill] sm:$0xff] }
 0x865   :  { %v6529_v14 = vpop.permute.xlu1 %6528 }
 0x866   :  { %v6527_v45 = vpop.permute.xlu0 %6526  ;;  %v7153_v4 = vsel %vm3343_vm9, %v7089_v49, %v6529_v14  ;;  %v8446_v14 = vld [vmem:[#allocation2 + $0xe0] sm:$0xff] }
 0x867   :  { %v7152_v24 = vsel %vm3343_vm9, %v7088_v1, %v6527_v45  ;;  %6312 = vrot.lane.b32.xlu1 %v4549_v39, %s8497_s29  ;;  %v6709_v1 = vsel %vm24_vm0, %v8446_v14, %v15245_v11  ;;  %v15246_v45 = vld [vmem:[#allocation179_spill] sm:$0xff] }
 0x868   :  { %6310 = vrot.lane.b32.xlu0 %v4548_v3, %s8497_s29  ;;  %8269 = vmatprep.mubr.msk.f32.mxu1 %vm3420_vm10, %v7152_v24  ;;  %v6772_v39 = vsel %vm2953_vm3, %v6708_v44, %v15246_v45  ;;  %v15247_v24 = vld [vmem:[#allocation11_spill] sm:$0xff] }
 0x869   :  { %v6021_v58 = vpop.permute.xlu1 %6020  ;;  %8270 = vmatmul.mubr.msk.f32.gmra.mrb[14].mxu1 %vm3420_vm10, %v7153_v4  ;;  %v6773_v3 = vsel %vm2953_vm3, %v6709_v1, %v15247_v24  ;;  %v15248_v4 = vld [vmem:[#allocation20_spill] sm:$0xff]  ;;  %v4490_v44 = vld [vmem:[#allocation2 + $0x240] sm:$0xff]  ;;  %v15261_v1 = vld [vmem:[#allocation318_spill] sm:$0xff] }
 0x86a   :  { %v6019_v42 = vpop.permute.xlu0 %6018  ;;  %v7027_v6 = vsel %vm3213_vm7, %v6963_v5, %v6021_v58  ;;  %v6836_v58 = vsel %vm3018_vm4, %v6772_v39, %v15248_v4  ;;  %v15260_v14 = vld [vmem:[#allocation83_spill] sm:$0xff]  ;;  %v15262_v39 = vld [vmem:[#allocation261_spill] sm:$0xff] }
 0x86b   :  { %6568 = vrot.lane.b32.xlu1 %v4613_v53, %s8498_s1  ;;  %v7026_v21 = vsel %vm3213_vm7, %v6962_v56, %v6019_v42  ;;  %v4489_v53 = vld [vmem:[#allocation2 + $0x230] sm:$0xff]  ;;  %v6900_v15 = vsel %vm3083_vm5, %v6836_v58, %v15250_v46  ;;  %v4554_v46 = vld [vmem:[#allocation2 + $0x241] sm:$0xff] }
 0x86c   :  { %6566 = vrot.lane.b32.xlu0 %v4612_v37, %s8498_s1  ;;  %v15249_v37 = vld [vmem:[#allocation244_spill] sm:$0xff]  ;;  %v6964_v20 = vsel %vm3148_vm6, %v6900_v15, %v12617_v30  ;;  %v8447_v56 = vld [vmem:[#allocation2 + $0xf0] sm:$0xff] }
 0x86d   :  { %v6277_v47 = vpop.permute.xlu1 %6276  ;;  %v6837_v0 = vsel %vm3018_vm4, %v6773_v3, %v15249_v37  ;;  %v4552_v30 = vld [vmem:[#allocation2 + $0x229] sm:$0xff]  ;;  %v6710_v5 = vsel %vm24_vm0, %v8447_v56, %v15253_v28 }
 0x86e   :  { %v6275_v22 = vpop.permute.xlu0 %6274  ;;  %v7091_v26 = vsel %vm3278_vm8, %v7027_v6, %v6277_v47  ;;  %v6901_v38 = vsel %vm3083_vm5, %v6837_v0, %v15251_v27  ;;  %v15269_v28 = vld [vmem:[#allocation369_spill] sm:$0xff] }
 0x86f   :  { %6060 = vrot.lane.b32.xlu1 %v4487_v54, %s8496_s28  ;;  %v7090_v57 = vsel %vm3278_vm8, %v7026_v21, %v6275_v22  ;;  %v6965_v47 = vsel %vm3148_vm6, %v6901_v38, %v15252_v18  ;;  %v4553_v54 = vld [vmem:[#allocation2 + $0x231] sm:$0xff]  ;;  %v8449_v18 = vld [vmem:[#allocation2 + $0x108] sm:$0xff] }
 0x870   :  { %6058 = vrot.lane.b32.xlu0 %v4486_v29, %s8496_s28  ;;  %v8448_v21 = vld [vmem:[#allocation2 + $0xf8] sm:$0xff]  ;;  %v4619_v38 = vld [vmem:[#allocation2 + $0x24a] sm:$0xff] }
 0x871   :  { %v6533_v61 = vpop.permute.xlu1 %6532 }
 0x872   :  { %v6531_v35 = vpop.permute.xlu0 %6530  ;;  %v7155_v25 = vsel %vm3343_vm9, %v7091_v26, %v6533_v61  ;;  %v15254_v61 = vld [vmem:[#allocation3_spill] sm:$0xff]  ;;  %v15256_v26 = vld [vmem:[#allocation236_spill] sm:$0xff] }
 0x873   :  { %v7154_v12 = vsel %vm3343_vm9, %v7090_v57, %v6531_v35  ;;  %6316 = vrot.lane.b32.xlu1 %v4551_v36, %s8497_s29  ;;  %v6711_v6 = vsel %vm24_vm0, %v8448_v21, %v15254_v61  ;;  %v15255_v57 = vld [vmem:[#allocation12_spill] sm:$0xff]  ;;  %v4492_v21 = vld [vmem:[#allocation2 + $0x258] sm:$0xff]  ;;  %v15270_v61 = vld [vmem:[#allocation311_spill] sm:$0xff] }
 0x874   :  { %6314 = vrot.lane.b32.xlu0 %v4550_v19, %s8497_s29  ;;  %8272 = vmatprep.mubr.msk.f32.mxu1 %vm3420_vm10, %v7154_v12  ;;  %v6774_v35 = vsel %vm2953_vm3, %v6710_v5, %v15255_v57  ;;  %v6775_v12 = vsel %vm2953_vm3, %v6711_v6, %v15256_v26  ;;  %v15257_v19 = vld [vmem:[#allocation245_spill] sm:$0xff] }
 0x875   :  { %v6025_v2 = vpop.permute.xlu1 %6024  ;;  %8273 = vmatmul.mubr.msk.f32.gmra.mrb[16].mxu1 %vm3420_vm10, %v7155_v25  ;;  %v6838_v25 = vsel %vm3018_vm4, %v6774_v35, %v15257_v19  ;;  %v15271_v35 = vld [vmem:[#allocation91_spill] sm:$0xff] }
 0x876   :  { %v6023_v23 = vpop.permute.xlu0 %6022  ;;  %v7029_v33 = vsel %vm3213_vm7, %v6965_v47, %v6025_v2  ;;  %v6902_v32 = vsel %vm3083_vm5, %v6838_v25, %v15259_v50  ;;  %v15263_v47 = vld [vmem:[#allocation4_spill] sm:$0xff] }
 0x877   :  { %6572 = vrot.lane.b32.xlu1 %v4615_v8, %s8498_s1  ;;  %v7028_v43 = vsel %vm3213_vm7, %v6964_v20, %v6023_v23  ;;  %v4491_v23 = vld [vmem:[#allocation2 + $0x248] sm:$0xff]  ;;  %v15258_v8 = vld [vmem:[#allocation74_spill] sm:$0xff]  ;;  %v6966_v45 = vsel %vm3148_vm6, %v6902_v32, %v15261_v1  ;;  %v8451_v1 = vld [vmem:[#allocation2 + $0x120] sm:$0xff] }
 0x878   :  { %6570 = vrot.lane.b32.xlu0 %v4614_v17, %s8498_s1  ;;  %v6839_v17 = vsel %vm3018_vm4, %v6775_v12, %v15258_v8  ;;  %v4618_v20 = vld [vmem:[#allocation2 + $0x242] sm:$0xff] }
 0x879   :  { %v6281_v49 = vpop.permute.xlu1 %6280  ;;  %v6903_v11 = vsel %vm3083_vm5, %v6839_v17, %v15260_v14  ;;  %v4621_v14 = vld [vmem:[#allocation2 + $0x262] sm:$0xff] }
 0x87a   :  { %v6279_v42 = vpop.permute.xlu0 %6278  ;;  %v7093_v34 = vsel %vm3278_vm8, %v7029_v33, %v6281_v49  ;;  %v6967_v49 = vsel %vm3148_vm6, %v6903_v11, %v15262_v39  ;;  %v15264_v33 = vld [vmem:[#allocation228_spill] sm:$0xff]  ;;  %v4620_v11 = vld [vmem:[#allocation2 + $0x25a] sm:$0xff] }
 0x87b   :  { %6064 = vrot.lane.b32.xlu1 %v4489_v53, %s8496_s28  ;;  %v7092_v62 = vsel %vm3278_vm8, %v7028_v43, %v6279_v42  ;;  %v4555_v53 = vld [vmem:[#allocation2 + $0x249] sm:$0xff]  ;;  %v6712_v43 = vsel %vm24_vm0, %v8449_v18, %v15263_v47 }
 0x87c   :  { %6062 = vrot.lane.b32.xlu0 %v4488_v31, %s8496_s28  ;;  %v4494_v47 = vld [vmem:[#allocation2 + $0x270] sm:$0xff] }
 0x87d   :  { %v6537_v48 = vpop.permute.xlu1 %6536 }
 0x87e   :  { %v6535_v22 = vpop.permute.xlu0 %6534  ;;  %v7157_v59 = vsel %vm3343_vm9, %v7093_v34, %v6537_v48  ;;  %v8450_v48 = vld [vmem:[#allocation2 + $0x110] sm:$0xff] }
 0x87f   :  { %v7156_v16 = vsel %vm3343_vm9, %v7092_v62, %v6535_v22  ;;  %6320 = vrot.lane.b32.xlu1 %v4553_v54, %s8497_s29  ;;  %v6713_v62 = vsel %vm24_vm0, %v8450_v48, %v15264_v33  ;;  %v15265_v22 = vld [vmem:[#allocation237_spill] sm:$0xff] }
 0x880   :  { %6318 = vrot.lane.b32.xlu0 %v4552_v30, %s8497_s29  ;;  %8275 = vmatprep.mubr.msk.f32.mxu1 %vm3420_vm10, %v7156_v16  ;;  %v6776_v54 = vsel %vm2953_vm3, %v6712_v43, %v15265_v22  ;;  %v15266_v16 = vld [vmem:[#allocation66_spill] sm:$0xff]  ;;  %v15279_v43 = vld [vmem:[#allocation139_spill] sm:$0xff] }
 0x881   :  { %v6029_v7 = vpop.permute.xlu1 %6028  ;;  %8276 = vmatmul.mubr.msk.f32.gmra.mrb[18].mxu1 %vm3420_vm10, %v7157_v59  ;;  %v6777_v30 = vsel %vm2953_vm3, %v6713_v62, %v15266_v16  ;;  %v15267_v59 = vld [vmem:[#allocation75_spill] sm:$0xff]  ;;  %v15280_v62 = vld [vmem:[#allocation146_spill] sm:$0xff] }
 0x882   :  { %v6027_v29 = vpop.permute.xlu0 %6026  ;;  %v7031_v4 = vsel %vm3213_vm7, %v6967_v49, %v6029_v7  ;;  %v6840_v7 = vsel %vm3018_vm4, %v6776_v54, %v15267_v59  ;;  %v8452_v49 = vld [vmem:[#allocation2 + $0x128] sm:$0xff] }
 0x883   :  { %6576 = vrot.lane.b32.xlu1 %v4617_v52, %s8498_s1  ;;  %v7030_v24 = vsel %vm3213_vm7, %v6966_v45, %v6027_v29  ;;  %v4493_v52 = vld [vmem:[#allocation2 + $0x260] sm:$0xff]  ;;  %v6904_v5 = vsel %vm3083_vm5, %v6840_v7, %v15269_v28  ;;  %v15272_v45 = vld [vmem:[#allocation229_spill] sm:$0xff] }
 0x884   :  { %6574 = vrot.lane.b32.xlu0 %v4616_v10, %s8498_s1  ;;  %v15268_v10 = vld [vmem:[#allocation302_spill] sm:$0xff]  ;;  %v6968_v57 = vsel %vm3148_vm6, %v6904_v5, %v12631_v40  ;;  %v6714_v39 = vsel %vm24_vm0, %v8451_v1, %v15272_v45  ;;  %v4496_v1 = vld [vmem:[#allocation2 + $0x288] sm:$0xff] }
 0x885   :  { %v6285_v36 = vpop.permute.xlu1 %6284  ;;  %v6841_v56 = vsel %vm3018_vm4, %v6777_v30, %v15268_v10  ;;  %v4556_v40 = vld [vmem:[#allocation2 + $0x259] sm:$0xff] }
 0x886   :  { %v6283_v2 = vpop.permute.xlu0 %6282  ;;  %v7095_v37 = vsel %vm3278_vm8, %v7031_v4, %v6285_v36  ;;  %v6905_v6 = vsel %vm3083_vm5, %v6841_v56, %v15270_v61  ;;  %v15274_v4 = vld [vmem:[#allocation67_spill] sm:$0xff]  ;;  %v8453_v61 = vld [vmem:[#allocation2 + $0x138] sm:$0xff] }
 0x887   :  { %6068 = vrot.lane.b32.xlu1 %v4491_v23, %s8496_s28  ;;  %v7094_v58 = vsel %vm3278_vm8, %v7030_v24, %v6283_v2  ;;  %v6969_v36 = vsel %vm3148_vm6, %v6905_v6, %v15271_v35  ;;  %v4557_v23 = vld [vmem:[#allocation2 + $0x261] sm:$0xff]  ;;  %v15273_v24 = vld [vmem:[#allocation58_spill] sm:$0xff] }
 0x888   :  { %6066 = vrot.lane.b32.xlu0 %v4490_v44, %s8496_s28  ;;  %v4559_v7 = vld [vmem:[#allocation2 + $0x279] sm:$0xff] }
 0x889   :  { %v6541_v3 = vpop.permute.xlu1 %6540  ;;  %v4623_v5 = vld [vmem:[#allocation2 + $0x27a] sm:$0xff] }
 0x88a   :  { %v6539_v42 = vpop.permute.xlu0 %6538  ;;  %v7159_v15 = vsel %vm3343_vm9, %v7095_v37, %v6541_v3  ;;  %v6715_v3 = vsel %vm24_vm0, %v8452_v49, %v15273_v24  ;;  %v15281_v6 = vld [vmem:[#allocation59_spill] sm:$0xff]  ;;  %v15288_v45 = vld [vmem:[#allocation370_spill] sm:$0xff]  ;;  %v15289_v49 = vld [vmem:[#allocation377_spill] sm:$0xff] }
 0x88b   :  { %v7158_v0 = vsel %vm3343_vm9, %v7094_v58, %v6539_v42  ;;  %6324 = vrot.lane.b32.xlu1 %v4555_v53, %s8497_s29  ;;  %v6778_v58 = vsel %vm2953_vm3, %v6714_v39, %v15274_v4  ;;  %v15275_v53 = vld [vmem:[#allocation294_spill] sm:$0xff]  ;;  %v8454_v35 = vld [vmem:[#allocation2 + $0x140] sm:$0xff] }
 0x88c   :  { %6322 = vrot.lane.b32.xlu0 %v4554_v46, %s8497_s29  ;;  %8278 = vmatprep.mubr.msk.f32.mxu1 %vm3420_vm10, %v7158_v0  ;;  %v6779_v37 = vsel %vm2953_vm3, %v6715_v3, %v15275_v53  ;;  %v15276_v0 = vld [vmem:[#allocation303_spill] sm:$0xff] }
 0x88d   :  { %v6033_v31 = vpop.permute.xlu1 %6032  ;;  %8279 = vmatmul.mubr.msk.f32.gmra.mrb[20].mxu1 %vm3420_vm10, %v7159_v15  ;;  %v6842_v46 = vsel %vm3018_vm4, %v6778_v58, %v15276_v0  ;;  %v15290_v3 = vld [vmem:[#allocation319_spill] sm:$0xff] }
 0x88e   :  { %v6031_v27 = vpop.permute.xlu0 %6030  ;;  %v7033_v19 = vsel %vm3213_vm7, %v6969_v36, %v6033_v31  ;;  %v4495_v31 = vld [vmem:[#allocation2 + $0x278] sm:$0xff] }
 0x88f   :  { %6580 = vrot.lane.b32.xlu1 %v4619_v38, %s8498_s1  ;;  %v7032_v26 = vsel %vm3213_vm7, %v6968_v57, %v6031_v27  ;;  %v15277_v27 = vld [vmem:[#allocation130_spill] sm:$0xff]  ;;  %v6716_v57 = vsel %vm24_vm0, %v8453_v61, %v15281_v6  ;;  %v4498_v6 = vld [vmem:[#allocation2 + $0x2a0] sm:$0xff] }
 0x890   :  { %6578 = vrot.lane.b32.xlu0 %v4618_v20, %s8498_s1  ;;  %v6843_v38 = vsel %vm3018_vm4, %v6779_v37, %v15277_v27  ;;  %v15278_v20 = vld [vmem:[#allocation196_spill] sm:$0xff]  ;;  %v15282_v36 = vld [vmem:[#allocation286_spill] sm:$0xff] }
 0x891   :  { %v6289_v34 = vpop.permute.xlu1 %6288  ;;  %v6906_v18 = vsel %vm3083_vm5, %v6842_v46, %v15278_v20  ;;  %v6907_v48 = vsel %vm3083_vm5, %v6843_v38, %v15279_v43  ;;  %v4561_v46 = vld [vmem:[#allocation2 + $0x291] sm:$0xff]  ;;  %v4560_v27 = vld [vmem:[#allocation2 + $0x289] sm:$0xff] }
 0x892   :  { %v6287_v29 = vpop.permute.xlu0 %6286  ;;  %v7097_v8 = vsel %vm3278_vm8, %v7033_v19, %v6289_v34  ;;  %v6970_v33 = vsel %vm3148_vm6, %v6906_v18, %v12637_v9  ;;  %v6971_v22 = vsel %vm3148_vm6, %v6907_v48, %v15280_v62  ;;  %v4558_v9 = vld [vmem:[#allocation2 + $0x271] sm:$0xff] }
 0x893   :  { %6072 = vrot.lane.b32.xlu1 %v4493_v52, %s8496_s28  ;;  %v7096_v25 = vsel %vm3278_vm8, %v7032_v26, %v6287_v29  ;;  %v6717_v26 = vsel %vm24_vm0, %v8454_v35, %v15282_v36  ;;  %v4624_v43 = vld [vmem:[#allocation2 + $0x28a] sm:$0xff] }
 0x894   :  { %6070 = vrot.lane.b32.xlu0 %v4492_v21, %s8496_s28  ;;  %v4622_v21 = vld [vmem:[#allocation2 + $0x272] sm:$0xff] }
 0x895   :  { %v6545_v12 = vpop.permute.xlu1 %6544  ;;  %v8455_v48 = vld [vmem:[#allocation2 + $0x150] sm:$0xff] }
 0x896   :  { %v6543_v2 = vpop.permute.xlu0 %6542  ;;  %v7161_v50 = vsel %vm3343_vm9, %v7097_v8, %v6545_v12  ;;  %v15283_v12 = vld [vmem:[#allocation295_spill] sm:$0xff] }
 0x897   :  { %v7160_v17 = vsel %vm3343_vm9, %v7096_v25, %v6543_v2  ;;  %6328 = vrot.lane.b32.xlu1 %v4557_v23, %s8497_s29  ;;  %v6780_v19 = vsel %vm2953_vm3, %v6716_v57, %v15283_v12  ;;  %v15284_v2 = vld [vmem:[#allocation122_spill] sm:$0xff]  ;;  %v15285_v8 = vld [vmem:[#allocation131_spill] sm:$0xff]  ;;  %v15298_v57 = vld [vmem:[#allocation197_spill] sm:$0xff] }
 0x898   :  { %6326 = vrot.lane.b32.xlu0 %v4556_v40, %s8497_s29  ;;  %8281 = vmatprep.mubr.msk.f32.mxu1 %vm3420_vm10, %v7160_v17  ;;  %v6781_v23 = vsel %vm2953_vm3, %v6717_v26, %v15284_v2  ;;  %v6844_v17 = vsel %vm3018_vm4, %v6780_v19, %v15285_v8  ;;  %v15299_v26 = vld [vmem:[#allocation147_spill] sm:$0xff] }
 0x899   :  { %v6037_v32 = vpop.permute.xlu1 %6036  ;;  %8282 = vmatmul.mubr.msk.f32.gmra.mrb[22].mxu1 %vm3420_vm10, %v7161_v50  ;;  %v4497_v50 = vld [vmem:[#allocation2 + $0x290] sm:$0xff] }
 0x89a   :  { %v6035_v44 = vpop.permute.xlu0 %6034  ;;  %v7035_v16 = vsel %vm3213_vm7, %v6971_v22, %v6037_v32  ;;  %v15286_v32 = vld [vmem:[#allocation361_spill] sm:$0xff]  ;;  %v8456_v22 = vld [vmem:[#allocation2 + $0x158] sm:$0xff] }
 0x89b   :  { %6584 = vrot.lane.b32.xlu1 %v4621_v14, %s8498_s1  ;;  %v7034_v54 = vsel %vm3213_vm7, %v6970_v33, %v6035_v44  ;;  %v6845_v44 = vsel %vm3018_vm4, %v6781_v23, %v15286_v32  ;;  %v15287_v14 = vld [vmem:[#allocation29_spill] sm:$0xff]  ;;  %v15291_v33 = vld [vmem:[#allocation287_spill] sm:$0xff] }
 0x89c   :  { %6582 = vrot.lane.b32.xlu0 %v4620_v11, %s8498_s1  ;;  %v6908_v11 = vsel %vm3083_vm5, %v6844_v17, %v15287_v14  ;;  %v6909_v39 = vsel %vm3083_vm5, %v6845_v44, %v15288_v45  ;;  %v6718_v62 = vsel %vm24_vm0, %v8455_v48, %v15291_v33  ;;  %v4563_v17 = vld [vmem:[#allocation2 + $0x2a9] sm:$0xff]  ;;  %v15307_v48 = vld [vmem:[#allocation30_spill] sm:$0xff] }
 0x89d   :  { %v6293_v42 = vpop.permute.xlu1 %6292  ;;  %v6972_v24 = vsel %vm3148_vm6, %v6908_v11, %v15289_v49  ;;  %v6973_v4 = vsel %vm3148_vm6, %v6909_v39, %v15290_v3  ;;  %v4627_v11 = vld [vmem:[#allocation2 + $0x2aa] sm:$0xff]  ;;  %v15300_v39 = vld [vmem:[#allocation115_spill] sm:$0xff] }
 0x89e   :  { %v6291_v15 = vpop.permute.xlu0 %6290  ;;  %v7099_v29 = vsel %vm3278_vm8, %v7035_v16, %v6293_v42  ;;  %v15293_v16 = vld [vmem:[#allocation123_spill] sm:$0xff]  ;;  %v8457_v45 = vld [vmem:[#allocation2 + $0x168] sm:$0xff]  ;;  %v15301_v3 = vld [vmem:[#allocation345_spill] sm:$0xff] }
 0x89f   :  { %6076 = vrot.lane.b32.xlu1 %v4495_v31, %s8496_s28  ;;  %v7098_v30 = vsel %vm3278_vm8, %v7034_v54, %v6291_v15  ;;  %v15292_v54 = vld [vmem:[#allocation114_spill] sm:$0xff]  ;;  %v6720_v49 = vsel %vm24_vm0, %v8457_v45, %v15300_v39  ;;  %v15317_v39 = vld [vmem:[#allocation37_spill] sm:$0xff] }
 0x8a0   :  { %6074 = vrot.lane.b32.xlu0 %v4494_v47, %s8496_s28  ;;  %v4625_v47 = vld [vmem:[#allocation2 + $0x292] sm:$0xff] }
 0x8a1   :  { %v6549_v34 = vpop.permute.xlu1 %6548 }
 0x8a2   :  { %v6547_v59 = vpop.permute.xlu0 %6546  ;;  %v7163_v10 = vsel %vm3343_vm9, %v7099_v29, %v6549_v34  ;;  %v6719_v34 = vsel %vm24_vm0, %v8456_v22, %v15292_v54  ;;  %v15308_v22 = vld [vmem:[#allocation204_spill] sm:$0xff] }
 0x8a3   :  { %v7162_v52 = vsel %vm3343_vm9, %v7098_v30, %v6547_v59  ;;  %6332 = vrot.lane.b32.xlu1 %v4559_v7, %s8497_s29  ;;  %v6782_v30 = vsel %vm2953_vm3, %v6718_v62, %v15293_v16  ;;  %v15294_v7 = vld [vmem:[#allocation353_spill] sm:$0xff] }
 0x8a4   :  { %6330 = vrot.lane.b32.xlu0 %v4558_v9, %s8497_s29  ;;  %8284 = vmatprep.mubr.msk.f32.mxu1 %vm3420_vm10, %v7162_v52  ;;  %v6783_v29 = vsel %vm2953_vm3, %v6719_v34, %v15294_v7  ;;  %v15295_v52 = vld [vmem:[#allocation362_spill] sm:$0xff] }
 0x8a5   :  { %v6041_v56 = vpop.permute.xlu1 %6040  ;;  %8285 = vmatmul.mubr.msk.f32.gmra.mrb[24].mxu1 %vm3420_vm10, %v7163_v10  ;;  %v6846_v9 = vsel %vm3018_vm4, %v6782_v30, %v15295_v52 }
 0x8a6   :  { %v6039_v28 = vpop.permute.xlu0 %6038  ;;  %v7037_v53 = vsel %vm3213_vm7, %v6973_v4, %v6041_v56  ;;  %v4499_v56 = vld [vmem:[#allocation2 + $0x2a8] sm:$0xff] }
 0x8a7   :  { %6588 = vrot.lane.b32.xlu1 %v4623_v5, %s8498_s1  ;;  %v7036_v58 = vsel %vm3213_vm7, %v6972_v24, %v6039_v28  ;;  %v15296_v28 = vld [vmem:[#allocation188_spill] sm:$0xff]  ;;  %v8458_v24 = vld [vmem:[#allocation2 + $0x170] sm:$0xff] }
 0x8a8   :  { %6586 = vrot.lane.b32.xlu0 %v4622_v21, %s8498_s1  ;;  %v6847_v5 = vsel %vm3018_vm4, %v6783_v29, %v15296_v28  ;;  %v15297_v21 = vld [vmem:[#allocation254_spill] sm:$0xff]  ;;  %v6721_v4 = vsel %vm24_vm0, %v8458_v24, %v15301_v3  ;;  %v4565_v29 = vld [vmem:[#allocation2 + $0x2c1] sm:$0xff] }
 0x8a9   :  { %v6297_v25 = vpop.permute.xlu1 %6296  ;;  %v6910_v61 = vsel %vm3083_vm5, %v6846_v9, %v15297_v21  ;;  %v6911_v35 = vsel %vm3083_vm5, %v6847_v5, %v15298_v57  ;;  %v4099_v5 = vld [vmem:[#allocation2 + $0x1b8] sm:$0xff] }
 0x8aa   :  { %v6295_v40 = vpop.permute.xlu0 %6294  ;;  %v7101_v15 = vsel %vm3278_vm8, %v7037_v53, %v6297_v25  ;;  %v6974_v36 = vsel %vm3148_vm6, %v6910_v61, %v12651_v13  ;;  %v6975_v12 = vsel %vm3148_vm6, %v6911_v35, %v15299_v26  ;;  %v4562_v13 = vld [vmem:[#allocation2 + $0x2a1] sm:$0xff]  ;;  %v15309_v57 = vld [vmem:[#allocation346_spill] sm:$0xff] }
 0x8ab   :  { %6080 = vrot.lane.b32.xlu1 %v4497_v50, %s8496_s28  ;;  %v7100_v37 = vsel %vm3278_vm8, %v7036_v58, %v6295_v40  ;;  %v15302_v58 = vld [vmem:[#allocation354_spill] sm:$0xff]  ;;  %v4629_v61 = vld [vmem:[#allocation2 + $0x2c2] sm:$0xff] }
 0x8ac   :  { %6078 = vrot.lane.b32.xlu0 %v4496_v1, %s8496_s28  ;;  %v4626_v1 = vld [vmem:[#allocation2 + $0x2a2] sm:$0xff]  ;;  %v15318_v24 = vld [vmem:[#allocation378_spill] sm:$0xff] }
 0x8ad   :  { %v6553_v42 = vpop.permute.xlu1 %6552 }
 0x8ae   :  { %v6551_v0 = vpop.permute.xlu0 %6550  ;;  %v7165_v38 = vsel %vm3343_vm9, %v7101_v15, %v6553_v42  ;;  %v6784_v42 = vsel %vm2953_vm3, %v6720_v49, %v15302_v58 }
 0x8af   :  { %v7164_v31 = vsel %vm3343_vm9, %v7100_v37, %v6551_v0  ;;  %6336 = vrot.lane.b32.xlu1 %v4561_v46, %s8497_s29  ;;  %v15303_v37 = vld [vmem:[#allocation180_spill] sm:$0xff]  ;;  %v15304_v46 = vld [vmem:[#allocation189_spill] sm:$0xff] }
 0x8b0   :  { %6334 = vrot.lane.b32.xlu0 %v4560_v27, %s8497_s29  ;;  %8287 = vmatprep.mubr.msk.f32.mxu1 %vm3420_vm10, %v7164_v31  ;;  %v6785_v0 = vsel %vm2953_vm3, %v6721_v4, %v15303_v37  ;;  %v6848_v15 = vsel %vm3018_vm4, %v6784_v42, %v15304_v46  ;;  %v4501_v27 = vld [vmem:[#allocation2 + $0x2c0] sm:$0xff] }
 0x8b1   :  { %v6045_v20 = vpop.permute.xlu1 %6044  ;;  %8288 = vmatmul.mubr.msk.f32.gmra.mrb[26].mxu1 %vm3420_vm10, %v7165_v38  ;;  %v15305_v38 = vld [vmem:[#allocation21_spill] sm:$0xff] }
 0x8b2   :  { %v6043_v18 = vpop.permute.xlu0 %6042  ;;  %v7039_v2 = vsel %vm3213_vm7, %v6975_v12, %v6045_v20  ;;  %v6849_v20 = vsel %vm3018_vm4, %v6785_v0, %v15305_v38  ;;  %v15311_v12 = vld [vmem:[#allocation181_spill] sm:$0xff]  ;;  %v4567_v0 = vld [vmem:[#allocation2 + $0x2d9] sm:$0xff] }
 0x8b3   :  { %6592 = vrot.lane.b32.xlu1 %v4625_v47, %s8498_s1  ;;  %v7038_v19 = vsel %vm3213_vm7, %v6974_v36, %v6043_v18  ;;  %v15306_v18 = vld [vmem:[#allocation84_spill] sm:$0xff]  ;;  %v6913_v33 = vsel %vm3083_vm5, %v6849_v20, %v15307_v48  ;;  %v15319_v48 = vld [vmem:[#allocation173_spill] sm:$0xff] }
 0x8b4   :  { %6590 = vrot.lane.b32.xlu0 %v4624_v43, %s8498_s1  ;;  %v6912_v47 = vsel %vm3083_vm5, %v6848_v15, %v15306_v18  ;;  %v4500_v43 = vld [vmem:[#allocation2 + $0x2b8] sm:$0xff]  ;;  %v6977_v54 = vsel %vm3148_vm6, %v6913_v33, %v15308_v22  ;;  %v15310_v36 = vld [vmem:[#allocation172_spill] sm:$0xff]  ;;  %v15320_v22 = vld [vmem:[#allocation5_spill] sm:$0xff] }
 0x8b5   :  { %v6301_v59 = vpop.permute.xlu1 %6300  ;;  %v6976_v62 = vsel %vm3148_vm6, %v6912_v47, %v12657_v63  ;;  %v4564_v63 = vld [vmem:[#allocation2 + $0x2b9] sm:$0xff]  ;;  %v6723_v26 = vsel %vm24_vm0, %v4099_v5, %v15310_v36 }
 0x8b6   :  { %v6299_v10 = vpop.permute.xlu0 %6298  ;;  %v7103_v40 = vsel %vm3278_vm8, %v7039_v2, %v6301_v59  ;;  %v15312_v2 = vld [vmem:[#allocation13_spill] sm:$0xff]  ;;  %v4631_v18 = vld [vmem:[#allocation2 + $0x2da] sm:$0xff] }
 0x8b7   :  { %6084 = vrot.lane.b32.xlu1 %v4499_v56, %s8496_s28  ;;  %v7102_v23 = vsel %vm3278_vm8, %v7038_v19, %v6299_v10  ;;  %v4098_v56 = vld [vmem:[#allocation2 + $0x1b0] sm:$0xff] }
 0x8b8   :  { %6082 = vrot.lane.b32.xlu0 %v4498_v6, %s8496_s28  ;;  %v4628_v6 = vld [vmem:[#allocation2 + $0x2ba] sm:$0xff]  ;;  %v6722_v35 = vsel %vm24_vm0, %v4098_v56, %v15309_v57  ;;  %v4630_v47 = vld [vmem:[#allocation2 + $0x2d2] sm:$0xff] }
 0x8b9   :  { %v6557_v25 = vpop.permute.xlu1 %6556  ;;  %v6786_v19 = vsel %vm2953_vm3, %v6722_v35, %v15311_v12  ;;  %v15327_v35 = vld [vmem:[#allocation205_spill] sm:$0xff] }
 0x8ba   :  { %v6555_v8 = vpop.permute.xlu0 %6554  ;;  %v7167_v32 = vsel %vm3343_vm9, %v7103_v40, %v6557_v25 }
 0x8bb   :  { %v7166_v50 = vsel %vm3343_vm9, %v7102_v23, %v6555_v8  ;;  %6340 = vrot.lane.b32.xlu1 %v4563_v17, %s8497_s29  ;;  %v6787_v23 = vsel %vm2953_vm3, %v6723_v26, %v15312_v2  ;;  %v15313_v8 = vld [vmem:[#allocation22_spill] sm:$0xff] }
 0x8bc   :  { %6338 = vrot.lane.b32.xlu0 %v4562_v13, %s8497_s29  ;;  %8290 = vmatprep.mubr.msk.f32.mxu1 %vm3420_vm10, %v7166_v50  ;;  %v6850_v17 = vsel %vm3018_vm4, %v6786_v19, %v15313_v8  ;;  %v4503_v50 = vld [vmem:[#allocation2 + $0x2d8] sm:$0xff] }
 0x8bd   :  { %v6049_v44 = vpop.permute.xlu1 %6048  ;;  %8291 = vmatmul.mubr.msk.f32.gmra.mrb[28].mxu1 %vm3420_vm10, %v7167_v32  ;;  %v15314_v13 = vld [vmem:[#allocation246_spill] sm:$0xff] }
 0x8be   :  { %v6047_v14 = vpop.permute.xlu0 %6046  ;;  %v7041_v30 = vsel %vm3213_vm7, %v6977_v54, %v6049_v44  ;;  %v6851_v32 = vsel %vm3018_vm4, %v6787_v23, %v15314_v13  ;;  %v15315_v44 = vld [vmem:[#allocation312_spill] sm:$0xff]  ;;  %v4569_v23 = vld [vmem:[#allocation2 + $0x2f1] sm:$0xff] }
 0x8bf   :  { %6596 = vrot.lane.b32.xlu1 %v4627_v11, %s8498_s1  ;;  %v7040_v34 = vsel %vm3213_vm7, %v6976_v62, %v6047_v14  ;;  %v6914_v14 = vsel %vm3083_vm5, %v6850_v17, %v15315_v44  ;;  %v4502_v11 = vld [vmem:[#allocation2 + $0x2d0] sm:$0xff]  ;;  %v8461_v44 = vld [vmem:[#allocation2 + $0x1e0] sm:$0xff] }
 0x8c0   :  { %6594 = vrot.lane.b32.xlu0 %v4626_v1, %s8498_s1  ;;  %v15316_v1 = vld [vmem:[#allocation255_spill] sm:$0xff]  ;;  %v6978_v49 = vsel %vm3148_vm6, %v6914_v14, %v15317_v39  ;;  %v8460_v62 = vld [vmem:[#allocation2 + $0x1d0] sm:$0xff]  ;;  %v15328_v14 = vld [vmem:[#allocation6_spill] sm:$0xff] }
 0x8c1   :  { %v6305_v53 = vpop.permute.xlu1 %6304  ;;  %v6915_v45 = vsel %vm3083_vm5, %v6851_v32, %v15316_v1  ;;  %v6725_v54 = vsel %vm24_vm0, %v8460_v62, %v15320_v22  ;;  %v4442_v32 = vld [vmem:[#allocation2 + $0x2ea] sm:$0xff] }
 0x8c2   :  { %v6303_v31 = vpop.permute.xlu0 %6302  ;;  %v7105_v52 = vsel %vm3278_vm8, %v7041_v30, %v6305_v53  ;;  %v6979_v3 = vsel %vm3148_vm6, %v6915_v45, %v15318_v24  ;;  %v8462_v1 = vld [vmem:[#allocation2 + $0x1e8] sm:$0xff]  ;;  %v15329_v45 = vld [vmem:[#allocation230_spill] sm:$0xff] }
 0x8c3   :  { %6088 = vrot.lane.b32.xlu1 %v4501_v27, %s8496_s28  ;;  %v7104_v59 = vsel %vm3278_vm8, %v7040_v34, %v6303_v31  ;;  %v4566_v31 = vld [vmem:[#allocation2 + $0x2d1] sm:$0xff]  ;;  %v6727_v39 = vsel %vm24_vm0, %v8462_v1, %v15329_v45 }
 0x8c4   :  { %6086 = vrot.lane.b32.xlu0 %v4500_v43, %s8496_s28  ;;  %v8459_v43 = vld [vmem:[#allocation2 + $0x1c8] sm:$0xff]  ;;  %v15321_v34 = vld [vmem:[#allocation14_spill] sm:$0xff] }
 0x8c5   :  { %v6561_v16 = vpop.permute.xlu1 %6560  ;;  %v6724_v33 = vsel %vm24_vm0, %v8459_v43, %v15319_v48  ;;  %v15336_v48 = vld [vmem:[#allocation262_spill] sm:$0xff] }
 0x8c6   :  { %v6559_v7 = vpop.permute.xlu0 %6558  ;;  %v7169_v10 = vsel %vm3343_vm9, %v7105_v52, %v6561_v16  ;;  %v6788_v16 = vsel %vm2953_vm3, %v6724_v33, %v15321_v34 }
 0x8c7   :  { %v7168_v9 = vsel %vm3343_vm9, %v7104_v59, %v6559_v7  ;;  %6344 = vrot.lane.b32.xlu1 %v4565_v29, %s8497_s29  ;;  %v15322_v59 = vld [vmem:[#allocation238_spill] sm:$0xff]  ;;  %v15323_v29 = vld [vmem:[#allocation247_spill] sm:$0xff] }
 0x8c8   :  { %6342 = vrot.lane.b32.xlu0 %v4564_v63, %s8497_s29  ;;  %8293 = vmatprep.mubr.msk.f32.mxu1 %vm3420_vm10, %v7168_v9  ;;  %v6789_v7 = vsel %vm2953_vm3, %v6725_v54, %v15322_v59  ;;  %v6852_v52 = vsel %vm3018_vm4, %v6788_v16, %v15323_v29  ;;  %v4505_v63 = vld [vmem:[#allocation2 + $0x2f0] sm:$0xff] }
 0x8c9   :  { %v6053_v28 = vpop.permute.xlu1 %6052  ;;  %8294 = vmatmul.mubr.msk.f32.gmra.mrb[30].mxu1 %vm3420_vm10, %v7169_v10  ;;  %v15324_v10 = vld [vmem:[#allocation76_spill] sm:$0xff] }
 0x8ca   :  { %v6051_v21 = vpop.permute.xlu0 %6050  ;;  %v7043_v42 = vsel %vm3213_vm7, %v6979_v3, %v6053_v28  ;;  %v6853_v56 = vsel %vm3018_vm4, %v6789_v7, %v15324_v10  ;;  %v15325_v28 = vld [vmem:[#allocation371_spill] sm:$0xff] }
 0x8cb   :  { %6600 = vrot.lane.b32.xlu1 %v4629_v61, %s8498_s1  ;;  %v7042_v4 = vsel %vm3213_vm7, %v6978_v49, %v6051_v21  ;;  %v6916_v5 = vsel %vm3083_vm5, %v6852_v52, %v15325_v28  ;;  %v4504_v21 = vld [vmem:[#allocation2 + $0x2e8] sm:$0xff]  ;;  %v15326_v61 = vld [vmem:[#allocation313_spill] sm:$0xff]  ;;  %v15330_v49 = vld [vmem:[#allocation239_spill] sm:$0xff] }
 0x8cc   :  { %6598 = vrot.lane.b32.xlu0 %v4628_v6, %s8498_s1  ;;  %v6917_v6 = vsel %vm3083_vm5, %v6853_v56, %v15326_v61  ;;  %v6980_v57 = vsel %vm3148_vm6, %v6916_v5, %v12671_v60  ;;  %v4568_v60 = vld [vmem:[#allocation2 + $0x2e9] sm:$0xff]  ;;  %v4570_v5 = vld [vmem:[#allocation2 + $0x301] sm:$0xff] }
 0x8cd   :  { %v6309_v25 = vpop.permute.xlu1 %6308  ;;  %v6981_v36 = vsel %vm3148_vm6, %v6917_v6, %v15327_v35  ;;  %v4571_v28 = vld [vmem:[#allocation2 + $0x309] sm:$0xff]  ;;  %v15337_v61 = vld [vmem:[#allocation231_spill] sm:$0xff] }
 0x8ce   :  { %v6307_v40 = vpop.permute.xlu0 %6306  ;;  %v7107_v46 = vsel %vm3278_vm8, %v7043_v42, %v6309_v25  ;;  %v15332_v42 = vld [vmem:[#allocation77_spill] sm:$0xff]  ;;  %v15338_v35 = vld [vmem:[#allocation60_spill] sm:$0xff] }
 0x8cf   :  { %6092 = vrot.lane.b32.xlu1 %v4503_v50, %s8496_s28  ;;  %v7106_v53 = vsel %vm3278_vm8, %v7042_v4, %v6307_v40  ;;  %v15331_v4 = vld [vmem:[#allocation68_spill] sm:$0xff] }
 0x8d0   :  { %6090 = vrot.lane.b32.xlu0 %v4502_v11, %s8496_s28  ;;  %v6726_v11 = vsel %vm24_vm0, %v8461_v44, %v15328_v14  ;;  %v15344_v44 = vld [vmem:[#allocation32_spill] sm:$0xff] }
 0x8d1   :  { %v6565_v58 = vpop.permute.xlu1 %6564  ;;  %v6790_v24 = vsel %vm2953_vm3, %v6726_v11, %v15330_v49  ;;  %v15345_v11 = vld [vmem:[#allocation92_spill] sm:$0xff] }
 0x8d2   :  { %v6563_v37 = vpop.permute.xlu0 %6562  ;;  %v7171_v27 = vsel %vm3343_vm9, %v7107_v46, %v6565_v58  ;;  %v6791_v58 = vsel %vm2953_vm3, %v6727_v39, %v15331_v4  ;;  %v13380_v46 = vld [vmem:[%s14117_s4] ss:$0 sm:$0xff]  ;;  %v15346_v39 = vld [vmem:[#allocation38_spill] sm:$0xff] }
 0x8d3   :  { %v7170_v15 = vsel %vm3343_vm9, %v7106_v53, %v6563_v37  ;;  %6348 = vrot.lane.b32.xlu1 %v4567_v0, %s8497_s29  ;;  %v6854_v53 = vsel %vm3018_vm4, %v6790_v24, %v15332_v42  ;;  %v4443_v0 = vld [vmem:[#allocation2 + $0x2f2] sm:$0xff] }
 0x8d4   :  { %6346 = vrot.lane.b32.xlu0 %v4566_v31, %s8497_s29  ;;  %8296 = vmatprep.mubr.msk.f32.mxu1 %vm3420_vm10, %v7170_v15  ;;  %v15333_v15 = vld [vmem:[#allocation304_spill] sm:$0xff] }
 0x8d5   :  { %v6057_v38 = vpop.permute.xlu1 %6056  ;;  %8297 = vmatmul.mubr.msk.f32.gmra.mrb[32].mxu1 %vm3420_vm10, %v7171_v27  ;;  %v6855_v31 = vsel %vm3018_vm4, %v6791_v58, %v15333_v15  ;;  %v15334_v27 = vld [vmem:[#allocation31_spill] sm:$0xff]  ;;  %v4445_v15 = vld [vmem:[#allocation2 + $0x30a] sm:$0xff] }
 0x8d6   :  { %v6055_v20 = vpop.permute.xlu0 %6054  ;;  %v7045_v19 = vsel %vm3213_vm7, %v6981_v36, %v6057_v38  ;;  %v6918_v38 = vsel %vm3083_vm5, %v6854_v53, %v15334_v27 }
 0x8d7   :  { %6604 = vrot.lane.b32.xlu1 %v4631_v18, %s8498_s1  ;;  %v7044_v26 = vsel %vm3213_vm7, %v6980_v57, %v6055_v20  ;;  %v15335_v20 = vld [vmem:[#allocation372_spill] sm:$0xff]  ;;  %v8464_v57 = vld [vmem:[#allocation2 + $0x200] sm:$0xff] }
 0x8d8   :  { %6602 = vrot.lane.b32.xlu0 %v4630_v47, %s8498_s1  ;;  %v6919_v18 = vsel %vm3083_vm5, %v6855_v31, %v15335_v20  ;;  %v6982_v47 = vsel %vm3148_vm6, %v6918_v38, %v12677_v55  ;;  %v4507_v55 = vld [vmem:[#allocation2 + $0x308] sm:$0xff]  ;;  %v6729_v36 = vsel %vm24_vm0, %v8464_v57, %v15338_v35 }
 0x8d9   :  { %v6313_v30 = vpop.permute.xlu1 %6312  ;;  %v6983_v33 = vsel %vm3148_vm6, %v6919_v18, %v15336_v48  ;;  %v8465_v48 = vld [vmem:[#allocation2 + $0x210] sm:$0xff] }
 0x8da   :  { %v6311_v9 = vpop.permute.xlu0 %6310  ;;  %v7109_v8 = vsel %vm3278_vm8, %v7045_v19, %v6313_v30 }
 0x8db   :  { %6096 = vrot.lane.b32.xlu1 %v4505_v63, %s8496_s28  ;;  %v7108_v25 = vsel %vm3278_vm8, %v7044_v26, %v6311_v9  ;;  %v4506_v9 = vld [vmem:[#allocation2 + $0x300] sm:$0xff]  ;;  %v15339_v26 = vld [vmem:[#allocation69_spill] sm:$0xff] }
 0x8dc   :  { %6094 = vrot.lane.b32.xlu0 %v4504_v21, %s8496_s28  ;;  %v8463_v21 = vld [vmem:[#allocation2 + $0x1f8] sm:$0xff] }
 0x8dd   :  { %v6569_v12 = vpop.permute.xlu1 %6568  ;;  %v6728_v6 = vsel %vm24_vm0, %v8463_v21, %v15337_v61  ;;  %v4572_v21 = vld [vmem:[#allocation2 + $0x319] sm:$0xff]  ;;  %v15354_v61 = vld [vmem:[#allocation257_spill] sm:$0xff] }
 0x8de   :  { %v6567_v2 = vpop.permute.xlu0 %6566  ;;  %v7173_v40 = vsel %vm3343_vm9, %v7109_v8, %v6569_v12  ;;  %v6792_v12 = vsel %vm2953_vm3, %v6728_v6, %v15339_v26 }
 0x8df   :  { %v7172_v17 = vsel %vm3343_vm9, %v7108_v25, %v6567_v2  ;;  %6352 = vrot.lane.b32.xlu1 %v4569_v23, %s8497_s29  ;;  %v15340_v25 = vld [vmem:[#allocation296_spill] sm:$0xff]  ;;  %v15341_v23 = vld [vmem:[#allocation305_spill] sm:$0xff] }
 0x8e0   :  { %6350 = vrot.lane.b32.xlu0 %v4568_v60, %s8497_s29  ;;  %8299 = vmatprep.mubr.msk.f32.mxu1 %vm3420_vm10, %v7172_v17  ;;  %v6793_v2 = vsel %vm2953_vm3, %v6729_v36, %v15340_v25  ;;  %v6856_v8 = vsel %vm3018_vm4, %v6792_v12, %v15341_v23  ;;  %v4444_v60 = vld [vmem:[#allocation2 + $0x302] sm:$0xff] }
 0x8e1   :  { %v6061_v50 = vpop.permute.xlu1 %6060  ;;  %8300 = vmatmul.mubr.msk.f32.gmra.mrb[34].mxu1 %vm3420_vm10, %v7173_v40  ;;  %v15342_v40 = vld [vmem:[#allocation132_spill] sm:$0xff]  ;;  %v15355_v36 = vld [vmem:[#allocation263_spill] sm:$0xff] }
 0x8e2   :  { %v6059_v13 = vpop.permute.xlu0 %6058  ;;  %v7047_v16 = vsel %vm3213_vm7, %v6983_v33, %v6061_v50  ;;  %v6857_v50 = vsel %vm3018_vm4, %v6793_v2, %v15342_v40  ;;  %v15347_v33 = vld [vmem:[#allocation61_spill] sm:$0xff] }
 0x8e3   :  { %5842 = vrot.lane.b32.xlu1 %v4442_v32, %s8495_s27  ;;  %v7046_v62 = vsel %vm3213_vm7, %v6982_v47, %v6059_v13  ;;  %v15343_v13 = vld [vmem:[#allocation86_spill] sm:$0xff]  ;;  %v6921_v14 = vsel %vm3083_vm5, %v6857_v50, %v15344_v44  ;;  %v4509_v47 = vld [vmem:[#allocation2 + $0x320] sm:$0xff] }
 0x8e4   :  { %6606 = vrot.lane.b32.xlu0 %v4442_v32, %s8498_s1  ;;  %v6920_v32 = vsel %vm3083_vm5, %v6856_v8, %v15343_v13  ;;  %v6985_v49 = vsel %vm3148_vm6, %v6921_v14, %v15346_v39  ;;  %v4447_v14 = vld [vmem:[#allocation2 + $0x322] sm:$0xff]  ;;  %v8468_v39 = vld [vmem:[#allocation2 + $0x230] sm:$0xff] }
 0x8e5   :  { %v6317_v3 = vpop.permute.xlu1 %6316  ;;  %v6984_v1 = vsel %vm3148_vm6, %v6920_v32, %v15345_v11  ;;  %v8467_v11 = vld [vmem:[#allocation2 + $0x228] sm:$0xff] }
 0x8e6   :  { %v6315_v37 = vpop.permute.xlu0 %6314  ;;  %v7111_v29 = vsel %vm3278_vm8, %v7047_v16, %v6317_v3  ;;  %v15349_v16 = vld [vmem:[#allocation297_spill] sm:$0xff] }
 0x8e7   :  { %5844 = vrot.lane.b32.xlu1 %v4443_v0, %s8495_s27  ;;  %v7110_v30 = vsel %vm3278_vm8, %v7046_v62, %v6315_v37  ;;  %v6730_v62 = vsel %vm24_vm0, %v8465_v48, %v15347_v33 }
 0x8e8   :  { %v8250_v43 = vpop.f32.mrb[0].mxu1  ;;  %6608 = vrot.lane.b32.xlu0 %v4443_v0, %s8498_s1 }
 0x8e9   :  { %v7481_v22 = vadd.f32 %v8250_v43, %v13380_v46  ;;  %v6573_v54 = vpop.permute.xlu1 %6572  ;;  %v7475_v34 = vpop.f32.mrb[1].mxu1  ;;  %v4508_v43 = vld [vmem:[#allocation2 + $0x318] sm:$0xff] }
 0x8ea   :  { %v7476_v59 = vadd.f32 %v13380_v46, %v7475_v34  ;;  %v6571_v7 = vpop.permute.xlu0 %6570  ;;  %v7175_v63 = vsel %vm3343_vm9, %v7111_v29, %v6573_v54  ;;  %v15348_v54 = vld [vmem:[#allocation288_spill] sm:$0xff]  ;;  %v15351_v29 = vld [vmem:[#allocation133_spill] sm:$0xff] }
 0x8eb   :  { %7795 = vst.msk [vmem:[%s14118_s5 + $0x8] sm:$0xff] %vm3018_vm4, %v7481_v22  ;;  %v7174_v52 = vsel %vm3343_vm9, %v7110_v30, %v6571_v7  ;;  %6100 = vrot.lane.b32.xlu1 %v4507_v55, %s8496_s28  ;;  %v8466_v22 = vld [vmem:[#allocation2 + $0x218] sm:$0xff]  ;;  %v6794_v30 = vsel %vm2953_vm3, %v6730_v62, %v15349_v16  ;;  %v15350_v7 = vld [vmem:[#allocation124_spill] sm:$0xff] }
 0x8ec   :  { %7794 = vst.msk [vmem:[%s14118_s5] sm:$0xff] %vm3018_vm4, %v7476_v59  ;;  %6098 = vrot.lane.b32.xlu0 %v4506_v9, %s8496_s28  ;;  %8302 = vmatprep.mubr.msk.f32.mxu1 %vm3420_vm10, %v7174_v52  ;;  %v6731_v34 = vsel %vm24_vm0, %v8466_v22, %v15348_v54  ;;  %v6858_v52 = vsel %vm3018_vm4, %v6794_v30, %v15351_v29  ;;  %v15364_v22 = vld [vmem:[#allocation320_spill] sm:$0xff] }
 0x8ed   :  { %v6065_v10 = vpop.permute.xlu1 %6064  ;;  %8303 = vmatmul.mubr.msk.f32.gmra.mrb[36].mxu1 %vm3420_vm10, %v7175_v63  ;;  %v6795_v55 = vsel %vm2953_vm3, %v6731_v34, %v15350_v7  ;;  %v4573_v63 = vld [vmem:[#allocation2 + $0x321] sm:$0xff] }
 0x8ee   :  { %v6063_v56 = vpop.permute.xlu0 %6062  ;;  %v7049_v42 = vsel %vm3213_vm7, %v6985_v49, %v6065_v10  ;;  %v15352_v10 = vld [vmem:[#allocation363_spill] sm:$0xff]  ;;  %v15357_v49 = vld [vmem:[#allocation116_spill] sm:$0xff] }
 0x8ef   :  { %6356 = vrot.lane.b32.xlu1 %v4571_v28, %s8497_s29  ;;  %v7048_v24 = vsel %vm3213_vm7, %v6984_v1, %v6063_v56  ;;  %v6859_v56 = vsel %vm3018_vm4, %v6795_v55, %v15352_v10  ;;  %v15353_v28 = vld [vmem:[#allocation314_spill] sm:$0xff]  ;;  %v15356_v1 = vld [vmem:[#allocation289_spill] sm:$0xff] }
 0x8f0   :  { %6354 = vrot.lane.b32.xlu0 %v4570_v5, %s8497_s29  ;;  %v6922_v5 = vsel %vm3083_vm5, %v6858_v52, %v15353_v28  ;;  %v6923_v6 = vsel %vm3083_vm5, %v6859_v56, %v15354_v61  ;;  %v4574_v10 = vld [vmem:[#allocation2 + $0x331] sm:$0xff]  ;;  %v8469_v61 = vld [vmem:[#allocation2 + $0x240] sm:$0xff] }
 0x8f1   :  { %v6321_v19 = vpop.permute.xlu1 %6320  ;;  %v6986_v57 = vsel %vm3148_vm6, %v6922_v5, %v12691_v41  ;;  %v6987_v26 = vsel %vm3148_vm6, %v6923_v6, %v15355_v36  ;;  %v4446_v41 = vld [vmem:[#allocation2 + $0x31a] sm:$0xff]  ;;  %v15365_v6 = vld [vmem:[#allocation117_spill] sm:$0xff] }
 0x8f2   :  { %v6319_v17 = vpop.permute.xlu0 %6318  ;;  %v7113_v31 = vsel %vm3278_vm8, %v7049_v42, %v6321_v19  ;;  %v15359_v42 = vld [vmem:[#allocation355_spill] sm:$0xff] }
 0x8f3   :  { %5846 = vrot.lane.b32.xlu1 %v4444_v60, %s8495_s27  ;;  %v7112_v53 = vsel %vm3278_vm8, %v7048_v24, %v6319_v17  ;;  %v6733_v24 = vsel %vm24_vm0, %v8468_v39, %v15357_v49  ;;  %v15366_v36 = vld [vmem:[#allocation347_spill] sm:$0xff]  ;;  %v4513_v39 = vld [vmem:[#allocation2 + $0x350] sm:$0xff] }
 0x8f4   :  { %v8253_v45 = vpop.f32.mrb[2].mxu1  ;;  %6610 = vrot.lane.b32.xlu0 %v4444_v60, %s8498_s1  ;;  %v15374_v49 = vld [vmem:[#allocation93_spill] sm:$0xff] }
 0x8f5   :  { %v7491_v3 = vadd.f32 %v8253_v45, %v13380_v46  ;;  %v6577_v4 = vpop.permute.xlu1 %6576  ;;  %v7485_v58 = vpop.f32.mrb[3].mxu1  ;;  %v6732_v45 = vsel %vm24_vm0, %v8467_v11, %v15356_v1  ;;  %v15373_v11 = vld [vmem:[#allocation148_spill] sm:$0xff] }
 0x8f6   :  { %v7486_v37 = vadd.f32 %v13380_v46, %v7485_v58  ;;  %v6575_v0 = vpop.permute.xlu0 %6574  ;;  %v7177_v38 = vsel %vm3343_vm9, %v7113_v31, %v6577_v4  ;;  %v4511_v31 = vld [vmem:[#allocation2 + $0x338] sm:$0xff] }
 0x8f7   :  { %7797 = vst.msk [vmem:[%s14118_s5 + $0x18] sm:$0xff] %vm3018_vm4, %v7491_v3  ;;  %v7176_v27 = vsel %vm3343_vm9, %v7112_v53, %v6575_v0  ;;  %5848 = vrot.lane.b32.xlu1 %v4445_v15, %s8495_s27  ;;  %v15358_v3 = vld [vmem:[#allocation125_spill] sm:$0xff]  ;;  %v6797_v53 = vsel %vm2953_vm3, %v6733_v24, %v15359_v42 }
 0x8f8   :  { %7796 = vst.msk [vmem:[%s14118_s5 + $0x10] sm:$0xff] %vm3018_vm4, %v7486_v37  ;;  %6612 = vrot.lane.b32.xlu0 %v4445_v15, %s8498_s1  ;;  %8305 = vmatprep.mubr.msk.f32.mxu1 %vm3420_vm10, %v7176_v27  ;;  %v6796_v4 = vsel %vm2953_vm3, %v6732_v45, %v15358_v3  ;;  %v15360_v37 = vld [vmem:[#allocation364_spill] sm:$0xff]  ;;  %v15361_v27 = vld [vmem:[#allocation190_spill] sm:$0xff] }
 0x8f9   :  { %v6069_v20 = vpop.permute.xlu1 %6068  ;;  %8306 = vmatmul.mubr.msk.f32.gmra.mrb[38].mxu1 %vm3420_vm10, %v7177_v38  ;;  %v6860_v0 = vsel %vm3018_vm4, %v6796_v4, %v15360_v37  ;;  %v6861_v38 = vsel %vm3018_vm4, %v6797_v53, %v15361_v27  ;;  %v4512_v53 = vld [vmem:[#allocation2 + $0x348] sm:$0xff] }
 0x8fa   :  { %v6067_v18 = vpop.permute.xlu0 %6066  ;;  %v7051_v23 = vsel %vm3213_vm7, %v6987_v26, %v6069_v20  ;;  %v15362_v20 = vld [vmem:[#allocation142_spill] sm:$0xff] }
 0x8fb   :  { %6104 = vrot.lane.b32.xlu1 %v4509_v47, %s8496_s28  ;;  %v7050_v12 = vsel %vm3213_vm7, %v6986_v57, %v6067_v18  ;;  %v6924_v18 = vsel %vm3083_vm5, %v6860_v0, %v15362_v20  ;;  %v4510_v47 = vld [vmem:[#allocation2 + $0x330] sm:$0xff]  ;;  %v6734_v57 = vsel %vm24_vm0, %v8469_v61, %v15365_v6  ;;  %v15382_v61 = vld [vmem:[#allocation143_spill] sm:$0xff] }
 0x8fc   :  { %6102 = vrot.lane.b32.xlu0 %v4508_v43, %s8496_s28  ;;  %v15363_v43 = vld [vmem:[#allocation87_spill] sm:$0xff]  ;;  %v6988_v33 = vsel %vm3148_vm6, %v6924_v18, %v12697_v51  ;;  %v4577_v18 = vld [vmem:[#allocation2 + $0x351] sm:$0xff] }
 0x8fd   :  { %v6325_v59 = vpop.permute.xlu1 %6324  ;;  %v6925_v48 = vsel %vm3083_vm5, %v6861_v38, %v15363_v43  ;;  %v4575_v51 = vld [vmem:[#allocation2 + $0x339] sm:$0xff]  ;;  %v4576_v43 = vld [vmem:[#allocation2 + $0x349] sm:$0xff] }
 0x8fe   :  { %v6323_v9 = vpop.permute.xlu0 %6322  ;;  %v7115_v40 = vsel %vm3278_vm8, %v7051_v23, %v6325_v59  ;;  %v6989_v54 = vsel %vm3148_vm6, %v6925_v48, %v15364_v22 }
 0x8ff   :  { %6360 = vrot.lane.b32.xlu1 %v4573_v63, %s8497_s29  ;;  %v7114_v8 = vsel %vm3278_vm8, %v7050_v12, %v6323_v9  ;;  %v15367_v12 = vld [vmem:[#allocation356_spill] sm:$0xff] }
 0x900   :  { %6358 = vrot.lane.b32.xlu0 %v4572_v21, %s8497_s29  ;;  %v8256_v35 = vpop.f32.mrb[4].mxu1  ;;  %v4448_v21 = vld [vmem:[#allocation2 + $0x332] sm:$0xff] }
 0x901   :  { %v7501_v19 = vadd.f32 %v8256_v35, %v13380_v46  ;;  %v6581_v25 = vpop.permute.xlu1 %6580  ;;  %v7495_v2 = vpop.f32.mrb[5].mxu1  ;;  %v8470_v35 = vld [vmem:[#allocation2 + $0x248] sm:$0xff] }
 0x902   :  { %v7496_v17 = vadd.f32 %v13380_v46, %v7495_v2  ;;  %v6579_v60 = vpop.permute.xlu0 %6578  ;;  %v7179_v13 = vsel %vm3343_vm9, %v7115_v40, %v6581_v25  ;;  %v6735_v26 = vsel %vm24_vm0, %v8470_v35, %v15366_v36  ;;  %v15368_v2 = vld [vmem:[#allocation182_spill] sm:$0xff]  ;;  %v15370_v40 = vld [vmem:[#allocation23_spill] sm:$0xff] }
 0x903   :  { %7799 = vst.msk [vmem:[%s14118_s5 + $0x28] sm:$0xff] %vm3018_vm4, %v7501_v19  ;;  %v7178_v50 = vsel %vm3343_vm9, %v7114_v8, %v6579_v60  ;;  %5850 = vrot.lane.b32.xlu1 %v4446_v41, %s8495_s27  ;;  %v6798_v19 = vsel %vm2953_vm3, %v6734_v57, %v15367_v12  ;;  %v6799_v23 = vsel %vm2953_vm3, %v6735_v26, %v15368_v2  ;;  %v15369_v8 = vld [vmem:[#allocation191_spill] sm:$0xff]  ;;  %v15384_v26 = vld [vmem:[#allocation321_spill] sm:$0xff] }
 0x904   :  { %7798 = vst.msk [vmem:[%s14118_s5 + $0x20] sm:$0xff] %vm3018_vm4, %v7496_v17  ;;  %6614 = vrot.lane.b32.xlu0 %v4446_v41, %s8498_s1  ;;  %8308 = vmatprep.mubr.msk.f32.mxu1 %vm3420_vm10, %v7178_v50  ;;  %v6862_v17 = vsel %vm3018_vm4, %v6798_v19, %v15369_v8  ;;  %v4449_v41 = vld [vmem:[#allocation2 + $0x33a] sm:$0xff]  ;;  %v6863_v50 = vsel %vm3018_vm4, %v6799_v23, %v15370_v40 }
 0x905   :  { %v6073_v32 = vpop.permute.xlu1 %6072  ;;  %8309 = vmatmul.mubr.msk.f32.gmra.mrb[40].mxu1 %vm3420_vm10, %v7179_v13  ;;  %v15371_v13 = vld [vmem:[#allocation373_spill] sm:$0xff]  ;;  %v15383_v57 = vld [vmem:[#allocation379_spill] sm:$0xff] }
 0x906   :  { %v6071_v44 = vpop.permute.xlu0 %6070  ;;  %v7053_v7 = vsel %vm3213_vm7, %v6989_v54, %v6073_v32  ;;  %v6926_v32 = vsel %vm3083_vm5, %v6862_v17, %v15371_v13  ;;  %v4641_v54 = vld [vmem:[#allocation2 + $0x352] sm:$0xff] }
 0x907   :  { %5852 = vrot.lane.b32.xlu1 %v4447_v14, %s8495_s27  ;;  %v7052_v34 = vsel %vm3213_vm7, %v6988_v33, %v6071_v44  ;;  %v15372_v44 = vld [vmem:[#allocation315_spill] sm:$0xff]  ;;  %v6990_v1 = vsel %vm3148_vm6, %v6926_v32, %v15373_v11  ;;  %v8471_v33 = vld [vmem:[#allocation2 + $0x258] sm:$0xff] }
 0x908   :  { %6616 = vrot.lane.b32.xlu0 %v4447_v14, %s8498_s1  ;;  %v6927_v14 = vsel %vm3083_vm5, %v6863_v50, %v15372_v44  ;;  %v15385_v11 = vld [vmem:[#allocation175_spill] sm:$0xff] }
 0x909   :  { %v6329_v58 = vpop.permute.xlu1 %6328  ;;  %v6991_v24 = vsel %vm3148_vm6, %v6927_v14, %v15374_v49  ;;  %v8473_v14 = vld [vmem:[#allocation2 + $0x270] sm:$0xff] }
 0x90a   :  { %v6327_v15 = vpop.permute.xlu0 %6326  ;;  %v7117_v9 = vsel %vm3278_vm8, %v7053_v7, %v6329_v58 }
 0x90b   :  { %6108 = vrot.lane.b32.xlu1 %v4511_v31, %s8496_s28  ;;  %v7116_v55 = vsel %vm3278_vm8, %v7052_v34, %v6327_v15  ;;  %v8472_v34 = vld [vmem:[#allocation2 + $0x260] sm:$0xff] }
 0x90c   :  { %6106 = vrot.lane.b32.xlu0 %v4510_v47, %s8496_s28  ;;  %v8259_v62 = vpop.f32.mrb[6].mxu1 }
 0x90d   :  { %v7511_v16 = vadd.f32 %v8259_v62, %v13380_v46  ;;  %v6585_v30 = vpop.permute.xlu1 %6584  ;;  %v7505_v59 = vpop.f32.mrb[7].mxu1  ;;  %v15375_v62 = vld [vmem:[#allocation348_spill] sm:$0xff] }
 0x90e   :  { %v7506_v29 = vadd.f32 %v13380_v46, %v7505_v59  ;;  %v6583_v52 = vpop.permute.xlu0 %6582  ;;  %v7181_v56 = vsel %vm3343_vm9, %v7117_v9, %v6585_v30  ;;  %v6736_v22 = vsel %vm24_vm0, %v8471_v33, %v15375_v62  ;;  %v15377_v59 = vld [vmem:[#allocation183_spill] sm:$0xff]  ;;  %v15379_v9 = vld [vmem:[#allocation24_spill] sm:$0xff]  ;;  %v15394_v33 = vld [vmem:[#allocation149_spill] sm:$0xff] }
 0x90f   :  { %7801 = vst.msk [vmem:[%s14118_s5 + $0x38] sm:$0xff] %vm3018_vm4, %v7511_v16  ;;  %v7180_v63 = vsel %vm3343_vm9, %v7116_v55, %v6583_v52  ;;  %6364 = vrot.lane.b32.xlu1 %v4575_v51, %s8497_s29  ;;  %v15376_v16 = vld [vmem:[#allocation174_spill] sm:$0xff]  ;;  %v6800_v7 = vsel %vm2953_vm3, %v6736_v22, %v15377_v59  ;;  %v15378_v52 = vld [vmem:[#allocation15_spill] sm:$0xff] }
 0x910   :  { %7800 = vst.msk [vmem:[%s14118_s5 + $0x30] sm:$0xff] %vm3018_vm4, %v7506_v29  ;;  %6362 = vrot.lane.b32.xlu0 %v4574_v10, %s8497_s29  ;;  %8311 = vmatprep.mubr.msk.f32.mxu1 %vm3420_vm10, %v7180_v63  ;;  %v6737_v30 = vsel %vm24_vm0, %v8472_v34, %v15376_v16  ;;  %v4640_v29 = vld [vmem:[#allocation2 + $0x34a] sm:$0xff]  ;;  %v6864_v63 = vsel %vm3018_vm4, %v6800_v7, %v15379_v9 }
 0x911   :  { %v6077_v28 = vpop.permute.xlu1 %6076  ;;  %8312 = vmatmul.mubr.msk.f32.gmra.mrb[42].mxu1 %vm3420_vm10, %v7181_v56  ;;  %v6801_v51 = vsel %vm2953_vm3, %v6737_v30, %v15378_v52  ;;  %v15380_v56 = vld [vmem:[#allocation248_spill] sm:$0xff] }
 0x912   :  { %v6075_v5 = vpop.permute.xlu0 %6074  ;;  %v7055_v37 = vsel %vm3213_vm7, %v6991_v24, %v6077_v28  ;;  %v6865_v28 = vsel %vm3018_vm4, %v6801_v51, %v15380_v56  ;;  %v15387_v24 = vld [vmem:[#allocation16_spill] sm:$0xff] }
 0x913   :  { %5854 = vrot.lane.b32.xlu1 %v4448_v21, %s8495_s27  ;;  %v7054_v3 = vsel %vm3213_vm7, %v6990_v1, %v6075_v5  ;;  %v15381_v5 = vld [vmem:[#allocation200_spill] sm:$0xff]  ;;  %v6929_v6 = vsel %vm3083_vm5, %v6865_v28, %v15382_v61  ;;  %v6738_v1 = vsel %vm24_vm0, %v8473_v14, %v15385_v11 }
 0x914   :  { %6618 = vrot.lane.b32.xlu0 %v4448_v21, %s8498_s1  ;;  %v6928_v21 = vsel %vm3083_vm5, %v6864_v63, %v15381_v5  ;;  %v6993_v12 = vsel %vm3148_vm6, %v6929_v6, %v15384_v26  ;;  %v15395_v56 = vld [vmem:[#allocation8_spill] sm:$0xff]  ;;  %v8476_v5 = vld [vmem:[#allocation2 + $0x290] sm:$0xff] }
 0x915   :  { %v6333_v25 = vpop.permute.xlu1 %6332  ;;  %v6992_v35 = vsel %vm3148_vm6, %v6928_v21, %v15383_v57  ;;  %v15396_v21 = vld [vmem:[#allocation232_spill] sm:$0xff]  ;;  %v15397_v6 = vld [vmem:[#allocation241_spill] sm:$0xff] }
 0x916   :  { %v6331_v60 = vpop.permute.xlu0 %6330  ;;  %v7119_v27 = vsel %vm3278_vm8, %v7055_v37, %v6333_v25  ;;  %v6741_v61 = vsel %vm24_vm0, %v8476_v5, %v15396_v21 }
 0x917   :  { %5856 = vrot.lane.b32.xlu1 %v4449_v41, %s8495_s27  ;;  %v7118_v0 = vsel %vm3278_vm8, %v7054_v3, %v6331_v60  ;;  %v6802_v3 = vsel %vm2953_vm3, %v6738_v1, %v15387_v24 }
 0x918   :  { %6620 = vrot.lane.b32.xlu0 %v4449_v41, %s8498_s1  ;;  %v8262_v45 = vpop.f32.mrb[8].mxu1 }
 0x919   :  { %v7521_v4 = vadd.f32 %v8262_v45, %v13380_v46  ;;  %v6589_v58 = vpop.permute.xlu1 %6588  ;;  %v7515_v42 = vpop.f32.mrb[9].mxu1  ;;  %v8474_v45 = vld [vmem:[#allocation2 + $0x278] sm:$0xff] }
 0x91a   :  { %v7516_v15 = vadd.f32 %v13380_v46, %v7515_v42  ;;  %v6587_v31 = vpop.permute.xlu0 %6586  ;;  %v7183_v20 = vsel %vm3343_vm9, %v7119_v27, %v6589_v58  ;;  %v15388_v58 = vld [vmem:[#allocation240_spill] sm:$0xff]  ;;  %v15391_v27 = vld [vmem:[#allocation33_spill] sm:$0xff] }
 0x91b   :  { %7803 = vst.msk [vmem:[%s14118_s5 + $0x48] sm:$0xff] %vm3018_vm4, %v7521_v4  ;;  %v7182_v38 = vsel %vm3343_vm9, %v7118_v0, %v6587_v31  ;;  %6112 = vrot.lane.b32.xlu1 %v4513_v39, %s8496_s28  ;;  %v15386_v39 = vld [vmem:[#allocation7_spill] sm:$0xff] }
 0x91c   :  { %7802 = vst.msk [vmem:[%s14118_s5 + $0x40] sm:$0xff] %vm3018_vm4, %v7516_v15  ;;  %6110 = vrot.lane.b32.xlu0 %v4512_v53, %s8496_s28  ;;  %8314 = vmatprep.mubr.msk.f32.mxu1 %vm3420_vm10, %v7182_v38  ;;  %v6739_v49 = vsel %vm24_vm0, %v8474_v45, %v15386_v39  ;;  %v15389_v53 = vld [vmem:[#allocation249_spill] sm:$0xff]  ;;  %v15390_v15 = vld [vmem:[#allocation78_spill] sm:$0xff] }
 0x91d   :  { %v6081_v47 = vpop.permute.xlu1 %6080  ;;  %8315 = vmatmul.mubr.msk.f32.gmra.mrb[44].mxu1 %vm3420_vm10, %v7183_v20  ;;  %v6803_v42 = vsel %vm2953_vm3, %v6739_v49, %v15388_v58  ;;  %v6866_v37 = vsel %vm3018_vm4, %v6802_v3, %v15389_v53  ;;  %v15392_v20 = vld [vmem:[#allocation374_spill] sm:$0xff] }
 0x91e   :  { %v6079_v48 = vpop.permute.xlu0 %6078  ;;  %v7057_v8 = vsel %vm3213_vm7, %v6993_v12, %v6081_v47  ;;  %v6867_v31 = vsel %vm3018_vm4, %v6803_v42, %v15390_v15  ;;  %v6930_v38 = vsel %vm3083_vm5, %v6866_v37, %v15391_v27  ;;  %v15393_v47 = vld [vmem:[#allocation206_spill] sm:$0xff]  ;;  %v15399_v12 = vld [vmem:[#allocation79_spill] sm:$0xff]  ;;  %v15405_v15 = vld [vmem:[#allocation233_spill] sm:$0xff] }
 0x91f   :  { %6368 = vrot.lane.b32.xlu1 %v4577_v18, %s8497_s29  ;;  %v7056_v19 = vsel %vm3213_vm7, %v6992_v35, %v6079_v48  ;;  %v6931_v18 = vsel %vm3083_vm5, %v6867_v31, %v15392_v20  ;;  %v8478_v27 = vld [vmem:[#allocation2 + $0x2a8] sm:$0xff] }
 0x920   :  { %6366 = vrot.lane.b32.xlu0 %v4576_v43, %s8497_s29  ;;  %v6994_v43 = vsel %vm3148_vm6, %v6930_v38, %v15393_v47  ;;  %v6995_v62 = vsel %vm3148_vm6, %v6931_v18, %v15394_v33  ;;  %v15406_v38 = vld [vmem:[#allocation62_spill] sm:$0xff]  ;;  %v15407_v18 = vld [vmem:[#allocation71_spill] sm:$0xff] }
 0x921   :  { %v6337_v55 = vpop.permute.xlu1 %6336  ;;  %v6743_v20 = vsel %vm24_vm0, %v8478_v27, %v15406_v38  ;;  %v15423_v27 = vld [vmem:[#allocation259_spill] sm:$0xff] }
 0x922   :  { %v6335_v10 = vpop.permute.xlu0 %6334  ;;  %v7121_v40 = vsel %vm3278_vm8, %v7057_v8, %v6337_v55  ;;  %v15401_v8 = vld [vmem:[#allocation258_spill] sm:$0xff] }
 0x923   :  { %6624 = vrot.lane.b32.xlu1 %v4641_v54, %s8498_s1  ;;  %v7120_v17 = vsel %vm3278_vm8, %v7056_v19, %v6335_v10  ;;  %v8475_v10 = vld [vmem:[#allocation2 + $0x288] sm:$0xff] }
 0x924   :  { %6622 = vrot.lane.b32.xlu0 %v4640_v29, %s8498_s1  ;;  %v8265_v36 = vpop.f32.mrb[10].mxu1  ;;  %v6740_v28 = vsel %vm24_vm0, %v8475_v10, %v15395_v56 }
 0x925   :  { %v7531_v25 = vadd.f32 %v8265_v36, %v13380_v46  ;;  %v6593_v2 = vpop.permute.xlu1 %6592  ;;  %v7525_v23 = vpop.f32.mrb[11].mxu1  ;;  %v6804_v57 = vsel %vm2953_vm3, %v6740_v28, %v15397_v6  ;;  %v15398_v36 = vld [vmem:[#allocation70_spill] sm:$0xff] }
 0x926   :  { %v7526_v60 = vadd.f32 %v13380_v46, %v7525_v23  ;;  %v6591_v41 = vpop.permute.xlu0 %6590  ;;  %v7185_v13 = vsel %vm3343_vm9, %v7121_v40, %v6593_v2  ;;  %v6805_v26 = vsel %vm2953_vm3, %v6741_v61, %v15398_v36  ;;  %v6868_v19 = vsel %vm3018_vm4, %v6804_v57, %v15399_v12  ;;  %v15400_v2 = vld [vmem:[#allocation306_spill] sm:$0xff]  ;;  %v15403_v40 = vld [vmem:[#allocation39_spill] sm:$0xff] }
 0x927   :  { %7805 = vst.msk [vmem:[%s14118_s5 + $0x58] sm:$0xff] %vm3018_vm4, %v7531_v25  ;;  %v7184_v50 = vsel %vm3343_vm9, %v7120_v17, %v6591_v41  ;;  %v6869_v23 = vsel %vm3018_vm4, %v6805_v26, %v15400_v2  ;;  %v6932_v17 = vsel %vm3083_vm5, %v6868_v19, %v15401_v8  ;;  %v15415_v2 = vld [vmem:[#allocation63_spill] sm:$0xff] }
 0x928   :  { %7804 = vst.msk [vmem:[%s14118_s5 + $0x50] sm:$0xff] %vm3018_vm4, %v7526_v60  ;;  %8317 = vmatprep.mubr.msk.f32.mxu1 %vm3420_vm10, %v7184_v50  ;;  %v15402_v60 = vld [vmem:[#allocation201_spill] sm:$0xff]  ;;  %v6996_v50 = vsel %vm3148_vm6, %v6932_v17, %v15403_v40  ;;  %v15416_v8 = vld [vmem:[#allocation299_spill] sm:$0xff] }
 0x929   :  { %v6085_v32 = vpop.permute.xlu1 %6084  ;;  %8318 = vmatmul.mubr.msk.f32.gmra.mrb[46].mxu1 %vm3420_vm10, %v7185_v13  ;;  %v6933_v41 = vsel %vm3083_vm5, %v6869_v23, %v15402_v60 }
 0x92a   :  { %v6083_v44 = vpop.permute.xlu0 %6082  ;;  %v7059_v30 = vsel %vm3213_vm7, %v6995_v62, %v6085_v32  ;;  %v15404_v32 = vld [vmem:[#allocation380_spill] sm:$0xff]  ;;  %v15409_v62 = vld [vmem:[#allocation307_spill] sm:$0xff] }
 0x92b   :  { %v7058_v22 = vsel %vm3213_vm7, %v6994_v43, %v6083_v44  ;;  %v6997_v44 = vsel %vm3148_vm6, %v6933_v41, %v15404_v32  ;;  %v15417_v41 = vld [vmem:[#allocation135_spill] sm:$0xff] }
 0x92d   :  { %v6341_v4 = vpop.permute.xlu1 %6340 }
 0x92e   :  { %v6339_v0 = vpop.permute.xlu0 %6338  ;;  %v7123_v29 = vsel %vm3278_vm8, %v7059_v30, %v6341_v4  ;;  %v15411_v30 = vld [vmem:[#allocation88_spill] sm:$0xff] }
 0x92f   :  { %v7122_v59 = vsel %vm3278_vm8, %v7058_v22, %v6339_v0  ;;  %v8477_v0 = vld [vmem:[#allocation2 + $0x2a0] sm:$0xff] }
 0x930   :  { %v8268_v48 = vpop.f32.mrb[12].mxu1  ;;  %v6742_v31 = vsel %vm24_vm0, %v8477_v0, %v15405_v15 }
 0x931   :  { %v7541_v54 = vadd.f32 %v8268_v48, %v13380_v46  ;;  %v6597_v34 = vpop.permute.xlu1 %6596  ;;  %v7535_v16 = vpop.f32.mrb[13].mxu1  ;;  %v6806_v47 = vsel %vm2953_vm3, %v6742_v31, %v15407_v18  ;;  %v15408_v48 = vld [vmem:[#allocation298_spill] sm:$0xff]  ;;  %v15424_v18 = vld [vmem:[#allocation40_spill] sm:$0xff] }
 0x932   :  { %v7536_v7 = vadd.f32 %v13380_v46, %v7535_v16  ;;  %v6595_v55 = vpop.permute.xlu0 %6594  ;;  %v7187_v51 = vsel %vm3343_vm9, %v7123_v29, %v6597_v34  ;;  %v6807_v33 = vsel %vm2953_vm3, %v6743_v20, %v15408_v48  ;;  %v6870_v22 = vsel %vm3018_vm4, %v6806_v47, %v15409_v62  ;;  %v15410_v34 = vld [vmem:[#allocation134_spill] sm:$0xff]  ;;  %v15413_v29 = vld [vmem:[#allocation264_spill] sm:$0xff] }
 0x933   :  { %7807 = vst.msk [vmem:[%s14118_s5 + $0x68] sm:$0xff] %vm3018_vm4, %v7541_v54  ;;  %v7186_v52 = vsel %vm3343_vm9, %v7122_v59, %v6595_v55  ;;  %v6871_v16 = vsel %vm3018_vm4, %v6807_v33, %v15410_v34  ;;  %v6934_v59 = vsel %vm3083_vm5, %v6870_v22, %v15411_v30  ;;  %v15425_v30 = vld [vmem:[#allocation291_spill] sm:$0xff] }
 0x934   :  { %7806 = vst.msk [vmem:[%s14118_s5 + $0x60] sm:$0xff] %vm3018_vm4, %v7536_v7  ;;  %8320 = vmatprep.mubr.msk.f32.mxu1 %vm3420_vm10, %v7186_v52  ;;  %v15412_v7 = vld [vmem:[#allocation34_spill] sm:$0xff]  ;;  %v6998_v52 = vsel %vm3148_vm6, %v6934_v59, %v15413_v29 }
 0x935   :  { %v6089_v9 = vpop.permute.xlu1 %6088  ;;  %8321 = vmatmul.mubr.msk.f32.gmra.mrb[48].mxu1 %vm3420_vm10, %v7187_v51  ;;  %v6935_v55 = vsel %vm3083_vm5, %v6871_v16, %v15412_v7  ;;  %v8481_v16 = vld [vmem:[#allocation2 + $0x2d0] sm:$0xff] }
 0x936   :  { %v6087_v63 = vpop.permute.xlu0 %6086  ;;  %v7061_v39 = vsel %vm3213_vm7, %v6997_v44, %v6089_v9  ;;  %v15414_v9 = vld [vmem:[#allocation207_spill] sm:$0xff]  ;;  %v6746_v59 = vsel %vm24_vm0, %v8481_v16, %v15425_v30 }
 0x937   :  { %v7060_v14 = vsel %vm3213_vm7, %v6996_v50, %v6087_v63  ;;  %v6999_v63 = vsel %vm3148_vm6, %v6935_v55, %v15414_v9  ;;  %v8480_v44 = vld [vmem:[#allocation2 + $0x2c0] sm:$0xff] }
 0x938   :  { %v15426_v55 = vld [vmem:[#allocation127_spill] sm:$0xff] }
 0x939   :  { %v6345_v35 = vpop.permute.xlu1 %6344  ;;  %v6810_v29 = vsel %vm2953_vm3, %v6746_v59, %v15426_v55  ;;  %v15440_v59 = vld [vmem:[#allocation317_spill] sm:$0xff] }
 0x93a   :  { %v6343_v25 = vpop.permute.xlu0 %6342  ;;  %v7125_v4 = vsel %vm3278_vm8, %v7061_v39, %v6345_v35 }
 0x93b   :  { %v7124_v49 = vsel %vm3278_vm8, %v7060_v14, %v6343_v25  ;;  %v8479_v25 = vld [vmem:[#allocation2 + $0x2b8] sm:$0xff] }
 0x93c   :  { %v8271_v13 = vpop.f32.mrb[14].mxu1  ;;  %v6744_v23 = vsel %vm24_vm0, %v8479_v25, %v15415_v2  ;;  %v15419_v14 = vld [vmem:[#allocation290_spill] sm:$0xff]  ;;  %v15431_v25 = vld [vmem:[#allocation192_spill] sm:$0xff] }
 0x93d   :  { %v7551_v11 = vadd.f32 %v8271_v13, %v13380_v46  ;;  %v6601_v1 = vpop.permute.xlu1 %6600  ;;  %v7545_v45 = vpop.f32.mrb[15].mxu1  ;;  %v6808_v17 = vsel %vm2953_vm3, %v6744_v23, %v15416_v8  ;;  %v15418_v13 = vld [vmem:[#allocation316_spill] sm:$0xff] }
 0x93e   :  { %v7546_v24 = vadd.f32 %v13380_v46, %v7545_v45  ;;  %v6599_v3 = vpop.permute.xlu0 %6598  ;;  %v7189_v42 = vsel %vm3343_vm9, %v7125_v4, %v6601_v1  ;;  %v6872_v40 = vsel %vm3018_vm4, %v6808_v17, %v15417_v41  ;;  %v15420_v1 = vld [vmem:[#allocation94_spill] sm:$0xff]  ;;  %v15432_v17 = vld [vmem:[#allocation89_spill] sm:$0xff] }
 0x93f   :  { %7809 = vst.msk [vmem:[%s14118_s5 + $0x78] sm:$0xff] %vm3018_vm4, %v7551_v11  ;;  %v7188_v58 = vsel %vm3343_vm9, %v7124_v49, %v6599_v3  ;;  %v6936_v32 = vsel %vm3083_vm5, %v6872_v40, %v15418_v13  ;;  %v6745_v11 = vsel %vm24_vm0, %v8480_v44, %v15419_v14  ;;  %v15421_v49 = vld [vmem:[#allocation126_spill] sm:$0xff] }
 0x940   :  { %7808 = vst.msk [vmem:[%s14118_s5 + $0x70] sm:$0xff] %vm3018_vm4, %v7546_v24  ;;  %8323 = vmatprep.mubr.msk.f32.mxu1 %vm3420_vm10, %v7188_v58  ;;  %v7000_v45 = vsel %vm3148_vm6, %v6936_v32, %v15420_v1  ;;  %v6809_v24 = vsel %vm2953_vm3, %v6745_v11, %v15421_v49 }
 0x941   :  { %v6093_v53 = vpop.permute.xlu1 %6092  ;;  %8324 = vmatmul.mubr.msk.f32.gmra.mrb[50].mxu1 %vm3420_vm10, %v7189_v42 }
 0x942   :  { %v6091_v37 = vpop.permute.xlu0 %6090  ;;  %v7063_v21 = vsel %vm3213_vm7, %v6999_v63, %v6093_v53  ;;  %v15422_v53 = vld [vmem:[#allocation365_spill] sm:$0xff]  ;;  %v15427_v63 = vld [vmem:[#allocation366_spill] sm:$0xff] }
 0x943   :  { %v7062_v10 = vsel %vm3213_vm7, %v6998_v52, %v6091_v37  ;;  %v6873_v37 = vsel %vm3018_vm4, %v6809_v24, %v15422_v53 }
 0x944   :  { %v6937_v38 = vsel %vm3083_vm5, %v6873_v37, %v15423_v27  ;;  %v15436_v27 = vld [vmem:[#allocation375_spill] sm:$0xff] }
 0x945   :  { %v6349_v43 = vpop.permute.xlu1 %6348  ;;  %v7001_v47 = vsel %vm3148_vm6, %v6937_v38, %v15424_v18  ;;  %v15437_v18 = vld [vmem:[#allocation349_spill] sm:$0xff] }
 0x946   :  { %v6347_v54 = vpop.permute.xlu0 %6346  ;;  %v7127_v35 = vsel %vm3278_vm8, %v7063_v21, %v6349_v43 }
 0x947   :  { %v7126_v61 = vsel %vm3278_vm8, %v7062_v10, %v6347_v54  ;;  %v6874_v10 = vsel %vm3018_vm4, %v6810_v29, %v15427_v63 }
 0x948   :  { %v8274_v51 = vpop.f32.mrb[16].mxu1 }
 0x949   :  { %v7561_v56 = vadd.f32 %v8274_v51, %v13380_v46  ;;  %v6605_v28 = vpop.permute.xlu1 %6604  ;;  %v7555_v5 = vpop.f32.mrb[17].mxu1 }
 0x94a   :  { %v7556_v6 = vadd.f32 %v13380_v46, %v7555_v5  ;;  %v6603_v57 = vpop.permute.xlu0 %6602  ;;  %v7191_v26 = vsel %vm3343_vm9, %v7127_v35, %v6605_v28  ;;  %v15428_v5 = vld [vmem:[#allocation144_spill] sm:$0xff] }
 0x94b   :  { %7811 = vst.msk [vmem:[%s14118_s5 + $0x88] sm:$0xff] %vm3018_vm4, %v7561_v56  ;;  %v7190_v36 = vsel %vm3343_vm9, %v7126_v61, %v6603_v57  ;;  %v6938_v21 = vsel %vm3083_vm5, %v6874_v10, %v15428_v5  ;;  %v8482_v61 = vld [vmem:[#allocation2 + $0x2d8] sm:$0xff] }
 0x94c   :  { %7810 = vst.msk [vmem:[%s14118_s5 + $0x80] sm:$0xff] %vm3018_vm4, %v7556_v6  ;;  %8326 = vmatprep.mubr.msk.f32.mxu1 %vm3420_vm10, %v7190_v36  ;;  %v15429_v6 = vld [vmem:[#allocation118_spill] sm:$0xff]  ;;  %v15430_v36 = vld [vmem:[#allocation357_spill] sm:$0xff] }
 0x94d   :  { %v6097_v12 = vpop.permute.xlu1 %6096  ;;  %8327 = vmatmul.mubr.msk.f32.gmra.mrb[52].mxu1 %vm3420_vm10, %v7191_v26  ;;  %v6747_v57 = vsel %vm24_vm0, %v8482_v61, %v15429_v6 }
 0x94e   :  { %v6095_v19 = vpop.permute.xlu0 %6094  ;;  %v7065_v43 = vsel %vm3213_vm7, %v7001_v47, %v6097_v12  ;;  %v6811_v26 = vsel %vm2953_vm3, %v6747_v57, %v15430_v36  ;;  %v8485_v57 = vld [vmem:[#allocation2 + $0x300] sm:$0xff] }
 0x94f   :  { %v7064_v3 = vsel %vm3213_vm7, %v7000_v45, %v6095_v19  ;;  %v6875_v2 = vsel %vm3018_vm4, %v6811_v26, %v15431_v25  ;;  %v15442_v26 = vld [vmem:[#allocation185_spill] sm:$0xff]  ;;  %v15443_v25 = vld [vmem:[#allocation26_spill] sm:$0xff] }
 0x951   :  { %v6353_v60 = vpop.permute.xlu1 %6352 }
 0x952   :  { %v6351_v50 = vpop.permute.xlu0 %6350  ;;  %v7129_v33 = vsel %vm3278_vm8, %v7065_v43, %v6353_v60  ;;  %v6939_v60 = vsel %vm3083_vm5, %v6875_v2, %v15432_v17 }
 0x953   :  { %v7128_v0 = vsel %vm3278_vm8, %v7064_v3, %v6351_v50  ;;  %v8483_v3 = vld [vmem:[#allocation2 + $0x2e8] sm:$0xff] }
 0x954   :  { %v8277_v39 = vpop.f32.mrb[18].mxu1 }
 0x955   :  { %v7571_v4 = vadd.f32 %v8277_v39, %v13380_v46  ;;  %v5843_v58 = vpop.permute.xlu1 %5842  ;;  %v7565_v42 = vpop.f32.mrb[19].mxu1 }
 0x956   :  { %v7566_v15 = vadd.f32 %v13380_v46, %v7565_v42  ;;  %v6607_v31 = vpop.permute.xlu0 %6606  ;;  %v7002_v35 = vsel %vm3148_vm6, %v6938_v21, %v5843_v58  ;;  %v15434_v42 = vld [vmem:[#allocation358_spill] sm:$0xff] }
 0x957   :  { %7813 = vst.msk [vmem:[%s14118_s5 + $0x98] sm:$0xff] %vm3018_vm4, %v7571_v4  ;;  %v7192_v20 = vsel %vm3343_vm9, %v7128_v0, %v6607_v31  ;;  %v15433_v4 = vld [vmem:[#allocation119_spill] sm:$0xff]  ;;  %v15435_v0 = vld [vmem:[#allocation193_spill] sm:$0xff] }
 0x958   :  { %7812 = vst.msk [vmem:[%s14118_s5 + $0x90] sm:$0xff] %vm3018_vm4, %v7566_v15  ;;  %8329 = vmatprep.mubr.msk.f32.mxu1 %vm3420_vm10, %v7192_v20  ;;  %v6748_v58 = vsel %vm24_vm0, %v8483_v3, %v15433_v4  ;;  %v8484_v20 = vld [vmem:[#allocation2 + $0x2f0] sm:$0xff] }
 0x959   :  { %v5845_v48 = vpop.permute.xlu1 %5844  ;;  %v6812_v53 = vsel %vm2953_vm3, %v6748_v58, %v15434_v42  ;;  %v6749_v47 = vsel %vm24_vm0, %v8484_v20, %v15437_v18  ;;  %v15448_v58 = vld [vmem:[#allocation145_spill] sm:$0xff] }
 0x95a   :  { %v6609_v62 = vpop.permute.xlu0 %6608  ;;  %v7003_v40 = vsel %vm3148_vm6, %v6939_v60, %v5845_v48  ;;  %v6876_v15 = vsel %vm3018_vm4, %v6812_v53, %v15435_v0  ;;  %v15438_v48 = vld [vmem:[#allocation184_spill] sm:$0xff] }
 0x95b   :  { %v7193_v22 = vsel %vm3343_vm9, %v7129_v33, %v6609_v62  ;;  %v6940_v38 = vsel %vm3083_vm5, %v6876_v15, %v15436_v27  ;;  %v6813_v33 = vsel %vm2953_vm3, %v6749_v47, %v15438_v48  ;;  %v8486_v60 = vld [vmem:[#allocation2 + $0x308] sm:$0xff]  ;;  %v8487_v47 = vld [vmem:[#allocation2 + $0x318] sm:$0xff] }
 0x95c   :  { %8330 = vmatmul.mubr.msk.f32.gmra.mrb[54].mxu1 %vm3420_vm10, %v7193_v22 }
 0x95d   :  { %v6101_v54 = vpop.permute.xlu1 %6100 }
 0x95e   :  { %v6099_v34 = vpop.permute.xlu0 %6098  ;;  %v7067_v50 = vsel %vm3213_vm7, %v7003_v40, %v6101_v54  ;;  %v15439_v54 = vld [vmem:[#allocation25_spill] sm:$0xff] }
 0x95f   :  { %v7066_v12 = vsel %vm3213_vm7, %v7002_v35, %v6099_v34  ;;  %v6877_v34 = vsel %vm3018_vm4, %v6813_v33, %v15439_v54  ;;  %v15441_v35 = vld [vmem:[#allocation350_spill] sm:$0xff] }
 0x960   :  { %v8280_v7 = vpop.f32.mrb[20].mxu1  ;;  %v6750_v36 = vsel %vm24_vm0, %v8485_v57, %v15441_v35 }
 0x961   :  { %v7581_v52 = vadd.f32 %v8280_v7, %v13380_v46  ;;  %v6357_v51 = vpop.permute.xlu1 %6356  ;;  %v7575_v9 = vpop.f32.mrb[21].mxu1  ;;  %v6941_v7 = vsel %vm3083_vm5, %v6877_v34, %v15440_v59  ;;  %v15451_v34 = vld [vmem:[#allocation18_spill] sm:$0xff] }
 0x962   :  { %v7576_v56 = vadd.f32 %v13380_v46, %v7575_v9  ;;  %v6355_v28 = vpop.permute.xlu0 %6354  ;;  %v7131_v32 = vsel %vm3278_vm8, %v7067_v50, %v6357_v51 }
 0x963   :  { %7815 = vst.msk [vmem:[%s14118_s5 + $0xa8] sm:$0xff] %vm3018_vm4, %v7581_v52  ;;  %v7130_v23 = vsel %vm3278_vm8, %v7066_v12, %v6355_v28  ;;  %v6814_v12 = vsel %vm2953_vm3, %v6750_v36, %v15442_v26 }
 0x964   :  { %7814 = vst.msk [vmem:[%s14118_s5 + $0xa0] sm:$0xff] %vm3018_vm4, %v7576_v56  ;;  %v6878_v2 = vsel %vm3018_vm4, %v6814_v12, %v15443_v25 }
 0x965   :  { %v5847_v19 = vpop.permute.xlu1 %5846 }
 0x966   :  { %v6611_v8 = vpop.permute.xlu0 %6610  ;;  %v7004_v43 = vsel %vm3148_vm6, %v6940_v38, %v5847_v19 }
 0x967   :  { %v7194_v41 = vsel %vm3343_vm9, %v7130_v23, %v6611_v8  ;;  %v15444_v8 = vld [vmem:[#allocation202_spill] sm:$0xff] }
 0x968   :  { %8332 = vmatprep.mubr.msk.f32.mxu1 %vm3420_vm10, %v7194_v41  ;;  %v6942_v17 = vsel %vm3083_vm5, %v6878_v2, %v15444_v8  ;;  %v15445_v41 = vld [vmem:[#allocation176_spill] sm:$0xff] }
 0x969   :  { %v5849_v13 = vpop.permute.xlu1 %5848  ;;  %v6751_v40 = vsel %vm24_vm0, %v8486_v60, %v15445_v41 }
 0x96a   :  { %v6613_v44 = vpop.permute.xlu0 %6612  ;;  %v7005_v29 = vsel %vm3148_vm6, %v6941_v7, %v5849_v13 }
 0x96b   :  { %v7195_v14 = vsel %vm3343_vm9, %v7131_v32, %v6613_v44  ;;  %v15446_v32 = vld [vmem:[#allocation17_spill] sm:$0xff] }
 0x96c   :  { %v8283_v11 = vpop.f32.mrb[22].mxu1  ;;  %8333 = vmatmul.mubr.msk.f32.gmra.mrb[56].mxu1 %vm3420_vm10, %v7195_v14  ;;  %v6815_v44 = vsel %vm2953_vm3, %v6751_v40, %v15446_v32 }
 0x96d   :  { %v7591_v1 = vadd.f32 %v8283_v11, %v13380_v46  ;;  %v6105_v45 = vpop.permute.xlu1 %6104  ;;  %v7585_v39 = vpop.f32.mrb[23].mxu1 }
 0x96e   :  { %v7586_v49 = vadd.f32 %v13380_v46, %v7585_v39  ;;  %v6103_v24 = vpop.permute.xlu0 %6102  ;;  %v7069_v51 = vsel %vm3213_vm7, %v7005_v29, %v6105_v45  ;;  %v15447_v39 = vld [vmem:[#allocation250_spill] sm:$0xff] }
 0x96f   :  { %7817 = vst.msk [vmem:[%s14118_s5 + $0xb8] sm:$0xff] %vm3018_vm4, %v7591_v1  ;;  %v7068_v62 = vsel %vm3213_vm7, %v7004_v43, %v6103_v24  ;;  %v15449_v43 = vld [vmem:[#allocation177_spill] sm:$0xff] }
 0x970   :  { %7816 = vst.msk [vmem:[%s14118_s5 + $0xb0] sm:$0xff] %vm3018_vm4, %v7586_v49  ;;  %v6879_v49 = vsel %vm3018_vm4, %v6815_v44, %v15447_v39  ;;  %v6752_v48 = vsel %vm24_vm0, %v8487_v47, %v15449_v43 }
 0x971   :  { %v6361_v37 = vpop.permute.xlu1 %6360  ;;  %v6943_v42 = vsel %vm3083_vm5, %v6879_v49, %v15448_v58 }
 0x972   :  { %v6359_v31 = vpop.permute.xlu0 %6358  ;;  %v7133_v56 = vsel %vm3278_vm8, %v7069_v51, %v6361_v37 }
 0x973   :  { %v7132_v16 = vsel %vm3278_vm8, %v7068_v62, %v6359_v31  ;;  %v8488_v62 = vld [vmem:[#allocation2 + $0x320] sm:$0xff] }
 0x975   :  { %v5851_v22 = vpop.permute.xlu1 %5850 }
 0x976   :  { %v6615_v30 = vpop.permute.xlu0 %6614  ;;  %v7006_v50 = vsel %vm3148_vm6, %v6942_v17, %v5851_v22  ;;  %v15450_v22 = vld [vmem:[#allocation9_spill] sm:$0xff] }
 0x977   :  { %v7196_v55 = vsel %vm3343_vm9, %v7132_v16, %v6615_v30  ;;  %v6753_v54 = vsel %vm24_vm0, %v8488_v62, %v15450_v22  ;;  %v6816_v16 = vsel %vm2953_vm3, %v6752_v48, %v15451_v34 }
 0x978   :  { %v8286_v52 = vpop.f32.mrb[24].mxu1  ;;  %8335 = vmatprep.mubr.msk.f32.mxu1 %vm3420_vm10, %v7196_v55  ;;  %v15452_v55 = vld [vmem:[#allocation242_spill] sm:$0xff] }
 0x979   :  { %v7601_v9 = vadd.f32 %v8286_v52, %v13380_v46  ;;  %v5853_v63 = vpop.permute.xlu1 %5852  ;;  %v7595_v10 = vpop.f32.mrb[25].mxu1  ;;  %v6817_v29 = vsel %vm2953_vm3, %v6753_v54, %v15452_v55  ;;  %v15453_v52 = vld [vmem:[#allocation251_spill] sm:$0xff] }
 0x97a   :  { %v7596_v28 = vadd.f32 %v13380_v46, %v7595_v10  ;;  %v6617_v5 = vpop.permute.xlu0 %6616  ;;  %v7007_v37 = vsel %vm3148_vm6, %v6943_v42, %v5853_v63  ;;  %v6880_v51 = vsel %vm3018_vm4, %v6816_v16, %v15453_v52  ;;  %v15454_v10 = vld [vmem:[#allocation80_spill] sm:$0xff] }
 0x97b   :  { %7819 = vst.msk [vmem:[%s14118_s5 + $0xc8] sm:$0xff] %vm3018_vm4, %v7601_v9  ;;  %v7197_v21 = vsel %vm3343_vm9, %v7133_v56, %v6617_v5  ;;  %v6881_v56 = vsel %vm3018_vm4, %v6817_v29, %v15454_v10 }
 0x97c   :  { %7818 = vst.msk [vmem:[%s14118_s5 + $0xc0] sm:$0xff] %vm3018_vm4, %v7596_v28  ;;  %8336 = vmatmul.mubr.msk.f32.gmra.mrb[58].mxu1 %vm3420_vm10, %v7197_v21  ;;  %v15455_v28 = vld [vmem:[#allocation35_spill] sm:$0xff]  ;;  %v15456_v21 = vld [vmem:[#allocation376_spill] sm:$0xff] }
 0x97d   :  { %v6109_v61 = vpop.permute.xlu1 %6108  ;;  %v6944_v5 = vsel %vm3083_vm5, %v6880_v51, %v15455_v28 }
 0x97e   :  { %v6107_v6 = vpop.permute.xlu0 %6106  ;;  %v7071_v0 = vsel %vm3213_vm7, %v7007_v37, %v6109_v61  ;;  %v6945_v61 = vsel %vm3083_vm5, %v6881_v56, %v15456_v21  ;;  %v13991_v37 = vld [vmem:[%s14117_s4] ss:$0 sm:$0xff] }
 0x97f   :  { %v7070_v14 = vsel %vm3213_vm7, %v7006_v50, %v6107_v6 }
 0x981   :  { %v6365_v19 = vpop.permute.xlu1 %6364 }
 0x982   :  { %v6363_v23 = vpop.permute.xlu0 %6362  ;;  %v7135_v31 = vsel %vm3278_vm8, %v7071_v0, %v6365_v19 }
 0x983   :  { %v7134_v24 = vsel %vm3278_vm8, %v7070_v14, %v6363_v23 }
 0x984   :  { %v8289_v13 = vpop.f32.mrb[26].mxu1 }
 0x985   :  { %v7611_v11 = vadd.f32 %v8289_v13, %v13380_v46  ;;  %v5855_v1 = vpop.permute.xlu1 %5854  ;;  %v7605_v45 = vpop.f32.mrb[27].mxu1 }
 0x986   :  { %v7606_v3 = vadd.f32 %v13380_v46, %v7605_v45  ;;  %v6619_v4 = vpop.permute.xlu0 %6618  ;;  %v7008_v6 = vsel %vm3148_vm6, %v6944_v5, %v5855_v1 }
 0x987   :  { %7821 = vst.msk [vmem:[%s14118_s5 + $0xd8] sm:$0xff] %vm3018_vm4, %v7611_v11  ;;  %v7198_v53 = vsel %vm3343_vm9, %v7134_v24, %v6619_v4 }
 0x988   :  { %7820 = vst.msk [vmem:[%s14118_s5 + $0xd0] sm:$0xff] %vm3018_vm4, %v7606_v3  ;;  %8338 = vmatprep.mubr.msk.f32.mxu1 %vm3420_vm10, %v7198_v53 }
 0x989   :  { %v5857_v15 = vpop.permute.xlu1 %5856 }
 0x98a   :  { %v6621_v27 = vpop.permute.xlu0 %6620  ;;  %v7009_v57 = vsel %vm3148_vm6, %v6945_v61, %v5857_v15 }
 0x98b   :  { %v7199_v38 = vsel %vm3343_vm9, %v7135_v31, %v6621_v27 }
 0x98c   :  { %8339 = vmatmul.mubr.msk.f32.gmra.mrb[60].mxu1 %vm3420_vm10, %v7199_v38 }
 0x98d   :  { %v6113_v20 = vpop.permute.xlu1 %6112 }
 0x98e   :  { %v6111_v18 = vpop.permute.xlu0 %6110  ;;  %v7073_v26 = vsel %vm3213_vm7, %v7009_v57, %v6113_v20 }
 0x98f   :  { %v7072_v35 = vsel %vm3213_vm7, %v7008_v6, %v6111_v18 }
 0x990   :  { %v8292_v33 = vpop.f32.mrb[28].mxu1 }
 0x991   :  { %v7621_v30 = vadd.f32 %v8292_v33, %v13380_v46  ;;  %v6369_v59 = vpop.permute.xlu1 %6368  ;;  %v7615_v7 = vpop.f32.mrb[29].mxu1 }
 0x992   :  { %v7616_v9 = vadd.f32 %v13380_v46, %v7615_v7  ;;  %v6367_v63 = vpop.permute.xlu0 %6366  ;;  %v7137_v25 = vsel %vm3278_vm8, %v7073_v26, %v6369_v59 }
 0x993   :  { %7823 = vst.msk [vmem:[%s14118_s5 + $0xe8] sm:$0xff] %vm3018_vm4, %v7621_v30  ;;  %v7136_v12 = vsel %vm3278_vm8, %v7072_v35, %v6367_v63 }
 0x994   :  { %7822 = vst.msk [vmem:[%s14118_s5 + $0xe0] sm:$0xff] %vm3018_vm4, %v7616_v9 }
 0x995   :  { %v6625_v36 = vpop.permute.xlu1 %6624 }
 0x996   :  { %v6623_v19 = vpop.permute.xlu0 %6622  ;;  %v7201_v23 = vsel %vm3343_vm9, %v7137_v25, %v6625_v36 }
 0x997   :  { %v7200_v2 = vsel %vm3343_vm9, %v7136_v12, %v6623_v19 }
 0x998   :  { %8341 = vmatprep.mubr.msk.f32.mxu1 %vm3420_vm10, %v7200_v2 }
 0x999   :  { %8342 = vmatmul.mubr.msk.f32.gmra.mrb[62].mxu1 %vm3420_vm10, %v7201_v23 }
 0x99c   :  { %v8295_v8 = vpop.f32.mrb[30].mxu1 }
 0x99d   :  { %v7631_v17 = vadd.f32 %v8295_v8, %v13380_v46  ;;  %v7625_v60 = vpop.f32.mrb[31].mxu1 }
 0x99e   :  { %v7626_v41 = vadd.f32 %v13380_v46, %v7625_v60 }
 0x99f   :  { %7825 = vst.msk [vmem:[%s14118_s5 + $0xf8] sm:$0xff] %vm3018_vm4, %v7631_v17 }
 0x9a0   :  { %7824 = vst.msk [vmem:[%s14118_s5 + $0xf0] sm:$0xff] %vm3018_vm4, %v7626_v41 }
 0x9a8   :  { %v8298_v40 = vpop.f32.mrb[32].mxu1 }
 0x9a9   :  { %v7641_v50 = vadd.f32 %v8298_v40, %v13380_v46  ;;  %v7635_v13 = vpop.f32.mrb[33].mxu1 }
 0x9aa   :  { %v7636_v32 = vadd.f32 %v13380_v46, %v7635_v13 }
 0x9ab   :  { %7827 = vst.msk [vmem:[%s14118_s5 + $0x108] sm:$0xff] %vm3018_vm4, %v7641_v50 }
 0x9ac   :  { %7826 = vst.msk [vmem:[%s14118_s5 + $0x100] sm:$0xff] %vm3018_vm4, %v7636_v32 }
 0x9b4   :  { %v8301_v44 = vpop.f32.mrb[34].mxu1 }
 0x9b5   :  { %v7651_v14 = vadd.f32 %v8301_v44, %v13380_v46  ;;  %v7645_v11 = vpop.f32.mrb[35].mxu1 }
 0x9b6   :  { %v7646_v1 = vadd.f32 %v13380_v46, %v7645_v11 }
 0x9b7   :  { %7829 = vst.msk [vmem:[%s14118_s5 + $0x118] sm:$0xff] %vm3018_vm4, %v7651_v14 }
 0x9b8   :  { %7828 = vst.msk [vmem:[%s14118_s5 + $0x110] sm:$0xff] %vm3018_vm4, %v7646_v1 }
 0x9c0   :  { %v8304_v45 = vpop.f32.mrb[36].mxu1 }
 0x9c1   :  { %v7661_v39 = vadd.f32 %v8304_v45, %v13380_v46  ;;  %v7655_v49 = vpop.f32.mrb[37].mxu1 }
 0x9c2   :  { %v7656_v24 = vadd.f32 %v13380_v46, %v7655_v49 }
 0x9c3   :  { %7831 = vst.msk [vmem:[%s14118_s5 + $0x128] sm:$0xff] %vm3018_vm4, %v7661_v39 }
 0x9c4   :  { %7830 = vst.msk [vmem:[%s14118_s5 + $0x120] sm:$0xff] %vm3018_vm4, %v7656_v24 }
 0x9cc   :  { %v8307_v3 = vpop.f32.mrb[38].mxu1 }
 0x9cd   :  { %v7671_v4 = vadd.f32 %v8307_v3, %v13380_v46  ;;  %v7665_v58 = vpop.f32.mrb[39].mxu1 }
 0x9ce   :  { %v7666_v42 = vadd.f32 %v13380_v46, %v7665_v58 }
 0x9cf   :  { %7833 = vst.msk [vmem:[%s14118_s5 + $0x138] sm:$0xff] %vm3018_vm4, %v7671_v4 }
 0x9d0   :  { %7832 = vst.msk [vmem:[%s14118_s5 + $0x130] sm:$0xff] %vm3018_vm4, %v7666_v42 }
 0x9d8   :  { %v8310_v53 = vpop.f32.mrb[40].mxu1 }
 0x9d9   :  { %v7681_v0 = vadd.f32 %v13991_v37, %v8310_v53  ;;  %v7675_v15 = vpop.f32.mrb[41].mxu1 }
 0x9da   :  { %v7676_v46 = vadd.f32 %v13991_v37, %v7675_v15 }
 0x9db   :  { %7835 = vst.msk [vmem:[%s14118_s5 + $0x148] sm:$0xff] %vm3018_vm4, %v7681_v0 }
 0x9dc   :  { %7834 = vst.msk [vmem:[%s14118_s5 + $0x140] sm:$0xff] %vm3018_vm4, %v7676_v46 }
 0x9e4   :  { %v8313_v31 = vpop.f32.mrb[42].mxu1 }
 0x9e5   :  { %v7691_v27 = vadd.f32 %v13991_v37, %v8313_v31  ;;  %v7685_v38 = vpop.f32.mrb[43].mxu1 }
 0x9e6   :  { %v7686_v20 = vadd.f32 %v13991_v37, %v7685_v38 }
 0x9e7   :  { %7837 = vst.msk [vmem:[%s14118_s5 + $0x158] sm:$0xff] %vm3018_vm4, %v7691_v27 }
 0x9e8   :  { %7836 = vst.msk [vmem:[%s14118_s5 + $0x150] sm:$0xff] %vm3018_vm4, %v7686_v20 }
 0x9f0   :  { %v8316_v18 = vpop.f32.mrb[44].mxu1 }
 0x9f1   :  { %v7701_v47 = vadd.f32 %v13991_v37, %v8316_v18  ;;  %v7695_v43 = vpop.f32.mrb[45].mxu1 }
 0x9f2   :  { %v7696_v48 = vadd.f32 %v13991_v37, %v7695_v43 }
 0x9f3   :  { %7839 = vst.msk [vmem:[%s14118_s5 + $0x168] sm:$0xff] %vm3018_vm4, %v7701_v47 }
 0x9f4   :  { %7838 = vst.msk [vmem:[%s14118_s5 + $0x160] sm:$0xff] %vm3018_vm4, %v7696_v48 }
 0x9fc   :  { %v8319_v33 = vpop.f32.mrb[46].mxu1 }
 0x9fd   :  { %v7711_v62 = vadd.f32 %v13991_v37, %v8319_v33  ;;  %v7705_v22 = vpop.f32.mrb[47].mxu1 }
 0x9fe   :  { %v7706_v54 = vadd.f32 %v13991_v37, %v7705_v22 }
 0x9ff   :  { %7841 = vst.msk [vmem:[%s14118_s5 + $0x178] sm:$0xff] %vm3018_vm4, %v7711_v62 }
 0xa00   :  { %7840 = vst.msk [vmem:[%s14118_s5 + $0x170] sm:$0xff] %vm3018_vm4, %v7706_v54 }
 0xa08   :  { %v8322_v34 = vpop.f32.mrb[48].mxu1 }
 0xa09   :  { %v7721_v16 = vadd.f32 %v13991_v37, %v8322_v34  ;;  %v7715_v30 = vpop.f32.mrb[49].mxu1 }
 0xa0a   :  { %v7716_v59 = vadd.f32 %v13991_v37, %v7715_v30 }
 0xa0b   :  { %7843 = vst.msk [vmem:[%s14118_s5 + $0x188] sm:$0xff] %vm3018_vm4, %v7721_v16 }
 0xa0c   :  { %7842 = vst.msk [vmem:[%s14118_s5 + $0x180] sm:$0xff] %vm3018_vm4, %v7716_v59 }
 0xa14   :  { %v8325_v7 = vpop.f32.mrb[50].mxu1 }
 0xa15   :  { %v7731_v55 = vadd.f32 %v13991_v37, %v8325_v7  ;;  %v7725_v29 = vpop.f32.mrb[51].mxu1 }
 0xa16   :  { %v7726_v52 = vadd.f32 %v13991_v37, %v7725_v29 }
 0xa17   :  { %7845 = vst.msk [vmem:[%s14118_s5 + $0x198] sm:$0xff] %vm3018_vm4, %v7731_v55 }
 0xa18   :  { %7844 = vst.msk [vmem:[%s14118_s5 + $0x190] sm:$0xff] %vm3018_vm4, %v7726_v52 }
 0xa20   :  { %v8328_v51 = vpop.f32.mrb[52].mxu1 }
 0xa21   :  { %v7741_v9 = vadd.f32 %v13991_v37, %v8328_v51  ;;  %v7735_v63 = vpop.f32.mrb[53].mxu1 }
 0xa22   :  { %v7736_v10 = vadd.f32 %v13991_v37, %v7735_v63 }
 0xa23   :  { %7847 = vst.msk [vmem:[%s14118_s5 + $0x1a8] sm:$0xff] %vm3018_vm4, %v7741_v9 }
 0xa24   :  { %7846 = vst.msk [vmem:[%s14118_s5 + $0x1a0] sm:$0xff] %vm3018_vm4, %v7736_v10 }
 0xa2f   :  { %v8331_v56 = vpop.f32.mrb[54].mxu1 }
 0xa30   :  { %v7751_v28 = vadd.f32 %v13991_v37, %v8331_v56  ;;  %v7745_v5 = vpop.f32.mrb[55].mxu1 }
 0xa31   :  { %v7746_v21 = vadd.f32 %v13991_v37, %v7745_v5 }
 0xa32   :  { %7849 = vst.msk [vmem:[%s14118_s5 + $0x1b8] sm:$0xff] %vm3018_vm4, %v7751_v28 }
 0xa33   :  { %7848 = vst.msk [vmem:[%s14118_s5 + $0x1b0] sm:$0xff] %vm3018_vm4, %v7746_v21 }
 0xa3f   :  { %v8334_v61 = vpop.f32.mrb[56].mxu1 }
 0xa40   :  { %v7761_v6 = vadd.f32 %v13991_v37, %v8334_v61  ;;  %v7755_v57 = vpop.f32.mrb[57].mxu1 }
 0xa41   :  { %v7756_v35 = vadd.f32 %v13991_v37, %v7755_v57 }
 0xa42   :  { %7851 = vst.msk [vmem:[%s14118_s5 + $0x1c8] sm:$0xff] %vm3018_vm4, %v7761_v6 }
 0xa43   :  { %7850 = vst.msk [vmem:[%s14118_s5 + $0x1c0] sm:$0xff] %vm3018_vm4, %v7756_v35 }
 0xa4f   :  { %v8337_v36 = vpop.f32.mrb[58].mxu1 }
 0xa50   :  { %v7771_v26 = vadd.f32 %v13991_v37, %v8337_v36  ;;  %v7765_v12 = vpop.f32.mrb[59].mxu1 }
 0xa51   :  { %v7766_v19 = vadd.f32 %v13991_v37, %v7765_v12 }
 0xa52   :  { %7853 = vst.msk [vmem:[%s14118_s5 + $0x1d8] sm:$0xff] %vm3018_vm4, %v7771_v26 }
 0xa53   :  { %7852 = vst.msk [vmem:[%s14118_s5 + $0x1d0] sm:$0xff] %vm3018_vm4, %v7766_v19 }
 0xa5f   :  { %v8340_v25 = vpop.f32.mrb[60].mxu1 }
 0xa60   :  { %v7781_v2 = vadd.f32 %v13991_v37, %v8340_v25  ;;  %v7775_v23 = vpop.f32.mrb[61].mxu1 }
 0xa61   :  { %v7776_v8 = vadd.f32 %v13991_v37, %v7775_v23 }
 0xa62   :  { %7855 = vst.msk [vmem:[%s14118_s5 + $0x1e8] sm:$0xff] %vm3018_vm4, %v7781_v2 }
 0xa63   :  { %7854 = vst.msk [vmem:[%s14118_s5 + $0x1e0] sm:$0xff] %vm3018_vm4, %v7776_v8 }
 0xa6c   :  { %v8343_v17 = vpop.f32.mrb[62].mxu1 }
 0xa6d   :  { %v7791_v60 = vadd.f32 %v13991_v37, %v8343_v17  ;;  %v7785_v41 = vpop.f32.mrb[63].mxu1 }
 0xa6e   :  { %v7786_v40 = vadd.f32 %v13991_v37, %v7785_v41 }
 0xa6f   :  { %7857 = vst.msk [vmem:[%s14118_s5 + $0x1f8] sm:$0xff] %vm3018_vm4, %v7791_v60 }
 0xa70   :  { %7856 = vst.msk [vmem:[%s14118_s5 + $0x1f0] sm:$0xff] %vm3018_vm4, %v7786_v40 }

</bundles_post_ra>
